<compile_context>
chip_gen: v7x
topology: tpu7x:2x2x1
jax: 0.10.0
libtpu: 0.0.40
codegen_flags: <defaults>
</compile_context>

<pallas_src>
import functools

import jax
import jax.numpy as jnp
from jax import lax
from jax.experimental import pallas as pl
from jax.experimental.pallas import tpu as pltpu


# ----------------------------------------------------------------------------
# In-kernel helpers (operate on VMEM-resident values)
# ----------------------------------------------------------------------------
def _im2col3x3(x_bf16, H, W):
    """Zero-pad a 1-px halo and build the (H*W, 9*C) im2col patch in VMEM.

    Staged in f32 (robust concat/slice relayout); caller casts the result back
    to bf16 right before the MXU dot (exact - values are bf16-representable).
    """
    C = x_bf16.shape[-1]
    x = x_bf16.astype(jnp.float32)
    zr = jnp.zeros((1, W, C), jnp.float32)
    xp = jnp.concatenate([zr, x, zr], axis=0)            # (H+2, W,   C)
    zc = jnp.zeros((H + 2, 1, C), jnp.float32)
    xp = jnp.concatenate([zc, xp, zc], axis=1)           # (H+2, W+2, C)
    cols = [xp[ky:ky + H, kx:kx + W, :].reshape(H * W, C)
            for ky in range(3) for kx in range(3)]
    return jnp.concatenate(cols, axis=-1)                # (H*W, 9*C) f32


def _cummax_doubling(v, axis):
    """Inclusive running max (prefix doubling).  v >= 0 (post-ReLU), so the
    shifted-in fill is 0 - a neutral element - instead of -inf."""
    size = v.shape[axis]
    shift = 1
    while shift < size:
        if axis == 0:
            pad = jnp.zeros((shift,) + v.shape[1:], v.dtype)
            shifted = jnp.concatenate([pad, v[:size - shift]], axis=0)
        else:  # axis == 1
            pad = jnp.zeros((v.shape[0], shift) + v.shape[2:], v.dtype)
            shifted = jnp.concatenate([pad, v[:, :size - shift]], axis=1)
        v = jnp.maximum(v, shifted)
        shift *= 2
    return v


# ----------------------------------------------------------------------------
# Kernel 1: fused [conv1 ++ conv2](3x3, dim -> 256) + BN + ReLU
#           + bottom_pool(conv1) + right_pool(conv2) + add   -> (H, W, 128)
# ----------------------------------------------------------------------------
def _conv12_pool_kernel(x_ref, w_ref, s_ref, b_ref, o_ref, *, H, W):
    cout = w_ref.shape[-1]                               # 256
    c128 = cout // 2
    patch = _im2col3x3(x_ref[0], H, W).astype(jnp.bfloat16)     # (H*W, 9*Cin)
    acc = jnp.dot(patch, w_ref[...], preferred_element_type=jnp.float32)
    y = jnp.maximum(acc * s_ref[...] + b_ref[...], 0.0)         # (H*W, 256) f32
    a = y[:, :c128].reshape(H, W, c128)                  # conv1 -> bottom pool
    b = y[:, c128:].reshape(H, W, c128)                  # conv2 -> right pool
    a = _cummax_doubling(a, axis=0)                      # cummax top -> bottom
    b = _cummax_doubling(b, axis=1)                      # cummax left -> right
    o_ref[0] = (a + b).astype(o_ref.dtype)


def conv12_pool(x, wA, sA, bA):
    B, H, W, Cin = x.shape
    C128 = wA.shape[-1] // 2
    kern = functools.partial(_conv12_pool_kernel, H=H, W=W)
    return pl.pallas_call(
        kern,
        out_shape=jax.ShapeDtypeStruct((B, H, W, C128), jnp.bfloat16),
        grid=(B,),
        in_specs=[
            pl.BlockSpec((1, H, W, Cin), lambda i: (i, 0, 0, 0)),
            pl.BlockSpec(wA.shape, lambda i: (0, 0)),
            pl.BlockSpec(sA.shape, lambda i: (0, 0)),
            pl.BlockSpec(bA.shape, lambda i: (0, 0)),
        ],
        out_specs=pl.BlockSpec((1, H, W, C128), lambda i: (i, 0, 0, 0)),
        compiler_params=pltpu.CompilerParams(dimension_semantics=("parallel",)),
    )(x, wA, sA, bA)


# ----------------------------------------------------------------------------
# Kernel 2: conv2(3x3, 128->dim)*bn2  +  skip_conv(1x1)*skip_bn  folded into a
#           single matmul (skip appended as a 10th im2col tap), + bias + ReLU
# ----------------------------------------------------------------------------
def _conv2_skip_relu_kernel(pp_ref, x_ref, w_ref, b_ref, o_ref, *, H, W):
    d = x_ref.shape[-1]
    patch = _im2col3x3(pp_ref[0], H, W)                              # (H*W, 9*128) f32
    skip_cols = x_ref[0].astype(jnp.float32).reshape(H * W, d)       # 1x1 skip "tap"
    patch = jnp.concatenate([patch, skip_cols], axis=-1).astype(jnp.bfloat16)
    acc = jnp.dot(patch, w_ref[...], preferred_element_type=jnp.float32)
    y = jnp.maximum(acc + b_ref[...], 0.0)                           # (H*W, dim)
    o_ref[0] = y.reshape(H, W, d).astype(o_ref.dtype)


def conv2_skip_relu(pooled, x, wB, bB):
    B, H, W, C128 = pooled.shape
    D = x.shape[-1]
    kern = functools.partial(_conv2_skip_relu_kernel, H=H, W=W)
    return pl.pallas_call(
        kern,
        out_shape=jax.ShapeDtypeStruct((B, H, W, D), jnp.bfloat16),
        grid=(B,),
        in_specs=[
            pl.BlockSpec((1, H, W, C128), lambda i: (i, 0, 0, 0)),
            pl.BlockSpec((1, H, W, D), lambda i: (i, 0, 0, 0)),
            pl.BlockSpec(wB.shape, lambda i: (0, 0)),
            pl.BlockSpec(bB.shape, lambda i: (0, 0)),
        ],
        out_specs=pl.BlockSpec((1, H, W, D), lambda i: (i, 0, 0, 0)),
        compiler_params=pltpu.CompilerParams(dimension_semantics=("parallel",)),
    )(pooled, x, wB, bB)


# ----------------------------------------------------------------------------
# Kernel 3: conv3 (3x3, dim->dim) + BN + ReLU
# ----------------------------------------------------------------------------
def _conv3x3_bn_relu_kernel(x_ref, w_ref, s_ref, b_ref, o_ref, *, H, W):
    cout = w_ref.shape[-1]
    patch = _im2col3x3(x_ref[0], H, W).astype(jnp.bfloat16)
    acc = jnp.dot(patch, w_ref[...], preferred_element_type=jnp.float32)
    y = jnp.maximum(acc * s_ref[...] + b_ref[...], 0.0)
    o_ref[0] = y.reshape(H, W, cout).astype(o_ref.dtype)


def conv3x3_bn_relu(x, w, s, b):
    B, H, W, Cin = x.shape
    Cout = w.shape[-1]
    kern = functools.partial(_conv3x3_bn_relu_kernel, H=H, W=W)
    return pl.pallas_call(
        kern,
        out_shape=jax.ShapeDtypeStruct((B, H, W, Cout), jnp.float32),
        grid=(B,),
        in_specs=[
            pl.BlockSpec((1, H, W, Cin), lambda i: (i, 0, 0, 0)),
            pl.BlockSpec(w.shape, lambda i: (0, 0)),
            pl.BlockSpec(s.shape, lambda i: (0, 0)),
            pl.BlockSpec(b.shape, lambda i: (0, 0)),
        ],
        out_specs=pl.BlockSpec((1, H, W, Cout), lambda i: (i, 0, 0, 0)),
        compiler_params=pltpu.CompilerParams(dimension_semantics=("parallel",)),
    )(x, w, s, b)


# ----------------------------------------------------------------------------
# Parameters (deterministic synthetic init), BN folded to (scale, bias)
# ----------------------------------------------------------------------------
def _fold_bn(key, c):
    kg, kb, km, kv = jax.random.split(key, 4)
    gamma = 1.0 + 0.1 * jax.random.normal(kg, (c,), jnp.float32)
    beta = 0.1 * jax.random.normal(kb, (c,), jnp.float32)
    mean = 0.1 * jax.random.normal(km, (c,), jnp.float32)
    var = 1.0 + 0.1 * jnp.abs(jax.random.normal(kv, (c,), jnp.float32))
    scale = gamma * lax.rsqrt(var + 1e-5)
    bias = beta - mean * scale
    return scale.reshape(1, c), bias.reshape(1, c)


def init_params(key, dim):
    ks = jax.random.split(key, 10)

    def cw(k, kh, kw, cin, cout):
        fan_in = kh * kw * cin
        return jax.random.normal(k, (kh, kw, cin, cout), jnp.float32) / jnp.sqrt(
            jnp.float32(fan_in))

    p = {}
    p['w1'] = cw(ks[0], 3, 3, dim, 128); p['s1'], p['b1'] = _fold_bn(ks[1], 128)
    p['w2'] = cw(ks[2], 3, 3, dim, 128); p['s2'], p['b2'] = _fold_bn(ks[3], 128)
    p['w3'] = cw(ks[4], 3, 3, 128, dim); p['s3'], p['b3'] = _fold_bn(ks[5], dim)
    p['wskip'] = jax.random.normal(ks[6], (dim, dim), jnp.float32) / jnp.sqrt(
        jnp.float32(dim))
    p['sskip'], p['bskip'] = _fold_bn(ks[7], dim)
    p['w4'] = cw(ks[8], 3, 3, dim, dim); p['s4'], p['b4'] = _fold_bn(ks[9], dim)
    return p


def prepare_kernel_params(p, dim):
    """Build kernel-ready weights: concat conv1/conv2 along Cout, im2col-reshape
    to (9*Cin, Cout), fold bn2/skip_bn scales into the conv2/skip weights and
    stack them along K, cast all MXU weights to bf16."""
    bf16 = jnp.bfloat16
    kp = {}
    # Kernel 1: conv1 ++ conv2, Cout = 256
    wA = jnp.concatenate([p['w1'], p['w2']], axis=-1)            # (3,3,dim,256)
    kp['wA'] = wA.reshape(-1, wA.shape[-1]).astype(bf16)         # (9*dim, 256)
    kp['sA'] = jnp.concatenate([p['s1'], p['s2']], axis=-1)      # (1, 256) f32
    kp['bA'] = jnp.concatenate([p['b1'], p['b2']], axis=-1)
    # Kernel 2: conv2*s3 stacked with skip*sskip along K
    w3_eff = (p['w3'] * p['s3'].reshape(1, 1, 1, -1)).reshape(-1, dim)   # (9*128, dim)
    wsk_eff = p['wskip'] * p['sskip'].reshape(1, -1)                     # (dim, dim)
    kp['wB'] = jnp.concatenate([w3_eff, wsk_eff], axis=0).astype(bf16)   # (9*128+dim, dim)
    kp['bB'] = p['b3'] + p['bskip']                                      # (1, dim) f32
    # Kernel 3: conv3
    kp['wC'] = p['w4'].reshape(-1, dim).astype(bf16)                     # (9*dim, dim)
    kp['sC'] = p['s4']
    kp['bC'] = p['b4']
    return kp


# ----------------------------------------------------------------------------
# Full forward (NCHW in / NCHW out, matching the PyTorch module)
# ----------------------------------------------------------------------------
def br_corner_pooling_forward(x_nchw, kp):
    x = jnp.transpose(x_nchw, (0, 2, 3, 1)).astype(jnp.bfloat16)    # NCHW -> NHWC, bf16
    pooled = conv12_pool(x, kp['wA'], kp['sA'], kp['bA'])           # (B,H,W,128) bf16
    fused = conv2_skip_relu(pooled, x, kp['wB'], kp['bB'])          # (B,H,W,dim) bf16
    out = conv3x3_bn_relu(fused, kp['wC'], kp['sC'], kp['bC'])      # (B,H,W,dim) f32
    return jnp.transpose(out, (0, 3, 1, 2))                         # NHWC -> NCHW


# ----------------------------------------------------------------------------
# Pure-JAX reference (mirrors the kernels' bf16 quantization points exactly,
# but uses lax.conv / lax.cummax / einsum — independent of the im2col logic)
# ----------------------------------------------------------------------------
def _q(t):
    """Round-trip through bf16 to mirror the kernels' MXU-input quantization."""
    return t.astype(jnp.bfloat16).astype(jnp.float32)


def ref_forward(x_nchw, p):
    x = jnp.transpose(x_nchw, (0, 2, 3, 1))
    xq = _q(x)

    def conv(z, w):
        return lax.conv_general_dilated(z, w, (1, 1), 'SAME',
                                        dimension_numbers=('NHWC', 'HWIO', 'NHWC'))

    def bn(y, s, b):
        return y * s.reshape(1, 1, 1, -1) + b.reshape(1, 1, 1, -1)

    c1 = jnp.maximum(bn(conv(xq, _q(p['w1'])), p['s1'], p['b1']), 0.0)
    c2 = jnp.maximum(bn(conv(xq, _q(p['w2'])), p['s2'], p['b2']), 0.0)
    pooled = _q(lax.cummax(c1, axis=1) + lax.cummax(c2, axis=2))

    bn1_2 = conv(pooled, _q(p['w3'] * p['s3'].reshape(1, 1, 1, -1))) \
        + p['b3'].reshape(1, 1, 1, -1)
    skip_bn = jnp.einsum('bhwc,cd->bhwd', xq,
                         _q(p['wskip'] * p['sskip'].reshape(1, -1))) \
        + p['bskip'].reshape(1, 1, 1, -1)
    h = _q(jnp.maximum(skip_bn + bn1_2, 0.0))

    out = jnp.maximum(bn(conv(h, _q(p['w4'])), p['s4'], p['b4']), 0.0)
    return jnp.transpose(out, (0, 3, 1, 2))


if __name__ == "__main__":
    key = jax.random.PRNGKey(0)
    kx, kparam = jax.random.split(key)
    B, dim, H, W = 2, 4, 16, 16
    x = jax.random.normal(kx, (B, dim, H, W), jnp.float32)
    params = init_params(kparam, dim)
    kparams = prepare_kernel_params(params, dim)

    out = jax.block_until_ready(jax.jit(br_corner_pooling_forward)(x, kparams))
    ref = jax.block_until_ready(jax.jit(ref_forward)(x, params))

    assert out.shape == (B, dim, H, W), out.shape
    err = float(jnp.max(jnp.abs(out - ref)))
    if not bool(jnp.allclose(out, ref, rtol=5e-3, atol=5e-3)):
        raise AssertionError(f"mismatch: max abs err = {err}")
    print("KERNEL_OK")
</pallas_src>

<mosaic_0001>
module attributes {stable_mosaic.version = 11 : i64} {
  func.func @_conv12_pool_kernel(%arg0: i32, %arg1: memref<1x16x16x4xbf16, #tpu.memory_space<vmem>>, %arg2: memref<36x256xbf16, #tpu.memory_space<vmem>>, %arg3: memref<1x256xf32, #tpu.memory_space<vmem>>, %arg4: memref<1x256xf32, #tpu.memory_space<vmem>>, %arg5: memref<1x16x16x128xbf16, #tpu.memory_space<vmem>>) attributes {dimension_semantics = [#tpu.dimension_semantics<parallel>], iteration_bounds = array<i64: 2>, scalar_prefetch = 0 : i64, scratch_operands = 0 : i64, tpu.core_type = #tpu.core_type<tc>, window_params = [{transform_indices = @transform_0, window_bounds = array<i64: 1, 16, 16, 4>}, {pipeline_mode = #tpu.pipeline_mode<synchronous>, transform_indices = @transform_1, window_bounds = array<i64: 36, 256>}, {pipeline_mode = #tpu.pipeline_mode<synchronous>, transform_indices = @transform_2, window_bounds = array<i64: 1, 256>}, {pipeline_mode = #tpu.pipeline_mode<synchronous>, transform_indices = @transform_3, window_bounds = array<i64: 1, 256>}, {transform_indices = @transform_4, window_bounds = array<i64: 1, 16, 16, 128>}]} {
    %c0 = arith.constant 0 : index
    %c0_0 = arith.constant 0 : index
    %c0_1 = arith.constant 0 : index
    %c0_2 = arith.constant 0 : index
    %0 = vector.load %arg1[%c0, %c0_0, %c0_1, %c0_2] : memref<1x16x16x4xbf16, #tpu.memory_space<vmem>>, vector<1x16x16x4xbf16>
    %1 = vector.shape_cast %0 : vector<1x16x16x4xbf16> to vector<16x16x4xbf16>
    %2 = arith.extf %1 : vector<16x16x4xbf16> to vector<16x16x4xf32>
    %cst = arith.constant 0.000000e+00 : f32
    %3 = vector.broadcast %cst : f32 to vector<1x16x4xf32>
    %4 = tpu.concatenate %3, %2, %3 in 0 : vector<1x16x4xf32>, vector<16x16x4xf32>, vector<1x16x4xf32> -> vector<18x16x4xf32>
    %cst_3 = arith.constant 0.000000e+00 : f32
    %5 = vector.broadcast %cst_3 : f32 to vector<18x1x4xf32>
    %6 = tpu.concatenate %5, %4, %5 in 1 : vector<18x1x4xf32>, vector<18x16x4xf32>, vector<18x1x4xf32> -> vector<18x18x4xf32>
    %7 = vector.extract_strided_slice %6 {offsets = [0, 0, 0], sizes = [16, 16, 4], strides = [1, 1, 1]} : vector<18x18x4xf32> to vector<16x16x4xf32>
    %8 = vector.shape_cast %7 : vector<16x16x4xf32> to vector<256x4xf32>
    %9 = vector.extract_strided_slice %6 {offsets = [0, 1, 0], sizes = [16, 16, 4], strides = [1, 1, 1]} : vector<18x18x4xf32> to vector<16x16x4xf32>
    %10 = vector.shape_cast %9 : vector<16x16x4xf32> to vector<256x4xf32>
    %11 = vector.extract_strided_slice %6 {offsets = [0, 2, 0], sizes = [16, 16, 4], strides = [1, 1, 1]} : vector<18x18x4xf32> to vector<16x16x4xf32>
    %12 = vector.shape_cast %11 : vector<16x16x4xf32> to vector<256x4xf32>
    %13 = vector.extract_strided_slice %6 {offsets = [1, 0, 0], sizes = [16, 16, 4], strides = [1, 1, 1]} : vector<18x18x4xf32> to vector<16x16x4xf32>
    %14 = vector.shape_cast %13 : vector<16x16x4xf32> to vector<256x4xf32>
    %15 = vector.extract_strided_slice %6 {offsets = [1, 1, 0], sizes = [16, 16, 4], strides = [1, 1, 1]} : vector<18x18x4xf32> to vector<16x16x4xf32>
    %16 = vector.shape_cast %15 : vector<16x16x4xf32> to vector<256x4xf32>
    %17 = vector.extract_strided_slice %6 {offsets = [1, 2, 0], sizes = [16, 16, 4], strides = [1, 1, 1]} : vector<18x18x4xf32> to vector<16x16x4xf32>
    %18 = vector.shape_cast %17 : vector<16x16x4xf32> to vector<256x4xf32>
    %19 = vector.extract_strided_slice %6 {offsets = [2, 0, 0], sizes = [16, 16, 4], strides = [1, 1, 1]} : vector<18x18x4xf32> to vector<16x16x4xf32>
    %20 = vector.shape_cast %19 : vector<16x16x4xf32> to vector<256x4xf32>
    %21 = vector.extract_strided_slice %6 {offsets = [2, 1, 0], sizes = [16, 16, 4], strides = [1, 1, 1]} : vector<18x18x4xf32> to vector<16x16x4xf32>
    %22 = vector.shape_cast %21 : vector<16x16x4xf32> to vector<256x4xf32>
    %23 = vector.extract_strided_slice %6 {offsets = [2, 2, 0], sizes = [16, 16, 4], strides = [1, 1, 1]} : vector<18x18x4xf32> to vector<16x16x4xf32>
    %24 = vector.shape_cast %23 : vector<16x16x4xf32> to vector<256x4xf32>
    %25 = tpu.concatenate %8, %10, %12, %14, %16, %18, %20, %22, %24 in 1 : vector<256x4xf32>, vector<256x4xf32>, vector<256x4xf32>, vector<256x4xf32>, vector<256x4xf32>, vector<256x4xf32>, vector<256x4xf32>, vector<256x4xf32>, vector<256x4xf32> -> vector<256x36xf32>
    %26 = arith.truncf %25 : vector<256x36xf32> to vector<256x36xbf16>
    %c0_4 = arith.constant 0 : index
    %c0_5 = arith.constant 0 : index
    %27 = vector.load %arg2[%c0_4, %c0_5] : memref<36x256xbf16, #tpu.memory_space<vmem>>, vector<36x256xbf16>
    %cst_6 = arith.constant dense<0.000000e+00> : vector<256x256xf32>
    %28 = tpu.matmul %26, %27, %cst_6 {dimension_numbers = #tpu.dot_dimension_numbers<[1], [0], [0], [1], [0, 0, 1, 1], [], []>} : vector<256x36xbf16>, vector<36x256xbf16>, vector<256x256xf32> -> vector<256x256xf32>
    %c0_7 = arith.constant 0 : index
    %c0_8 = arith.constant 0 : index
    %29 = vector.load %arg3[%c0_7, %c0_8] : memref<1x256xf32, #tpu.memory_space<vmem>>, vector<1x256xf32>
    %30 = vector.broadcast %29 : vector<1x256xf32> to vector<256x256xf32>
    %31 = arith.mulf %28, %30 : vector<256x256xf32>
    %c0_9 = arith.constant 0 : index
    %c0_10 = arith.constant 0 : index
    %32 = vector.load %arg4[%c0_9, %c0_10] : memref<1x256xf32, #tpu.memory_space<vmem>>, vector<1x256xf32>
    %33 = vector.broadcast %32 : vector<1x256xf32> to vector<256x256xf32>
    %34 = arith.addf %31, %33 : vector<256x256xf32>
    %cst_11 = arith.constant 0.000000e+00 : f32
    %35 = vector.broadcast %cst_11 : f32 to vector<256x256xf32>
    %36 = arith.maximumf %34, %35 : vector<256x256xf32>
    %37 = vector.extract_strided_slice %36 {offsets = [0, 0], sizes = [256, 128], strides = [1, 1]} : vector<256x256xf32> to vector<256x128xf32>
    %38 = vector.shape_cast %37 : vector<256x128xf32> to vector<16x16x128xf32>
    %39 = vector.extract_strided_slice %36 {offsets = [0, 128], sizes = [256, 128], strides = [1, 1]} : vector<256x256xf32> to vector<256x128xf32>
    %40 = vector.shape_cast %39 : vector<256x128xf32> to vector<16x16x128xf32>
    %cst_12 = arith.constant 0.000000e+00 : f32
    %41 = vector.broadcast %cst_12 : f32 to vector<1x16x128xf32>
    %42 = vector.extract_strided_slice %38 {offsets = [0, 0, 0], sizes = [15, 16, 128], strides = [1, 1, 1]} : vector<16x16x128xf32> to vector<15x16x128xf32>
    %43 = tpu.concatenate %41, %42 in 0 : vector<1x16x128xf32>, vector<15x16x128xf32> -> vector<16x16x128xf32>
    %44 = arith.maximumf %38, %43 : vector<16x16x128xf32>
    %cst_13 = arith.constant 0.000000e+00 : f32
    %45 = vector.broadcast %cst_13 : f32 to vector<2x16x128xf32>
    %46 = vector.extract_strided_slice %44 {offsets = [0, 0, 0], sizes = [14, 16, 128], strides = [1, 1, 1]} : vector<16x16x128xf32> to vector<14x16x128xf32>
    %47 = tpu.concatenate %45, %46 in 0 : vector<2x16x128xf32>, vector<14x16x128xf32> -> vector<16x16x128xf32>
    %48 = arith.maximumf %44, %47 : vector<16x16x128xf32>
    %cst_14 = arith.constant 0.000000e+00 : f32
    %49 = vector.broadcast %cst_14 : f32 to vector<4x16x128xf32>
    %50 = vector.extract_strided_slice %48 {offsets = [0, 0, 0], sizes = [12, 16, 128], strides = [1, 1, 1]} : vector<16x16x128xf32> to vector<12x16x128xf32>
    %51 = tpu.concatenate %49, %50 in 0 : vector<4x16x128xf32>, vector<12x16x128xf32> -> vector<16x16x128xf32>
    %52 = arith.maximumf %48, %51 : vector<16x16x128xf32>
    %cst_15 = arith.constant 0.000000e+00 : f32
    %53 = vector.broadcast %cst_15 : f32 to vector<8x16x128xf32>
    %54 = vector.extract_strided_slice %52 {offsets = [0, 0, 0], sizes = [8, 16, 128], strides = [1, 1, 1]} : vector<16x16x128xf32> to vector<8x16x128xf32>
    %55 = tpu.concatenate %53, %54 in 0 : vector<8x16x128xf32>, vector<8x16x128xf32> -> vector<16x16x128xf32>
    %56 = arith.maximumf %52, %55 : vector<16x16x128xf32>
    %cst_16 = arith.constant 0.000000e+00 : f32
    %57 = vector.broadcast %cst_16 : f32 to vector<16x1x128xf32>
    %58 = vector.extract_strided_slice %40 {offsets = [0, 0, 0], sizes = [16, 15, 128], strides = [1, 1, 1]} : vector<16x16x128xf32> to vector<16x15x128xf32>
    %59 = tpu.concatenate %57, %58 in 1 : vector<16x1x128xf32>, vector<16x15x128xf32> -> vector<16x16x128xf32>
    %60 = arith.maximumf %40, %59 : vector<16x16x128xf32>
    %cst_17 = arith.constant 0.000000e+00 : f32
    %61 = vector.broadcast %cst_17 : f32 to vector<16x2x128xf32>
    %62 = vector.extract_strided_slice %60 {offsets = [0, 0, 0], sizes = [16, 14, 128], strides = [1, 1, 1]} : vector<16x16x128xf32> to vector<16x14x128xf32>
    %63 = tpu.concatenate %61, %62 in 1 : vector<16x2x128xf32>, vector<16x14x128xf32> -> vector<16x16x128xf32>
    %64 = arith.maximumf %60, %63 : vector<16x16x128xf32>
    %cst_18 = arith.constant 0.000000e+00 : f32
    %65 = vector.broadcast %cst_18 : f32 to vector<16x4x128xf32>
    %66 = vector.extract_strided_slice %64 {offsets = [0, 0, 0], sizes = [16, 12, 128], strides = [1, 1, 1]} : vector<16x16x128xf32> to vector<16x12x128xf32>
    %67 = tpu.concatenate %65, %66 in 1 : vector<16x4x128xf32>, vector<16x12x128xf32> -> vector<16x16x128xf32>
    %68 = arith.maximumf %64, %67 : vector<16x16x128xf32>
    %cst_19 = arith.constant 0.000000e+00 : f32
    %69 = vector.broadcast %cst_19 : f32 to vector<16x8x128xf32>
    %70 = vector.extract_strided_slice %68 {offsets = [0, 0, 0], sizes = [16, 8, 128], strides = [1, 1, 1]} : vector<16x16x128xf32> to vector<16x8x128xf32>
    %71 = tpu.concatenate %69, %70 in 1 : vector<16x8x128xf32>, vector<16x8x128xf32> -> vector<16x16x128xf32>
    %72 = arith.maximumf %68, %71 : vector<16x16x128xf32>
    %73 = arith.addf %56, %72 : vector<16x16x128xf32>
    %74 = arith.truncf %73 : vector<16x16x128xf32> to vector<16x16x128xbf16>
    %c0_20 = arith.constant 0 : index
    %c0_21 = arith.constant 0 : index
    %c0_22 = arith.constant 0 : index
    %c0_23 = arith.constant 0 : index
    %75 = vector.load %arg5[%c0_20, %c0_21, %c0_22, %c0_23] : memref<1x16x16x128xbf16, #tpu.memory_space<vmem>>, vector<1x16x16x128xbf16>
    %76 = vector.shape_cast %75 : vector<1x16x16x128xbf16> to vector<16x16x128xbf16>
    %77 = vector.shape_cast %74 : vector<16x16x128xbf16> to vector<1x16x16x128xbf16>
    tpu.vector_store %arg5[%c0_20, %c0_21, %c0_22, %c0_23], %77 {strides = array<i32>} : memref<1x16x16x128xbf16, #tpu.memory_space<vmem>>, vector<1x16x16x128xbf16>,
    return
  }
  func.func @transform_0(%arg0: i32) -> (i32, i32, i32, i32) {
    %c0_i32 = arith.constant 0 : i32
    %c0_i32_0 = arith.constant 0 : i32
    %c0_i32_1 = arith.constant 0 : i32
    %c0_i32_2 = arith.constant 0 : i32
    return %arg0, %c0_i32, %c0_i32_0, %c0_i32_1 : i32, i32, i32, i32
  }
  func.func @transform_1(%arg0: i32) -> (i32, i32) {
    %c0_i32 = arith.constant 0 : i32
    %c0_i32_0 = arith.constant 0 : i32
    %c0_i32_1 = arith.constant 0 : i32
    return %c0_i32, %c0_i32_0 : i32, i32
  }
  func.func @transform_2(%arg0: i32) -> (i32, i32) {
    %c0_i32 = arith.constant 0 : i32
    %c0_i32_0 = arith.constant 0 : i32
    %c0_i32_1 = arith.constant 0 : i32
    return %c0_i32, %c0_i32_0 : i32, i32
  }
  func.func @transform_3(%arg0: i32) -> (i32, i32) {
    %c0_i32 = arith.constant 0 : i32
    %c0_i32_0 = arith.constant 0 : i32
    %c0_i32_1 = arith.constant 0 : i32
    return %c0_i32, %c0_i32_0 : i32, i32
  }
  func.func @transform_4(%arg0: i32) -> (i32, i32, i32, i32) {
    %c0_i32 = arith.constant 0 : i32
    %c0_i32_0 = arith.constant 0 : i32
    %c0_i32_1 = arith.constant 0 : i32
    %c0_i32_2 = arith.constant 0 : i32
    return %arg0, %c0_i32, %c0_i32_0, %c0_i32_1 : i32, i32, i32, i32
  }
}

module attributes {stable_mosaic.version = 11 : i64} {
  func.func @_conv2_skip_relu_kernel(%arg0: i32, %arg1: memref<1x16x16x128xbf16, #tpu.memory_space<vmem>>, %arg2: memref<1x16x16x4xbf16, #tpu.memory_space<vmem>>, %arg3: memref<1156x4xbf16, #tpu.memory_space<vmem>>, %arg4: memref<1x4xf32, #tpu.memory_space<vmem>>, %arg5: memref<1x16x16x4xbf16, #tpu.memory_space<vmem>>) attributes {dimension_semantics = [#tpu.dimension_semantics<parallel>], iteration_bounds = array<i64: 2>, scalar_prefetch = 0 : i64, scratch_operands = 0 : i64, tpu.core_type = #tpu.core_type<tc>, window_params = [{transform_indices = @transform_0, window_bounds = array<i64: 1, 16, 16, 128>}, {transform_indices = @transform_1, window_bounds = array<i64: 1, 16, 16, 4>}, {pipeline_mode = #tpu.pipeline_mode<synchronous>, transform_indices = @transform_2, window_bounds = array<i64: 1156, 4>}, {pipeline_mode = #tpu.pipeline_mode<synchronous>, transform_indices = @transform_3, window_bounds = array<i64: 1, 4>}, {transform_indices = @transform_4, window_bounds = array<i64: 1, 16, 16, 4>}]} {
    %c0 = arith.constant 0 : index
    %c0_0 = arith.constant 0 : index
    %c0_1 = arith.constant 0 : index
    %c0_2 = arith.constant 0 : index
    %0 = vector.load %arg1[%c0, %c0_0, %c0_1, %c0_2] : memref<1x16x16x128xbf16, #tpu.memory_space<vmem>>, vector<1x16x16x128xbf16>
    %1 = vector.shape_cast %0 : vector<1x16x16x128xbf16> to vector<16x16x128xbf16>
    %2 = arith.extf %1 : vector<16x16x128xbf16> to vector<16x16x128xf32>
    %cst = arith.constant 0.000000e+00 : f32
    %3 = vector.broadcast %cst : f32 to vector<1x16x128xf32>
    %4 = tpu.concatenate %3, %2, %3 in 0 : vector<1x16x128xf32>, vector<16x16x128xf32>, vector<1x16x128xf32> -> vector<18x16x128xf32>
    %cst_3 = arith.constant 0.000000e+00 : f32
    %5 = vector.broadcast %cst_3 : f32 to vector<18x1x128xf32>
    %6 = tpu.concatenate %5, %4, %5 in 1 : vector<18x1x128xf32>, vector<18x16x128xf32>, vector<18x1x128xf32> -> vector<18x18x128xf32>
    %7 = vector.extract_strided_slice %6 {offsets = [0, 0, 0], sizes = [16, 16, 128], strides = [1, 1, 1]} : vector<18x18x128xf32> to vector<16x16x128xf32>
    %8 = vector.shape_cast %7 : vector<16x16x128xf32> to vector<256x128xf32>
    %9 = vector.extract_strided_slice %6 {offsets = [0, 1, 0], sizes = [16, 16, 128], strides = [1, 1, 1]} : vector<18x18x128xf32> to vector<16x16x128xf32>
    %10 = vector.shape_cast %9 : vector<16x16x128xf32> to vector<256x128xf32>
    %11 = vector.extract_strided_slice %6 {offsets = [0, 2, 0], sizes = [16, 16, 128], strides = [1, 1, 1]} : vector<18x18x128xf32> to vector<16x16x128xf32>
    %12 = vector.shape_cast %11 : vector<16x16x128xf32> to vector<256x128xf32>
    %13 = vector.extract_strided_slice %6 {offsets = [1, 0, 0], sizes = [16, 16, 128], strides = [1, 1, 1]} : vector<18x18x128xf32> to vector<16x16x128xf32>
    %14 = vector.shape_cast %13 : vector<16x16x128xf32> to vector<256x128xf32>
    %15 = vector.extract_strided_slice %6 {offsets = [1, 1, 0], sizes = [16, 16, 128], strides = [1, 1, 1]} : vector<18x18x128xf32> to vector<16x16x128xf32>
    %16 = vector.shape_cast %15 : vector<16x16x128xf32> to vector<256x128xf32>
    %17 = vector.extract_strided_slice %6 {offsets = [1, 2, 0], sizes = [16, 16, 128], strides = [1, 1, 1]} : vector<18x18x128xf32> to vector<16x16x128xf32>
    %18 = vector.shape_cast %17 : vector<16x16x128xf32> to vector<256x128xf32>
    %19 = vector.extract_strided_slice %6 {offsets = [2, 0, 0], sizes = [16, 16, 128], strides = [1, 1, 1]} : vector<18x18x128xf32> to vector<16x16x128xf32>
    %20 = vector.shape_cast %19 : vector<16x16x128xf32> to vector<256x128xf32>
    %21 = vector.extract_strided_slice %6 {offsets = [2, 1, 0], sizes = [16, 16, 128], strides = [1, 1, 1]} : vector<18x18x128xf32> to vector<16x16x128xf32>
    %22 = vector.shape_cast %21 : vector<16x16x128xf32> to vector<256x128xf32>
    %23 = vector.extract_strided_slice %6 {offsets = [2, 2, 0], sizes = [16, 16, 128], strides = [1, 1, 1]} : vector<18x18x128xf32> to vector<16x16x128xf32>
    %24 = vector.shape_cast %23 : vector<16x16x128xf32> to vector<256x128xf32>
    %25 = tpu.concatenate %8, %10, %12, %14, %16, %18, %20, %22, %24 in 1 : vector<256x128xf32>, vector<256x128xf32>, vector<256x128xf32>, vector<256x128xf32>, vector<256x128xf32>, vector<256x128xf32>, vector<256x128xf32>, vector<256x128xf32>, vector<256x128xf32> -> vector<256x1152xf32>
    %c0_4 = arith.constant 0 : index
    %c0_5 = arith.constant 0 : index
    %c0_6 = arith.constant 0 : index
    %c0_7 = arith.constant 0 : index
    %26 = vector.load %arg2[%c0_4, %c0_5, %c0_6, %c0_7] : memref<1x16x16x4xbf16, #tpu.memory_space<vmem>>, vector<1x16x16x4xbf16>
    %27 = vector.shape_cast %26 : vector<1x16x16x4xbf16> to vector<16x16x4xbf16>
    %28 = arith.extf %27 : vector<16x16x4xbf16> to vector<16x16x4xf32>
    %29 = vector.shape_cast %28 : vector<16x16x4xf32> to vector<256x4xf32>
    %30 = tpu.concatenate %25, %29 in 1 : vector<256x1152xf32>, vector<256x4xf32> -> vector<256x1156xf32>
    %31 = arith.truncf %30 : vector<256x1156xf32> to vector<256x1156xbf16>
    %c0_8 = arith.constant 0 : index
    %c0_9 = arith.constant 0 : index
    %32 = vector.load %arg3[%c0_8, %c0_9] : memref<1156x4xbf16, #tpu.memory_space<vmem>>, vector<1156x4xbf16>
    %cst_10 = arith.constant dense<0.000000e+00> : vector<256x4xf32>
    %33 = tpu.matmul %31, %32, %cst_10 {dimension_numbers = #tpu.dot_dimension_numbers<[1], [0], [0], [1], [0, 0, 1, 1], [], []>} : vector<256x1156xbf16>, vector<1156x4xbf16>, vector<256x4xf32> -> vector<256x4xf32>
    %c0_11 = arith.constant 0 : index
    %c0_12 = arith.constant 0 : index
    %34 = vector.load %arg4[%c0_11, %c0_12] : memref<1x4xf32, #tpu.memory_space<vmem>>, vector<1x4xf32>
    %35 = vector.broadcast %34 : vector<1x4xf32> to vector<256x4xf32>
    %36 = arith.addf %33, %35 : vector<256x4xf32>
    %cst_13 = arith.constant 0.000000e+00 : f32
    %37 = vector.broadcast %cst_13 : f32 to vector<256x4xf32>
    %38 = arith.maximumf %36, %37 : vector<256x4xf32>
    %39 = vector.shape_cast %38 : vector<256x4xf32> to vector<16x16x4xf32>
    %40 = arith.truncf %39 : vector<16x16x4xf32> to vector<16x16x4xbf16>
    %c0_14 = arith.constant 0 : index
    %c0_15 = arith.constant 0 : index
    %c0_16 = arith.constant 0 : index
    %c0_17 = arith.constant 0 : index
    %41 = vector.load %arg5[%c0_14, %c0_15, %c0_16, %c0_17] : memref<1x16x16x4xbf16, #tpu.memory_space<vmem>>, vector<1x16x16x4xbf16>
    %42 = vector.shape_cast %41 : vector<1x16x16x4xbf16> to vector<16x16x4xbf16>
    %43 = vector.shape_cast %40 : vector<16x16x4xbf16> to vector<1x16x16x4xbf16>
    tpu.vector_store %arg5[%c0_14, %c0_15, %c0_16, %c0_17], %43 {strides = array<i32>} : memref<1x16x16x4xbf16, #tpu.memory_space<vmem>>, vector<1x16x16x4xbf16>,
    return
  }
  func.func @transform_0(%arg0: i32) -> (i32, i32, i32, i32) {
    %c0_i32 = arith.constant 0 : i32
    %c0_i32_0 = arith.constant 0 : i32
    %c0_i32_1 = arith.constant 0 : i32
    %c0_i32_2 = arith.constant 0 : i32
    return %arg0, %c0_i32, %c0_i32_0, %c0_i32_1 : i32, i32, i32, i32
  }
  func.func @transform_1(%arg0: i32) -> (i32, i32, i32, i32) {
    %c0_i32 = arith.constant 0 : i32
    %c0_i32_0 = arith.constant 0 : i32
    %c0_i32_1 = arith.constant 0 : i32
    %c0_i32_2 = arith.constant 0 : i32
    return %arg0, %c0_i32, %c0_i32_0, %c0_i32_1 : i32, i32, i32, i32
  }
  func.func @transform_2(%arg0: i32) -> (i32, i32) {
    %c0_i32 = arith.constant 0 : i32
    %c0_i32_0 = arith.constant 0 : i32
    %c0_i32_1 = arith.constant 0 : i32
    return %c0_i32, %c0_i32_0 : i32, i32
  }
  func.func @transform_3(%arg0: i32) -> (i32, i32) {
    %c0_i32 = arith.constant 0 : i32
    %c0_i32_0 = arith.constant 0 : i32
    %c0_i32_1 = arith.constant 0 : i32
    return %c0_i32, %c0_i32_0 : i32, i32
  }
  func.func @transform_4(%arg0: i32) -> (i32, i32, i32, i32) {
    %c0_i32 = arith.constant 0 : i32
    %c0_i32_0 = arith.constant 0 : i32
    %c0_i32_1 = arith.constant 0 : i32
    %c0_i32_2 = arith.constant 0 : i32
    return %arg0, %c0_i32, %c0_i32_0, %c0_i32_1 : i32, i32, i32, i32
  }
}

module attributes {stable_mosaic.version = 11 : i64} {
  func.func @_conv3x3_bn_relu_kernel(%arg0: i32, %arg1: memref<1x16x16x4xbf16, #tpu.memory_space<vmem>>, %arg2: memref<36x4xbf16, #tpu.memory_space<vmem>>, %arg3: memref<1x4xf32, #tpu.memory_space<vmem>>, %arg4: memref<1x4xf32, #tpu.memory_space<vmem>>, %arg5: memref<1x16x16x4xf32, #tpu.memory_space<vmem>>) attributes {dimension_semantics = [#tpu.dimension_semantics<parallel>], iteration_bounds = array<i64: 2>, scalar_prefetch = 0 : i64, scratch_operands = 0 : i64, tpu.core_type = #tpu.core_type<tc>, window_params = [{transform_indices = @transform_0, window_bounds = array<i64: 1, 16, 16, 4>}, {pipeline_mode = #tpu.pipeline_mode<synchronous>, transform_indices = @transform_1, window_bounds = array<i64: 36, 4>}, {pipeline_mode = #tpu.pipeline_mode<synchronous>, transform_indices = @transform_2, window_bounds = array<i64: 1, 4>}, {pipeline_mode = #tpu.pipeline_mode<synchronous>, transform_indices = @transform_3, window_bounds = array<i64: 1, 4>}, {transform_indices = @transform_4, window_bounds = array<i64: 1, 16, 16, 4>}]} {
    %c0 = arith.constant 0 : index
    %c0_0 = arith.constant 0 : index
    %c0_1 = arith.constant 0 : index
    %c0_2 = arith.constant 0 : index
    %0 = vector.load %arg1[%c0, %c0_0, %c0_1, %c0_2] : memref<1x16x16x4xbf16, #tpu.memory_space<vmem>>, vector<1x16x16x4xbf16>
    %1 = vector.shape_cast %0 : vector<1x16x16x4xbf16> to vector<16x16x4xbf16>
    %2 = arith.extf %1 : vector<16x16x4xbf16> to vector<16x16x4xf32>
    %cst = arith.constant 0.000000e+00 : f32
    %3 = vector.broadcast %cst : f32 to vector<1x16x4xf32>
    %4 = tpu.concatenate %3, %2, %3 in 0 : vector<1x16x4xf32>, vector<16x16x4xf32>, vector<1x16x4xf32> -> vector<18x16x4xf32>
    %cst_3 = arith.constant 0.000000e+00 : f32
    %5 = vector.broadcast %cst_3 : f32 to vector<18x1x4xf32>
    %6 = tpu.concatenate %5, %4, %5 in 1 : vector<18x1x4xf32>, vector<18x16x4xf32>, vector<18x1x4xf32> -> vector<18x18x4xf32>
    %7 = vector.extract_strided_slice %6 {offsets = [0, 0, 0], sizes = [16, 16, 4], strides = [1, 1, 1]} : vector<18x18x4xf32> to vector<16x16x4xf32>
    %8 = vector.shape_cast %7 : vector<16x16x4xf32> to vector<256x4xf32>
    %9 = vector.extract_strided_slice %6 {offsets = [0, 1, 0], sizes = [16, 16, 4], strides = [1, 1, 1]} : vector<18x18x4xf32> to vector<16x16x4xf32>
    %10 = vector.shape_cast %9 : vector<16x16x4xf32> to vector<256x4xf32>
    %11 = vector.extract_strided_slice %6 {offsets = [0, 2, 0], sizes = [16, 16, 4], strides = [1, 1, 1]} : vector<18x18x4xf32> to vector<16x16x4xf32>
    %12 = vector.shape_cast %11 : vector<16x16x4xf32> to vector<256x4xf32>
    %13 = vector.extract_strided_slice %6 {offsets = [1, 0, 0], sizes = [16, 16, 4], strides = [1, 1, 1]} : vector<18x18x4xf32> to vector<16x16x4xf32>
    %14 = vector.shape_cast %13 : vector<16x16x4xf32> to vector<256x4xf32>
    %15 = vector.extract_strided_slice %6 {offsets = [1, 1, 0], sizes = [16, 16, 4], strides = [1, 1, 1]} : vector<18x18x4xf32> to vector<16x16x4xf32>
    %16 = vector.shape_cast %15 : vector<16x16x4xf32> to vector<256x4xf32>
    %17 = vector.extract_strided_slice %6 {offsets = [1, 2, 0], sizes = [16, 16, 4], strides = [1, 1, 1]} : vector<18x18x4xf32> to vector<16x16x4xf32>
    %18 = vector.shape_cast %17 : vector<16x16x4xf32> to vector<256x4xf32>
    %19 = vector.extract_strided_slice %6 {offsets = [2, 0, 0], sizes = [16, 16, 4], strides = [1, 1, 1]} : vector<18x18x4xf32> to vector<16x16x4xf32>
    %20 = vector.shape_cast %19 : vector<16x16x4xf32> to vector<256x4xf32>
    %21 = vector.extract_strided_slice %6 {offsets = [2, 1, 0], sizes = [16, 16, 4], strides = [1, 1, 1]} : vector<18x18x4xf32> to vector<16x16x4xf32>
    %22 = vector.shape_cast %21 : vector<16x16x4xf32> to vector<256x4xf32>
    %23 = vector.extract_strided_slice %6 {offsets = [2, 2, 0], sizes = [16, 16, 4], strides = [1, 1, 1]} : vector<18x18x4xf32> to vector<16x16x4xf32>
    %24 = vector.shape_cast %23 : vector<16x16x4xf32> to vector<256x4xf32>
    %25 = tpu.concatenate %8, %10, %12, %14, %16, %18, %20, %22, %24 in 1 : vector<256x4xf32>, vector<256x4xf32>, vector<256x4xf32>, vector<256x4xf32>, vector<256x4xf32>, vector<256x4xf32>, vector<256x4xf32>, vector<256x4xf32>, vector<256x4xf32> -> vector<256x36xf32>
    %26 = arith.truncf %25 : vector<256x36xf32> to vector<256x36xbf16>
    %c0_4 = arith.constant 0 : index
    %c0_5 = arith.constant 0 : index
    %27 = vector.load %arg2[%c0_4, %c0_5] : memref<36x4xbf16, #tpu.memory_space<vmem>>, vector<36x4xbf16>
    %cst_6 = arith.constant dense<0.000000e+00> : vector<256x4xf32>
    %28 = tpu.matmul %26, %27, %cst_6 {dimension_numbers = #tpu.dot_dimension_numbers<[1], [0], [0], [1], [0, 0, 1, 1], [], []>} : vector<256x36xbf16>, vector<36x4xbf16>, vector<256x4xf32> -> vector<256x4xf32>
    %c0_7 = arith.constant 0 : index
    %c0_8 = arith.constant 0 : index
    %29 = vector.load %arg3[%c0_7, %c0_8] : memref<1x4xf32, #tpu.memory_space<vmem>>, vector<1x4xf32>
    %30 = vector.broadcast %29 : vector<1x4xf32> to vector<256x4xf32>
    %31 = arith.mulf %28, %30 : vector<256x4xf32>
    %c0_9 = arith.constant 0 : index
    %c0_10 = arith.constant 0 : index
    %32 = vector.load %arg4[%c0_9, %c0_10] : memref<1x4xf32, #tpu.memory_space<vmem>>, vector<1x4xf32>
    %33 = vector.broadcast %32 : vector<1x4xf32> to vector<256x4xf32>
    %34 = arith.addf %31, %33 : vector<256x4xf32>
    %cst_11 = arith.constant 0.000000e+00 : f32
    %35 = vector.broadcast %cst_11 : f32 to vector<256x4xf32>
    %36 = arith.maximumf %34, %35 : vector<256x4xf32>
    %37 = vector.shape_cast %36 : vector<256x4xf32> to vector<16x16x4xf32>
    %c0_12 = arith.constant 0 : index
    %c0_13 = arith.constant 0 : index
    %c0_14 = arith.constant 0 : index
    %c0_15 = arith.constant 0 : index
    %38 = vector.load %arg5[%c0_12, %c0_13, %c0_14, %c0_15] : memref<1x16x16x4xf32, #tpu.memory_space<vmem>>, vector<1x16x16x4xf32>
    %39 = vector.shape_cast %38 : vector<1x16x16x4xf32> to vector<16x16x4xf32>
    %40 = vector.shape_cast %37 : vector<16x16x4xf32> to vector<1x16x16x4xf32>
    tpu.vector_store %arg5[%c0_12, %c0_13, %c0_14, %c0_15], %40 {strides = array<i32>} : memref<1x16x16x4xf32, #tpu.memory_space<vmem>>, vector<1x16x16x4xf32>,
    return
  }
  func.func @transform_0(%arg0: i32) -> (i32, i32, i32, i32) {
    %c0_i32 = arith.constant 0 : i32
    %c0_i32_0 = arith.constant 0 : i32
    %c0_i32_1 = arith.constant 0 : i32
    %c0_i32_2 = arith.constant 0 : i32
    return %arg0, %c0_i32, %c0_i32_0, %c0_i32_1 : i32, i32, i32, i32
  }
  func.func @transform_1(%arg0: i32) -> (i32, i32) {
    %c0_i32 = arith.constant 0 : i32
    %c0_i32_0 = arith.constant 0 : i32
    %c0_i32_1 = arith.constant 0 : i32
    return %c0_i32, %c0_i32_0 : i32, i32
  }
  func.func @transform_2(%arg0: i32) -> (i32, i32) {
    %c0_i32 = arith.constant 0 : i32
    %c0_i32_0 = arith.constant 0 : i32
    %c0_i32_1 = arith.constant 0 : i32
    return %c0_i32, %c0_i32_0 : i32, i32
  }
  func.func @transform_3(%arg0: i32) -> (i32, i32) {
    %c0_i32 = arith.constant 0 : i32
    %c0_i32_0 = arith.constant 0 : i32
    %c0_i32_1 = arith.constant 0 : i32
    return %c0_i32, %c0_i32_0 : i32, i32
  }
  func.func @transform_4(%arg0: i32) -> (i32, i32, i32, i32) {
    %c0_i32 = arith.constant 0 : i32
    %c0_i32_0 = arith.constant 0 : i32
    %c0_i32_1 = arith.constant 0 : i32
    %c0_i32_2 = arith.constant 0 : i32
    return %arg0, %c0_i32, %c0_i32_0, %c0_i32_1 : i32, i32, i32, i32
  }
}

</mosaic_0001>

<bundles_post_ra>
// kernel: br_corner_pooling_forward.5
= control target key start
LH: loop header
LB: loop body
LE: loop exit
PB: predicated region body
PF: predicated region fallthrough
CT: control target
= control target key end

     0   :  { %s2995_s15 = smov 0   ;;  %s4498_s0 = inlined_call_operand.vmem [shape: bf16[2,16,16,4], index: 0, kind: input, shape index: {}]   ;;  %s4499_s1 = inlined_call_operand.vmem [shape: bf16[36,4], index: 1, kind: input, shape index: {}]   ;;  %s4500_s2 = inlined_call_operand.vmem [shape: f32[1,4], index: 2, kind: input, shape index: {}]   ;;  %s4501_s3 = inlined_call_operand.vmem [shape: f32[1,4], index: 3, kind: input, shape index: {}]   ;;  %s4502_s4 = inlined_call_operand.vmem [shape: f32[2,16,16,4], index: 4, kind: output, shape index: {}]  }
   0x1 LB: > { %s2115_s16 = sadd.s32 4294967295, %s2959_s15   ;;  %p2119_p0 = scmp.ge.s32.totalorder %s2959_s15, 1  ;;  %s2959_s15 = sphi %s2995_s15, %s14_s15  }
   0x2   : > { %p162_p1 = scmp.lt.s32.totalorder %s2959_s15, 3 }
   0x4   : > { %p163_p2 = pnand %p2119_p0, %p162_p1 }
   0x6   : > { %166 = sbr.rel (%p163_p2) target bundleno = 638 (0x27e), region = 36 }
   0xd   : > { %vm296_vm0 = vcmask 1040384   ;;  %p188_p3 = scmp.lt.s32.totalorder %s2115_s16, 1  ;;  %v2961_v0 = vmov 0.0   ;;  %vm462_vm1 = vcmask 1046528   ;;  %vm543_vm2 = vcmask 1045504   ;;  %s2962_s21 = smov 4  }
   0xe   : > { %v3003_v1 = vrot.slane %v2961_v0, 7  ;;  %s2963_s22 = smov 8   ;;  %s2964_s23 = smov 12   ;;  %vm1753_vm3 = vcmask 1041408   ;;  %vm1404_vm4 = vcmask 31744   ;;  %vm1437_vm5 = vcmask 64512  }
   0xf   : > { %s4678_s16 = smov (!%p188_p3, %s2115_s16), 1  ;;  %s2965_s24 = smov 16   ;;  %vm1470_vm6 = vcmask 97280   ;;  %vm1503_vm7 = vcmask 130048   ;;  %vm1536_vm8 = vcmask 162816   ;;  %vm1569_vm9 = vcmask 195584  }
  0x10   : > { %4567 = vst [vmem:[#allocation2_spill] sm:$0xff] %v3003_v1  ;;  %v3009_v2 = vsel %vm296_vm0, 0.0, %v3003_v1  ;;  %v413_v3 = vsel %vm296_vm0, %v3003_v1, 0.0  ;;  %v464_v4 = vrot.slane %v3003_v1, 1  ;;  %v545_v5 = vrot.slane %v3003_v1, 2  ;;  %s2147_s17 = sshll.u32 %s4678_s16, 7 }
  0x11   : > { %4568 = vst [vmem:[#allocation3_spill] sm:$0xff] %v3009_v2  ;;  %v463_v6 = vrot.slane %v3009_v2, 1  ;;  %v466_v7 = vrot.slane %v413_v3, 1  ;;  %v547_v8 = vrot.slane %v413_v3, 2  ;;  %v544_v9 = vrot.slane %v3009_v2, 2  ;;  %s3021_s20 = scalar_lea.vmem %s4498_s0, %s2147_s17  ;;  %s2966_s25 = smov 20  }
  0x12   : > { %v2213_v12 = vld [vmem:[%s3021_s20 + $0x8] sm:$0xff]   ;;  %v2150_v13 = vld [vmem:[%s3021_s20] sm:$0xff]   ;;  %v2214_v14 = vld [vmem:[%s3021_s20 + $0x10] sm:$0xff]   ;;  %s2967_s26 = smov 24   ;;  %s2968_s5 = smov 28   ;;  %vm1602_vm10 = vcmask 228352  }
  0x13   : > { %v465_v10 = vsel %vm462_vm1, %v463_v6, %v464_v4  ;;  %v467_v11 = vsel %vm462_vm1, %v464_v4, %v466_v7  ;;  %v3029_v15 = vsel %vm543_vm2, %v544_v9, %v545_v5  ;;  %v3032_v16 = vsel %vm543_vm2, %v545_v5, %v547_v8  ;;  %v2215_v20 = vld [vmem:[%s3021_s20 + $0x18] sm:$0xff]   ;;  %v2216_v49 = vld [vmem:[%s3021_s20 + $0x20] sm:$0xff]   ;;  %v2217_v62 = vld [vmem:[%s3021_s20 + $0x28] sm:$0xff]   ;;  %s2969_s8 = smov 32   ;;  %s2148_s13 = sshll.u32 %s4678_s16, 8 }
  0x14   : > { %v3034_v17 = vpack.i.bf16 %v467_v11, %v465_v10  ;;  %v2155_v18 = vunpack.c.l.bf16 %v2213_v12  ;;  %v2156_v19 = vunpack.c.h.bf16 %v2213_v12  ;;  %v2151_v21 = vunpack.c.l.bf16 %v2150_v13  ;;  %v2218_v5 = vld [vmem:[%s3021_s20 + $0x30] sm:$0xff]   ;;  %s4370_s18 = scalar_lea.vmem %s4502_s4, %s2148_s13 }
  0x15   : > { %v2152_v22 = vunpack.c.h.bf16 %v2150_v13  ;;  %v2159_v23 = vunpack.c.l.bf16 %v2214_v14  ;;  %v2160_v24 = vunpack.c.h.bf16 %v2214_v14  ;;  %v2163_v27 = vunpack.c.l.bf16 %v2215_v20 }
  0x16   : > { %4569 = vst [vmem:[#allocation4_spill] sm:$0xff] %v3034_v17  ;;  %2311 = vrot.lane.b32.xlu0 %v3034_v17, %s2962_s21  ;;  %v302_v25 = vrot.slane %v2155_v18, 7  ;;  %v303_v26 = vrot.slane %v2156_v19, 7  ;;  %v2164_v28 = vunpack.c.h.bf16 %v2215_v20  ;;  %v299_v29 = vrot.slane %v2151_v21, 7 }
  0x17   : > { %v300_v30 = vrot.slane %v2152_v22, 7  ;;  %v305_v31 = vrot.slane %v2159_v23, 7  ;;  %v306_v32 = vrot.slane %v2160_v24, 7  ;;  %v308_v36 = vrot.slane %v2163_v27, 7 }
  0x18   : > { %v3040_v33 = vsel %vm296_vm0, %v302_v25, %v303_v26  ;;  %v3043_v34 = vsel %vm296_vm0, 0.0, %v302_v25  ;;  %v3046_v35 = vsel %vm296_vm0, %v303_v26, 0.0  ;;  %v3056_v42 = vsel %vm296_vm0, 0.0, %v299_v29  ;;  %v2219_v25 = vld [vmem:[%s3021_s20 + $0x38] sm:$0xff]  }
  0x19   : > { %4570 = vst [vmem:[#allocation5_spill] sm:$0xff] %v3040_v33  ;;  %v473_v37 = vrot.slane %v3043_v34, 1  ;;  %v474_v38 = vrot.slane %v3040_v33, 1  ;;  %v476_v39 = vrot.slane %v3046_v35, 1  ;;  %v3053_v41 = vsel %vm296_vm0, %v299_v29, %v300_v30 }
  0x1a   : > { %v3059_v43 = vsel %vm296_vm0, %v300_v30, 0.0  ;;  %v3062_v44 = vsel %vm296_vm0, %v305_v31, %v306_v32  ;;  %v468_v47 = vrot.slane %v3056_v42, 1  ;;  %v469_v48 = vrot.slane %v3053_v41, 1 }
  0x1b   : > { %4571 = vst [vmem:[#allocation6_spill] sm:$0xff] %v3062_v44  ;;  %v475_v45 = vsel %vm462_vm1, %v473_v37, %v474_v38  ;;  %v477_v46 = vsel %vm462_vm1, %v474_v38, %v476_v39  ;;  %v471_v51 = vrot.slane %v3059_v43, 1  ;;  %v3073_v52 = vsel %vm296_vm0, 0.0, %v305_v31 }
  0x1c   : > { %v3069_v50 = vpack.i.bf16 %v477_v46, %v475_v45  ;;  %4573 = vst [vmem:[#allocation8_spill] sm:$0xff] %v3073_v52  ;;  %v3076_v53 = vsel %vm296_vm0, %v306_v32, 0.0  ;;  %v470_v54 = vsel %vm462_vm1, %v468_v47, %v469_v48  ;;  %v478_v55 = vrot.slane %v3073_v52, 1 }
  0x1d   : > { %v479_v56 = vrot.slane %v3062_v44, 1  ;;  %v481_v57 = vrot.slane %v3076_v53, 1  ;;  %v472_v58 = vsel %vm462_vm1, %v469_v48, %v471_v51  ;;  %v309_v59 = vrot.slane %v2164_v28, 7 }
  0x1e   : > { %4572 = vst [vmem:[#allocation7_spill] sm:$0xff] %v3069_v50  ;;  %2321 = vrot.lane.b32.xlu1 %v3069_v50, %s2962_s21  ;;  %v3086_v60 = vsel %vm296_vm0, 0.0, %v308_v36  ;;  %v2167_v61 = vunpack.c.l.bf16 %v2216_v49  ;;  %v3089_v63 = vpack.i.bf16 %v472_v58, %v470_v54  ;;  %v2168_v9 = vunpack.c.h.bf16 %v2216_v49 }
  0x1f   : > { %v3092_v0 = vsel %vm462_vm1, %v478_v55, %v479_v56  ;;  %v3095_v3 = vsel %vm462_vm1, %v479_v56, %v481_v57  ;;  %v483_v4 = vrot.slane %v3086_v60, 1  ;;  %v3104_v7 = vsel %vm296_vm0, %v308_v36, %v309_v59  ;;  %v2220_v57 = vld [vmem:[%s3021_s20 + $0x40] sm:$0xff]  }
  0x20   : > { %4574 = vst [vmem:[#allocation9_spill] sm:$0xff] %v3095_v3  ;;  %v3101_v6 = vpack.i.bf16 %v3095_v3, %v3092_v0  ;;  %v3107_v8 = vsel %vm296_vm0, %v309_v59, 0.0  ;;  %2316 = vrot.lane.b32.xlu0 %v3089_v63, %s2962_s21  ;;  %v484_v10 = vrot.slane %v3104_v7, 1  ;;  %v311_v12 = vrot.slane %v2167_v61, 7 }
  0x21   : > { %v486_v11 = vrot.slane %v3107_v8, 1  ;;  %v2171_v13 = vunpack.c.l.bf16 %v2217_v62  ;;  %v312_v14 = vrot.slane %v2168_v9, 7  ;;  %v2172_v18 = vunpack.c.h.bf16 %v2217_v62 }
  0x22   : > { %4575 = vst [vmem:[#allocation10_spill] sm:$0xff] %v3101_v6  ;;  %2326 = vrot.lane.b32.xlu1 %v3101_v6, %s2962_s21  ;;  %v2175_v19 = vunpack.c.l.bf16 %v2218_v5  ;;  %v2176_v20 = vunpack.c.h.bf16 %v2218_v5  ;;  %v485_v21 = vsel %vm462_vm1, %v483_v4, %v484_v10  ;;  %v3118_v23 = vsel %vm296_vm0, 0.0, %v311_v12  ;;  %v2221_v4 = vld [vmem:[%s3021_s20 + $0x48] sm:$0xff]  }
  0x23   : > { %v487_v22 = vsel %vm462_vm1, %v484_v10, %v486_v11  ;;  %v314_v24 = vrot.slane %v2171_v13, 7  ;;  %v3124_v27 = vsel %vm296_vm0, %v311_v12, %v312_v14  ;;  %v3127_v28 = vsel %vm296_vm0, %v312_v14, 0.0 }
  0x24   : > { %v3121_v26 = vpack.i.bf16 %v487_v22, %v485_v21  ;;  %v488_v29 = vrot.slane %v3118_v23, 1  ;;  %v489_v30 = vrot.slane %v3124_v27, 1  ;;  %v491_v31 = vrot.slane %v3127_v28, 1 }
  0x25   : > { %v315_v32 = vrot.slane %v2172_v18, 7  ;;  %v3133_v36 = vsel %vm296_vm0, 0.0, %v314_v24  ;;  %v317_v38 = vrot.slane %v2175_v19, 7  ;;  %v318_v39 = vrot.slane %v2176_v20, 7 }
  0x26   : > { %4576 = vst [vmem:[#allocation11_spill] sm:$0xff] %v3121_v26  ;;  %2331 = vrot.lane.b32.xlu0 %v3121_v26, %s2962_s21  ;;  %v493_v37 = vrot.slane %v3133_v36, 1  ;;  %v2179_v45 = vunpack.c.l.bf16 %v2219_v25  ;;  %v490_v46 = vsel %vm462_vm1, %v488_v29, %v489_v30  ;;  %v492_v47 = vsel %vm462_vm1, %v489_v30, %v491_v31 }
  0x27   : > { %v3141_v48 = vsel %vm296_vm0, %v314_v24, %v315_v32  ;;  %v3144_v49 = vsel %vm296_vm0, %v315_v32, 0.0  ;;  %v3146_v51 = vpack.i.bf16 %v492_v47, %v490_v46  ;;  %v3151_v56 = vsel %vm296_vm0, %v317_v38, %v318_v39  ;;  %v2222_v24 = vld [vmem:[%s3021_s20 + $0x50] sm:$0xff]  }
  0x28   : > { %v494_v54 = vrot.slane %v3141_v48, 1  ;;  %v496_v55 = vrot.slane %v3144_v49, 1  ;;  %v3155_v58 = vsel %vm296_vm0, 0.0, %v317_v38  ;;  %v3158_v59 = vsel %vm296_vm0, %v318_v39, 0.0 }
  0x29   : > { %4577 = vst [vmem:[#allocation12_spill] sm:$0xff] %v3146_v51  ;;  %v499_v61 = vrot.slane %v3151_v56, 1  ;;  %v2180_v62 = vunpack.c.h.bf16 %v2219_v25  ;;  %2336 = vrot.lane.b32.xlu1 %v3146_v51, %s2962_s21  ;;  %v498_v10 = vrot.slane %v3155_v58, 1  ;;  %v501_v11 = vrot.slane %v3158_v59, 1 }
  0x2a   : > { %v495_v5 = vsel %vm462_vm1, %v493_v37, %v494_v54  ;;  %v497_v9 = vsel %vm462_vm1, %v494_v54, %v496_v55  ;;  %v320_v13 = vrot.slane %v2179_v45, 7  ;;  %v2183_v18 = vunpack.c.l.bf16 %v2220_v57 }
  0x2b   : > { %v3168_v12 = vpack.i.bf16 %v497_v9, %v495_v5  ;;  %v321_v14 = vrot.slane %v2180_v62, 7  ;;  %v500_v19 = vsel %vm462_vm1, %v498_v10, %v499_v61  ;;  %v502_v20 = vsel %vm462_vm1, %v499_v61, %v501_v11  ;;  %v2223_v5 = vld [vmem:[%s3021_s20 + $0x58] sm:$0xff]  }
  0x2c   : > { %v2184_v21 = vunpack.c.h.bf16 %v2220_v57  ;;  %v2187_v22 = vunpack.c.l.bf16 %v2221_v4  ;;  %v3175_v25 = vpack.i.bf16 %v502_v20, %v500_v19  ;;  %v3181_v30 = vsel %vm296_vm0, 0.0, %v320_v13 }
  0x2d   : > { %4578 = vst [vmem:[#allocation13_spill] sm:$0xff] %v3168_v12  ;;  %2341 = vrot.lane.b32.xlu0 %v3168_v12, %s2962_s21  ;;  %v3178_v29 = vsel %vm296_vm0, %v320_v13, %v321_v14  ;;  %4581 = vst [vmem:[#allocation16_spill] sm:$0xff] %v3181_v30  ;;  %v3184_v31 = vsel %vm296_vm0, %v321_v14, 0.0  ;;  %v503_v32 = vrot.slane %v3181_v30, 1  ;;  %v323_v39 = vrot.slane %v2183_v18, 7  ;;  %v2226_v12 = vld [vmem:[%s3021_s20 + $0x70] sm:$0xff]  }
  0x2e   : > { %4579 = vst [vmem:[#allocation14_spill] sm:$0xff] %v3175_v25  ;;  %4580 = vst [vmem:[#allocation15_spill] sm:$0xff] %v3178_v29  ;;  %v504_v37 = vrot.slane %v3178_v29, 1  ;;  %v506_v38 = vrot.slane %v3184_v31, 1  ;;  %2346 = vrot.lane.b32.xlu1 %v3175_v25, %s2962_s21  ;;  %v324_v45 = vrot.slane %v2184_v21, 7  ;;  %v2188_v46 = vunpack.c.h.bf16 %v2221_v4 }
  0x2f   : > { %v326_v47 = vrot.slane %v2187_v22, 7  ;;  %v2191_v54 = vunpack.c.l.bf16 %v2222_v24  ;;  %v3194_v61 = vsel %vm296_vm0, 0.0, %v323_v39  ;;  %v2192_v62 = vunpack.c.h.bf16 %v2222_v24 }
  0x30   : > { %v505_v55 = vsel %vm462_vm1, %v503_v32, %v504_v37  ;;  %v507_v57 = vsel %vm462_vm1, %v504_v37, %v506_v38  ;;  %4582 = vst [vmem:[#allocation17_spill] sm:$0xff] %v3194_v61  ;;  %v3200_v10 = vsel %vm296_vm0, %v323_v39, %v324_v45  ;;  %v3203_v11 = vsel %vm296_vm0, %v324_v45, 0.0 }
  0x31   : > { %v3197_v9 = vpack.i.bf16 %v507_v57, %v505_v55  ;;  %4584 = vst [vmem:[#allocation19_spill] sm:$0xff] %v3200_v10  ;;  %v508_v4 = vrot.slane %v3194_v61, 1  ;;  %v509_v13 = vrot.slane %v3200_v10, 1  ;;  %v511_v14 = vrot.slane %v3203_v11, 1  ;;  %v2224_v57 = vld [vmem:[%s3021_s20 + $0x60] sm:$0xff]  }
  0x32   : > { %v327_v18 = vrot.slane %v2188_v46, 7  ;;  %v3209_v19 = vsel %vm296_vm0, 0.0, %v326_v47  ;;  %v329_v21 = vrot.slane %v2191_v54, 7  ;;  %v330_v22 = vrot.slane %v2192_v62, 7 }
  0x33   : > { %4583 = vst [vmem:[#allocation18_spill] sm:$0xff] %v3197_v9  ;;  %4585 = vst [vmem:[#allocation20_spill] sm:$0xff] %v3209_v19  ;;  %2351 = vrot.lane.b32.xlu0 %v3197_v9, %s2962_s21  ;;  %v513_v20 = vrot.slane %v3209_v19, 1  ;;  %v2195_v24 = vunpack.c.l.bf16 %v2223_v5  ;;  %v3215_v32 = vsel %vm462_vm1, %v508_v4, %v509_v13  ;;  %v3218_v37 = vsel %vm462_vm1, %v509_v13, %v511_v14  ;;  %v2225_v14 = vld [vmem:[%s3021_s20 + $0x68] sm:$0xff]  }
  0x34   : > { %4586 = vst [vmem:[#allocation21_spill] sm:$0xff] %v3218_v37  ;;  %v3221_v38 = vsel %vm296_vm0, %v326_v47, %v327_v18  ;;  %v3224_v39 = vsel %vm296_vm0, %v327_v18, 0.0  ;;  %v3228_v45 = vpack.i.bf16 %v3218_v37, %v3215_v32  ;;  %v3233_v55 = vsel %vm296_vm0, %v329_v21, %v330_v22 }
  0x35   : > { %4587 = vst [vmem:[#allocation22_spill] sm:$0xff] %v3221_v38  ;;  %v514_v46 = vrot.slane %v3221_v38, 1  ;;  %v516_v54 = vrot.slane %v3224_v39, 1  ;;  %4589 = vst [vmem:[#allocation24_spill] sm:$0xff] %v3233_v55  ;;  %v3237_v62 = vsel %vm296_vm0, 0.0, %v329_v21  ;;  %v3240_v47 = vsel %vm296_vm0, %v330_v22, 0.0 }
  0x36   : > { %4588 = vst [vmem:[#allocation23_spill] sm:$0xff] %v3228_v45  ;;  %4590 = vst [vmem:[#allocation25_spill] sm:$0xff] %v3237_v62  ;;  %v519_v4 = vrot.slane %v3233_v55, 1  ;;  %v2196_v13 = vunpack.c.h.bf16 %v2223_v5  ;;  %2356 = vrot.lane.b32.xlu1 %v3228_v45, %s2962_s21  ;;  %v518_v21 = vrot.slane %v3237_v62, 1  ;;  %v521_v17 = vrot.slane %v3240_v47, 1 }
  0x37   : > { %v3247_v18 = vsel %vm462_vm1, %v513_v20, %v514_v46  ;;  %v3250_v40 = vsel %vm462_vm1, %v514_v46, %v516_v54  ;;  %v332_v9 = vrot.slane %v2195_v24, 7  ;;  %v2199_v2 = vunpack.c.l.bf16 %v2224_v57 }
  0x38   : > { %4591 = vst [vmem:[#allocation26_spill] sm:$0xff] %v3247_v18  ;;  %4592 = vst [vmem:[#allocation27_spill] sm:$0xff] %v3250_v40  ;;  %v3256_v22 = vpack.i.bf16 %v3250_v40, %v3247_v18  ;;  %v333_v5 = vrot.slane %v2196_v13, 7  ;;  %v520_v1 = vsel %vm462_vm1, %v518_v21, %v519_v4  ;;  %v522_v45 = vsel %vm462_vm1, %v519_v4, %v521_v17 }
  0x39   : > { %v2200_v20 = vunpack.c.h.bf16 %v2224_v57  ;;  %v2203_v25 = vunpack.c.l.bf16 %v2225_v14  ;;  %v3263_v46 = vpack.i.bf16 %v522_v45, %v520_v1  ;;  %v3269_v51 = vsel %vm296_vm0, 0.0, %v332_v9 }
  0x3a   : > { %4593 = vst [vmem:[#allocation28_spill] sm:$0xff] %v3256_v22  ;;  %2361 = vrot.lane.b32.xlu0 %v3256_v22, %s2962_s21  ;;  %v3266_v54 = vsel %vm296_vm0, %v332_v9, %v333_v5  ;;  %v3272_v24 = vsel %vm296_vm0, %v333_v5, 0.0  ;;  %v523_v13 = vrot.slane %v3269_v51, 1  ;;  %v335_v4 = vrot.slane %v2199_v2, 7 }
  0x3b   : > { %4594 = vst [vmem:[#allocation29_spill] sm:$0xff] %v3263_v46  ;;  %v524_v17 = vrot.slane %v3266_v54, 1  ;;  %v526_v57 = vrot.slane %v3272_v24, 1  ;;  %2366 = vrot.lane.b32.xlu1 %v3263_v46, %s2962_s21  ;;  %v336_v1 = vrot.slane %v2200_v20, 7  ;;  %v2204_v45 = vunpack.c.h.bf16 %v2225_v14 }
  0x3c   : > { %v338_v21 = vrot.slane %v2203_v25, 7  ;;  %v2207_v26 = vunpack.c.l.bf16 %v2226_v12  ;;  %v3282_v5 = vsel %vm296_vm0, 0.0, %v335_v4  ;;  %v2208_v22 = vunpack.c.h.bf16 %v2226_v12 }
  0x3d   : > { %v525_v9 = vsel %vm462_vm1, %v523_v13, %v524_v17  ;;  %v527_v6 = vsel %vm462_vm1, %v524_v17, %v526_v57  ;;  %v3287_v40 = vsel %vm296_vm0, %v335_v4, %v336_v1  ;;  %v3290_v2 = vsel %vm296_vm0, %v336_v1, 0.0 }
  0x3e   : > { %v3284_v3 = vpack.i.bf16 %v527_v6, %v525_v9  ;;  %v528_v14 = vrot.slane %v3282_v5, 1  ;;  %v529_v25 = vrot.slane %v3287_v40, 1  ;;  %v531_v20 = vrot.slane %v3290_v2, 1 }
  0x3f   : > { %v339_v13 = vrot.slane %v2204_v45, 7  ;;  %v3296_v17 = vsel %vm296_vm0, 0.0, %v338_v21  ;;  %v341_v12 = vrot.slane %v2207_v26, 7  ;;  %v342_v57 = vrot.slane %v2208_v22, 7 }
  0x40   : > { %4595 = vst [vmem:[#allocation30_spill] sm:$0xff] %v3284_v3  ;;  %2371 = vrot.lane.b32.xlu0 %v3284_v3, %s2962_s21  ;;  %v533_v6 = vrot.slane %v3296_v17, 1  ;;  %v3303_v4 = vpack.i.bf16 %v3032_v16, %v3029_v15  ;;  %v530_v1 = vsel %vm462_vm1, %v528_v14, %v529_v25  ;;  %v532_v9 = vsel %vm462_vm1, %v529_v25, %v531_v20 }
  0x41   : > { %v3308_v45 = vsel %vm296_vm0, %v338_v21, %v339_v13  ;;  %v3311_v46 = vsel %vm296_vm0, %v339_v13, 0.0  ;;  %v3313_v18 = vpack.i.bf16 %v532_v9, %v530_v1  ;;  %v3318_v22 = vsel %vm296_vm0, %v341_v12, %v342_v57 }
  0x42   : > { %4596 = vst [vmem:[#allocation31_spill] sm:$0xff] %v3303_v4  ;;  %v534_v3 = vrot.slane %v3308_v45, 1  ;;  %v536_v26 = vrot.slane %v3311_v46, 1  ;;  %v3321_v15 = vsel %vm296_vm0, 0.0, %v341_v12  ;;  %v3324_v16 = vsel %vm296_vm0, %v342_v57, 0.0 }
  0x43   : > { %4597 = vst [vmem:[#allocation32_spill] sm:$0xff] %v3313_v18  ;;  %v539_v21 = vrot.slane %v3318_v22, 1  ;;  %2376 = vrot.lane.b32.xlu1 %v3313_v18, %s2962_s21  ;;  %v538_v20 = vrot.slane %v3321_v15, 1  ;;  %v541_v13 = vrot.slane %v3324_v16, 1  ;;  %v549_v12 = vrot.slane %v3056_v42, 2 }
  0x44   : > { %v535_v14 = vsel %vm462_vm1, %v533_v6, %v534_v3  ;;  %v537_v25 = vsel %vm462_vm1, %v534_v3, %v536_v26  ;;  %v550_v57 = vrot.slane %v3053_v41, 2  ;;  %v552_v9 = vrot.slane %v3059_v43, 2 }
  0x45   : > { %v3333_v1 = vpack.i.bf16 %v537_v25, %v535_v14  ;;  %v540_v37 = vsel %vm462_vm1, %v538_v20, %v539_v21  ;;  %v542_v18 = vsel %vm462_vm1, %v539_v21, %v541_v13  ;;  %v554_v6 = vrot.slane %v3043_v34, 2 }
  0x46   : > { %v555_v3 = vrot.slane %v3040_v33, 2  ;;  %v3344_v26 = vpack.i.bf16 %v542_v18, %v540_v37  ;;  %v551_v14 = vsel %vm543_vm2, %v549_v12, %v550_v57  ;;  %v553_v25 = vsel %vm543_vm2, %v550_v57, %v552_v9 }
  0x47   : > { %4598 = vst [vmem:[#allocation33_spill] sm:$0xff] %v3333_v1  ;;  %2381 = vrot.lane.b32.xlu0 %v3333_v1, %s2962_s21  ;;  %v559_v50 = vrot.slane %v3073_v52, 2  ;;  %v4600_v20 = vrot.slane %v3046_v35, 2  ;;  %v560_v13 = vrot.slane %v3062_v44, 2  ;;  %v3356_v1 = vpack.i.bf16 %v553_v25, %v551_v14 }
  0x48   : > { %4599 = vst [vmem:[#allocation34_spill] sm:$0xff] %v3344_v26  ;;  %v556_v43 = vsel %vm543_vm2, %v554_v6, %v555_v3  ;;  %2386 = vrot.lane.b32.xlu1 %v3344_v26, %s2962_s21  ;;  %v562_v37 = vrot.slane %v3076_v53, 2  ;;  %v564_v18 = vrot.slane %v3086_v60, 2  ;;  %v565_v12 = vrot.slane %v3104_v7, 2 }
  0x49   : > { %v558_v21 = vsel %vm543_vm2, %v555_v3, %v4600_v20  ;;  %v561_v57 = vsel %vm543_vm2, %v559_v50, %v560_v13  ;;  %v567_v9 = vrot.slane %v3107_v8, 2  ;;  %v569_v35 = vrot.slane %v3118_v23, 2 }
  0x4a   : > { %v570_v6 = vrot.slane %v3124_v27, 2  ;;  %v3367_v3 = vpack.i.bf16 %v558_v21, %v556_v43  ;;  %v563_v53 = vsel %vm543_vm2, %v560_v13, %v562_v37  ;;  %v572_v14 = vrot.slane %v3127_v28, 2 }
  0x4b   : > { %2391 = vrot.lane.b32.xlu0 %v3303_v4, %s2963_s22  ;;  %v566_v25 = vsel %vm543_vm2, %v564_v18, %v565_v12  ;;  %v568_v50 = vsel %vm543_vm2, %v565_v12, %v567_v9  ;;  %v574_v8 = vrot.slane %v3133_v36, 2  ;;  %v575_v20 = vrot.slane %v3141_v48, 2 }
  0x4c   : > { %2396 = vrot.lane.b32.xlu1 %v3356_v1, %s2963_s22  ;;  %v3377_v26 = vpack.i.bf16 %v563_v53, %v561_v57  ;;  %v571_v43 = vsel %vm543_vm2, %v569_v35, %v570_v6  ;;  %v577_v21 = vrot.slane %v3144_v49, 2  ;;  %v573_v13 = vsel %vm543_vm2, %v570_v6, %v572_v14 }
  0x4d   : > { %v579_v28 = vrot.slane %v3155_v58, 2  ;;  %v580_v37 = vrot.slane %v3151_v56, 2  ;;  %v582_v18 = vrot.slane %v3158_v59, 2  ;;  %v3387_v12 = vpack.i.bf16 %v568_v50, %v566_v25 }
  0x4e   : > { %v584_v57 = vrot.slane %v3181_v30, 2  ;;  %v585_v9 = vrot.slane %v3178_v29, 2  ;;  %v576_v35 = vsel %vm543_vm2, %v574_v8, %v575_v20  ;;  %v578_v49 = vsel %vm543_vm2, %v575_v20, %v577_v21 }
  0x4f   : > { %2401 = vrot.lane.b32.xlu0 %v3367_v3, %s2963_s22  ;;  %v587_v6 = vrot.slane %v3184_v31, 2  ;;  %v3396_v53 = vpack.i.bf16 %v573_v13, %v571_v43  ;;  %v589_v59 = vrot.slane %v3194_v61, 2  ;;  %v590_v14 = vrot.slane %v3200_v10, 2 }
  0x50   : > { %2406 = vrot.lane.b32.xlu1 %v3377_v26, %s2963_s22  ;;  %v581_v25 = vsel %vm543_vm2, %v579_v28, %v580_v37  ;;  %v583_v50 = vsel %vm543_vm2, %v580_v37, %v582_v18  ;;  %v592_v4 = vrot.slane %v3203_v11, 2  ;;  %v3405_v8 = vpack.i.bf16 %v578_v49, %v576_v35 }
  0x51   : > { %v586_v31 = vsel %vm543_vm2, %v584_v57, %v585_v9  ;;  %v588_v20 = vsel %vm543_vm2, %v585_v9, %v587_v6  ;;  %v594_v43 = vrot.slane %v3209_v19, 2  ;;  %v595_v21 = vrot.slane %v3221_v38, 2 }
  0x52   : > { %v597_v13 = vrot.slane %v3224_v39, 2  ;;  %v3414_v28 = vpack.i.bf16 %v583_v50, %v581_v25  ;;  %v591_v11 = vsel %vm543_vm2, %v589_v59, %v590_v14  ;;  %v593_v37 = vsel %vm543_vm2, %v590_v14, %v592_v4 }
  0x53   : > { %2411 = vrot.lane.b32.xlu0 %v3387_v12, %s2963_s22  ;;  %v599_v18 = vrot.slane %v3237_v62, 2  ;;  %v600_v57 = vrot.slane %v3233_v55, 2  ;;  %v602_v9 = vrot.slane %v3240_v47, 2  ;;  %v3423_v35 = vpack.i.bf16 %v588_v20, %v586_v31 }
  0x54   : > { %2416 = vrot.lane.b32.xlu1 %v3396_v53, %s2963_s22  ;;  %v604_v39 = vrot.slane %v3269_v51, 2  ;;  %v605_v49 = vrot.slane %v3266_v54, 2  ;;  %v596_v6 = vsel %vm543_vm2, %v594_v43, %v595_v21  ;;  %v598_v59 = vsel %vm543_vm2, %v595_v21, %v597_v13 }
  0x55   : > { %4601 = vst [vmem:[#allocation35_spill] sm:$0xff] %v3423_v35  ;;  %v607_v4 = vrot.slane %v3272_v24, 2  ;;  %v3432_v14 = vpack.i.bf16 %v593_v37, %v591_v11  ;;  %v609_v47 = vrot.slane %v3282_v5, 2  ;;  %v610_v25 = vrot.slane %v3287_v40, 2 }
  0x56   : > { %v601_v50 = vsel %vm543_vm2, %v599_v18, %v600_v57  ;;  %v603_v31 = vsel %vm543_vm2, %v600_v57, %v602_v9  ;;  %v612_v20 = vrot.slane %v3290_v2, 2  ;;  %v3441_v43 = vpack.i.bf16 %v598_v59, %v596_v6 }
  0x57   : > { %2421 = vrot.lane.b32.xlu0 %v3405_v8, %s2963_s22  ;;  %4602 = vst [vmem:[#allocation36_spill] sm:$0xff] %v3432_v14  ;;  %v606_v24 = vsel %vm543_vm2, %v604_v39, %v605_v49  ;;  %v608_v21 = vsel %vm543_vm2, %v605_v49, %v607_v4  ;;  %v614_v13 = vrot.slane %v3296_v17, 2  ;;  %v615_v11 = vrot.slane %v3308_v45, 2 }
  0x58   : > { %2426 = vrot.lane.b32.xlu1 %v3414_v28, %s2963_s22  ;;  %v617_v37 = vrot.slane %v3311_v46, 2  ;;  %v3450_v18 = vpack.i.bf16 %v603_v31, %v601_v50  ;;  %v611_v2 = vsel %vm543_vm2, %v609_v47, %v610_v25  ;;  %v613_v57 = vsel %vm543_vm2, %v610_v25, %v612_v20 }
  0x59   : > { %v619_v9 = vrot.slane %v3321_v15, 2  ;;  %v620_v39 = vrot.slane %v3318_v22, 2  ;;  %v622_v49 = vrot.slane %v3324_v16, 2  ;;  %v3459_v6 = vpack.i.bf16 %v608_v21, %v606_v24 }
  0x5a   : > { %v616_v46 = vsel %vm543_vm2, %v614_v13, %v615_v11  ;;  %v618_v59 = vsel %vm543_vm2, %v615_v11, %v617_v37  ;;  %v3465_v4 = vpack.i.bf16 %v613_v57, %v611_v2  ;;  %v2470_v31 = vpack.i.bf16 %v3053_v41, %v3056_v42 }
  0x5b   : > { %2431 = vrot.lane.b32.xlu0 %v3423_v35, %s2963_s22  ;;  %v621_v47 = vsel %vm543_vm2, %v619_v9, %v620_v39  ;;  %v623_v25 = vsel %vm543_vm2, %v620_v39, %v622_v49  ;;  %v3471_v16 = vpack.i.bf16 %v618_v59, %v616_v46  ;;  %v3485_v20 = vpack.i.bf16 %v3040_v33, %v3043_v34  ;;  %v2227_v9 = vld [vmem:[%s3021_s20 + $0x78] sm:$0xff]  }
  0x5c   : > { %2436 = vrot.lane.b32.xlu1 %v3432_v14, %s2963_s22  ;;  %v3475_v50 = vpack.i.bf16 %v623_v25, %v621_v47  ;;  %v3490_v24 = vpack.i.bf16 %v3062_v44, %v3073_v52  ;;  %v3496_v21 = vpack.i.bf16 %v3104_v7, %v3086_v60  ;;  %v3502_v13 = vpack.i.bf16 %v3124_v27, %v3118_v23 }
  0x5d   : > { %v3508_v11 = vpack.i.bf16 %v3141_v48, %v3133_v36  ;;  %v3514_v37 = vpack.i.bf16 %v3151_v56, %v3155_v58  ;;  %v3520_v2 = vpack.i.bf16 %v3178_v29, %v3181_v30  ;;  %v3526_v57 = vpack.i.bf16 %v3200_v10, %v3194_v61  ;;  %v4606_v10 = vld [vmem:[#allocation7_spill] sm:$0xff]  ;;  %v4608_v30 = vld [vmem:[#allocation26_spill] sm:$0xff] }
  0x5e   : > { %v2515_v39 = vpack.i.bf16 %v3221_v38, %v3209_v19  ;;  %v2211_v49 = vunpack.c.l.bf16 %v2227_v9  ;;  %v2212_v46 = vunpack.c.h.bf16 %v2227_v9  ;;  %v2520_v59 = vpack.i.bf16 %v3233_v55, %v3237_v62 }
  0x5f   : > { %2441 = vrot.lane.b32.xlu0 %v3441_v43, %s2963_s22  ;;  %4603 = vst [vmem:[#allocation37_spill] sm:$0xff] %v3520_v2  ;;  %4604 = vst [vmem:[#allocation38_spill] sm:$0xff] %v3526_v57  ;;  %v3540_v47 = vpack.i.bf16 %v3266_v54, %v3269_v51  ;;  %v3545_v19 = vpack.i.bf16 %v3287_v40, %v3282_v5  ;;  %v3551_v9 = vpack.i.bf16 %v3308_v45, %v3296_v17  ;;  %vm1635_vm11 = vcmask 261120  }
  0x60   : > { %2446 = vrot.lane.b32.xlu1 %v3450_v18, %s2963_s22  ;;  %v344_v25 = vrot.slane %v2211_v49, 7  ;;  %v3559_v49 = vpack.i.bf16 %v3318_v22, %v3321_v15  ;;  %vm1704_vm12 = vcmask 293888  }
  0x62   : > { %v412_v55 = vsel %vm296_vm0, 0.0, %v344_v25 }
  0x63   : > { %2451 = vrot.lane.b32.xlu0 %v3459_v6, %s2963_s22  ;;  %v631_v35 = vrot.slane %v412_v55, 2 }
  0x64   : > { %2456 = vrot.lane.b32.xlu1 %v3465_v4, %s2963_s22 }
  0x67   : > { %2461 = vrot.lane.b32.xlu0 %v3471_v16, %s2963_s22 }
  0x68   : > { %2466 = vrot.lane.b32.xlu1 %v3475_v50, %s2963_s22 }
  0x6b   : > { %2471 = vrot.lane.b32.xlu0 %v2470_v31, %s2964_s23  ;;  %v345_v31 = vrot.slane %v2212_v46, 7  ;;  %v626_v46 = vrot.slane %v412_v55, 1 }
  0x6c   : > { %2476 = vrot.lane.b32.xlu1 %v3485_v20, %s2964_s23 }
  0x6d   : > { %v346_v62 = vsel %vm296_vm0, %v344_v25, %v345_v31  ;;  %v429_v44 = vsel %vm296_vm0, %v345_v31, 0.0  ;;  %v2560_v31 = vpack.i.bf16 %v3215_v32, %v3092_v0 }
  0x6e   : > { %v627_v38 = vrot.slane %v346_v62, 1  ;;  %v3563_v52 = vpack.i.bf16 %v346_v62, %v412_v55  ;;  %v629_v33 = vrot.slane %v429_v44, 1  ;;  %v632_v61 = vrot.slane %v346_v62, 2 }
  0x6f   : > { %2481 = vrot.lane.b32.xlu0 %v3490_v24, %s2964_s23 }
  0x70   : > { %2486 = vrot.lane.b32.xlu1 %v3496_v21, %s2964_s23  ;;  %4605 = vst [vmem:[#allocation39_spill] sm:$0xff] %v3563_v52  ;;  %v628_v25 = vsel %vm462_vm1, %v626_v46, %v627_v38  ;;  %v4607_v46 = vld [vmem:[#allocation21_spill] sm:$0xff] }
  0x73   : > { %2491 = vrot.lane.b32.xlu0 %v3502_v13, %s2964_s23 }
  0x74   : > { %2496 = vrot.lane.b32.xlu1 %v3508_v11, %s2964_s23 }
  0x77   : > { %2501 = vrot.lane.b32.xlu0 %v3514_v37, %s2964_s23 }
  0x78   : > { %2506 = vrot.lane.b32.xlu1 %v3520_v2, %s2964_s23 }
  0x7b   : > { %2511 = vrot.lane.b32.xlu0 %v3526_v57, %s2964_s23  ;;  %v630_v57 = vsel %vm462_vm1, %v627_v38, %v629_v33  ;;  %v2565_v33 = vpack.i.bf16 %v4608_v30, %v4607_v46  ;;  %v634_v38 = vrot.slane %v429_v44, 2  ;;  %v4614_v46 = vld [vmem:[#allocation10_spill] sm:$0xff] }
  0x7c   : > { %2516 = vrot.lane.b32.xlu1 %v2515_v39, %s2964_s23  ;;  %v3572_v2 = vpack.i.bf16 %v630_v57, %v628_v25  ;;  %v4609_v57 = vld [vmem:[#allocation27_spill] sm:$0xff]  ;;  %v4610_v25 = vld [vmem:[#allocation9_spill] sm:$0xff] }
  0x7d   : > { %v635_v0 = vsel %vm543_vm2, %v632_v61, %v634_v38 }
  0x7f   : > { %2521 = vrot.lane.b32.xlu0 %v2520_v59, %s2964_s23 }
  0x80   : > { %2526 = vrot.lane.b32.xlu1 %v3540_v47, %s2964_s23 }
  0x83   : > { %2531 = vrot.lane.b32.xlu0 %v3545_v19, %s2964_s23 }
  0x84   : > { %2536 = vrot.lane.b32.xlu1 %v3551_v9, %s2964_s23 }
  0x87   : > { %2541 = vrot.lane.b32.xlu0 %v3559_v49, %s2964_s23 }
  0x88   : > { %2546 = vrot.lane.b32.xlu1 %v3563_v52, %s2964_s23  ;;  %v2570_v52 = vpack.i.bf16 %v4610_v25, %v4609_v57  ;;  %v3585_v29 = vpop.permute.xlu0 %2311 }
  0x8b   : > { %2551 = vrot.lane.b32.xlu0 %v3089_v63, %s2965_s24  ;;  %v633_v63 = vsel %vm543_vm2, %v631_v35, %v632_v61  ;;  %v2951_v35 = vld [vmem:[%s4499_s1 + $0x8] sm:$0xff]  }
  0x8c   : > { %2556 = vrot.lane.b32.xlu1 %v4606_v10, %s2965_s24  ;;  %v3590_v32 = vpack.i.bf16 %v635_v0, %v633_v63 }
  0x8e   : > { %4611 = vst [vmem:[#allocation7_spill] sm:$0xff] %v3590_v32 }
  0x8f   : > { %2561 = vrot.lane.b32.xlu0 %v2560_v31, %s2965_s24 }
  0x90   : > { %2566 = vrot.lane.b32.xlu1 %v2565_v33, %s2965_s24  ;;  %v3592_v55 = vpop.permute.xlu1 %2321  ;;  %v4615_v33 = vld [vmem:[#allocation29_spill] sm:$0xff] }
  0x92   : > { %v3597_v44 = vpop.permute.xlu0 %2316 }
  0x93   : > { %2571 = vrot.lane.b32.xlu0 %v2570_v52, %s2965_s24  ;;  %v2950_v52 = vld [vmem:[%s4499_s1] sm:$0xff]  }
  0x94   : > { %2576 = vrot.lane.b32.xlu1 %v3356_v1, %s2966_s25  ;;  %v3601_v30 = vpop.permute.xlu1 %2326  ;;  %2247 = vmatprep.subr.bf16.mxu0 %v2950_v52 }
  0x95   : > { %4612 = vst [vmem:[#allocation21_spill] sm:$0xff] %v3601_v30  ;;  %2285 = vmatprep.subr.bf16.mxu1 %v2950_v52  ;;  %2248 = vmatpush3.bf16.msra.mxu0 %v2950_v52 }
  0x96   : > { %2288 = vmatpush3.bf16.msra.mxu1 %v2950_v52  ;;  %2249 = vmatprep.subr.bf16.mxu0 %v2951_v35 }
  0x97   : > { %2581 = vrot.lane.b32.xlu0 %v3432_v14, %s2966_s25  ;;  %2286 = vmatprep.subr.bf16.mxu1 %v2951_v35 }
  0x98   : > { %2586 = vrot.lane.b32.xlu1 %v3367_v3, %s2966_s25  ;;  %v3607_v61 = vpop.permute.xlu0 %2331 }
  0x99   : > { %2250 = vmatpush3.bf16.msra.mxu0 %v2951_v35 }
  0x9a   : > { %2289 = vmatpush3.bf16.msra.mxu1 %v2951_v35 }
  0x9b   : > { %2591 = vrot.lane.b32.xlu0 %v3441_v43, %s2966_s25  ;;  %v3614_v62 = vpop.permute.xlu1 %2336 }
  0x9c   : > { %2596 = vrot.lane.b32.xlu1 %v3485_v20, %s2967_s26 }
  0x9f   : > { %2601 = vrot.lane.b32.xlu0 %v2515_v39, %s2967_s26  ;;  %v3619_v1 = vpop.permute.xlu0 %2341  ;;  %v4613_v39 = vld [vmem:[#allocation28_spill] sm:$0xff] }
  0xa0   : > { %2606 = vrot.lane.b32.xlu1 %v3490_v24, %s2967_s26  ;;  %v3625_v20 = vpop.permute.xlu1 %2346  ;;  %v2952_v24 = vld [vmem:[%s4499_s1 + $0x10] ss:$0 sps:$4 sm:$0x33]  }
  0xa1   : > { %2291 = vmatprep.subr.msk.bf16.mxu0 %vm1753_vm3, %v2952_v24  ;;  %2292 = vmatprep.subr.msk.bf16.mxu1 %vm1753_vm3, %v2952_v24 }
  0xa3   : > { %2611 = vrot.lane.b32.xlu0 %v2520_v59, %s2967_s26  ;;  %v1755_v59 = vsel %vm1753_vm3, %v2952_v24, 0 }
  0xa4   : > { %2616 = vrot.lane.b32.xlu1 %v4606_v10, %s2968_s5  ;;  %2252 = vmatpush3.bf16.msra.mxu0 %v1755_v59 }
  0xa5   : > { %v3634_v31 = vpop.permute.xlu0 %2351  ;;  %2290 = vmatpush3.bf16.msra.mxu1 %v1755_v59 }
  0xa7   : > { %2621 = vrot.lane.b32.xlu0 %v4613_v39, %s2968_s5 }
  0xa8   : > { %2626 = vrot.lane.b32.xlu1 %v4614_v46, %s2968_s5  ;;  %v3638_v10 = vpop.permute.xlu1 %2356 }
  0xab   : > { %2631 = vrot.lane.b32.xlu0 %v4615_v33, %s2968_s5 }
  0xac   : > { %2636 = vrot.lane.b32.xlu1 %v3367_v3, %s2969_s8  ;;  %v3644_v38 = vpop.permute.xlu0 %2361  ;;  %v4618_v3 = vld [vmem:[#allocation11_spill] sm:$0xff] }
  0xad   : > { %4616 = vst [vmem:[#allocation26_spill] sm:$0xff] %v3644_v38  ;;  %v3648_v57 = vpop.permute.xlu1 %2366 }
  0xae   : > { %4617 = vst [vmem:[#allocation27_spill] sm:$0xff] %v3648_v57  ;;  %v4627_v57 = vld [vmem:[#allocation32_spill] sm:$0xff] }
  0xaf   : > { %2641 = vrot.lane.b32.xlu0 %v3441_v43, %s2969_s8  ;;  %v4619_v43 = vld [vmem:[#allocation30_spill] sm:$0xff] }
  0xb0   : > { %2646 = vrot.lane.b32.xlu1 %v3377_v26, %s2969_s8 }
  0xb2   : > { %v3654_v25 = vpop.permute.xlu0 %2371 }
  0xb3   : > { %2651 = vrot.lane.b32.xlu0 %v3450_v18, %s2969_s8 }
  0xb4   : > { %2656 = vrot.lane.b32.xlu1 %v4615_v33, %s2965_s24 }
  0xb5   : > { %v3658_v63 = vpop.permute.xlu1 %2376 }
  0xb7   : > { %2661 = vrot.lane.b32.xlu0 %v4618_v3, %s2965_s24 }
  0xb8   : > { %2666 = vrot.lane.b32.xlu1 %v4619_v43, %s2965_s24 }
  0xb9   : > { %v2382_v0 = vpop.permute.xlu0 %2381 }
  0xba   : > { %v2387_v52 = vpop.permute.xlu1 %2386  ;;  %v2383_v38 = vunpack.i.l.bf16 %v2382_v0 }
  0xbb   : > { %2671 = vrot.lane.b32.xlu0 %v3377_v26, %s2966_s25  ;;  %v2388_v14 = vunpack.i.l.bf16 %v2387_v52 }
  0xbc   : > { %2676 = vrot.lane.b32.xlu1 %v3450_v18, %s2966_s25 }
  0xbd   : > { %v3666_v35 = vpop.permute.xlu0 %2391 }
  0xbe   : > { %4620 = vst [vmem:[#allocation9_spill] sm:$0xff] %v3666_v35  ;;  %v3672_v24 = vpop.permute.xlu1 %2396 }
  0xbf   : > { %2681 = vrot.lane.b32.xlu0 %v3387_v12, %s2966_s25  ;;  %4621 = vst [vmem:[#allocation28_spill] sm:$0xff] %v3672_v24 }
  0xc0   : > { %2686 = vrot.lane.b32.xlu1 %v3459_v6, %s2966_s25 }
  0xc1   : > { %v3674_v39 = vpop.permute.xlu0 %2401 }
  0xc2   : > { %v3680_v26 = vpop.permute.xlu1 %2406 }
  0xc3   : > { %2691 = vrot.lane.b32.xlu0 %v3496_v21, %s2967_s26  ;;  %4622 = vst [vmem:[#allocation10_spill] sm:$0xff] %v3680_v26 }
  0xc4   : > { %2696 = vrot.lane.b32.xlu1 %v3540_v47, %s2967_s26  ;;  %v4624_v47 = vld [vmem:[#allocation12_spill] sm:$0xff] }
  0xc5   : > { %v3682_v59 = vpop.permute.xlu0 %2411 }
  0xc6   : > { %v3688_v18 = vpop.permute.xlu1 %2416 }
  0xc7   : > { %2701 = vrot.lane.b32.xlu0 %v3502_v13, %s2967_s26 }
  0xc8   : > { %2706 = vrot.lane.b32.xlu1 %v3545_v19, %s2967_s26 }
  0xc9   : > { %v3690_v46 = vpop.permute.xlu0 %2421 }
  0xca   : > { %v3696_v21 = vpop.permute.xlu1 %2426 }
  0xcb   : > { %2711 = vrot.lane.b32.xlu0 %v4618_v3, %s2968_s5 }
  0xcc   : > { %2716 = vrot.lane.b32.xlu1 %v4619_v43, %s2968_s5  ;;  %v2384_v43 = vunpack.i.h.bf16 %v2382_v0 }
  0xcd   : > { %v3698_v33 = vpop.permute.xlu0 %2431 }
  0xce   : > { %4623 = vst [vmem:[#allocation29_spill] sm:$0xff] %v3698_v33  ;;  %v3704_v13 = vpop.permute.xlu1 %2436 }
  0xcf   : > { %2721 = vrot.lane.b32.xlu0 %v4624_v47, %s2968_s5  ;;  %4625 = vst [vmem:[#allocation11_spill] sm:$0xff] %v3704_v13  ;;  %v1434_v13 = vsel %vm1404_vm4, %v3308_v45, %v2384_v43  ;;  %v1435_v45 = vsel %vm1404_vm4, %v3321_v15, %v2388_v14  ;;  %v2333_v15 = vunpack.i.l.bf16 %v3607_v61  ;;  %v2339_v14 = vunpack.i.h.bf16 %v3614_v62 }
  0xd0   : > { %2726 = vrot.lane.b32.xlu1 %v4627_v57, %s2968_s5 }
  0xd1   : > { %v3706_v26 = vpop.permute.xlu0 %2441 }
  0xd2   : > { %4626 = vst [vmem:[#allocation30_spill] sm:$0xff] %v3706_v26  ;;  %v3712_v19 = vpop.permute.xlu1 %2446  ;;  %v2389_v26 = vunpack.i.h.bf16 %v2387_v52 }
  0xd3   : > { %2731 = vrot.lane.b32.xlu0 %v3387_v12, %s2969_s8  ;;  %4628 = vst [vmem:[#allocation12_spill] sm:$0xff] %v3712_v19 }
  0xd4   : > { %2736 = vrot.lane.b32.xlu1 %v3459_v6, %s2969_s8  ;;  %v1433_v6 = vsel %vm1404_vm4, %v3296_v17, %v2383_v38 }
  0xd5   : > { %v3714_v3 = vpop.permute.xlu0 %2451 }
  0xd6   : > { %v3720_v30 = vpop.permute.xlu1 %2456 }
  0xd7   : > { %2741 = vrot.lane.b32.xlu0 %v3396_v53, %s2969_s8 }
  0xd8   : > { %2746 = vrot.lane.b32.xlu1 %v3465_v4, %s2969_s8 }
  0xd9   : > { %v2462_v32 = vpop.permute.xlu0 %2461 }
  0xda   : > { %v2464_v12 = vunpack.i.h.bf16 %v2462_v32  ;;  %v2463_v19 = vunpack.i.l.bf16 %v2462_v32  ;;  %v2467_v0 = vpop.permute.xlu1 %2466  ;;  %v1436_v32 = vsel %vm1404_vm4, %v3318_v22, %v2389_v26  ;;  %v2334_v22 = vunpack.i.h.bf16 %v3607_v61 }
  0xdb   : > { %2751 = vrot.lane.b32.xlu0 %v4624_v47, %s2965_s24  ;;  %v2469_v24 = vunpack.i.h.bf16 %v2467_v0  ;;  %v2468_v35 = vunpack.i.l.bf16 %v2467_v0  ;;  %v2338_v26 = vunpack.i.l.bf16 %v3614_v62  ;;  %v1416_v0 = vsel %vm1404_vm4, %v3124_v27, %v2339_v14 }
  0xdc   : > { %v3731_v52 = vsel %vm1437_vm5, %v1433_v6, %v2463_v19  ;;  %v3734_v33 = vsel %vm1437_vm5, %v1434_v13, %v2464_v12  ;;  %2756 = vrot.lane.b32.xlu1 %v4627_v57, %s2965_s24  ;;  %v4629_v13 = vld [vmem:[#allocation13_spill] sm:$0xff]  ;;  %v2344_v57 = vunpack.i.h.bf16 %v3619_v1  ;;  %v2414_v12 = vunpack.i.h.bf16 %v3682_v59 }
  0xdd   : > { %v3740_v17 = vpop.permute.xlu0 %2471  ;;  %v3745_v38 = vsel %vm1437_vm5, %v1436_v32, %v2469_v24  ;;  %v3748_v47 = vsel %vm1437_vm5, %v1435_v45, %v2468_v35  ;;  %v2343_v24 = vunpack.i.l.bf16 %v3619_v1  ;;  %v4630_v35 = vld [vmem:[#allocation33_spill] sm:$0xff]  ;;  %v2413_v6 = vunpack.i.l.bf16 %v3682_v59 }
  0xde   : > { %v3752_v19 = vpop.permute.xlu1 %2476  ;;  %v1414_v62 = vsel %vm1404_vm4, %v3104_v7, %v2334_v22  ;;  %v1413_v1 = vsel %vm1404_vm4, %v3086_v60, %v2333_v15  ;;  %v1415_v32 = vsel %vm1404_vm4, %v3118_v23, %v2338_v26  ;;  %v1418_v59 = vsel %vm1404_vm4, %v3141_v48, %v2344_v57 }
  0xdf   : > { %2761 = vrot.lane.b32.xlu0 %v4629_v13, %s2965_s24  ;;  %v2419_v45 = vunpack.i.h.bf16 %v3688_v18  ;;  %v2349_v60 = vunpack.i.h.bf16 %v3625_v20  ;;  %v2348_v27 = vunpack.i.l.bf16 %v3625_v20  ;;  %v1446_v15 = vsel %vm1437_vm5, %v1413_v1, %v2413_v6 }
  0xe0   : > { %2766 = vrot.lane.b32.xlu1 %v4630_v35, %s2965_s24  ;;  %v1447_v48 = vsel %vm1437_vm5, %v1414_v62, %v2414_v12  ;;  %v2423_v14 = vunpack.i.l.bf16 %v3690_v46  ;;  %v2429_v6 = vunpack.i.h.bf16 %v3696_v21 }
  0xe1   : > { %v3760_v43 = vpop.permute.xlu0 %2481 }
  0xe2   : > { %v3768_v61 = vpop.permute.xlu1 %2486 }
  0xe3   : > { %2771 = vrot.lane.b32.xlu0 %v3396_v53, %s2966_s25  ;;  %4631 = vst [vmem:[#allocation32_spill] sm:$0xff] %v3768_v61  ;;  %v1417_v53 = vsel %vm1404_vm4, %v3133_v36, %v2343_v24  ;;  %v2418_v61 = vunpack.i.l.bf16 %v3688_v18  ;;  %v2424_v36 = vunpack.i.h.bf16 %v3690_v46  ;;  %v1449_v24 = vsel %vm1437_vm5, %v1416_v0, %v2419_v45 }
  0xe4   : > { %2776 = vrot.lane.b32.xlu1 %v3465_v4, %s2966_s25  ;;  %v2428_v46 = vunpack.i.l.bf16 %v3696_v21  ;;  %v1420_v0 = vsel %vm1404_vm4, %v3151_v56, %v2349_v60  ;;  %v1450_v21 = vsel %vm1437_vm5, %v1417_v53, %v2423_v14  ;;  %v2379_v14 = vunpack.i.h.bf16 %v3658_v63 }
  0xe5   : > { %v2492_v7 = vpop.permute.xlu0 %2491  ;;  %v1448_v12 = vsel %vm1437_vm5, %v1415_v32, %v2418_v61  ;;  %v1419_v61 = vsel %vm1404_vm4, %v3155_v58, %v2348_v27  ;;  %v1451_v32 = vsel %vm1437_vm5, %v1418_v59, %v2424_v36  ;;  %v1453_v56 = vsel %vm1437_vm5, %v1420_v0, %v2429_v6 }
  0xe6   : > { %v2494_v22 = vunpack.i.h.bf16 %v2492_v7  ;;  %v2493_v23 = vunpack.i.l.bf16 %v2492_v7  ;;  %v2497_v18 = vpop.permute.xlu1 %2496  ;;  %v1452_v58 = vsel %vm1437_vm5, %v1419_v61, %v2428_v46  ;;  %v2374_v36 = vunpack.i.h.bf16 %v3654_v25 }
  0xe7   : > { %2781 = vrot.lane.b32.xlu0 %v3405_v8, %s2966_s25  ;;  %v2499_v20 = vunpack.i.h.bf16 %v2497_v18  ;;  %v2498_v57 = vunpack.i.l.bf16 %v2497_v18  ;;  %v2459_v6 = vunpack.i.h.bf16 %v3720_v30 }
  0xe8   : > { %v3795_v4 = vsel %vm1470_vm6, %v1446_v15, %v2493_v23  ;;  %v3798_v26 = vsel %vm1470_vm6, %v1447_v48, %v2494_v22  ;;  %2786 = vrot.lane.b32.xlu1 %v3471_v16, %s2966_s25 }
  0xe9   : > { %v2502_v62 = vpop.permute.xlu0 %2501  ;;  %v3807_v1 = vsel %vm1470_vm6, %v1448_v12, %v2498_v57  ;;  %v3810_v7 = vsel %vm1470_vm6, %v1449_v24, %v2499_v20  ;;  %v2378_v57 = vunpack.i.l.bf16 %v3658_v63  ;;  %v2454_v24 = vunpack.i.h.bf16 %v3714_v3 }
  0xea   : > { %v2504_v22 = vunpack.i.h.bf16 %v2502_v62  ;;  %v2503_v23 = vunpack.i.l.bf16 %v2502_v62  ;;  %v2507_v45 = vpop.permute.xlu1 %2506  ;;  %v2453_v12 = vunpack.i.l.bf16 %v3714_v3 }
  0xeb   : > { %2791 = vrot.lane.b32.xlu0 %v3508_v11, %s2967_s26  ;;  %v2509_v18 = vunpack.i.h.bf16 %v2507_v45  ;;  %v2508_v20 = vunpack.i.l.bf16 %v2507_v45  ;;  %v4635_v45 = vld [vmem:[#allocation34_spill] sm:$0xff] }
  0xec   : > { %v3821_v15 = vsel %vm1470_vm6, %v1450_v21, %v2503_v23  ;;  %v3824_v48 = vsel %vm1470_vm6, %v1451_v32, %v2504_v22  ;;  %2796 = vrot.lane.b32.xlu1 %v3551_v9, %s2967_s26  ;;  %v2373_v9 = vunpack.i.l.bf16 %v3654_v25  ;;  %v1430_v25 = vsel %vm1404_vm4, %v3266_v54, %v2374_v36 }
  0xed   : > { %v3828_v60 = vpop.permute.xlu0 %2511  ;;  %v3833_v11 = vsel %vm1470_vm6, %v1452_v58, %v2508_v20  ;;  %v3836_v59 = vsel %vm1470_vm6, %v1453_v56, %v2509_v18  ;;  %v1431_v22 = vsel %vm1404_vm4, %v3282_v5, %v2378_v57  ;;  %v1463_v23 = vsel %vm1437_vm5, %v1430_v25, %v2454_v24 }
  0xee   : > { %4632 = vst [vmem:[#allocation13_spill] sm:$0xff] %v3833_v11  ;;  %4633 = vst [vmem:[#allocation33_spill] sm:$0xff] %v3836_v59  ;;  %v3840_v53 = vpop.permute.xlu1 %2516  ;;  %v1429_v63 = vsel %vm1404_vm4, %v3269_v51, %v2373_v9  ;;  %v2478_v11 = vunpack.i.l.bf16 %v3752_v19 }
  0xef   : > { %2801 = vrot.lane.b32.xlu0 %v3514_v37, %s2967_s26 }
  0xf0   : > { %2806 = vrot.lane.b32.xlu1 %v3559_v49, %s2967_s26  ;;  %v2458_v49 = vunpack.i.l.bf16 %v3720_v30  ;;  %v1462_v30 = vsel %vm1437_vm5, %v1429_v63, %v2453_v12  ;;  %v2323_v12 = vunpack.i.l.bf16 %v3592_v55 }
  0xf1   : > { %v3842_v27 = vpop.permute.xlu0 %2521 }
  0xf2   : > { %v3854_v37 = vpop.permute.xlu1 %2526  ;;  %v1464_v5 = vsel %vm1437_vm5, %v1431_v22, %v2458_v49 }
  0xf3   : > { %2811 = vrot.lane.b32.xlu0 %v4629_v13, %s2968_s5  ;;  %v1432_v13 = vsel %vm1404_vm4, %v3287_v40, %v2379_v14 }
  0xf4   : > { %2816 = vrot.lane.b32.xlu1 %v4630_v35, %s2968_s5  ;;  %v4634_v35 = vld [vmem:[#allocation14_spill] sm:$0xff]  ;;  %v1465_v40 = vsel %vm1437_vm5, %v1432_v13, %v2459_v6  ;;  %v2318_v13 = vunpack.i.l.bf16 %v3597_v44 }
  0xf5   : > { %v2532_v46 = vpop.permute.xlu0 %2531 }
  0xf6   : > { %v2534_v3 = vunpack.i.h.bf16 %v2532_v46  ;;  %v2533_v62 = vunpack.i.l.bf16 %v2532_v46  ;;  %v2537_v0 = vpop.permute.xlu1 %2536 }
  0xf7   : > { %2821 = vrot.lane.b32.xlu0 %v4634_v35, %s2968_s5  ;;  %v2539_v61 = vunpack.i.h.bf16 %v2537_v0  ;;  %v2538_v21 = vunpack.i.l.bf16 %v2537_v0 }
  0xf8   : > { %v3873_v54 = vsel %vm1470_vm6, %v1462_v30, %v2533_v62  ;;  %v3876_v51 = vsel %vm1470_vm6, %v1463_v23, %v2534_v3  ;;  %2826 = vrot.lane.b32.xlu1 %v4635_v45, %s2968_s5  ;;  %v2319_v62 = vunpack.i.h.bf16 %v3597_v44 }
  0xf9   : > { %v2542_v32 = vpop.permute.xlu0 %2541  ;;  %v3883_v18 = vsel %vm1470_vm6, %v1464_v5, %v2538_v21  ;;  %v3886_v20 = vsel %vm1470_vm6, %v1465_v40, %v2539_v61  ;;  %v4639_v61 = vld [vmem:[#allocation3_spill] sm:$0xff]  ;;  %v4640_v40 = vld [vmem:[#allocation18_spill] sm:$0xff] }
  0xfa   : > { %v2544_v56 = vunpack.i.h.bf16 %v2542_v32  ;;  %v2543_v58 = vunpack.i.l.bf16 %v2542_v32  ;;  %v2547_v36 = vpop.permute.xlu1 %2546  ;;  %v1408_v21 = vsel %vm1404_vm4, %v3053_v41, %v2319_v62  ;;  %v2354_v32 = vunpack.i.h.bf16 %v3634_v31 }
  0xfb   : > { %2831 = vrot.lane.b32.xlu0 %v3405_v8, %s2969_s8  ;;  %v2549_v57 = vunpack.i.h.bf16 %v2547_v36  ;;  %v2548_v24 = vunpack.i.l.bf16 %v2547_v36  ;;  %v2403_v8 = vunpack.i.l.bf16 %v3674_v39  ;;  %v2358_v36 = vunpack.i.l.bf16 %v3638_v10 }
  0xfc   : > { %v3892_v9 = vsel %vm1470_vm6, %v3731_v52, %v2543_v58  ;;  %v3896_v14 = vsel %vm1470_vm6, %v3734_v33, %v2544_v56  ;;  %2836 = vrot.lane.b32.xlu1 %v3471_v16, %s2969_s8  ;;  %v2483_v33 = vunpack.i.l.bf16 %v3760_v43  ;;  %v1409_v16 = vsel %vm1404_vm4, %v3043_v34, %v2323_v12  ;;  %v4642_v12 = vld [vmem:[#allocation28_spill] sm:$0xff]  ;;  %v4647_v56 = vld [vmem:[#allocation19_spill] sm:$0xff] }
  0xfd   : > { %v3899_v6 = vpop.permute.xlu0 %2551  ;;  %v3906_v49 = vsel %vm1470_vm6, %v3748_v47, %v2548_v24  ;;  %v3910_v52 = vsel %vm1470_vm6, %v3745_v38, %v2549_v57  ;;  %v2314_v47 = vunpack.i.h.bf16 %v3585_v29  ;;  %v2313_v38 = vunpack.i.l.bf16 %v3585_v29  ;;  %v4638_v29 = vld [vmem:[#allocation2_spill] sm:$0xff] }
  0xfe   : > { %4636 = vst [vmem:[#allocation14_spill] sm:$0xff] %v3906_v49  ;;  %4637 = vst [vmem:[#allocation34_spill] sm:$0xff] %v3910_v52  ;;  %v3915_v46 = vpop.permute.xlu1 %2556  ;;  %v1442_v63 = vsel %vm1437_vm5, %v1409_v16, %v2403_v8  ;;  %v2359_v58 = vunpack.i.h.bf16 %v3638_v10  ;;  %v2399_v8 = vunpack.i.h.bf16 %v4642_v12  ;;  %v4648_v52 = vld [vmem:[#allocation17_spill] sm:$0xff] }
  0xff   : > { %2841 = vrot.lane.b32.xlu0 %v3414_v28, %s2969_s8  ;;  %v1475_v34 = vsel %vm1470_vm6, %v1442_v63, %v2483_v33  ;;  %v1406_v0 = vsel %vm1404_vm4, %v4638_v29, %v2314_v47  ;;  %v1405_v44 = vsel %vm1404_vm4, %v4639_v61, %v2313_v38  ;;  %v4643_v33 = vld [vmem:[#allocation29_spill] sm:$0xff]  ;;  %v4644_v38 = vld [vmem:[#allocation11_spill] sm:$0xff]  ;;  %v1423_v49 = vsel %vm1404_vm4, %v4648_v52, %v2358_v36 }
 0x100   : > { %2846 = vrot.lane.b32.xlu1 %v3475_v50, %s2969_s8  ;;  %v2434_v16 = vunpack.i.h.bf16 %v4643_v33  ;;  %v2433_v47 = vunpack.i.l.bf16 %v4643_v33  ;;  %v2439_v63 = vunpack.i.h.bf16 %v4644_v38  ;;  %v1424_v33 = vsel %vm1404_vm4, %v4647_v56, %v2359_v58 }
 0x101   : > { %v3919_v25 = vpop.permute.xlu0 %2561  ;;  %v1441_v56 = vsel %vm1437_vm5, %v1408_v21, %v2399_v8  ;;  %v2479_v36 = vunpack.i.h.bf16 %v3752_v19  ;;  %v2513_v21 = vunpack.i.l.bf16 %v3828_v60  ;;  %v2519_v8 = vunpack.i.h.bf16 %v3840_v53 }
 0x102   : > { %v2563_v3 = vunpack.i.l.bf16 %v3919_v25  ;;  %v3932_v22 = vpop.permute.xlu1 %2566  ;;  %v1457_v58 = vsel %vm1437_vm5, %v1424_v33, %v2439_v63  ;;  %v2518_v19 = vunpack.i.l.bf16 %v3840_v53  ;;  %v2559_v63 = vunpack.i.h.bf16 %v3915_v46 }
 0x103   : > { %2851 = vrot.lane.b32.xlu0 %v4634_v35, %s2965_s24  ;;  %v1407_v35 = vsel %vm1404_vm4, %v3056_v42, %v2318_v13  ;;  %v4641_v42 = vld [vmem:[#allocation9_spill] sm:$0xff]  ;;  %v4646_v13 = vld [vmem:[#allocation16_spill] sm:$0xff]  ;;  %v2568_v53 = vunpack.i.l.bf16 %v3932_v22 }
 0x104   : > { %v3935_v30 = vsel %vm1503_vm7, %v1475_v34, %v2563_v3  ;;  %2856 = vrot.lane.b32.xlu1 %v4635_v45, %s2965_s24  ;;  %v2353_v45 = vunpack.i.l.bf16 %v3634_v31  ;;  %v2394_v57 = vunpack.i.h.bf16 %v4641_v42  ;;  %v2393_v24 = vunpack.i.l.bf16 %v4641_v42  ;;  %v4645_v3 = vld [vmem:[#allocation15_spill] sm:$0xff] }
 0x105   : > { %v3937_v23 = vpop.permute.xlu0 %2571  ;;  %v2398_v31 = vunpack.i.l.bf16 %v4642_v12  ;;  %v1422_v62 = vsel %vm1404_vm4, %v4645_v3, %v2354_v32  ;;  %v2438_v42 = vunpack.i.l.bf16 %v4644_v38  ;;  %v2473_v12 = vunpack.i.l.bf16 %v3740_v17  ;;  %v4649_v3 = vld [vmem:[#allocation35_spill] sm:$0xff] }
 0x106   : > { %v3951_v5 = vpop.permute.xlu1 %2576  ;;  %v1421_v34 = vsel %vm1404_vm4, %v4646_v13, %v2353_v45  ;;  %v1439_v32 = vsel %vm1437_vm5, %v1406_v0, %v2394_v57  ;;  %v1438_v45 = vsel %vm1437_vm5, %v1405_v44, %v2393_v24  ;;  %v2569_v13 = vunpack.i.h.bf16 %v3932_v22 }
 0x107   : > { %2861 = vrot.lane.b32.xlu0 %v4640_v40, %s2965_s24  ;;  %v1440_v38 = vsel %vm1437_vm5, %v1407_v35, %v2398_v31  ;;  %v1454_v52 = vsel %vm1437_vm5, %v1421_v34, %v2433_v47  ;;  %v1456_v0 = vsel %vm1437_vm5, %v1423_v49, %v2438_v42  ;;  %v1471_v44 = vsel %vm1470_vm6, %v1438_v45, %v2473_v12  ;;  %v4651_v34 = vld [vmem:[#allocation37_spill] sm:$0xff] }
 0x108   : > { %2866 = vrot.lane.b32.xlu1 %v3572_v2, %s2965_s24  ;;  %v2514_v35 = vunpack.i.h.bf16 %v3828_v60  ;;  %v1473_v24 = vsel %vm1470_vm6, %v1440_v38, %v2478_v11  ;;  %v2554_v49 = vunpack.i.h.bf16 %v3899_v6  ;;  %v2553_v47 = vunpack.i.l.bf16 %v3899_v6  ;;  %v4652_v38 = vld [vmem:[#allocation39_spill] sm:$0xff] }
 0x109   : > { %v3959_v41 = vpop.permute.xlu0 %2581  ;;  %v2558_v60 = vunpack.i.l.bf16 %v3915_v46  ;;  %v2564_v11 = vunpack.i.h.bf16 %v3919_v25  ;;  %v1487_v12 = vsel %vm1470_vm6, %v1454_v52, %v2513_v21  ;;  %v2573_v33 = vunpack.i.l.bf16 %v3937_v23  ;;  %v4653_v21 = vld [vmem:[#allocation38_spill] sm:$0xff] }
 0x10a   : > { %v3972_v10 = vpop.permute.xlu1 %2586  ;;  %v2578_v46 = vunpack.i.l.bf16 %v3951_v5  ;;  %v1490_v25 = vsel %vm1470_vm6, %v1457_v58, %v2519_v8  ;;  %v2583_v22 = vunpack.i.l.bf16 %v3959_v41 }
 0x10b   : > { %2871 = vrot.lane.b32.xlu0 %v3414_v28, %s2966_s25  ;;  %v2474_v28 = vunpack.i.h.bf16 %v3740_v17  ;;  %v1455_v17 = vsel %vm1437_vm5, %v1422_v62, %v2434_v16  ;;  %v4650_v16 = vld [vmem:[#allocation7_spill] sm:$0xff]  ;;  %v1474_v62 = vsel %vm1470_vm6, %v1441_v56, %v2479_v36  ;;  %v1504_v56 = vsel %vm1503_vm7, %v1471_v44, %v2553_v47 }
 0x10c   : > { %2876 = vrot.lane.b32.xlu1 %v3475_v50, %s2966_s25  ;;  %v1488_v6 = vsel %vm1470_vm6, %v1455_v17, %v2514_v35  ;;  %v1506_v17 = vsel %vm1503_vm7, %v1473_v24, %v2558_v60  ;;  %v1507_v36 = vsel %vm1503_vm7, %v1474_v62, %v2559_v63  ;;  %v2584_v35 = vunpack.i.h.bf16 %v3959_v41 }
 0x10d   : > { %v3986_v59 = vpop.permute.xlu0 %2591  ;;  %v1472_v57 = vsel %vm1470_vm6, %v1439_v32, %v2474_v28  ;;  %v1489_v28 = vsel %vm1470_vm6, %v1456_v0, %v2518_v19  ;;  %v2579_v32 = vunpack.i.h.bf16 %v3951_v5  ;;  %v1520_v0 = vsel %vm1503_vm7, %v1487_v12, %v2564_v11 }
 0x10e   : > { %v4000_v50 = vpop.permute.xlu1 %2596  ;;  %v1505_v52 = vsel %vm1503_vm7, %v1472_v57, %v2554_v49  ;;  %v1521_v58 = vsel %vm1503_vm7, %v1488_v6, %v2568_v53  ;;  %v1522_v5 = vsel %vm1503_vm7, %v1489_v28, %v2569_v13  ;;  %v1523_v44 = vsel %vm1503_vm7, %v1490_v25, %v2573_v33 }
 0x10f   : > { %2881 = vrot.lane.b32.xlu0 %v4649_v3, %s2966_s25  ;;  %v1537_v57 = vsel %vm1536_vm8, %v1504_v56, %v2578_v46  ;;  %v2589_v24 = vunpack.i.h.bf16 %v3972_v10  ;;  %v2588_v19 = vunpack.i.l.bf16 %v3972_v10  ;;  %v1538_v49 = vsel %vm1536_vm8, %v1505_v52, %v2579_v32 }
 0x110   : > { %2886 = vrot.lane.b32.xlu1 %v4650_v16, %s2966_s25  ;;  %v1553_v47 = vsel %vm1536_vm8, %v1520_v0, %v2583_v22  ;;  %v2594_v63 = vunpack.i.h.bf16 %v3986_v59  ;;  %v2593_v41 = vunpack.i.l.bf16 %v3986_v59  ;;  %v4654_v62 = vpack.i.bf16 %v4638_v29, %v4639_v61  ;;  %v4655_v0 = vld [vmem:[#allocation23_spill] sm:$0xff] }
 0x111   : > { %v4010_v31 = vpop.permute.xlu0 %2601  ;;  %v2599_v11 = vunpack.i.h.bf16 %v4000_v50  ;;  %v2598_v13 = vunpack.i.l.bf16 %v4000_v50  ;;  %v1539_v29 = vsel %vm1536_vm8, %v1506_v17, %v2588_v19  ;;  %v1540_v61 = vsel %vm1536_vm8, %v1507_v36, %v2589_v24  ;;  %v4656_v24 = vld [vmem:[#allocation4_spill] sm:$0xff] }
 0x112   : > { %v2607_v42 = vpop.permute.xlu1 %2606  ;;  %v2604_v10 = vunpack.i.h.bf16 %v4010_v31  ;;  %v2603_v53 = vunpack.i.l.bf16 %v4010_v31  ;;  %v1555_v28 = vsel %vm1536_vm8, %v1522_v5, %v2593_v41  ;;  %v1556_v31 = vsel %vm1536_vm8, %v1523_v44, %v2594_v63 }
 0x113   : > { %2891 = vrot.lane.b32.xlu0 %v4651_v34, %s2967_s26  ;;  %v1554_v34 = vsel %vm1536_vm8, %v1521_v58, %v2584_v35  ;;  %v2609_v12 = vunpack.i.h.bf16 %v2607_v42  ;;  %v2608_v6 = vunpack.i.l.bf16 %v2607_v42  ;;  %v1570_v42 = vsel %vm1569_vm9, %v1537_v57, %v2598_v13 }
 0x114   : > { %2896 = vrot.lane.b32.xlu1 %v4652_v38, %s2967_s26  ;;  %v1586_v38 = vsel %vm1569_vm9, %v1553_v47, %v2603_v53  ;;  %v1587_v56 = vsel %vm1569_vm9, %v1554_v34, %v2604_v10 }
 0x115   : > { %v2612_v45 = vpop.permute.xlu0 %2611  ;;  %v1573_v52 = vsel %vm1569_vm9, %v1540_v61, %v2609_v12 }
 0x116   : > { %v2617_v8 = vpop.permute.xlu1 %2616  ;;  %v2613_v59 = vunpack.i.l.bf16 %v2612_v45  ;;  %v2614_v46 = vunpack.i.h.bf16 %v2612_v45  ;;  %v1572_v45 = vsel %vm1569_vm9, %v1539_v29, %v2608_v6 }
 0x117   : > { %2901 = vrot.lane.b32.xlu0 %v4653_v21, %s2967_s26  ;;  %v2618_v50 = vunpack.i.l.bf16 %v2617_v8  ;;  %v2619_v25 = vunpack.i.h.bf16 %v2617_v8 }
 0x118   : > { %2906 = vrot.lane.b32.xlu1 %v4654_v62, %s2967_s26  ;;  %v1588_v17 = vsel %vm1569_vm9, %v1555_v28, %v2613_v59 }
 0x119   : > { %v2622_v60 = vpop.permute.xlu0 %2621  ;;  %v1603_v21 = vsel %vm1602_vm10, %v1570_v42, %v2618_v50  ;;  %v4657_v42 = vld [vmem:[#allocation36_spill] sm:$0xff] }
 0x11a   : > { %v2627_v33 = vpop.permute.xlu1 %2626  ;;  %v2623_v32 = vunpack.i.l.bf16 %v2622_v60  ;;  %v2624_v36 = vunpack.i.h.bf16 %v2622_v60 }
 0x11b   : > { %2911 = vrot.lane.b32.xlu0 %v4640_v40, %s2968_s5  ;;  %v1571_v40 = vsel %vm1569_vm9, %v1538_v49, %v2599_v11  ;;  %v2629_v8 = vunpack.i.h.bf16 %v2627_v33  ;;  %v2628_v44 = vunpack.i.l.bf16 %v2627_v33 }
 0x11c   : > { %2916 = vrot.lane.b32.xlu1 %v3572_v2, %s2968_s5  ;;  %v1589_v2 = vsel %vm1569_vm9, %v1556_v31, %v2614_v46  ;;  %v1604_v19 = vsel %vm1602_vm10, %v1571_v40, %v2619_v25  ;;  %v1619_v49 = vsel %vm1602_vm10, %v1586_v38, %v2623_v32  ;;  %v1620_v53 = vsel %vm1602_vm10, %v1587_v56, %v2624_v36 }
 0x11d   : > { %v2632_v22 = vpop.permute.xlu0 %2631  ;;  %v1605_v33 = vsel %vm1602_vm10, %v1572_v45, %v2628_v44  ;;  %v1606_v29 = vsel %vm1602_vm10, %v1573_v52, %v2629_v8  ;;  %v4658_v52 = vld [vmem:[#allocation31_spill] sm:$0xff] }
 0x11e   : > { %v2637_v58 = vpop.permute.xlu1 %2636  ;;  %v2634_v62 = vunpack.i.h.bf16 %v2632_v22  ;;  %v2633_v11 = vunpack.i.l.bf16 %v2632_v22 }
 0x11f   : > { %2921 = vrot.lane.b32.xlu0 %v4655_v0, %s2968_s5  ;;  %v2639_v5 = vunpack.i.h.bf16 %v2637_v58  ;;  %v2638_v35 = vunpack.i.l.bf16 %v2637_v58  ;;  %v2324_v0 = vunpack.i.h.bf16 %v3592_v55  ;;  %v4659_v58 = vld [vmem:[#allocation21_spill] sm:$0xff] }
 0x120   : > { %2926 = vrot.lane.b32.xlu1 %v4656_v24, %s2968_s5  ;;  %v1621_v25 = vsel %vm1602_vm10, %v1588_v17, %v2633_v11  ;;  %v1622_v32 = vsel %vm1602_vm10, %v1589_v2, %v2634_v62  ;;  %v2329_v2 = vunpack.i.h.bf16 %v4659_v58  ;;  %v4664_v11 = vld [vmem:[#allocation6_spill] sm:$0xff] }
 0x121   : > { %v2642_v57 = vpop.permute.xlu0 %2641  ;;  %v1636_v41 = vsel %vm1635_vm11, %v1603_v21, %v2638_v35  ;;  %v1637_v60 = vsel %vm1635_vm11, %v1604_v19, %v2639_v5  ;;  %v2328_v5 = vunpack.i.l.bf16 %v4659_v58  ;;  %v4660_v35 = vld [vmem:[#allocation26_spill] sm:$0xff] }
 0x122   : > { %v2644_v47 = vunpack.i.h.bf16 %v2642_v57  ;;  %v2643_v63 = vunpack.i.l.bf16 %v2642_v57  ;;  %v2647_v13 = vpop.permute.xlu1 %2646  ;;  %v1668_v10 = vpack.c.bf16 %v1637_v60, %v1636_v41  ;;  %v2364_v21 = vunpack.i.h.bf16 %v4660_v35  ;;  %v4661_v57 = vld [vmem:[#allocation27_spill] sm:$0xff]  ;;  %v4663_v60 = vld [vmem:[#allocation5_spill] sm:$0xff] }
 0x123   : > { %2931 = vrot.lane.b32.xlu0 %v4649_v3, %s2969_s8  ;;  %v2649_v34 = vunpack.i.h.bf16 %v2647_v13  ;;  %v2648_v12 = vunpack.i.l.bf16 %v2647_v13  ;;  %v2363_v44 = vunpack.i.l.bf16 %v4660_v35  ;;  %v2369_v24 = vunpack.i.h.bf16 %v4661_v57 }
 0x124   : > { %v1652_v6 = vsel %vm1635_vm11, %v1619_v49, %v2643_v63  ;;  %v1653_v59 = vsel %vm1635_vm11, %v1620_v53, %v2644_v47  ;;  %2936 = vrot.lane.b32.xlu1 %v4650_v16, %s2969_s8  ;;  %2253 = vmatprep.mubr.msk.bf16.mxu0 %vm1704_vm12, %v1668_v10  ;;  %v2368_v19 = vunpack.i.l.bf16 %v4661_v57  ;;  %v2404_v49 = vunpack.i.h.bf16 %v3674_v39  ;;  %v4662_v47 = vld [vmem:[#allocation10_spill] sm:$0xff] }
 0x125   : > { %v2652_v61 = vpop.permute.xlu0 %2651  ;;  %v1676_v3 = vpack.c.bf16 %v1653_v59, %v1652_v6  ;;  %v1638_v46 = vsel %vm1635_vm11, %v1605_v33, %v2648_v12  ;;  %v1639_v50 = vsel %vm1635_vm11, %v1606_v29, %v2649_v34  ;;  %v2409_v63 = vunpack.i.h.bf16 %v4662_v47  ;;  %v4665_v10 = vld [vmem:[#allocation30_spill] sm:$0xff]  ;;  %v4666_v12 = vld [vmem:[#allocation8_spill] sm:$0xff] }
 0x126   : > { %v2654_v28 = vunpack.i.h.bf16 %v2652_v61  ;;  %v2653_v31 = vunpack.i.l.bf16 %v2652_v61  ;;  %v1669_v22 = vpack.c.bf16 %v1639_v50, %v1638_v46  ;;  %v4103_v16 = vpop.permute.xlu1 %2656  ;;  %v2408_v55 = vunpack.i.l.bf16 %v4662_v47  ;;  %v4667_v39 = vld [vmem:[#allocation22_spill] sm:$0xff]  ;;  %v4668_v33 = vld [vmem:[#allocation12_spill] sm:$0xff] }
 0x127   : > { %2941 = vrot.lane.b32.xlu0 %v4657_v42, %s2969_s8  ;;  %2269 = vmatprep.mubr.msk.bf16.mxu1 %vm1704_vm12, %v1676_v3  ;;  %v1410_v62 = vsel %vm1404_vm4, %v4663_v60, %v2324_v0  ;;  %v1412_v13 = vsel %vm1404_vm4, %v4664_v11, %v2329_v2  ;;  %v2444_v53 = vunpack.i.h.bf16 %v4665_v10  ;;  %v2443_v34 = vunpack.i.l.bf16 %v4665_v10  ;;  %v4669_v46 = vld [vmem:[#allocation20_spill] sm:$0xff] }
 0x128   : > { %v1654_v40 = vsel %vm1635_vm11, %v1621_v25, %v2653_v31  ;;  %v1655_v38 = vsel %vm1635_vm11, %v1622_v32, %v2654_v28  ;;  %2946 = vrot.lane.b32.xlu1 %v4658_v52, %s2969_s8  ;;  %2254 = vmatmul.mubr.msk.bf16.vlgmr.msra.gmra.mrb[0].mxu0 %vm1704_vm12, %v1669_v22  ;;  %v1411_v6 = vsel %vm1404_vm4, %v4666_v12, %v2328_v5  ;;  %v2449_v29 = vunpack.i.h.bf16 %v4668_v33  ;;  %v4670_v28 = vld [vmem:[#allocation24_spill] sm:$0xff]  ;;  %v4671_v25 = vld [vmem:[#allocation25_spill] sm:$0xff] }
 0x129   : > { %v1677_v56 = vpack.c.bf16 %v1655_v38, %v1654_v40  ;;  %v4107_v45 = vpop.permute.xlu0 %2661  ;;  %v1426_v59 = vsel %vm1404_vm4, %v4667_v39, %v2364_v21  ;;  %v2448_v61 = vunpack.i.l.bf16 %v4668_v33  ;;  %v1425_v50 = vsel %vm1404_vm4, %v4669_v46, %v2363_v44 }
 0x12a   : > { %v4113_v17 = vpop.permute.xlu1 %2666  ;;  %v1428_v31 = vsel %vm1404_vm4, %v4670_v28, %v2369_v24  ;;  %v1427_v32 = vsel %vm1404_vm4, %v4671_v25, %v2368_v19  ;;  %v1443_v22 = vsel %vm1437_vm5, %v1410_v62, %v2404_v49  ;;  %v1445_v42 = vsel %vm1437_vm5, %v1412_v13, %v2409_v63 }
 0x12b   : > { %2270 = vmatmul.mubr.msk.bf16.vlgmr.msra.gmra.mrb[0].mxu1 %vm1704_vm12, %v1677_v56  ;;  %v1444_v40 = vsel %vm1437_vm5, %v1411_v6, %v2408_v55  ;;  %v2484_v38 = vunpack.i.h.bf16 %v3760_v43  ;;  %v4672_v56 = vld [vmem:[#allocation32_spill] sm:$0xff]  ;;  %v1458_v58 = vsel %vm1437_vm5, %v1425_v50, %v2443_v34  ;;  %v1459_v2 = vsel %vm1437_vm5, %v1426_v59, %v2444_v53 }
 0x12c   : > { %v2488_v52 = vunpack.i.l.bf16 %v4672_v56  ;;  %v2489_v5 = vunpack.i.h.bf16 %v4672_v56  ;;  %v2523_v35 = vunpack.i.l.bf16 %v3842_v27  ;;  %v1461_v21 = vsel %vm1437_vm5, %v1428_v31, %v2449_v29 }
 0x12d   : > { %v4115_v36 = vpop.permute.xlu0 %2671  ;;  %v1460_v44 = vsel %vm1437_vm5, %v1427_v32, %v2448_v61  ;;  %v2524_v57 = vunpack.i.h.bf16 %v3842_v27  ;;  %v2528_v43 = vunpack.i.l.bf16 %v3854_v37  ;;  %v2529_v19 = vunpack.i.h.bf16 %v3854_v37 }
 0x12e   : > { %v4121_v8 = vpop.permute.xlu1 %2676  ;;  %v2574_v49 = vunpack.i.h.bf16 %v3937_v23  ;;  %v2659_v47 = vunpack.i.h.bf16 %v4103_v16  ;;  %v2658_v63 = vunpack.i.l.bf16 %v4103_v16  ;;  %v1476_v55 = vsel %vm1470_vm6, %v1443_v22, %v2484_v38 }
 0x12f   : > { %v1477_v60 = vsel %vm1470_vm6, %v1444_v40, %v2488_v52  ;;  %v2664_v62 = vunpack.i.h.bf16 %v4107_v45  ;;  %v2663_v11 = vunpack.i.l.bf16 %v4107_v45  ;;  %v1478_v13 = vsel %vm1470_vm6, %v1445_v42, %v2489_v5 }
 0x130   : > { %v1491_v10 = vsel %vm1470_vm6, %v1458_v58, %v2523_v35  ;;  %v2669_v37 = vunpack.i.h.bf16 %v4113_v17  ;;  %v2668_v23 = vunpack.i.l.bf16 %v4113_v17  ;;  %v1492_v53 = vsel %vm1470_vm6, %v1459_v2, %v2524_v57 }
 0x131   : > { %v4129_v41 = vpop.permute.xlu0 %2681  ;;  %v1493_v16 = vsel %vm1470_vm6, %v1460_v44, %v2528_v43  ;;  %v2674_v34 = vunpack.i.h.bf16 %v4115_v36  ;;  %v2673_v12 = vunpack.i.l.bf16 %v4115_v36  ;;  %v1494_v45 = vsel %vm1470_vm6, %v1461_v21, %v2529_v19 }
 0x132   : > { %v4143_v3 = vpop.permute.xlu1 %2686  ;;  %v1509_v39 = vsel %vm1503_vm7, %v1476_v55, %v2574_v49  ;;  %v1524_v59 = vsel %vm1503_vm7, %v1491_v10, %v2658_v63  ;;  %v1525_v33 = vsel %vm1503_vm7, %v1492_v53, %v2659_v47  ;;  %v1511_v17 = vsel %vm1503_vm7, %v1478_v13, %v2664_v62 }
 0x133   : > { %v1510_v29 = vsel %vm1503_vm7, %v1477_v60, %v2663_v11  ;;  %v2679_v61 = vunpack.i.h.bf16 %v4121_v8  ;;  %v2678_v46 = vunpack.i.l.bf16 %v4121_v8  ;;  %v1526_v36 = vsel %vm1503_vm7, %v1493_v16, %v2668_v23 }
 0x134   : > { %v1527_v28 = vsel %vm1503_vm7, %v1494_v45, %v2669_v37  ;;  %v2684_v31 = vunpack.i.h.bf16 %v4129_v41  ;;  %v2683_v25 = vunpack.i.l.bf16 %v4129_v41  ;;  %v1541_v32 = vsel %vm1536_vm8, %v3935_v30, %v2673_v12 }
 0x135   : > { %v4156_v0 = vpop.permute.xlu0 %2691  ;;  %v1542_v22 = vsel %vm1536_vm8, %v1509_v39, %v2674_v34  ;;  %v2689_v42 = vunpack.i.h.bf16 %v4143_v3  ;;  %v2688_v40 = vunpack.i.l.bf16 %v4143_v3  ;;  %v1557_v2 = vsel %vm1536_vm8, %v1524_v59, %v2678_v46 }
 0x136   : > { %v2697_v24 = vpop.permute.xlu1 %2696  ;;  %v2694_v8 = vunpack.i.h.bf16 %v4156_v0  ;;  %v2693_v56 = vunpack.i.l.bf16 %v4156_v0  ;;  %v1558_v41 = vsel %vm1536_vm8, %v1525_v33, %v2679_v61  ;;  %v1543_v21 = vsel %vm1536_vm8, %v1510_v29, %v2683_v25 }
 0x137   : > { %v2699_v52 = vunpack.i.h.bf16 %v2697_v24  ;;  %v2698_v58 = vunpack.i.l.bf16 %v2697_v24  ;;  %v1544_v44 = vsel %vm1536_vm8, %v1511_v17, %v2684_v31  ;;  %v1559_v43 = vsel %vm1536_vm8, %v1526_v36, %v2688_v40 }
 0x138   : > { %v1560_v0 = vsel %vm1536_vm8, %v1527_v28, %v2689_v42  ;;  %v1574_v47 = vsel %vm1569_vm9, %v1541_v32, %v2693_v56  ;;  %v1575_v63 = vsel %vm1569_vm9, %v1542_v22, %v2694_v8 }
 0x139   : > { %v2702_v27 = vpop.permute.xlu0 %2701  ;;  %v1590_v55 = vsel %vm1569_vm9, %v1557_v2, %v2698_v58  ;;  %v1591_v60 = vsel %vm1569_vm9, %v1558_v41, %v2699_v52 }
 0x13a   : > { %v4182_v6 = vpop.permute.xlu1 %2706  ;;  %v2704_v5 = vunpack.i.h.bf16 %v2702_v27  ;;  %v2703_v35 = vunpack.i.l.bf16 %v2702_v27 }
 0x13b   : > { %v2708_v3 = vunpack.i.l.bf16 %v4182_v6  ;;  %v2709_v27 = vunpack.i.h.bf16 %v4182_v6 }
 0x13c   : > { %v1576_v62 = vsel %vm1569_vm9, %v1543_v21, %v2703_v35  ;;  %v1577_v11 = vsel %vm1569_vm9, %v1544_v44, %v2704_v5 }
 0x13d   : > { %v2712_v50 = vpop.permute.xlu0 %2711  ;;  %v1592_v37 = vsel %vm1569_vm9, %v1559_v43, %v2708_v3  ;;  %v1593_v42 = vsel %vm1569_vm9, %v1560_v0, %v2709_v27 }
 0x13e   : > { %v2717_v38 = vpop.permute.xlu1 %2716  ;;  %v2713_v57 = vunpack.i.l.bf16 %v2712_v50  ;;  %v2714_v19 = vunpack.i.h.bf16 %v2712_v50 }
 0x13f   : > { %v2718_v24 = vunpack.i.l.bf16 %v2717_v38  ;;  %v2719_v13 = vunpack.i.h.bf16 %v2717_v38 }
 0x140   : > { %v1607_v23 = vsel %vm1602_vm10, %v1574_v47, %v2713_v57  ;;  %v1608_v34 = vsel %vm1602_vm10, %v1575_v63, %v2714_v19 }
 0x141   : > { %v2722_v30 = vpop.permute.xlu0 %2721  ;;  %v1623_v12 = vsel %vm1602_vm10, %v1590_v55, %v2718_v24  ;;  %v1624_v61 = vsel %vm1602_vm10, %v1591_v60, %v2719_v13 }
 0x142   : > { %v2727_v49 = vpop.permute.xlu1 %2726  ;;  %v2724_v45 = vunpack.i.h.bf16 %v2722_v30  ;;  %v2723_v39 = vunpack.i.l.bf16 %v2722_v30 }
 0x143   : > { %v2729_v46 = vunpack.i.h.bf16 %v2727_v49  ;;  %v2728_v50 = vunpack.i.l.bf16 %v2727_v49 }
 0x144   : > { %v1609_v40 = vsel %vm1602_vm10, %v1576_v62, %v2723_v39  ;;  %v1610_v38 = vsel %vm1602_vm10, %v1577_v11, %v2724_v45 }
 0x145   : > { %v2732_v10 = vpop.permute.xlu0 %2731  ;;  %v1625_v5 = vsel %vm1602_vm10, %v1592_v37, %v2728_v50  ;;  %v1626_v35 = vsel %vm1602_vm10, %v1593_v42, %v2729_v46 }
 0x146   : > { %v2734_v53 = vunpack.i.h.bf16 %v2732_v10  ;;  %v2733_v16 = vunpack.i.l.bf16 %v2732_v10  ;;  %v2737_v59 = vpop.permute.xlu1 %2736 }
 0x147   : > { %v2739_v6 = vunpack.i.h.bf16 %v2737_v59  ;;  %v2738_v29 = vunpack.i.l.bf16 %v2737_v59 }
 0x148   : > { %v1640_v33 = vsel %vm1635_vm11, %v1607_v23, %v2733_v16  ;;  %v1641_v17 = vsel %vm1635_vm11, %v1608_v34, %v2734_v53 }
 0x149   : > { %v1670_v36 = vpack.c.bf16 %v1641_v17, %v1640_v33  ;;  %v2742_v28 = vpop.permute.xlu0 %2741  ;;  %v1656_v31 = vsel %vm1635_vm11, %v1623_v12, %v2738_v29  ;;  %v1657_v25 = vsel %vm1635_vm11, %v1624_v61, %v2739_v6 }
 0x14a   : > { %v2744_v32 = vunpack.i.h.bf16 %v2742_v28  ;;  %v2743_v22 = vunpack.i.l.bf16 %v2742_v28  ;;  %v1678_v8 = vpack.c.bf16 %v1657_v25, %v1656_v31  ;;  %v2747_v56 = vpop.permute.xlu1 %2746 }
 0x14b   : > { %2257 = vmatprep.mubr.msk.bf16.mxu0 %vm1704_vm12, %v1670_v36  ;;  %v2749_v2 = vunpack.i.h.bf16 %v2747_v56  ;;  %v2748_v41 = vunpack.i.l.bf16 %v2747_v56 }
 0x14c   : > { %v1642_v52 = vsel %vm1635_vm11, %v1609_v40, %v2743_v22  ;;  %v1643_v58 = vsel %vm1635_vm11, %v1610_v38, %v2744_v32  ;;  %2273 = vmatprep.mubr.msk.bf16.mxu1 %vm1704_vm12, %v1678_v8 }
 0x14d   : > { %v1671_v30 = vpack.c.bf16 %v1643_v58, %v1642_v52  ;;  %v2752_v21 = vpop.permute.xlu0 %2751  ;;  %v1658_v44 = vsel %vm1635_vm11, %v1625_v5, %v2748_v41  ;;  %v1659_v3 = vsel %vm1635_vm11, %v1626_v35, %v2749_v2 }
 0x14e   : > { %v1679_v57 = vpack.c.bf16 %v1659_v3, %v1658_v44  ;;  %v2757_v43 = vpop.permute.xlu1 %2756  ;;  %v2754_v62 = vunpack.i.h.bf16 %v2752_v21  ;;  %v2753_v11 = vunpack.i.l.bf16 %v2752_v21 }
 0x14f   : > { %2258 = vmatmul.mubr.msk.bf16.gmra.mrb[4].mxu0 %vm1704_vm12, %v1671_v30  ;;  %v2759_v27 = vunpack.i.h.bf16 %v2757_v43  ;;  %v2758_v13 = vunpack.i.l.bf16 %v2757_v43 }
 0x150   : > { %2274 = vmatmul.mubr.msk.bf16.gmra.mrb[4].mxu1 %vm1704_vm12, %v1679_v57  ;;  %v1512_v39 = vsel %vm1503_vm7, %v3795_v4, %v2753_v11  ;;  %v1513_v59 = vsel %vm1503_vm7, %v3798_v26, %v2754_v62 }
 0x151   : > { %v2762_v0 = vpop.permute.xlu0 %2761  ;;  %v1528_v33 = vsel %vm1503_vm7, %v3873_v54, %v2758_v13  ;;  %v1529_v17 = vsel %vm1503_vm7, %v3876_v51, %v2759_v27 }
 0x152   : > { %v2767_v19 = vpop.permute.xlu1 %2766  ;;  %v2764_v10 = vunpack.i.h.bf16 %v2762_v0  ;;  %v2763_v37 = vunpack.i.l.bf16 %v2762_v0 }
 0x153   : > { %v2769_v53 = vunpack.i.h.bf16 %v2767_v19  ;;  %v2768_v16 = vunpack.i.l.bf16 %v2767_v19 }
 0x154   : > { %v1515_v6 = vsel %vm1503_vm7, %v3810_v7, %v2764_v10  ;;  %v1514_v29 = vsel %vm1503_vm7, %v3807_v1, %v2763_v37 }
 0x155   : > { %v2772_v24 = vpop.permute.xlu0 %2771  ;;  %v1530_v4 = vsel %vm1503_vm7, %v3883_v18, %v2768_v16  ;;  %v1531_v26 = vsel %vm1503_vm7, %v3886_v20, %v2769_v53 }
 0x156   : > { %v2777_v49 = vpop.permute.xlu1 %2776  ;;  %v2774_v34 = vunpack.i.h.bf16 %v2772_v24  ;;  %v2773_v12 = vunpack.i.l.bf16 %v2772_v24 }
 0x157   : > { %v2779_v61 = vunpack.i.h.bf16 %v2777_v49  ;;  %v2778_v46 = vunpack.i.l.bf16 %v2777_v49 }
 0x158   : > { %v1545_v28 = vsel %vm1536_vm8, %v1512_v39, %v2773_v12  ;;  %v1546_v51 = vsel %vm1536_vm8, %v1513_v59, %v2774_v34 }
 0x159   : > { %v2782_v47 = vpop.permute.xlu0 %2781  ;;  %v1561_v40 = vsel %vm1536_vm8, %v1528_v33, %v2778_v46  ;;  %v1562_v18 = vsel %vm1536_vm8, %v1529_v17, %v2779_v61 }
 0x15a   : > { %v2787_v63 = vpop.permute.xlu1 %2786  ;;  %v2784_v36 = vunpack.i.h.bf16 %v2782_v47  ;;  %v2783_v54 = vunpack.i.l.bf16 %v2782_v47 }
 0x15b   : > { %v2789_v31 = vunpack.i.h.bf16 %v2787_v63  ;;  %v2788_v7 = vunpack.i.l.bf16 %v2787_v63 }
 0x15c   : > { %v1547_v56 = vsel %vm1536_vm8, %v1514_v29, %v2783_v54  ;;  %v1548_v52 = vsel %vm1536_vm8, %v1515_v6, %v2784_v36 }
 0x15d   : > { %v2792_v55 = vpop.permute.xlu0 %2791  ;;  %v1563_v41 = vsel %vm1536_vm8, %v1530_v4, %v2788_v7  ;;  %v1564_v5 = vsel %vm1536_vm8, %v1531_v26, %v2789_v31 }
 0x15e   : > { %v2797_v60 = vpop.permute.xlu1 %2796  ;;  %v2794_v32 = vunpack.i.h.bf16 %v2792_v55  ;;  %v2793_v1 = vunpack.i.l.bf16 %v2792_v55 }
 0x15f   : > { %v2799_v22 = vunpack.i.h.bf16 %v2797_v60  ;;  %v2798_v42 = vunpack.i.l.bf16 %v2797_v60 }
 0x160   : > { %v1578_v44 = vsel %vm1569_vm9, %v1545_v28, %v2793_v1  ;;  %v1579_v3 = vsel %vm1569_vm9, %v1546_v51, %v2794_v32 }
 0x161   : > { %v2802_v23 = vpop.permute.xlu0 %2801  ;;  %v1594_v57 = vsel %vm1569_vm9, %v1561_v40, %v2798_v42  ;;  %v1595_v43 = vsel %vm1569_vm9, %v1562_v18, %v2799_v22 }
 0x162   : > { %v4239_v45 = vpop.permute.xlu1 %2806  ;;  %v2804_v38 = vunpack.i.h.bf16 %v2802_v23  ;;  %v2803_v8 = vunpack.i.l.bf16 %v2802_v23 }
 0x163   : > { %v2808_v58 = vunpack.i.l.bf16 %v4239_v45  ;;  %v2809_v24 = vunpack.i.h.bf16 %v4239_v45 }
 0x164   : > { %v1580_v0 = vsel %vm1569_vm9, %v1547_v56, %v2803_v8  ;;  %v1581_v19 = vsel %vm1569_vm9, %v1548_v52, %v2804_v38 }
 0x165   : > { %v2812_v50 = vpop.permute.xlu0 %2811  ;;  %v1596_v63 = vsel %vm1569_vm9, %v1563_v41, %v2808_v58  ;;  %v1597_v46 = vsel %vm1569_vm9, %v1564_v5, %v2809_v24 }
 0x166   : > { %v2817_v25 = vpop.permute.xlu1 %2816  ;;  %v2813_v2 = vunpack.i.l.bf16 %v2812_v50  ;;  %v2814_v35 = vunpack.i.h.bf16 %v2812_v50 }
 0x167   : > { %v2818_v30 = vunpack.i.l.bf16 %v2817_v25  ;;  %v2819_v49 = vunpack.i.h.bf16 %v2817_v25 }
 0x168   : > { %v1611_v55 = vsel %vm1602_vm10, %v1578_v44, %v2813_v2  ;;  %v1612_v11 = vsel %vm1602_vm10, %v1579_v3, %v2814_v35 }
 0x169   : > { %v2822_v20 = vpop.permute.xlu0 %2821  ;;  %v1627_v27 = vsel %vm1602_vm10, %v1594_v57, %v2818_v30  ;;  %v1628_v12 = vsel %vm1602_vm10, %v1595_v43, %v2819_v49 }
 0x16a   : > { %v2827_v21 = vpop.permute.xlu1 %2826  ;;  %v2824_v13 = vunpack.i.h.bf16 %v2822_v20  ;;  %v2823_v10 = vunpack.i.l.bf16 %v2822_v20 }
 0x16b   : > { %v2829_v45 = vunpack.i.h.bf16 %v2827_v21  ;;  %v2828_v39 = vunpack.i.l.bf16 %v2827_v21 }
 0x16c   : > { %v1613_v50 = vsel %vm1602_vm10, %v1580_v0, %v2823_v10  ;;  %v1614_v4 = vsel %vm1602_vm10, %v1581_v19, %v2824_v13 }
 0x16d   : > { %v2832_v47 = vpop.permute.xlu0 %2831  ;;  %v1629_v7 = vsel %vm1602_vm10, %v1596_v63, %v2828_v39  ;;  %v1630_v25 = vsel %vm1602_vm10, %v1597_v46, %v2829_v45 }
 0x16e   : > { %v2834_v60 = vunpack.i.h.bf16 %v2832_v47  ;;  %v2833_v62 = vunpack.i.l.bf16 %v2832_v47  ;;  %v2837_v37 = vpop.permute.xlu1 %2836 }
 0x16f   : > { %v2839_v16 = vunpack.i.h.bf16 %v2837_v37  ;;  %v2838_v34 = vunpack.i.l.bf16 %v2837_v37 }
 0x170   : > { %v1644_v23 = vsel %vm1635_vm11, %v1611_v55, %v2833_v62  ;;  %v1645_v53 = vsel %vm1635_vm11, %v1612_v11, %v2834_v60  ;;  %v4673_v62 = vld [vmem:[#allocation33_spill] sm:$0xff] }
 0x171   : > { %v1672_v59 = vpack.c.bf16 %v1645_v53, %v1644_v23  ;;  %v2842_v33 = vpop.permute.xlu0 %2841  ;;  %v1660_v17 = vsel %vm1635_vm11, %v1627_v27, %v2838_v34  ;;  %v1661_v6 = vsel %vm1635_vm11, %v1628_v12, %v2839_v16  ;;  %v4674_v27 = vld [vmem:[#allocation13_spill] sm:$0xff]  ;;  %v4675_v53 = vld [vmem:[#allocation14_spill] sm:$0xff] }
 0x172   : > { %v2844_v29 = vunpack.i.h.bf16 %v2842_v33  ;;  %v2843_v61 = vunpack.i.l.bf16 %v2842_v33  ;;  %v1680_v26 = vpack.c.bf16 %v1661_v6, %v1660_v17  ;;  %v2847_v36 = vpop.permute.xlu1 %2846  ;;  %v4676_v16 = vld [vmem:[#allocation34_spill] sm:$0xff] }
 0x173   : > { %2261 = vmatprep.mubr.msk.bf16.mxu0 %vm1704_vm12, %v1672_v59  ;;  %v2849_v51 = vunpack.i.h.bf16 %v2847_v36  ;;  %v2848_v31 = vunpack.i.l.bf16 %v2847_v36 }
 0x174   : > { %v1646_v54 = vsel %vm1635_vm11, %v1613_v50, %v2843_v61  ;;  %v1647_v28 = vsel %vm1635_vm11, %v1614_v4, %v2844_v29  ;;  %2277 = vmatprep.mubr.msk.bf16.mxu1 %vm1704_vm12, %v1680_v26 }
 0x175   : > { %v1673_v32 = vpack.c.bf16 %v1647_v28, %v1646_v54  ;;  %v2852_v1 = vpop.permute.xlu0 %2851  ;;  %v1662_v22 = vsel %vm1635_vm11, %v1629_v7, %v2848_v31  ;;  %v1663_v42 = vsel %vm1635_vm11, %v1630_v25, %v2849_v51 }
 0x176   : > { %v1681_v40 = vpack.c.bf16 %v1663_v42, %v1662_v22  ;;  %v2857_v18 = vpop.permute.xlu1 %2856  ;;  %v2854_v5 = vunpack.i.h.bf16 %v2852_v1  ;;  %v2853_v35 = vunpack.i.l.bf16 %v2852_v1 }
 0x177   : > { %2262 = vmatmul.mubr.msk.bf16.gmra.mrb[8].mxu0 %vm1704_vm12, %v1673_v32  ;;  %v2859_v30 = vunpack.i.h.bf16 %v2857_v18  ;;  %v2858_v21 = vunpack.i.l.bf16 %v2857_v18 }
 0x178   : > { %2278 = vmatmul.mubr.msk.bf16.gmra.mrb[8].mxu1 %vm1704_vm12, %v1681_v40  ;;  %v1516_v47 = vsel %vm1503_vm7, %v3821_v15, %v2853_v35  ;;  %v1517_v63 = vsel %vm1503_vm7, %v3824_v48, %v2854_v5 }
 0x179   : > { %v2862_v38 = vpop.permute.xlu0 %2861  ;;  %v1532_v55 = vsel %vm1503_vm7, %v3892_v9, %v2858_v21  ;;  %v1533_v60 = vsel %vm1503_vm7, %v3896_v14, %v2859_v30 }
 0x17a   : > { %v2867_v8 = vpop.permute.xlu1 %2866  ;;  %v2864_v44 = vunpack.i.h.bf16 %v2862_v38  ;;  %v2863_v3 = vunpack.i.l.bf16 %v2862_v38 }
 0x17b   : > { %v2869_v43 = vunpack.i.h.bf16 %v2867_v8  ;;  %v2868_v0 = vunpack.i.l.bf16 %v2867_v8 }
 0x17c   : > { %v1519_v11 = vsel %vm1503_vm7, %v4673_v62, %v2864_v44  ;;  %v1518_v13 = vsel %vm1503_vm7, %v4674_v27, %v2863_v3 }
 0x17d   : > { %v2872_v20 = vpop.permute.xlu0 %2871  ;;  %v1534_v15 = vsel %vm1503_vm7, %v4675_v53, %v2868_v0  ;;  %v1535_v48 = vsel %vm1503_vm7, %v4676_v16, %v2869_v43 }
 0x17e   : > { %v2877_v56 = vpop.permute.xlu1 %2876  ;;  %v2874_v19 = vunpack.i.h.bf16 %v2872_v20  ;;  %v2873_v24 = vunpack.i.l.bf16 %v2872_v20 }
 0x17f   : > { %v2879_v10 = vunpack.i.h.bf16 %v2877_v56  ;;  %v2878_v37 = vunpack.i.l.bf16 %v2877_v56 }
 0x180   : > { %v1549_v12 = vsel %vm1536_vm8, %v1516_v47, %v2873_v24  ;;  %v1550_v14 = vsel %vm1536_vm8, %v1517_v63, %v2874_v19 }
 0x181   : > { %v2882_v52 = vpop.permute.xlu0 %2881  ;;  %v1565_v61 = vsel %vm1536_vm8, %v1532_v55, %v2878_v37  ;;  %v1566_v46 = vsel %vm1536_vm8, %v1533_v60, %v2879_v10 }
 0x182   : > { %v2887_v58 = vpop.permute.xlu1 %2886  ;;  %v2884_v34 = vunpack.i.h.bf16 %v2882_v52  ;;  %v2883_v9 = vunpack.i.l.bf16 %v2882_v52 }
 0x183   : > { %v2889_v45 = vunpack.i.h.bf16 %v2887_v58  ;;  %v2888_v39 = vunpack.i.l.bf16 %v2887_v58 }
 0x184   : > { %v1551_v36 = vsel %vm1536_vm8, %v1518_v13, %v2883_v9  ;;  %v1552_v54 = vsel %vm1536_vm8, %v1519_v11, %v2884_v34 }
 0x185   : > { %v2892_v2 = vpop.permute.xlu0 %2891  ;;  %v1567_v31 = vsel %vm1536_vm8, %v1534_v15, %v2888_v39  ;;  %v1568_v7 = vsel %vm1536_vm8, %v1535_v48, %v2889_v45 }
 0x186   : > { %v2897_v41 = vpop.permute.xlu1 %2896  ;;  %v2894_v33 = vunpack.i.h.bf16 %v2892_v2  ;;  %v2893_v17 = vunpack.i.l.bf16 %v2892_v2 }
 0x187   : > { %v2899_v6 = vunpack.i.h.bf16 %v2897_v41  ;;  %v2898_v29 = vunpack.i.l.bf16 %v2897_v41 }
 0x188   : > { %v1582_v22 = vsel %vm1569_vm9, %v1549_v12, %v2893_v17  ;;  %v1583_v42 = vsel %vm1569_vm9, %v1550_v14, %v2894_v33  ;;  %v4354_v33 = vld [vmem:[%s4500_s2] ss:$0 sm:$0xff] }
 0x189   : > { %v2902_v57 = vpop.permute.xlu0 %2901  ;;  %v1598_v40 = vsel %vm1569_vm9, %v1565_v61, %v2898_v29  ;;  %v1599_v18 = vsel %vm1569_vm9, %v1566_v46, %v2899_v6  ;;  %v4359_v6 = vld [vmem:[%s4501_s3] ss:$0 sm:$0xff] }
 0x18a   : > { %v4295_v49 = vpop.permute.xlu1 %2906  ;;  %v2904_v50 = vunpack.i.h.bf16 %v2902_v57  ;;  %v2903_v4 = vunpack.i.l.bf16 %v2902_v57 }
 0x18b   : > { %v2908_v28 = vunpack.i.l.bf16 %v4295_v49  ;;  %v2909_v20 = vunpack.i.h.bf16 %v4295_v49 }
 0x18c   : > { %v1584_v38 = vsel %vm1569_vm9, %v1551_v36, %v2903_v4  ;;  %v1585_v8 = vsel %vm1569_vm9, %v1552_v54, %v2904_v50 }
 0x18d   : > { %v2912_v23 = vpop.permute.xlu0 %2911  ;;  %v1600_v58 = vsel %vm1569_vm9, %v1567_v31, %v2908_v28  ;;  %v1601_v13 = vsel %vm1569_vm9, %v1568_v7, %v2909_v20 }
 0x18e   : > { %v2917_v59 = vpop.permute.xlu1 %2916  ;;  %v2913_v51 = vunpack.i.l.bf16 %v2912_v23  ;;  %v2914_v25 = vunpack.i.h.bf16 %v2912_v23 }
 0x18f   : > { %v2918_v32 = vunpack.i.l.bf16 %v2917_v59  ;;  %v2919_v56 = vunpack.i.h.bf16 %v2917_v59 }
 0x190   : > { %v1615_v2 = vsel %vm1602_vm10, %v1582_v22, %v2913_v51  ;;  %v1616_v35 = vsel %vm1602_vm10, %v1583_v42, %v2914_v25 }
 0x191   : > { %v2922_v26 = vpop.permute.xlu0 %2921  ;;  %v1631_v30 = vsel %vm1602_vm10, %v1598_v40, %v2918_v32  ;;  %v1632_v24 = vsel %vm1602_vm10, %v1599_v18, %v2919_v56 }
 0x192   : > { %v2927_v1 = vpop.permute.xlu1 %2926  ;;  %v2924_v21 = vunpack.i.h.bf16 %v2922_v26  ;;  %v2923_v44 = vunpack.i.l.bf16 %v2922_v26 }
 0x193   : > { %v2929_v49 = vunpack.i.h.bf16 %v2927_v1  ;;  %v2928_v47 = vunpack.i.l.bf16 %v2927_v1 }
 0x194   : > { %v1617_v10 = vsel %vm1602_vm10, %v1584_v38, %v2923_v44  ;;  %v1618_v37 = vsel %vm1602_vm10, %v1585_v8, %v2924_v21 }
 0x195   : > { %v2932_v52 = vpop.permute.xlu0 %2931  ;;  %v1633_v9 = vsel %vm1602_vm10, %v1600_v58, %v2928_v47  ;;  %v1634_v12 = vsel %vm1602_vm10, %v1601_v13, %v2929_v49 }
 0x196   : > { %v2934_v41 = vunpack.i.h.bf16 %v2932_v52  ;;  %v2933_v5 = vunpack.i.l.bf16 %v2932_v52  ;;  %v2937_v3 = vpop.permute.xlu1 %2936 }
 0x197   : > { %v2939_v0 = vunpack.i.h.bf16 %v2937_v3  ;;  %v2938_v19 = vunpack.i.l.bf16 %v2937_v3 }
 0x198   : > { %v1648_v57 = vsel %vm1635_vm11, %v1615_v2, %v2933_v5  ;;  %v1649_v43 = vsel %vm1635_vm11, %v1616_v35, %v2934_v41 }
 0x199   : > { %v1674_v63 = vpack.c.bf16 %v1649_v43, %v1648_v57  ;;  %v2942_v55 = vpop.permute.xlu0 %2941  ;;  %v1664_v60 = vsel %vm1635_vm11, %v1631_v30, %v2938_v19  ;;  %v1665_v62 = vsel %vm1635_vm11, %v1632_v24, %v2939_v0 }
 0x19a   : > { %v2944_v11 = vunpack.i.h.bf16 %v2942_v55  ;;  %v2943_v27 = vunpack.i.l.bf16 %v2942_v55  ;;  %v1682_v23 = vpack.c.bf16 %v1665_v62, %v1664_v60  ;;  %v2947_v53 = vpop.permute.xlu1 %2946 }
 0x19b   : > { %2265 = vmatprep.mubr.msk.bf16.mxu0 %vm1704_vm12, %v1674_v63  ;;  %v2949_v48 = vunpack.i.h.bf16 %v2947_v53  ;;  %v2948_v34 = vunpack.i.l.bf16 %v2947_v53 }
 0x19c   : > { %v1650_v15 = vsel %vm1635_vm11, %v1617_v10, %v2943_v27  ;;  %v1651_v16 = vsel %vm1635_vm11, %v1618_v37, %v2944_v11  ;;  %2281 = vmatprep.mubr.msk.bf16.mxu1 %vm1704_vm12, %v1682_v23 }
 0x19d   : > { %v1675_v14 = vpack.c.bf16 %v1651_v16, %v1650_v15  ;;  %v1666_v45 = vsel %vm1635_vm11, %v1633_v9, %v2948_v34  ;;  %v1667_v39 = vsel %vm1635_vm11, %v1634_v12, %v2949_v48 }
 0x19e   : > { %v1683_v59 = vpack.c.bf16 %v1667_v39, %v1666_v45 }
 0x19f   : > { %2266 = vmatmul.mubr.msk.bf16.gmra.mrb[12].mxu0 %vm1704_vm12, %v1675_v14 }
 0x1a0   : > { %2282 = vmatmul.mubr.msk.bf16.gmra.mrb[12].mxu1 %vm1704_vm12, %v1683_v59 }
 0x1fb   : > { %v2255_v17 = vpop.f32.mrb[0].mxu0 }
 0x1fc   : > { %v1927_v29 = vmul.f32 %v2255_v17, %v4354_v33  ;;  %v1791_v61 = vpop.f32.mrb[1].mxu0 }
 0x1fd   : > { %v1925_v50 = vmul.f32 %v4354_v33, %v1791_v61  ;;  %v2256_v4 = vpop.f32.mrb[2].mxu0 }
 0x1fe   : > { %v2271_v46 = vpop.f32.mrb[0].mxu1  ;;  %v1966_v26 = vadd.f32 %v4359_v6, %v1927_v29  ;;  %v1928_v28 = vmul.f32 %v2256_v4, %v4354_v33  ;;  %v1794_v51 = vpop.f32.mrb[3].mxu0 }
 0x1ff   : > { %v1943_v36 = vmul.f32 %v2271_v46, %v4354_v33  ;;  %v1855_v54 = vpop.f32.mrb[1].mxu1  ;;  %v1964_v31 = vadd.f32 %v4359_v6, %v1925_v50  ;;  %v1926_v32 = vmul.f32 %v4354_v33, %v1794_v51 }
 0x200   : > { %v1941_v7 = vmul.f32 %v4354_v33, %v1855_v54  ;;  %v2272_v25 = vpop.f32.mrb[2].mxu1  ;;  %v1998_v1 = vmax.f32 %v1966_v26, 0.0  ;;  %v1967_v42 = vadd.f32 %v4359_v6, %v1928_v28 }
 0x201   : > { %v1982_v22 = vadd.f32 %v4359_v6, %v1943_v36  ;;  %v1944_v40 = vmul.f32 %v2272_v25, %v4354_v33  ;;  %v1858_v18 = vpop.f32.mrb[3].mxu1  ;;  %v1996_v38 = vmax.f32 %v1964_v31, 0.0  ;;  %v1965_v20 = vadd.f32 %v4359_v6, %v1926_v32 }
 0x202   : > { %v1980_v8 = vadd.f32 %v4359_v6, %v1941_v7  ;;  %v1942_v56 = vmul.f32 %v4354_v33, %v1858_v18  ;;  %2030 = vst.msk [vmem:[%s4370_s18 + $0x10] sm:$0xff] %vm1404_vm4, %v1998_v1  ;;  %v1999_v58 = vmax.f32 %v1967_v42, 0.0 }
 0x203   : > { %v2014_v52 = vmax.f32 %v1982_v22, 0.0  ;;  %v1983_v2 = vadd.f32 %v4359_v6, %v1944_v40  ;;  %2028 = vst.msk [vmem:[%s4370_s18] sm:$0xff] %vm1404_vm4, %v1996_v38  ;;  %v1997_v5 = vmax.f32 %v1965_v20, 0.0 }
 0x204   : > { %v2012_v41 = vmax.f32 %v1980_v8, 0.0  ;;  %v1981_v35 = vadd.f32 %v4359_v6, %v1942_v56  ;;  %2031 = vst.msk [vmem:[%s4370_s18 + $0x18] sm:$0xff] %vm1404_vm4, %v1999_v58 }
 0x205   : > { %2046 = vst.msk [vmem:[%s4370_s18 + $0x90] sm:$0xff] %vm1404_vm4, %v2014_v52  ;;  %v2015_v30 = vmax.f32 %v1983_v2, 0.0  ;;  %2029 = vst.msk [vmem:[%s4370_s18 + $0x8] sm:$0xff] %vm1404_vm4, %v1997_v5 }
 0x206   : > { %2044 = vst.msk [vmem:[%s4370_s18 + $0x80] sm:$0xff] %vm1404_vm4, %v2012_v41  ;;  %v2013_v21 = vmax.f32 %v1981_v35, 0.0 }
 0x207   : > { %2047 = vst.msk [vmem:[%s4370_s18 + $0x98] sm:$0xff] %vm1404_vm4, %v2015_v30 }
 0x208   : > { %2045 = vst.msk [vmem:[%s4370_s18 + $0x88] sm:$0xff] %vm1404_vm4, %v2013_v21 }
 0x222   : > { %v2259_v44 = vpop.f32.mrb[4].mxu0 }
 0x223   : > { %v1931_v3 = vmul.f32 %v2259_v44, %v4354_v33  ;;  %v1807_v57 = vpop.f32.mrb[5].mxu0  ;;  %v2275_v19 = vpop.f32.mrb[4].mxu1 }
 0x224   : > { %v1929_v43 = vmul.f32 %v4354_v33, %v1807_v57  ;;  %v2260_v0 = vpop.f32.mrb[6].mxu0  ;;  %v1947_v63 = vmul.f32 %v2275_v19, %v4354_v33  ;;  %v1871_v55 = vpop.f32.mrb[5].mxu1 }
 0x225   : > { %v1970_v24 = vadd.f32 %v4359_v6, %v1931_v3  ;;  %v1932_v49 = vmul.f32 %v2260_v0, %v4354_v33  ;;  %v1810_v47 = vpop.f32.mrb[7].mxu0  ;;  %v1945_v11 = vmul.f32 %v4354_v33, %v1871_v55  ;;  %v2276_v27 = vpop.f32.mrb[6].mxu1 }
 0x226   : > { %v1968_v60 = vadd.f32 %v4359_v6, %v1929_v43  ;;  %v1930_v62 = vmul.f32 %v4354_v33, %v1810_v47  ;;  %v1986_v37 = vadd.f32 %v4359_v6, %v1947_v63  ;;  %v1948_v23 = vmul.f32 %v2276_v27, %v4354_v33  ;;  %v1874_v53 = vpop.f32.mrb[7].mxu1 }
 0x227   : > { %v2002_v13 = vmax.f32 %v1970_v24, 0.0  ;;  %v1971_v10 = vadd.f32 %v4359_v6, %v1932_v49  ;;  %v1984_v48 = vadd.f32 %v4359_v6, %v1945_v11  ;;  %v1946_v34 = vmul.f32 %v4354_v33, %v1874_v53 }
 0x228   : > { %v2000_v15 = vmax.f32 %v1968_v60, 0.0  ;;  %v1969_v16 = vadd.f32 %v4359_v6, %v1930_v62  ;;  %v2018_v12 = vmax.f32 %v1986_v37, 0.0  ;;  %v1987_v14 = vadd.f32 %v4359_v6, %v1948_v23 }
 0x229   : > { %2034 = vst.msk [vmem:[%s4370_s18 + $0x30] sm:$0xff] %vm1404_vm4, %v2002_v13  ;;  %v2003_v9 = vmax.f32 %v1971_v10, 0.0  ;;  %v2016_v39 = vmax.f32 %v1984_v48, 0.0  ;;  %v1985_v59 = vadd.f32 %v4359_v6, %v1946_v34 }
 0x22a   : > { %2032 = vst.msk [vmem:[%s4370_s18 + $0x20] sm:$0xff] %vm1404_vm4, %v2000_v15  ;;  %v2001_v45 = vmax.f32 %v1969_v16, 0.0  ;;  %2050 = vst.msk [vmem:[%s4370_s18 + $0xb0] sm:$0xff] %vm1404_vm4, %v2018_v12  ;;  %v2019_v17 = vmax.f32 %v1987_v14, 0.0 }
 0x22b   : > { %2035 = vst.msk [vmem:[%s4370_s18 + $0x38] sm:$0xff] %vm1404_vm4, %v2003_v9  ;;  %2048 = vst.msk [vmem:[%s4370_s18 + $0xa0] sm:$0xff] %vm1404_vm4, %v2016_v39  ;;  %v2017_v29 = vmax.f32 %v1985_v59, 0.0 }
 0x22c   : > { %2033 = vst.msk [vmem:[%s4370_s18 + $0x28] sm:$0xff] %vm1404_vm4, %v2001_v45  ;;  %2051 = vst.msk [vmem:[%s4370_s18 + $0xb8] sm:$0xff] %vm1404_vm4, %v2019_v17 }
 0x22d   : > { %2049 = vst.msk [vmem:[%s4370_s18 + $0xa8] sm:$0xff] %vm1404_vm4, %v2017_v29 }
 0x24a   : > { %v2263_v61 = vpop.f32.mrb[8].mxu0 }
 0x24b   : > { %v1935_v46 = vmul.f32 %v2263_v61, %v4354_v33  ;;  %v1823_v50 = vpop.f32.mrb[9].mxu0  ;;  %v2279_v36 = vpop.f32.mrb[8].mxu1 }
 0x24c   : > { %v1933_v4 = vmul.f32 %v4354_v33, %v1823_v50  ;;  %v2264_v26 = vpop.f32.mrb[10].mxu0  ;;  %v1951_v31 = vmul.f32 %v2279_v36, %v4354_v33  ;;  %v1887_v7 = vpop.f32.mrb[9].mxu1 }
 0x24d   : > { %v1974_v54 = vadd.f32 %v4359_v6, %v1935_v46  ;;  %v1936_v28 = vmul.f32 %v2264_v26, %v4354_v33  ;;  %v1826_v51 = vpop.f32.mrb[11].mxu0  ;;  %v1949_v1 = vmul.f32 %v4354_v33, %v1887_v7  ;;  %v2280_v22 = vpop.f32.mrb[10].mxu1 }
 0x24e   : > { %v1972_v25 = vadd.f32 %v4359_v6, %v1933_v4  ;;  %v1934_v32 = vmul.f32 %v4354_v33, %v1826_v51  ;;  %v1990_v18 = vadd.f32 %v4359_v6, %v1951_v31  ;;  %v1952_v38 = vmul.f32 %v2280_v22, %v4354_v33  ;;  %v1890_v8 = vpop.f32.mrb[11].mxu1 }
 0x24f   : > { %v2006_v42 = vmax.f32 %v1974_v54, 0.0  ;;  %v1975_v40 = vadd.f32 %v4359_v6, %v1936_v28  ;;  %v1988_v52 = vadd.f32 %v4359_v6, %v1949_v1  ;;  %v1950_v58 = vmul.f32 %v4354_v33, %v1890_v8 }
 0x250   : > { %v2004_v20 = vmax.f32 %v1972_v25, 0.0  ;;  %v1973_v56 = vadd.f32 %v4359_v6, %v1934_v32  ;;  %v2022_v41 = vmax.f32 %v1990_v18, 0.0  ;;  %v1991_v5 = vadd.f32 %v4359_v6, %v1952_v38 }
 0x251   : > { %2038 = vst.msk [vmem:[%s4370_s18 + $0x50] sm:$0xff] %vm1404_vm4, %v2006_v42  ;;  %v2007_v2 = vmax.f32 %v1975_v40, 0.0  ;;  %v2020_v30 = vmax.f32 %v1988_v52, 0.0  ;;  %v1989_v21 = vadd.f32 %v4359_v6, %v1950_v58 }
 0x252   : > { %2036 = vst.msk [vmem:[%s4370_s18 + $0x40] sm:$0xff] %vm1404_vm4, %v2004_v20  ;;  %v2005_v35 = vmax.f32 %v1973_v56, 0.0  ;;  %2054 = vst.msk [vmem:[%s4370_s18 + $0xd0] sm:$0xff] %vm1404_vm4, %v2022_v41  ;;  %v2023_v44 = vmax.f32 %v1991_v5, 0.0 }
 0x253   : > { %2039 = vst.msk [vmem:[%s4370_s18 + $0x58] sm:$0xff] %vm1404_vm4, %v2007_v2  ;;  %2052 = vst.msk [vmem:[%s4370_s18 + $0xc0] sm:$0xff] %vm1404_vm4, %v2020_v30  ;;  %v2021_v3 = vmax.f32 %v1989_v21, 0.0 }
 0x254   : > { %2037 = vst.msk [vmem:[%s4370_s18 + $0x48] sm:$0xff] %vm1404_vm4, %v2005_v35  ;;  %2055 = vst.msk [vmem:[%s4370_s18 + $0xd8] sm:$0xff] %vm1404_vm4, %v2023_v44 }
 0x255   : > { %2053 = vst.msk [vmem:[%s4370_s18 + $0xc8] sm:$0xff] %vm1404_vm4, %v2021_v3 }
 0x272   : > { %v2267_v57 = vpop.f32.mrb[12].mxu0 }
 0x273   : > { %v1939_v43 = vmul.f32 %v2267_v57, %v4354_v33  ;;  %v1839_v0 = vpop.f32.mrb[13].mxu0  ;;  %v2283_v49 = vpop.f32.mrb[12].mxu1 }
 0x274   : > { %v1937_v19 = vmul.f32 %v4354_v33, %v1839_v0  ;;  %v2268_v24 = vpop.f32.mrb[14].mxu0  ;;  %v1955_v60 = vmul.f32 %v2283_v49, %v4354_v33  ;;  %v1903_v62 = vpop.f32.mrb[13].mxu1 }
 0x275   : > { %v1978_v47 = vadd.f32 %v4359_v6, %v1939_v43  ;;  %v1940_v63 = vmul.f32 %v2268_v24, %v4354_v33  ;;  %v1842_v55 = vpop.f32.mrb[15].mxu0  ;;  %v1953_v13 = vmul.f32 %v4354_v33, %v1903_v62  ;;  %v2284_v10 = vpop.f32.mrb[14].mxu1 }
 0x276   : > { %v1976_v11 = vadd.f32 %v4359_v6, %v1937_v19  ;;  %v1938_v27 = vmul.f32 %v4354_v33, %v1842_v55  ;;  %v1994_v53 = vadd.f32 %v4359_v6, %v1955_v60  ;;  %v1956_v15 = vmul.f32 %v2284_v10, %v4354_v33  ;;  %v1906_v16 = vpop.f32.mrb[15].mxu1 }
 0x277   : > { %v2010_v37 = vmax.f32 %v1978_v47, 0.0  ;;  %v1979_v23 = vadd.f32 %v4359_v6, %v1940_v63  ;;  %v1992_v9 = vadd.f32 %v4359_v6, %v1953_v13  ;;  %v1954_v12 = vmul.f32 %v4354_v33, %v1906_v16 }
 0x278   : > { %v2008_v48 = vmax.f32 %v1976_v11, 0.0  ;;  %v1977_v34 = vadd.f32 %v4359_v6, %v1938_v27  ;;  %v2026_v45 = vmax.f32 %v1994_v53, 0.0  ;;  %v1995_v39 = vadd.f32 %v4359_v6, %v1956_v15 }
 0x279   : > { %2042 = vst.msk [vmem:[%s4370_s18 + $0x70] sm:$0xff] %vm1404_vm4, %v2010_v37  ;;  %v2011_v14 = vmax.f32 %v1979_v23, 0.0  ;;  %v2024_v17 = vmax.f32 %v1992_v9, 0.0  ;;  %v1993_v29 = vadd.f32 %v4359_v6, %v1954_v12 }
 0x27a   : > { %2040 = vst.msk [vmem:[%s4370_s18 + $0x60] sm:$0xff] %vm1404_vm4, %v2008_v48  ;;  %v2009_v59 = vmax.f32 %v1977_v34, 0.0  ;;  %2058 = vst.msk [vmem:[%s4370_s18 + $0xf0] sm:$0xff] %vm1404_vm4, %v2026_v45  ;;  %v2027_v61 = vmax.f32 %v1995_v39, 0.0 }
 0x27b   : > { %2043 = vst.msk [vmem:[%s4370_s18 + $0x78] sm:$0xff] %vm1404_vm4, %v2011_v14  ;;  %2056 = vst.msk [vmem:[%s4370_s18 + $0xe0] sm:$0xff] %vm1404_vm4, %v2024_v17  ;;  %v2025_v33 = vmax.f32 %v1993_v29, 0.0 }
 0x27c   : > { %2041 = vst.msk [vmem:[%s4370_s18 + $0x68] sm:$0xff] %vm1404_vm4, %v2009_v59  ;;  %2059 = vst.msk [vmem:[%s4370_s18 + $0xf8] sm:$0xff] %vm1404_vm4, %v2027_v61 }
 0x27d   : > { %2057 = vst.msk [vmem:[%s4370_s18 + $0xe8] sm:$0xff] %vm1404_vm4, %v2025_v33 }
 0x27e PF: > { %s14_s15 = sadd.s32 1, %s2959_s15  }
 0x27f   : > { %p11_p4 = scmp.ge.s32.totalorder %s14_s15, 4  }
 0x281   :  { %13 = sbr.rel (!%p11_p4) target bundleno = 1 (0x1), region = 66 }

// kernel: br_corner_pooling_forward.3
= control target key start
LH: loop header
LB: loop body
LE: loop exit
PB: predicated region body
PF: predicated region fallthrough
CT: control target
= control target key end

     0   :  { %s4056_s15 = smov 0   ;;  %s6101_s0 = inlined_call_operand.vmem [shape: bf16[2,16,16,4], index: 0, kind: input, shape index: {}]   ;;  %s6102_s1 = inlined_call_operand.vmem [shape: bf16[36,256], index: 1, kind: input, shape index: {}]   ;;  %s6103_s2 = inlined_call_operand.vmem [shape: f32[1,256], index: 2, kind: input, shape index: {}]   ;;  %s6104_s3 = inlined_call_operand.vmem [shape: f32[1,256], index: 3, kind: input, shape index: {}]   ;;  %s6105_s4 = inlined_call_operand.vmem [shape: bf16[2,16,16,128], index: 4, kind: output, shape index: {}]  }
   0x1 LB: > { %s3067_s16 = sadd.s32 4294967295, %s4019_s15   ;;  %p3071_p0 = scmp.ge.s32.totalorder %s4019_s15, 1  ;;  %s4019_s15 = sphi %s4056_s15, %s14_s15  }
   0x2   : > { %p162_p1 = scmp.lt.s32.totalorder %s4019_s15, 3 }
   0x4   : > { %p163_p2 = pnand %p3071_p0, %p162_p1 }
   0x6   : > { %166 = sbr.rel (%p163_p2) target bundleno = 687 (0x2af), region = 36 }
   0xd   : > { %vm296_vm0 = vcmask 1040384   ;;  %p188_p3 = scmp.lt.s32.totalorder %s3067_s16, 1  ;;  %v4021_v0 = vmov 0.0   ;;  %vm462_vm1 = vcmask 1046528   ;;  %vm543_vm2 = vcmask 1045504   ;;  %s4022_s21 = smov 4  }
   0xe   : > { %v4064_v1 = vrot.slane %v4021_v0, 7  ;;  %s4023_s22 = smov 8   ;;  %s4024_s23 = smov 12   ;;  %vm1763_vm3 = vcmask 1041408   ;;  %vm1404_vm4 = vcmask 31744   ;;  %vm1437_vm5 = vcmask 64512  }
   0xf   : > { %s6350_s16 = smov (!%p188_p3, %s3067_s16), 1  ;;  %s4025_s6 = smov 16   ;;  %vm1470_vm6 = vcmask 97280   ;;  %vm1503_vm7 = vcmask 130048   ;;  %vm1536_vm8 = vcmask 162816   ;;  %vm1569_vm9 = vcmask 195584  }
  0x10   : > { %6192 = vst [vmem:[#allocation2_spill] sm:$0xff] %v4064_v1  ;;  %v4070_v2 = vsel %vm296_vm0, 0.0, %v4064_v1  ;;  %v413_v3 = vsel %vm296_vm0, %v4064_v1, 0.0  ;;  %v464_v4 = vrot.slane %v4064_v1, 1  ;;  %v545_v5 = vrot.slane %v4064_v1, 2  ;;  %s3133_s17 = sshll.u32 %s6350_s16, 7 }
  0x11   : > { %6193 = vst [vmem:[#allocation3_spill] sm:$0xff] %v4070_v2  ;;  %v463_v6 = vrot.slane %v4070_v2, 1  ;;  %v466_v7 = vrot.slane %v413_v3, 1  ;;  %v547_v8 = vrot.slane %v413_v3, 2  ;;  %v544_v9 = vrot.slane %v4070_v2, 2  ;;  %s4084_s20 = scalar_lea.vmem %s6101_s0, %s3133_s17  ;;  %s4026_s9 = smov 20  }
  0x12   : > { %v3311_v12 = vld [vmem:[%s4084_s20 + $0x8] sm:$0xff]   ;;  %v3168_v13 = vld [vmem:[%s4084_s20] sm:$0xff]   ;;  %v3312_v14 = vld [vmem:[%s4084_s20 + $0x10] sm:$0xff]   ;;  %s4028_s10 = smov 24   ;;  %s4029_s11 = smov 28   ;;  %vm1602_vm10 = vcmask 228352  }
  0x13   : > { %v465_v10 = vsel %vm462_vm1, %v463_v6, %v464_v4  ;;  %v467_v11 = vsel %vm462_vm1, %v464_v4, %v466_v7  ;;  %v4092_v15 = vsel %vm543_vm2, %v544_v9, %v545_v5  ;;  %v4095_v16 = vsel %vm543_vm2, %v545_v5, %v547_v8  ;;  %v3313_v20 = vld [vmem:[%s4084_s20 + $0x18] sm:$0xff]   ;;  %v3314_v49 = vld [vmem:[%s4084_s20 + $0x20] sm:$0xff]   ;;  %v3315_v62 = vld [vmem:[%s4084_s20 + $0x28] sm:$0xff]   ;;  %s4030_s12 = smov 32  }
  0x14   : > { %v4097_v17 = vpack.i.bf16 %v467_v11, %v465_v10  ;;  %v3173_v18 = vunpack.c.l.bf16 %v3311_v12  ;;  %v3174_v19 = vunpack.c.h.bf16 %v3311_v12  ;;  %v3169_v21 = vunpack.c.l.bf16 %v3168_v13  ;;  %v3316_v5 = vld [vmem:[%s4084_s20 + $0x30] sm:$0xff]  }
  0x15   : > { %v3170_v22 = vunpack.c.h.bf16 %v3168_v13  ;;  %v3177_v23 = vunpack.c.l.bf16 %v3312_v14  ;;  %v3178_v24 = vunpack.c.h.bf16 %v3312_v14  ;;  %v3181_v27 = vunpack.c.l.bf16 %v3313_v20  ;;  %v3324_v2 = vld [vmem:[%s4084_s20 + $0x70] sm:$0xff]  }
  0x16   : > { %6194 = vst [vmem:[#allocation4_spill] sm:$0xff] %v4097_v17  ;;  %3366 = vrot.lane.b32.xlu0 %v4097_v17, %s4022_s21  ;;  %v302_v25 = vrot.slane %v3173_v18, 7  ;;  %v303_v26 = vrot.slane %v3174_v19, 7  ;;  %v3182_v28 = vunpack.c.h.bf16 %v3313_v20  ;;  %v299_v29 = vrot.slane %v3169_v21, 7 }
  0x17   : > { %v300_v30 = vrot.slane %v3170_v22, 7  ;;  %v305_v31 = vrot.slane %v3177_v23, 7  ;;  %v306_v32 = vrot.slane %v3178_v24, 7  ;;  %v308_v36 = vrot.slane %v3181_v27, 7 }
  0x18   : > { %v4103_v33 = vsel %vm296_vm0, %v302_v25, %v303_v26  ;;  %v4106_v34 = vsel %vm296_vm0, 0.0, %v302_v25  ;;  %v4109_v35 = vsel %vm296_vm0, %v303_v26, 0.0  ;;  %v4119_v42 = vsel %vm296_vm0, 0.0, %v299_v29  ;;  %v3317_v25 = vld [vmem:[%s4084_s20 + $0x38] sm:$0xff]  }
  0x19   : > { %6195 = vst [vmem:[#allocation5_spill] sm:$0xff] %v4103_v33  ;;  %6196 = vst [vmem:[#allocation6_spill] sm:$0xff] %v4106_v34  ;;  %v473_v37 = vrot.slane %v4106_v34, 1  ;;  %v474_v38 = vrot.slane %v4103_v33, 1  ;;  %v476_v39 = vrot.slane %v4109_v35, 1  ;;  %v4116_v41 = vsel %vm296_vm0, %v299_v29, %v300_v30 }
  0x1a   : > { %v4122_v43 = vsel %vm296_vm0, %v300_v30, 0.0  ;;  %v4125_v44 = vsel %vm296_vm0, %v305_v31, %v306_v32  ;;  %v468_v47 = vrot.slane %v4119_v42, 1  ;;  %v469_v48 = vrot.slane %v4116_v41, 1 }
  0x1b   : > { %v475_v45 = vsel %vm462_vm1, %v473_v37, %v474_v38  ;;  %v477_v46 = vsel %vm462_vm1, %v474_v38, %v476_v39  ;;  %v471_v51 = vrot.slane %v4122_v43, 1  ;;  %v4136_v52 = vsel %vm296_vm0, 0.0, %v305_v31 }
  0x1c   : > { %v4132_v50 = vpack.i.bf16 %v477_v46, %v475_v45  ;;  %v4139_v53 = vsel %vm296_vm0, %v306_v32, 0.0  ;;  %v470_v54 = vsel %vm462_vm1, %v468_v47, %v469_v48  ;;  %v478_v55 = vrot.slane %v4136_v52, 1 }
  0x1d   : > { %v479_v56 = vrot.slane %v4125_v44, 1  ;;  %v481_v57 = vrot.slane %v4139_v53, 1  ;;  %v472_v58 = vsel %vm462_vm1, %v469_v48, %v471_v51  ;;  %v309_v59 = vrot.slane %v3182_v28, 7 }
  0x1e   : > { %3376 = vrot.lane.b32.xlu1 %v4132_v50, %s4022_s21  ;;  %v4149_v60 = vsel %vm296_vm0, 0.0, %v308_v36  ;;  %v3185_v61 = vunpack.c.l.bf16 %v3314_v49  ;;  %v4152_v63 = vpack.i.bf16 %v472_v58, %v470_v54  ;;  %v3186_v9 = vunpack.c.h.bf16 %v3314_v49 }
  0x1f   : > { %v480_v0 = vsel %vm462_vm1, %v478_v55, %v479_v56  ;;  %v482_v3 = vsel %vm462_vm1, %v479_v56, %v481_v57  ;;  %v483_v4 = vrot.slane %v4149_v60, 1  ;;  %v4161_v7 = vsel %vm296_vm0, %v308_v36, %v309_v59  ;;  %v3318_v57 = vld [vmem:[%s4084_s20 + $0x40] sm:$0xff]  }
  0x20   : > { %v4158_v6 = vpack.i.bf16 %v482_v3, %v480_v0  ;;  %v4164_v8 = vsel %vm296_vm0, %v309_v59, 0.0  ;;  %3371 = vrot.lane.b32.xlu0 %v4152_v63, %s4022_s21  ;;  %v484_v10 = vrot.slane %v4161_v7, 1  ;;  %v311_v12 = vrot.slane %v3185_v61, 7  ;;  %v3319_v0 = vld [vmem:[%s4084_s20 + $0x48] sm:$0xff]  }
  0x21   : > { %v486_v11 = vrot.slane %v4164_v8, 1  ;;  %v3189_v13 = vunpack.c.l.bf16 %v3315_v62  ;;  %v312_v14 = vrot.slane %v3186_v9, 7  ;;  %v3190_v18 = vunpack.c.h.bf16 %v3315_v62 }
  0x22   : > { %6197 = vst [vmem:[#allocation7_spill] sm:$0xff] %v4158_v6  ;;  %3381 = vrot.lane.b32.xlu1 %v4158_v6, %s4022_s21  ;;  %v3193_v19 = vunpack.c.l.bf16 %v3316_v5  ;;  %v3194_v20 = vunpack.c.h.bf16 %v3316_v5  ;;  %v485_v21 = vsel %vm462_vm1, %v483_v4, %v484_v10  ;;  %v4175_v23 = vsel %vm296_vm0, 0.0, %v311_v12 }
  0x23   : > { %v487_v22 = vsel %vm462_vm1, %v484_v10, %v486_v11  ;;  %v314_v24 = vrot.slane %v3189_v13, 7  ;;  %v4181_v27 = vsel %vm296_vm0, %v311_v12, %v312_v14  ;;  %v4184_v28 = vsel %vm296_vm0, %v312_v14, 0.0 }
  0x24   : > { %v4178_v26 = vpack.i.bf16 %v487_v22, %v485_v21  ;;  %v488_v29 = vrot.slane %v4175_v23, 1  ;;  %v489_v30 = vrot.slane %v4181_v27, 1  ;;  %v491_v31 = vrot.slane %v4184_v28, 1  ;;  %v3320_v21 = vld [vmem:[%s4084_s20 + $0x50] sm:$0xff]  }
  0x25   : > { %v315_v32 = vrot.slane %v3190_v18, 7  ;;  %v4190_v36 = vsel %vm296_vm0, 0.0, %v314_v24  ;;  %v317_v38 = vrot.slane %v3193_v19, 7  ;;  %v318_v39 = vrot.slane %v3194_v20, 7 }
  0x26   : > { %6198 = vst [vmem:[#allocation8_spill] sm:$0xff] %v4178_v26  ;;  %3386 = vrot.lane.b32.xlu0 %v4178_v26, %s4022_s21  ;;  %v493_v37 = vrot.slane %v4190_v36, 1  ;;  %v3197_v45 = vunpack.c.l.bf16 %v3317_v25  ;;  %v490_v46 = vsel %vm462_vm1, %v488_v29, %v489_v30  ;;  %v492_v47 = vsel %vm462_vm1, %v489_v30, %v491_v31 }
  0x27   : > { %v4198_v48 = vsel %vm296_vm0, %v314_v24, %v315_v32  ;;  %v4201_v49 = vsel %vm296_vm0, %v315_v32, 0.0  ;;  %v4203_v51 = vpack.i.bf16 %v492_v47, %v490_v46  ;;  %v4208_v56 = vsel %vm296_vm0, %v317_v38, %v318_v39 }
  0x28   : > { %v494_v54 = vrot.slane %v4198_v48, 1  ;;  %v496_v55 = vrot.slane %v4201_v49, 1  ;;  %v4212_v58 = vsel %vm296_vm0, 0.0, %v317_v38  ;;  %v4215_v59 = vsel %vm296_vm0, %v318_v39, 0.0 }
  0x29   : > { %6199 = vst [vmem:[#allocation9_spill] sm:$0xff] %v4203_v51  ;;  %v499_v61 = vrot.slane %v4208_v56, 1  ;;  %v3198_v62 = vunpack.c.h.bf16 %v3317_v25  ;;  %3391 = vrot.lane.b32.xlu1 %v4203_v51, %s4022_s21  ;;  %v498_v5 = vrot.slane %v4212_v58, 1  ;;  %v501_v9 = vrot.slane %v4215_v59, 1 }
  0x2a   : > { %v495_v3 = vsel %vm462_vm1, %v493_v37, %v494_v54  ;;  %v497_v4 = vsel %vm462_vm1, %v494_v54, %v496_v55  ;;  %v320_v11 = vrot.slane %v3197_v45, 7  ;;  %v3201_v13 = vunpack.c.l.bf16 %v3318_v57 }
  0x2b   : > { %v4225_v10 = vpack.i.bf16 %v497_v4, %v495_v3  ;;  %v321_v12 = vrot.slane %v3198_v62, 7  ;;  %v500_v14 = vsel %vm462_vm1, %v498_v5, %v499_v61  ;;  %v502_v18 = vsel %vm462_vm1, %v499_v61, %v501_v9  ;;  %v3321_v61 = vld [vmem:[%s4084_s20 + $0x58] sm:$0xff]  }
  0x2c   : > { %v3202_v19 = vunpack.c.h.bf16 %v3318_v57  ;;  %v3205_v20 = vunpack.c.l.bf16 %v3319_v0  ;;  %v4232_v22 = vpack.i.bf16 %v502_v18, %v500_v14  ;;  %v4238_v25 = vsel %vm296_vm0, 0.0, %v320_v11 }
  0x2d   : > { %6200 = vst [vmem:[#allocation10_spill] sm:$0xff] %v4225_v10  ;;  %3396 = vrot.lane.b32.xlu0 %v4225_v10, %s4022_s21  ;;  %v4235_v24 = vsel %vm296_vm0, %v320_v11, %v321_v12  ;;  %v4241_v29 = vsel %vm296_vm0, %v321_v12, 0.0  ;;  %v503_v30 = vrot.slane %v4238_v25, 1  ;;  %v323_v37 = vrot.slane %v3201_v13, 7 }
  0x2e   : > { %6201 = vst [vmem:[#allocation11_spill] sm:$0xff] %v4232_v22  ;;  %v504_v31 = vrot.slane %v4235_v24, 1  ;;  %v506_v32 = vrot.slane %v4241_v29, 1  ;;  %3401 = vrot.lane.b32.xlu1 %v4232_v22, %s4022_s21  ;;  %v324_v38 = vrot.slane %v3202_v19, 7  ;;  %v3206_v39 = vunpack.c.h.bf16 %v3319_v0 }
  0x2f   : > { %v326_v45 = vrot.slane %v3205_v20, 7  ;;  %v3209_v46 = vunpack.c.l.bf16 %v3320_v21  ;;  %v4251_v55 = vsel %vm296_vm0, 0.0, %v323_v37  ;;  %v3210_v57 = vunpack.c.h.bf16 %v3320_v21 }
  0x30   : > { %v505_v47 = vsel %vm462_vm1, %v503_v30, %v504_v31  ;;  %v507_v54 = vsel %vm462_vm1, %v504_v31, %v506_v32  ;;  %v4257_v3 = vsel %vm296_vm0, %v323_v37, %v324_v38  ;;  %v4260_v4 = vsel %vm296_vm0, %v324_v38, 0.0 }
  0x31   : > { %v4254_v62 = vpack.i.bf16 %v507_v54, %v505_v47  ;;  %v508_v0 = vrot.slane %v4251_v55, 1  ;;  %v509_v5 = vrot.slane %v4257_v3, 1  ;;  %v511_v9 = vrot.slane %v4260_v4, 1 }
  0x32   : > { %v327_v11 = vrot.slane %v3206_v39, 7  ;;  %v4266_v12 = vsel %vm296_vm0, 0.0, %v326_v45  ;;  %v329_v14 = vrot.slane %v3209_v46, 7  ;;  %v330_v18 = vrot.slane %v3210_v57, 7  ;;  %v3322_v46 = vld [vmem:[%s4084_s20 + $0x60] sm:$0xff]  }
  0x33   : > { %6202 = vst [vmem:[#allocation12_spill] sm:$0xff] %v4254_v62  ;;  %6203 = vst [vmem:[#allocation13_spill] sm:$0xff] %v4266_v12  ;;  %3406 = vrot.lane.b32.xlu0 %v4254_v62, %s4022_s21  ;;  %v513_v13 = vrot.slane %v4266_v12, 1  ;;  %v3213_v19 = vunpack.c.l.bf16 %v3321_v61  ;;  %v510_v20 = vsel %vm462_vm1, %v508_v0, %v509_v5  ;;  %v512_v21 = vsel %vm462_vm1, %v509_v5, %v511_v9  ;;  %v3323_v0 = vld [vmem:[%s4084_s20 + $0x68] sm:$0xff]  }
  0x34   : > { %v4274_v30 = vsel %vm296_vm0, %v326_v45, %v327_v11  ;;  %v4277_v31 = vsel %vm296_vm0, %v327_v11, 0.0  ;;  %v4279_v32 = vpack.i.bf16 %v512_v21, %v510_v20  ;;  %v4284_v39 = vsel %vm296_vm0, %v329_v14, %v330_v18 }
  0x35   : > { %6204 = vst [vmem:[#allocation14_spill] sm:$0xff] %v4274_v30  ;;  %v514_v37 = vrot.slane %v4274_v30, 1  ;;  %v516_v38 = vrot.slane %v4277_v31, 1  ;;  %v4288_v47 = vsel %vm296_vm0, 0.0, %v329_v14  ;;  %v4291_v54 = vsel %vm296_vm0, %v330_v18, 0.0 }
  0x36   : > { %6205 = vst [vmem:[#allocation15_spill] sm:$0xff] %v4279_v32  ;;  %v519_v45 = vrot.slane %v4284_v39, 1  ;;  %v3214_v57 = vunpack.c.h.bf16 %v3321_v61  ;;  %3411 = vrot.lane.b32.xlu1 %v4279_v32, %s4022_s21  ;;  %v518_v11 = vrot.slane %v4288_v47, 1  ;;  %v521_v14 = vrot.slane %v4291_v54, 1 }
  0x37   : > { %v515_v5 = vsel %vm462_vm1, %v513_v13, %v514_v37  ;;  %v517_v9 = vsel %vm462_vm1, %v514_v37, %v516_v38  ;;  %v332_v18 = vrot.slane %v3213_v19, 7  ;;  %v3217_v40 = vunpack.c.l.bf16 %v3322_v46 }
  0x38   : > { %v4301_v20 = vpack.i.bf16 %v517_v9, %v515_v5  ;;  %v333_v21 = vrot.slane %v3214_v57, 7  ;;  %v520_v17 = vsel %vm462_vm1, %v518_v11, %v519_v45  ;;  %v522_v61 = vsel %vm462_vm1, %v519_v45, %v521_v14 }
  0x39   : > { %v3218_v62 = vunpack.c.h.bf16 %v3322_v46  ;;  %v3221_v22 = vunpack.c.l.bf16 %v3323_v0  ;;  %v4308_v13 = vpack.i.bf16 %v522_v61, %v520_v17  ;;  %v4314_v38 = vsel %vm296_vm0, 0.0, %v332_v18 }
  0x3a   : > { %6206 = vst [vmem:[#allocation16_spill] sm:$0xff] %v4301_v20  ;;  %3416 = vrot.lane.b32.xlu0 %v4301_v20, %s4022_s21  ;;  %v4311_v37 = vsel %vm296_vm0, %v332_v18, %v333_v21  ;;  %v4317_v19 = vsel %vm296_vm0, %v333_v21, 0.0  ;;  %v523_v57 = vrot.slane %v4314_v38, 1  ;;  %v335_v5 = vrot.slane %v3217_v40, 7 }
  0x3b   : > { %6207 = vst [vmem:[#allocation17_spill] sm:$0xff] %v4308_v13  ;;  %v524_v46 = vrot.slane %v4311_v37, 1  ;;  %v526_v45 = vrot.slane %v4317_v19, 1  ;;  %3421 = vrot.lane.b32.xlu1 %v4308_v13, %s4022_s21  ;;  %v336_v17 = vrot.slane %v3218_v62, 7  ;;  %v3222_v9 = vunpack.c.h.bf16 %v3323_v0 }
  0x3c   : > { %v338_v11 = vrot.slane %v3221_v22, 7  ;;  %v3225_v14 = vunpack.c.l.bf16 %v3324_v2  ;;  %v4327_v21 = vsel %vm296_vm0, 0.0, %v335_v5  ;;  %v3226_v1 = vunpack.c.h.bf16 %v3324_v2 }
  0x3d   : > { %v525_v18 = vsel %vm462_vm1, %v523_v57, %v524_v46  ;;  %v527_v61 = vsel %vm462_vm1, %v524_v46, %v526_v45  ;;  %v4332_v51 = vsel %vm296_vm0, %v335_v5, %v336_v17  ;;  %v4335_v40 = vsel %vm296_vm0, %v336_v17, 0.0 }
  0x3e   : > { %v4329_v10 = vpack.i.bf16 %v527_v61, %v525_v18  ;;  %v528_v62 = vrot.slane %v4327_v21, 1  ;;  %v529_v22 = vrot.slane %v4332_v51, 1  ;;  %v531_v0 = vrot.slane %v4335_v40, 1 }
  0x3f   : > { %v339_v57 = vrot.slane %v3222_v9, 7  ;;  %v4341_v46 = vsel %vm296_vm0, 0.0, %v338_v11  ;;  %v341_v45 = vrot.slane %v3225_v14, 7  ;;  %v342_v5 = vrot.slane %v3226_v1, 7 }
  0x40   : > { %6208 = vst [vmem:[#allocation18_spill] sm:$0xff] %v4329_v10  ;;  %3426 = vrot.lane.b32.xlu0 %v4329_v10, %s4022_s21  ;;  %v533_v2 = vrot.slane %v4341_v46, 1  ;;  %v4348_v17 = vpack.i.bf16 %v4095_v16, %v4092_v15  ;;  %v530_v18 = vsel %vm462_vm1, %v528_v62, %v529_v22  ;;  %v532_v61 = vsel %vm462_vm1, %v529_v22, %v531_v0 }
  0x41   : > { %v4353_v9 = vsel %vm296_vm0, %v338_v11, %v339_v57  ;;  %v4356_v26 = vsel %vm296_vm0, %v339_v57, 0.0  ;;  %v4358_v13 = vpack.i.bf16 %v532_v61, %v530_v18  ;;  %v4363_v14 = vsel %vm296_vm0, %v341_v45, %v342_v5 }
  0x42   : > { %6209 = vst [vmem:[#allocation19_spill] sm:$0xff] %v4348_v17  ;;  %v534_v10 = vrot.slane %v4353_v9, 1  ;;  %v536_v1 = vrot.slane %v4356_v26, 1  ;;  %v4366_v15 = vsel %vm296_vm0, 0.0, %v341_v45  ;;  %v4369_v16 = vsel %vm296_vm0, %v342_v5, 0.0 }
  0x43   : > { %6210 = vst [vmem:[#allocation20_spill] sm:$0xff] %v4358_v13  ;;  %v539_v11 = vrot.slane %v4363_v14, 1  ;;  %3431 = vrot.lane.b32.xlu1 %v4358_v13, %s4022_s21  ;;  %v538_v0 = vrot.slane %v4366_v15, 1  ;;  %v541_v57 = vrot.slane %v4369_v16, 1  ;;  %v549_v45 = vrot.slane %v4119_v42, 2 }
  0x44   : > { %v535_v62 = vsel %vm462_vm1, %v533_v2, %v534_v10  ;;  %v537_v22 = vsel %vm462_vm1, %v534_v10, %v536_v1  ;;  %v550_v5 = vrot.slane %v4116_v41, 2  ;;  %v552_v61 = vrot.slane %v4122_v43, 2 }
  0x45   : > { %v4378_v18 = vpack.i.bf16 %v537_v22, %v535_v62  ;;  %v540_v6 = vsel %vm462_vm1, %v538_v0, %v539_v11  ;;  %v542_v13 = vsel %vm462_vm1, %v539_v11, %v541_v57  ;;  %v554_v2 = vrot.slane %v4106_v34, 2 }
  0x46   : > { %v555_v10 = vrot.slane %v4103_v33, 2  ;;  %v4389_v1 = vpack.i.bf16 %v542_v13, %v540_v6  ;;  %v551_v62 = vsel %vm543_vm2, %v549_v45, %v550_v5  ;;  %v553_v22 = vsel %vm543_vm2, %v550_v5, %v552_v61 }
  0x47   : > { %6211 = vst [vmem:[#allocation21_spill] sm:$0xff] %v4378_v18  ;;  %3436 = vrot.lane.b32.xlu0 %v4378_v18, %s4022_s21  ;;  %v559_v20 = vrot.slane %v4136_v52, 2  ;;  %v6213_v0 = vrot.slane %v4109_v35, 2  ;;  %v560_v57 = vrot.slane %v4125_v44, 2  ;;  %v4401_v18 = vpack.i.bf16 %v553_v22, %v551_v62 }
  0x48   : > { %6212 = vst [vmem:[#allocation22_spill] sm:$0xff] %v4389_v1  ;;  %v556_v43 = vsel %vm543_vm2, %v554_v2, %v555_v10  ;;  %3441 = vrot.lane.b32.xlu1 %v4389_v1, %s4022_s21  ;;  %v562_v6 = vrot.slane %v4139_v53, 2  ;;  %v564_v13 = vrot.slane %v4149_v60, 2  ;;  %v565_v45 = vrot.slane %v4161_v7, 2 }
  0x49   : > { %v558_v11 = vsel %vm543_vm2, %v555_v10, %v6213_v0  ;;  %v561_v5 = vsel %vm543_vm2, %v559_v20, %v560_v57  ;;  %v567_v61 = vrot.slane %v4164_v8, 2  ;;  %v569_v35 = vrot.slane %v4175_v23, 2 }
  0x4a   : > { %v570_v2 = vrot.slane %v4181_v27, 2  ;;  %v4412_v10 = vpack.i.bf16 %v558_v11, %v556_v43  ;;  %v563_v53 = vsel %vm543_vm2, %v560_v57, %v562_v6  ;;  %v572_v62 = vrot.slane %v4184_v28, 2 }
  0x4b   : > { %3446 = vrot.lane.b32.xlu0 %v4348_v17, %s4023_s22  ;;  %v566_v22 = vsel %vm543_vm2, %v564_v13, %v565_v45  ;;  %v568_v20 = vsel %vm543_vm2, %v565_v45, %v567_v61  ;;  %v574_v8 = vrot.slane %v4190_v36, 2  ;;  %v575_v0 = vrot.slane %v4198_v48, 2 }
  0x4c   : > { %3451 = vrot.lane.b32.xlu1 %v4401_v18, %s4023_s22  ;;  %v4422_v1 = vpack.i.bf16 %v563_v53, %v561_v5  ;;  %v571_v43 = vsel %vm543_vm2, %v569_v35, %v570_v2  ;;  %v577_v11 = vrot.slane %v4201_v49, 2  ;;  %v573_v57 = vsel %vm543_vm2, %v570_v2, %v572_v62 }
  0x4d   : > { %v579_v28 = vrot.slane %v4212_v58, 2  ;;  %v580_v6 = vrot.slane %v4208_v56, 2  ;;  %v582_v13 = vrot.slane %v4215_v59, 2  ;;  %v4432_v45 = vpack.i.bf16 %v568_v20, %v566_v22 }
  0x4e   : > { %v584_v5 = vrot.slane %v4238_v25, 2  ;;  %v585_v61 = vrot.slane %v4235_v24, 2  ;;  %v576_v35 = vsel %vm543_vm2, %v574_v8, %v575_v0  ;;  %v578_v49 = vsel %vm543_vm2, %v575_v0, %v577_v11 }
  0x4f   : > { %3456 = vrot.lane.b32.xlu0 %v4412_v10, %s4023_s22  ;;  %v587_v2 = vrot.slane %v4241_v29, 2  ;;  %v4441_v53 = vpack.i.bf16 %v573_v57, %v571_v43  ;;  %v589_v59 = vrot.slane %v4251_v55, 2  ;;  %v590_v62 = vrot.slane %v4257_v3, 2 }
  0x50   : > { %3461 = vrot.lane.b32.xlu1 %v4422_v1, %s4023_s22  ;;  %v581_v22 = vsel %vm543_vm2, %v579_v28, %v580_v6  ;;  %v583_v20 = vsel %vm543_vm2, %v580_v6, %v582_v13  ;;  %v592_v17 = vrot.slane %v4260_v4, 2  ;;  %v4450_v8 = vpack.i.bf16 %v578_v49, %v576_v35 }
  0x51   : > { %v586_v29 = vsel %vm543_vm2, %v584_v5, %v585_v61  ;;  %v588_v0 = vsel %vm543_vm2, %v585_v61, %v587_v2  ;;  %v594_v43 = vrot.slane %v4266_v12, 2  ;;  %v595_v11 = vrot.slane %v4274_v30, 2 }
  0x52   : > { %v597_v57 = vrot.slane %v4277_v31, 2  ;;  %v4459_v28 = vpack.i.bf16 %v583_v20, %v581_v22  ;;  %v591_v4 = vsel %vm543_vm2, %v589_v59, %v590_v62  ;;  %v593_v6 = vsel %vm543_vm2, %v590_v62, %v592_v17 }
  0x53   : > { %3466 = vrot.lane.b32.xlu0 %v4432_v45, %s4023_s22  ;;  %v599_v13 = vrot.slane %v4288_v47, 2  ;;  %v600_v5 = vrot.slane %v4284_v39, 2  ;;  %v602_v61 = vrot.slane %v4291_v54, 2  ;;  %v4468_v35 = vpack.i.bf16 %v588_v0, %v586_v29 }
  0x54   : > { %3471 = vrot.lane.b32.xlu1 %v4441_v53, %s4023_s22  ;;  %v604_v31 = vrot.slane %v4314_v38, 2  ;;  %v605_v49 = vrot.slane %v4311_v37, 2  ;;  %v596_v2 = vsel %vm543_vm2, %v594_v43, %v595_v11  ;;  %v598_v59 = vsel %vm543_vm2, %v595_v11, %v597_v57 }
  0x55   : > { %v607_v17 = vrot.slane %v4317_v19, 2  ;;  %v4477_v62 = vpack.i.bf16 %v593_v6, %v591_v4  ;;  %v609_v54 = vrot.slane %v4327_v21, 2  ;;  %v610_v22 = vrot.slane %v4332_v51, 2 }
  0x56   : > { %v601_v20 = vsel %vm543_vm2, %v599_v13, %v600_v5  ;;  %v603_v29 = vsel %vm543_vm2, %v600_v5, %v602_v61  ;;  %v612_v0 = vrot.slane %v4335_v40, 2  ;;  %v4486_v43 = vpack.i.bf16 %v598_v59, %v596_v2 }
  0x57   : > { %3476 = vrot.lane.b32.xlu0 %v4450_v8, %s4023_s22  ;;  %6214 = vst [vmem:[#allocation23_spill] sm:$0xff] %v4477_v62  ;;  %v606_v19 = vsel %vm543_vm2, %v604_v31, %v605_v49  ;;  %v608_v11 = vsel %vm543_vm2, %v605_v49, %v607_v17  ;;  %v614_v57 = vrot.slane %v4341_v46, 2  ;;  %v615_v4 = vrot.slane %v4353_v9, 2 }
  0x58   : > { %3481 = vrot.lane.b32.xlu1 %v4459_v28, %s4023_s22  ;;  %v617_v6 = vrot.slane %v4356_v26, 2  ;;  %v4495_v13 = vpack.i.bf16 %v603_v29, %v601_v20  ;;  %v611_v40 = vsel %vm543_vm2, %v609_v54, %v610_v22  ;;  %v613_v5 = vsel %vm543_vm2, %v610_v22, %v612_v0 }
  0x59   : > { %v619_v61 = vrot.slane %v4366_v15, 2  ;;  %v620_v31 = vrot.slane %v4363_v14, 2  ;;  %v622_v49 = vrot.slane %v4369_v16, 2  ;;  %v4504_v2 = vpack.i.bf16 %v608_v11, %v606_v19 }
  0x5a   : > { %v616_v26 = vsel %vm543_vm2, %v614_v57, %v615_v4  ;;  %v618_v59 = vsel %vm543_vm2, %v615_v4, %v617_v6  ;;  %v4510_v17 = vpack.i.bf16 %v613_v5, %v611_v40  ;;  %v3525_v29 = vpack.i.bf16 %v4116_v41, %v4119_v42  ;;  %v4005_v6 = vld [vmem:[%s6102_s1 + $0x4] ss:$8 sps:$4 sm:$0xff]   ;;  %v4007_v40 = vld [vmem:[%s6102_s1] ss:$8 sps:$4 sm:$0xff]   ;;  %v4008_v5 = vld [vmem:[%s6102_s1 + $0x14] ss:$8 sps:$4 sm:$0xff]  }
  0x5b   : > { %3486 = vrot.lane.b32.xlu0 %v4468_v35, %s4023_s22  ;;  %v621_v54 = vsel %vm543_vm2, %v619_v61, %v620_v31  ;;  %v623_v22 = vsel %vm543_vm2, %v620_v31, %v622_v49  ;;  %v4516_v16 = vpack.i.bf16 %v618_v59, %v616_v26  ;;  %v3530_v0 = vpack.i.bf16 %v4103_v33, %v4106_v34  ;;  %v4010_v61 = vld [vmem:[%s6102_s1 + $0x10] ss:$8 sps:$4 sm:$0xff]   ;;  %v1688_v31 = vld [vmem:[%s6102_s1 + $0x20] sm:$0x33] }
  0x5c   : > { %3491 = vrot.lane.b32.xlu1 %v4477_v62, %s4023_s22  ;;  %v4520_v20 = vpack.i.bf16 %v623_v22, %v621_v54  ;;  %v3535_v19 = vpack.i.bf16 %v4125_v44, %v4136_v52  ;;  %v4536_v11 = vpack.i.bf16 %v4161_v7, %v4149_v60  ;;  %v4541_v57 = vpack.i.bf16 %v4181_v27, %v4175_v23  ;;  %v6224_v33 = vld [vmem:[#allocation9_spill] sm:$0xff] }
  0x5d   : > { %v4547_v4 = vpack.i.bf16 %v4257_v3, %v4251_v55  ;;  %1770 = vmatprep.subr.bf16.mxu0 %v4005_v6  ;;  %3341 = vmatprep.subr.bf16.mxu1 %v4005_v6  ;;  %v3081_v49 = vcombine.high %v1688_v31, %v1688_v31  ;;  %v3080_v26 = vcombine.low %v1688_v31, %v1688_v31  ;;  %v6136_v54 = vmov 0  }
  0x5e   : > { %1771 = vmatpush1.bf16.msra.mxu0 %v4007_v40  ;;  %3344 = vmatpush1.bf16.msra.mxu1 %v4007_v40  ;;  %v3580_v59 = vpack.i.bf16 %v4274_v30, %v4266_v12  ;;  %v6218_v40 = vld [vmem:[#allocation7_spill] sm:$0xff]  ;;  %vm1635_vm11 = vcmask 261120   ;;  %vm1714_vm12 = vcmask 293888   ;;  %vm2659_vm13 = vcmask 1043456  }
  0x5f   : > { %3496 = vrot.lane.b32.xlu0 %v4486_v43, %s4023_s22  ;;  %6215 = vst [vmem:[#allocation24_spill] sm:$0xff] %v4547_v4  ;;  %1772 = vmatprep.subr.bf16.mxu0 %v4008_v5 }
  0x60   : > { %3501 = vrot.lane.b32.xlu1 %v4495_v13, %s4023_s22  ;;  %3342 = vmatprep.subr.bf16.mxu1 %v4008_v5 }
  0x61   : > { %1802 = vmatprep.mubr.bf16.mxu0 %v6136_v54  ;;  %1882 = vmatprep.mubr.bf16.mxu1 %v6136_v54 }
  0x62   : > { %1773 = vmatpush1.bf16.msra.mxu0 %v4010_v61  ;;  %3345 = vmatpush1.bf16.msra.mxu1 %v4010_v61 }
  0x63   : > { %3506 = vrot.lane.b32.xlu0 %v4504_v2, %s4023_s22  ;;  %3082 = vmatprep.subr.msk.bf16.mxu0 %vm1763_vm3, %v3081_v49 }
  0x64   : > { %3511 = vrot.lane.b32.xlu1 %v4510_v17, %s4023_s22  ;;  %3343 = vmatprep.subr.msk.bf16.mxu1 %vm1763_vm3, %v3081_v49  ;;  %v3690_v49 = vpack.i.bf16 %v4311_v37, %v4314_v38 }
  0x67   : > { %3516 = vrot.lane.b32.xlu0 %v4516_v16, %s4023_s22 }
  0x68   : > { %3521 = vrot.lane.b32.xlu1 %v4520_v20, %s4023_s22  ;;  %s5401_s22 = scalar_lea.vmem %s6105_s4, %s3133_s17 }
  0x6b   : > { %3526 = vrot.lane.b32.xlu0 %v3525_v29, %s4024_s23 }
  0x6c   : > { %3531 = vrot.lane.b32.xlu1 %v3530_v0, %s4024_s23 }
  0x6f   : > { %3536 = vrot.lane.b32.xlu0 %v3535_v19, %s4024_s23 }
  0x70   : > { %3541 = vrot.lane.b32.xlu1 %v4536_v11, %s4024_s23 }
  0x73   : > { %3546 = vrot.lane.b32.xlu0 %v4541_v57, %s4024_s23 }
  0x74   : > { %3551 = vrot.lane.b32.xlu1 %v4547_v4, %s4024_s23 }
  0x77   : > { %3556 = vrot.lane.b32.xlu0 %v4152_v63, %s4025_s6  ;;  %v1765_v63 = vsel %vm1763_vm3, %v3080_v26, 0 }
  0x78   : > { %3561 = vrot.lane.b32.xlu1 %v4279_v32, %s4025_s6  ;;  %1775 = vmatpush1.bf16.msra.mxu0 %v1765_v63 }
  0x79   : > { %3346 = vmatpush1.bf16.msra.mxu1 %v1765_v63 }
  0x7b   : > { %3566 = vrot.lane.b32.xlu0 %v4401_v18, %s4026_s9  ;;  %v6216_v18 = vld [vmem:[#allocation16_spill] sm:$0xff] }
  0x7c   : > { %3571 = vrot.lane.b32.xlu1 %v4477_v62, %s4026_s9 }
  0x7f   : > { %3576 = vrot.lane.b32.xlu0 %v3530_v0, %s4028_s10  ;;  %v3635_v0 = vpack.i.bf16 %v4284_v39, %v4288_v47 }
  0x80   : > { %3581 = vrot.lane.b32.xlu1 %v3580_v59, %s4028_s10 }
  0x83   : > { %3586 = vrot.lane.b32.xlu0 %v4132_v50, %s4029_s11 }
  0x84   : > { %3591 = vrot.lane.b32.xlu1 %v6216_v18, %s4029_s11 }
  0x87   : > { %3596 = vrot.lane.b32.xlu0 %v4412_v10, %s4030_s12 }
  0x88   : > { %3601 = vrot.lane.b32.xlu1 %v4486_v43, %s4030_s12  ;;  %v4598_v22 = vpop.permute.xlu0 %3366 }
  0x8b   : > { %3606 = vrot.lane.b32.xlu0 %v3580_v59, %s4024_s23  ;;  %v6221_v59 = vld [vmem:[#allocation8_spill] sm:$0xff] }
  0x8c   : > { %3611 = vrot.lane.b32.xlu1 %v4132_v50, %s4025_s6 }
  0x8f   : > { %3616 = vrot.lane.b32.xlu0 %v6216_v18, %s4025_s6  ;;  %v6222_v18 = vld [vmem:[#allocation18_spill] sm:$0xff] }
  0x90   : > { %3621 = vrot.lane.b32.xlu1 %v4412_v10, %s4026_s9  ;;  %v4602_v29 = vpop.permute.xlu1 %3376  ;;  %v6219_v10 = vld [vmem:[#allocation17_spill] sm:$0xff] }
  0x91   : > { %6217 = vst [vmem:[#allocation16_spill] sm:$0xff] %v4602_v29 }
  0x92   : > { %v4609_v6 = vpop.permute.xlu0 %3371 }
  0x93   : > { %3626 = vrot.lane.b32.xlu0 %v4486_v43, %s4026_s9 }
  0x94   : > { %3631 = vrot.lane.b32.xlu1 %v3535_v19, %s4028_s10  ;;  %v3382_v50 = vpop.permute.xlu1 %3381 }
  0x95   : > { %v3384_v62 = vunpack.i.h.bf16 %v3382_v50 }
  0x97   : > { %3636 = vrot.lane.b32.xlu0 %v3635_v0, %s4028_s10  ;;  %v1412_v30 = vsel %vm1404_vm4, %v4125_v44, %v3384_v62 }
  0x98   : > { %3641 = vrot.lane.b32.xlu1 %v6218_v40, %s4029_s11  ;;  %v3387_v5 = vpop.permute.xlu0 %3386 }
  0x99   : > { %v3388_v4 = vunpack.i.l.bf16 %v3387_v5 }
  0x9b   : > { %3646 = vrot.lane.b32.xlu0 %v6219_v10, %s4029_s11  ;;  %v4618_v43 = vpop.permute.xlu1 %3391 }
  0x9c   : > { %3651 = vrot.lane.b32.xlu1 %v4422_v1, %s4030_s12  ;;  %v3394_v34 = vunpack.i.h.bf16 %v4618_v43 }
  0x9f   : > { %3656 = vrot.lane.b32.xlu0 %v4495_v13, %s4030_s12  ;;  %v4623_v19 = vpop.permute.xlu0 %3396 }
  0xa0   : > { %3661 = vrot.lane.b32.xlu1 %v3635_v0, %s4024_s23  ;;  %v4627_v61 = vpop.permute.xlu1 %3401  ;;  %v3399_v62 = vunpack.i.h.bf16 %v4623_v19 }
  0xa3   : > { %3666 = vrot.lane.b32.xlu0 %v6218_v40, %s4025_s6 }
  0xa4   : > { %3671 = vrot.lane.b32.xlu1 %v6219_v10, %s4025_s6 }
  0xa5   : > { %v4633_v31 = vpop.permute.xlu0 %3406 }
  0xa7   : > { %3676 = vrot.lane.b32.xlu0 %v4422_v1, %s4026_s9 }
  0xa8   : > { %3681 = vrot.lane.b32.xlu1 %v4495_v13, %s4026_s9  ;;  %v4639_v26 = vpop.permute.xlu1 %3411 }
  0xab   : > { %3686 = vrot.lane.b32.xlu0 %v4536_v11, %s4028_s10 }
  0xac   : > { %3691 = vrot.lane.b32.xlu1 %v3690_v49, %s4028_s10  ;;  %v4644_v63 = vpop.permute.xlu0 %3416 }
  0xad   : > { %6220 = vst [vmem:[#allocation7_spill] sm:$0xff] %v4644_v63  ;;  %v4648_v1 = vpop.permute.xlu1 %3421 }
  0xaf   : > { %3696 = vrot.lane.b32.xlu0 %v6221_v59, %s4029_s11 }
  0xb0   : > { %3701 = vrot.lane.b32.xlu1 %v6222_v18, %s4029_s11 }
  0xb2   : > { %v4654_v13 = vpop.permute.xlu0 %3426 }
  0xb3   : > { %3706 = vrot.lane.b32.xlu0 %v4432_v45, %s4030_s12 }
  0xb4   : > { %3711 = vrot.lane.b32.xlu1 %v4504_v2, %s4030_s12 }
  0xb5   : > { %v4658_v11 = vpop.permute.xlu1 %3431 }
  0xb7   : > { %3716 = vrot.lane.b32.xlu0 %v3690_v49, %s4024_s23  ;;  %v3745_v49 = vpack.i.bf16 %v4332_v51, %v4327_v21 }
  0xb8   : > { %3721 = vrot.lane.b32.xlu1 %v6221_v59, %s4025_s6  ;;  %v3383_v59 = vunpack.i.l.bf16 %v3382_v50 }
  0xb9   : > { %v4661_v0 = vpop.permute.xlu0 %3436 }
  0xba   : > { %v4667_v40 = vpop.permute.xlu1 %3441  ;;  %v1411_v50 = vsel %vm1404_vm4, %v4136_v52, %v3383_v59  ;;  %v1413_v52 = vsel %vm1404_vm4, %v4149_v60, %v3388_v4  ;;  %v6225_v59 = vld [vmem:[#allocation20_spill] sm:$0xff]  ;;  %v3404_v4 = vunpack.i.h.bf16 %v4627_v61 }
  0xbb   : > { %3726 = vrot.lane.b32.xlu0 %v6222_v18, %s4025_s6  ;;  %v3389_v18 = vunpack.i.h.bf16 %v3387_v5 }
  0xbc   : > { %3731 = vrot.lane.b32.xlu1 %v4432_v45, %s4026_s9 }
  0xbd   : > { %v4669_v10 = vpop.permute.xlu0 %3446  ;;  %v1414_v44 = vsel %vm1404_vm4, %v4161_v7, %v3389_v18  ;;  %v1416_v7 = vsel %vm1404_vm4, %v4181_v27, %v3394_v34  ;;  %v1418_v34 = vsel %vm1404_vm4, %v4198_v48, %v3399_v62 }
  0xbe   : > { %v4675_v54 = vpop.permute.xlu1 %3451 }
  0xbf   : > { %3736 = vrot.lane.b32.xlu0 %v4504_v2, %s4026_s9 }
  0xc0   : > { %3741 = vrot.lane.b32.xlu1 %v4541_v57, %s4028_s10 }
  0xc1   : > { %v4679_v32 = vpop.permute.xlu0 %3456 }
  0xc2   : > { %6223 = vst [vmem:[#allocation17_spill] sm:$0xff] %v4679_v32  ;;  %v3462_v45 = vpop.permute.xlu1 %3461  ;;  %v3393_v32 = vunpack.i.l.bf16 %v4618_v43  ;;  %v3398_v43 = vunpack.i.l.bf16 %v4623_v19  ;;  %v3403_v19 = vunpack.i.l.bf16 %v4627_v61 }
  0xc3   : > { %3746 = vrot.lane.b32.xlu0 %v3745_v49, %s4028_s10  ;;  %v3464_v2 = vunpack.i.h.bf16 %v3462_v45  ;;  %v3463_v12 = vunpack.i.l.bf16 %v3462_v45 }
  0xc4   : > { %3751 = vrot.lane.b32.xlu1 %v6224_v33, %s4029_s11  ;;  %v1415_v60 = vsel %vm1404_vm4, %v4175_v23, %v3393_v32  ;;  %v1417_v23 = vsel %vm1404_vm4, %v4190_v36, %v3398_v43  ;;  %v1419_v62 = vsel %vm1404_vm4, %v4212_v58, %v3403_v19 }
  0xc5   : > { %v3467_v57 = vpop.permute.xlu0 %3466  ;;  %v4693_v5 = vsel %vm1437_vm5, %v1412_v30, %v3464_v2  ;;  %v4696_v63 = vsel %vm1437_vm5, %v1411_v50, %v3463_v12 }
  0xc6   : > { %v3469_v45 = vunpack.i.h.bf16 %v3467_v57  ;;  %v3468_v29 = vunpack.i.l.bf16 %v3467_v57  ;;  %v3472_v30 = vpop.permute.xlu1 %3471 }
  0xc7   : > { %3756 = vrot.lane.b32.xlu0 %v6225_v59, %s4029_s11  ;;  %v3474_v50 = vunpack.i.h.bf16 %v3472_v30  ;;  %v3473_v57 = vunpack.i.l.bf16 %v3472_v30 }
  0xc8   : > { %v4707_v2 = vsel %vm1437_vm5, %v1413_v52, %v3468_v29  ;;  %v4710_v12 = vsel %vm1437_vm5, %v1414_v44, %v3469_v45  ;;  %3761 = vrot.lane.b32.xlu1 %v4441_v53, %s4030_s12 }
  0xc9   : > { %v3477_v18 = vpop.permute.xlu0 %3476  ;;  %v4721_v29 = vsel %vm1437_vm5, %v1416_v7, %v3474_v50  ;;  %v4724_v45 = vsel %vm1437_vm5, %v1415_v60, %v3473_v57  ;;  %v1420_v57 = vsel %vm1404_vm4, %v4208_v56, %v3404_v4  ;;  %v3424_v4 = vunpack.i.h.bf16 %v4648_v1 }
  0xca   : > { %v3479_v44 = vunpack.i.h.bf16 %v3477_v18  ;;  %v3478_v52 = vunpack.i.l.bf16 %v3477_v18  ;;  %v3482_v27 = vpop.permute.xlu1 %3481 }
  0xcb   : > { %3766 = vrot.lane.b32.xlu0 %v4510_v17, %s4030_s12  ;;  %v3484_v30 = vunpack.i.h.bf16 %v3482_v27  ;;  %v3483_v50 = vunpack.i.l.bf16 %v3482_v27 }
  0xcc   : > { %v4733_v32 = vsel %vm1437_vm5, %v1417_v23, %v3478_v52  ;;  %v4736_v61 = vsel %vm1437_vm5, %v1418_v34, %v3479_v44  ;;  %3771 = vrot.lane.b32.xlu1 %v3745_v49, %s4024_s23  ;;  %v3423_v44 = vunpack.i.l.bf16 %v4648_v1  ;;  %v3429_v49 = vunpack.i.h.bf16 %v4654_v13 }
  0xcd   : > { %6226 = vst [vmem:[#allocation8_spill] sm:$0xff] %v4733_v32  ;;  %6227 = vst [vmem:[#allocation18_spill] sm:$0xff] %v4736_v61  ;;  %v4742_v7 = vpop.permute.xlu0 %3486  ;;  %v4746_v43 = vsel %vm1437_vm5, %v1420_v57, %v3484_v30  ;;  %v4749_v60 = vsel %vm1437_vm5, %v1419_v62, %v3483_v50  ;;  %v3428_v52 = vunpack.i.l.bf16 %v4654_v13  ;;  %v3800_v1 = vpack.i.bf16 %v4353_v9, %v4341_v46 }
  0xce   : > { %6228 = vst [vmem:[#allocation9_spill] sm:$0xff] %v4746_v43  ;;  %6229 = vst [vmem:[#allocation20_spill] sm:$0xff] %v4749_v60  ;;  %v4753_v18 = vpop.permute.xlu1 %3491  ;;  %v1428_v30 = vsel %vm1404_vm4, %v4284_v39, %v3424_v4  ;;  %v3434_v13 = vunpack.i.h.bf16 %v4658_v11  ;;  %v3433_v50 = vunpack.i.l.bf16 %v4658_v11  ;;  %v1430_v39 = vsel %vm1404_vm4, %v4311_v37, %v3429_v49 }
  0xcf   : > { %3776 = vrot.lane.b32.xlu0 %v6224_v33, %s4025_s6  ;;  %v3795_v33 = vpack.i.bf16 %v4198_v48, %v4190_v36  ;;  %v3439_v11 = vunpack.i.h.bf16 %v4661_v0  ;;  %v3438_v4 = vunpack.i.l.bf16 %v4661_v0  ;;  %v3444_v49 = vunpack.i.h.bf16 %v4667_v40 }
  0xd0   : > { %3781 = vrot.lane.b32.xlu1 %v6225_v59, %s4025_s6  ;;  %v1427_v59 = vsel %vm1404_vm4, %v4288_v47, %v3423_v44  ;;  %v1429_v47 = vsel %vm1404_vm4, %v4314_v38, %v3428_v52  ;;  %v1432_v37 = vsel %vm1404_vm4, %v4332_v51, %v3434_v13  ;;  %v1431_v38 = vsel %vm1404_vm4, %v4327_v21, %v3433_v50 }
  0xd1   : > { %v4757_v19 = vpop.permute.xlu0 %3496  ;;  %v3443_v0 = vunpack.i.l.bf16 %v4667_v40  ;;  %v1434_v51 = vsel %vm1404_vm4, %v4353_v9, %v3439_v11  ;;  %v1433_v21 = vsel %vm1404_vm4, %v4341_v46, %v3438_v4  ;;  %v6231_v40 = vld [vmem:[#allocation10_spill] sm:$0xff]  ;;  %v6234_v46 = vld [vmem:[#allocation21_spill] sm:$0xff] }
  0xd2   : > { %v3502_v34 = vpop.permute.xlu1 %3501 }
  0xd3   : > { %3786 = vrot.lane.b32.xlu0 %v4441_v53, %s4026_s9  ;;  %v3504_v23 = vunpack.i.h.bf16 %v3502_v34  ;;  %v3503_v27 = vunpack.i.l.bf16 %v3502_v34  ;;  %v1435_v9 = vsel %vm1404_vm4, %v4366_v15, %v3443_v0 }
  0xd4   : > { %3791 = vrot.lane.b32.xlu1 %v4510_v17, %s4026_s9 }
  0xd5   : > { %v3507_v53 = vpop.permute.xlu0 %3506  ;;  %v4778_v36 = vsel %vm1437_vm5, %v1428_v30, %v3504_v23  ;;  %v4781_v48 = vsel %vm1437_vm5, %v1427_v59, %v3503_v27 }
  0xd6   : > { %v3509_v57 = vunpack.i.h.bf16 %v3507_v53  ;;  %v3508_v62 = vunpack.i.l.bf16 %v3507_v53  ;;  %v3512_v17 = vpop.permute.xlu1 %3511 }
  0xd7   : > { %3796 = vrot.lane.b32.xlu0 %v3795_v33, %s4028_s10  ;;  %v3514_v23 = vunpack.i.h.bf16 %v3512_v17  ;;  %v3513_v27 = vunpack.i.l.bf16 %v3512_v17  ;;  %v1436_v17 = vsel %vm1404_vm4, %v4363_v14, %v3444_v49 }
  0xd8   : > { %v4791_v44 = vsel %vm1437_vm5, %v1429_v47, %v3508_v62  ;;  %v4794_v34 = vsel %vm1437_vm5, %v1430_v39, %v3509_v57  ;;  %3801 = vrot.lane.b32.xlu1 %v3800_v1, %s4028_s10 }
  0xd9   : > { %v3517_v52 = vpop.permute.xlu0 %3516  ;;  %v4804_v30 = vsel %vm1437_vm5, %v1432_v37, %v3514_v23  ;;  %v4807_v59 = vsel %vm1437_vm5, %v1431_v38, %v3513_v27  ;;  %v3325_v27 = vld [vmem:[%s4084_s20 + $0x78] sm:$0xff]  }
  0xda   : > { %6230 = vst [vmem:[#allocation25_spill] sm:$0xff] %v4804_v30  ;;  %v3519_v53 = vunpack.i.h.bf16 %v3517_v52  ;;  %v3518_v57 = vunpack.i.l.bf16 %v3517_v52  ;;  %v3522_v13 = vpop.permute.xlu1 %3521  ;;  %v3229_v49 = vunpack.c.l.bf16 %v3325_v27  ;;  %v3230_v52 = vunpack.c.h.bf16 %v3325_v27 }
  0xdb   : > { %3806 = vrot.lane.b32.xlu0 %v6231_v40, %s4029_s11  ;;  %v3524_v39 = vunpack.i.h.bf16 %v3522_v13  ;;  %v3523_v47 = vunpack.i.l.bf16 %v3522_v13 }
  0xdc   : > { %v4816_v50 = vsel %vm1437_vm5, %v1433_v21, %v3518_v57  ;;  %v4819_v62 = vsel %vm1437_vm5, %v1434_v51, %v3519_v53  ;;  %3811 = vrot.lane.b32.xlu1 %v6234_v46, %s4029_s11  ;;  %v344_v21 = vrot.slane %v3229_v49, 7  ;;  %v4884_v49 = vpack.i.bf16 %v4363_v14, %v4366_v15  ;;  %v6237_v14 = vld [vmem:[#allocation2_spill] sm:$0xff] }
  0xdd   : > { %6232 = vst [vmem:[#allocation10_spill] sm:$0xff] %v4816_v50  ;;  %6233 = vst [vmem:[#allocation26_spill] sm:$0xff] %v4819_v62  ;;  %v4825_v11 = vpop.permute.xlu0 %3526  ;;  %v4830_v4 = vsel %vm1437_vm5, %v1436_v17, %v3524_v39  ;;  %v4833_v23 = vsel %vm1437_vm5, %v1435_v9, %v3523_v47  ;;  %v345_v9 = vrot.slane %v3230_v52, 7  ;;  %v3409_v52 = vunpack.i.h.bf16 %v4633_v31  ;;  %v6239_v62 = vld [vmem:[#allocation11_spill] sm:$0xff] }
  0xde   : > { %6235 = vst [vmem:[#allocation21_spill] sm:$0xff] %v4830_v4  ;;  %6236 = vst [vmem:[#allocation27_spill] sm:$0xff] %v4833_v23  ;;  %v4838_v37 = vpop.permute.xlu1 %3531 }
  0xdf   : > { %3816 = vrot.lane.b32.xlu0 %v4450_v8, %s4030_s12 }
  0xe0   : > { %3821 = vrot.lane.b32.xlu1 %v4516_v16, %s4030_s12 }
  0xe1   : > { %v4840_v38 = vpop.permute.xlu0 %3536 }
  0xe2   : > { %v3542_v0 = vpop.permute.xlu1 %3541 }
  0xe3   : > { %3826 = vrot.lane.b32.xlu0 %v3795_v33, %s4024_s23  ;;  %v3544_v53 = vunpack.i.h.bf16 %v3542_v0  ;;  %v3543_v57 = vunpack.i.l.bf16 %v3542_v0  ;;  %v3368_v0 = vunpack.i.l.bf16 %v4598_v22 }
  0xe4   : > { %3831 = vrot.lane.b32.xlu1 %v3800_v1, %s4024_s23 }
  0xe5   : > { %v3547_v51 = vpop.permute.xlu0 %3546  ;;  %v4848_v13 = vsel %vm1470_vm6, %v4696_v63, %v3543_v57  ;;  %v4852_v39 = vsel %vm1470_vm6, %v4693_v5, %v3544_v53  ;;  %v3369_v5 = vunpack.i.h.bf16 %v4598_v22  ;;  %v3408_v53 = vunpack.i.l.bf16 %v4633_v31 }
  0xe6   : > { %v3549_v47 = vunpack.i.h.bf16 %v3547_v51  ;;  %v3548_v17 = vunpack.i.l.bf16 %v3547_v51  ;;  %v4856_v33 = vpop.permute.xlu1 %3551  ;;  %v3449_v22 = vunpack.i.h.bf16 %v4669_v10  ;;  %v3448_v57 = vunpack.i.l.bf16 %v4669_v10 }
  0xe7   : > { %3836 = vrot.lane.b32.xlu0 %v6231_v40, %s4025_s6  ;;  %v4872_v40 = vsel %vm296_vm0, 0.0, %v344_v21  ;;  %v1406_v15 = vsel %vm1404_vm4, %v6237_v14, %v3369_v5  ;;  %v3489_v51 = vunpack.i.h.bf16 %v4742_v7  ;;  %v3554_v4 = vunpack.i.h.bf16 %v4856_v33 }
  0xe8   : > { %v4860_v1 = vsel %vm1470_vm6, %v4707_v2, %v3548_v17  ;;  %v4864_v63 = vsel %vm1470_vm6, %v4710_v12, %v3549_v47  ;;  %3841 = vrot.lane.b32.xlu1 %v6234_v46, %s4025_s6  ;;  %v4880_v12 = vpack.i.bf16 %v4208_v56, %v4212_v58  ;;  %v4887_v46 = vsel %vm296_vm0, %v344_v21, %v345_v9 }
  0xe9   : > { %v4866_v27 = vpop.permute.xlu0 %3556  ;;  %v4897_v56 = vsel %vm296_vm0, %v345_v9, 0.0  ;;  %v3488_v21 = vunpack.i.l.bf16 %v4742_v7  ;;  %v3528_v47 = vunpack.i.l.bf16 %v4825_v11  ;;  %v6238_v9 = vld [vmem:[#allocation3_spill] sm:$0xff]  ;;  %v1422_v7 = vsel %vm1404_vm4, %v4235_v24, %v3409_v52 }
  0xea   : > { %v4876_v2 = vpop.permute.xlu1 %3561  ;;  %v1405_v5 = vsel %vm1404_vm4, %v6238_v9, %v3368_v0  ;;  %v3553_v23 = vunpack.i.l.bf16 %v4856_v33  ;;  %v1439_v0 = vsel %vm1437_vm5, %v1406_v15, %v3449_v22  ;;  %v3559_v31 = vunpack.i.h.bf16 %v4866_v27 }
  0xeb   : > { %3846 = vrot.lane.b32.xlu0 %v4450_v8, %s4026_s9  ;;  %v1438_v58 = vsel %vm1437_vm5, %v1405_v5, %v3448_v57  ;;  %v3558_v52 = vunpack.i.l.bf16 %v4866_v27  ;;  %v3564_v15 = vunpack.i.h.bf16 %v4876_v2  ;;  %v3563_v22 = vunpack.i.l.bf16 %v4876_v2  ;;  %v6240_v5 = vld [vmem:[#allocation22_spill] sm:$0xff] }
  0xec   : > { %3851 = vrot.lane.b32.xlu1 %v4516_v16, %s4026_s9  ;;  %v3529_v16 = vunpack.i.h.bf16 %v4825_v11  ;;  %v1421_v11 = vsel %vm1404_vm4, %v4238_v25, %v3408_v53  ;;  %v1455_v53 = vsel %vm1437_vm5, %v1422_v7, %v3489_v51  ;;  %v1471_v43 = vsel %vm1470_vm6, %v1438_v58, %v3528_v47 }
  0xed   : > { %v4892_v8 = vpop.permute.xlu0 %3566  ;;  %v1454_v10 = vsel %vm1437_vm5, %v1421_v11, %v3488_v21  ;;  %v1488_v51 = vsel %vm1470_vm6, %v1455_v53, %v3554_v4  ;;  %v1504_v7 = vsel %vm1503_vm7, %v1471_v43, %v3558_v52 }
  0xee   : > { %v3572_v17 = vpop.permute.xlu1 %3571  ;;  %v1472_v33 = vsel %vm1470_vm6, %v1439_v0, %v3529_v16  ;;  %v3569_v57 = vunpack.i.h.bf16 %v4892_v8  ;;  %v3568_v27 = vunpack.i.l.bf16 %v4892_v8  ;;  %v1487_v21 = vsel %vm1470_vm6, %v1454_v10, %v3553_v23 }
  0xef   : > { %3856 = vrot.lane.b32.xlu0 %v4880_v12, %s4028_s10  ;;  %v3574_v58 = vunpack.i.h.bf16 %v3572_v17  ;;  %v3573_v47 = vunpack.i.l.bf16 %v3572_v17  ;;  %v1505_v11 = vsel %vm1503_vm7, %v1472_v33, %v3559_v31  ;;  %v1520_v23 = vsel %vm1503_vm7, %v1487_v21, %v3563_v22 }
  0xf0   : > { %3861 = vrot.lane.b32.xlu1 %v4884_v49, %s4028_s10  ;;  %v1521_v17 = vsel %vm1503_vm7, %v1488_v51, %v3564_v15  ;;  %v1537_v10 = vsel %vm1536_vm8, %v1504_v7, %v3568_v27  ;;  %v1538_v43 = vsel %vm1536_vm8, %v1505_v11, %v3569_v57 }
  0xf1   : > { %v3577_v60 = vpop.permute.xlu0 %3576  ;;  %v1553_v31 = vsel %vm1536_vm8, %v1520_v23, %v3573_v47 }
  0xf2   : > { %v3582_v50 = vpop.permute.xlu1 %3581  ;;  %v3579_v2 = vunpack.i.h.bf16 %v3577_v60  ;;  %v3578_v0 = vunpack.i.l.bf16 %v3577_v60  ;;  %v1554_v60 = vsel %vm1536_vm8, %v1521_v17, %v3574_v58 }
  0xf3   : > { %3866 = vrot.lane.b32.xlu0 %v6239_v62, %s4029_s11  ;;  %v3584_v61 = vunpack.i.h.bf16 %v3582_v50  ;;  %v3583_v32 = vunpack.i.l.bf16 %v3582_v50 }
  0xf4   : > { %3871 = vrot.lane.b32.xlu1 %v6240_v5, %s4029_s11  ;;  %v1570_v33 = vsel %vm1569_vm9, %v1537_v10, %v3578_v0  ;;  %v1571_v22 = vsel %vm1569_vm9, %v1538_v43, %v3579_v2  ;;  %v6241_v10 = vrot.slane %v4887_v46, 1  ;;  %v6242_v43 = vrot.slane %v4872_v40, 1 }
  0xf5   : > { %v3587_v16 = vpop.permute.xlu0 %3586  ;;  %v1586_v27 = vsel %vm1569_vm9, %v1553_v31, %v3583_v32  ;;  %v1587_v57 = vsel %vm1569_vm9, %v1554_v60, %v3584_v61 }
  0xf6   : > { %v3589_v8 = vunpack.i.h.bf16 %v3587_v16  ;;  %v3588_v30 = vunpack.i.l.bf16 %v3587_v16  ;;  %v3592_v4 = vpop.permute.xlu1 %3591  ;;  %v628_v31 = vsel %vm462_vm1, %v6242_v43, %v6241_v10 }
  0xf7   : > { %3876 = vrot.lane.b32.xlu0 %v4459_v28, %s4030_s12  ;;  %v3594_v52 = vunpack.i.h.bf16 %v3592_v4  ;;  %v3593_v50 = vunpack.i.l.bf16 %v3592_v4 }
  0xf8   : > { %3881 = vrot.lane.b32.xlu1 %v4520_v20, %s4030_s12  ;;  %v1603_v51 = vsel %vm1602_vm10, %v1570_v33, %v3588_v30  ;;  %v1604_v58 = vsel %vm1602_vm10, %v1571_v22, %v3589_v8  ;;  %v634_v30 = vrot.slane %v4897_v56, 2  ;;  %v6247_v33 = vrot.slane %v4872_v40, 2 }
  0xf9   : > { %v3597_v53 = vpop.permute.xlu0 %3596  ;;  %v1619_v0 = vsel %vm1602_vm10, %v1586_v27, %v3593_v50  ;;  %v1620_v32 = vsel %vm1602_vm10, %v1587_v57, %v3594_v52  ;;  %v6245_v52 = vmov %v6241_v10  ;;  %v3373_v27 = vunpack.i.l.bf16 %v4609_v6 }
  0xfa   : > { %v3599_v21 = vunpack.i.h.bf16 %v3597_v53  ;;  %v3598_v15 = vunpack.i.l.bf16 %v3597_v53  ;;  %v3602_v47 = vpop.permute.xlu1 %3601  ;;  %v6246_v53 = vrot.slane %v4887_v46, 2  ;;  %v5006_v57 = vpack.i.bf16 %v4887_v46, %v4872_v40 }
  0xfb   : > { %3886 = vrot.lane.b32.xlu0 %v4880_v12, %s4024_s23  ;;  %v3604_v11 = vunpack.i.h.bf16 %v3602_v47  ;;  %v3603_v2 = vunpack.i.l.bf16 %v3602_v47  ;;  %v3494_v40 = vunpack.i.h.bf16 %v4753_v18  ;;  %v3493_v46 = vunpack.i.l.bf16 %v4753_v18 }
  0xfc   : > { %v1636_v16 = vsel %vm1635_vm11, %v1603_v51, %v3598_v15  ;;  %v1637_v7 = vsel %vm1635_vm11, %v1604_v58, %v3599_v21  ;;  %3891 = vrot.lane.b32.xlu1 %v4884_v49, %s4024_s23  ;;  %v6243_v49 = vmov 0   ;;  %v633_v22 = vsel %vm543_vm2, %v6247_v33, %v6246_v53 }
  0xfd   : > { %v1668_v4 = vpack.c.bf16 %v1637_v7, %v1636_v16  ;;  %v3607_v61 = vpop.permute.xlu0 %3606  ;;  %v1652_v12 = vsel %vm1635_vm11, %v1619_v0, %v3603_v2  ;;  %v1653_v8 = vsel %vm1635_vm11, %v1620_v32, %v3604_v11  ;;  %v6248_v21 = vmov %v6246_v53 }
  0xfe   : > { %v1676_v23 = vpack.c.bf16 %v1653_v8, %v1652_v12  ;;  %v3612_v17 = vpop.permute.xlu1 %3611  ;;  %v635_v15 = vsel %vm543_vm2, %v6248_v21, %v634_v30  ;;  %v3414_v51 = vunpack.i.h.bf16 %v4639_v26  ;;  %v3413_v58 = vunpack.i.l.bf16 %v4639_v26 }
  0xff   : > { %3896 = vrot.lane.b32.xlu0 %v6239_v62, %s4025_s6  ;;  %3083 = vmatmul.mubr.msk.bf16.vlgmr.msra.gmra.mrb[0].mxu0 %vm1714_vm12, %v1668_v4  ;;  %v6244_v62 = vrot.slane %v4897_v56, 1  ;;  %v5002_v56 = vpack.i.bf16 %v4235_v24, %v4238_v25  ;;  %v3453_v16 = vunpack.i.l.bf16 %v4675_v54  ;;  %v5017_v25 = vpack.i.bf16 %v635_v15, %v633_v22 }
 0x100   : > { %1812 = vmatprep.mubr.bf16.mxu0 %v6243_v49  ;;  %3901 = vrot.lane.b32.xlu1 %v6240_v5, %s4025_s6  ;;  %v3374_v5 = vunpack.i.h.bf16 %v4609_v6  ;;  %v3454_v6 = vunpack.i.h.bf16 %v4675_v54  ;;  %v3534_v7 = vunpack.i.h.bf16 %v4838_v37  ;;  %v3533_v26 = vunpack.i.l.bf16 %v4838_v37 }
 0x101   : > { %v4980_v60 = vpop.permute.xlu0 %3616  ;;  %3091 = vmatmul.mubr.msk.bf16.vlgmr.msra.gmra.mrb[0].mxu1 %vm1714_vm12, %v1676_v23  ;;  %v630_v50 = vsel %vm462_vm1, %v6245_v52, %v6244_v62  ;;  %v1407_v54 = vsel %vm1404_vm4, %v4119_v42, %v3373_v27  ;;  %v1424_v2 = vsel %vm1404_vm4, %v4257_v3, %v3414_v51  ;;  %v1423_v18 = vsel %vm1404_vm4, %v4251_v55, %v3413_v58 }
 0x102   : > { %1892 = vmatprep.mubr.bf16.mxu1 %v6243_v49  ;;  %v3622_v47 = vpop.permute.xlu1 %3621  ;;  %v5015_v24 = vpack.i.bf16 %v630_v50, %v628_v31  ;;  %v3609_v0 = vunpack.i.h.bf16 %v3607_v61  ;;  %v3608_v32 = vunpack.i.l.bf16 %v3607_v61  ;;  %v3613_v30 = vunpack.i.l.bf16 %v3612_v17  ;;  %v6249_v50 = vld [vmem:[#allocation12_spill] sm:$0xff] }
 0x103   : > { %3906 = vrot.lane.b32.xlu0 %v4459_v28, %s4026_s9  ;;  %v1408_v28 = vsel %vm1404_vm4, %v4116_v41, %v3374_v5  ;;  %v3614_v41 = vunpack.i.h.bf16 %v3612_v17  ;;  %v1457_v42 = vsel %vm1437_vm5, %v1424_v2, %v3494_v40  ;;  %v1456_v12 = vsel %vm1437_vm5, %v1423_v18, %v3493_v46 }
 0x104   : > { %3911 = vrot.lane.b32.xlu1 %v4520_v20, %s4026_s9  ;;  %v1440_v20 = vsel %vm1437_vm5, %v1407_v54, %v3453_v16  ;;  %v1441_v4 = vsel %vm1437_vm5, %v1408_v28, %v3454_v6  ;;  %v3619_v61 = vunpack.i.h.bf16 %v4980_v60  ;;  %v3618_v23 = vunpack.i.l.bf16 %v4980_v60 }
 0x105   : > { %v3627_v11 = vpop.permute.xlu0 %3626  ;;  %v1473_v3 = vsel %vm1470_vm6, %v1440_v20, %v3533_v26  ;;  %v1474_v55 = vsel %vm1470_vm6, %v1441_v4, %v3534_v7  ;;  %v3624_v10 = vunpack.i.h.bf16 %v3622_v47  ;;  %v3623_v43 = vunpack.i.l.bf16 %v3622_v47 }
 0x106   : > { %v3632_v37 = vpop.permute.xlu1 %3631  ;;  %v1490_v17 = vsel %vm1470_vm6, %v1457_v42, %v3609_v0  ;;  %v1489_v31 = vsel %vm1470_vm6, %v1456_v12, %v3608_v32  ;;  %v3629_v62 = vunpack.i.h.bf16 %v3627_v11  ;;  %v3628_v52 = vunpack.i.l.bf16 %v3627_v11 }
 0x107   : > { %3916 = vrot.lane.b32.xlu0 %v5002_v56, %s4028_s10  ;;  %v1506_v33 = vsel %vm1503_vm7, %v1473_v3, %v3613_v30  ;;  %v1507_v22 = vsel %vm1503_vm7, %v1474_v55, %v3614_v41  ;;  %v3634_v21 = vunpack.i.h.bf16 %v3632_v37  ;;  %v3633_v15 = vunpack.i.l.bf16 %v3632_v37 }
 0x108   : > { %3921 = vrot.lane.b32.xlu1 %v5006_v57, %s4028_s10  ;;  %v1522_v47 = vsel %vm1503_vm7, %v1489_v31, %v3618_v23  ;;  %v1523_v6 = vsel %vm1503_vm7, %v1490_v17, %v3619_v61  ;;  %v1539_v16 = vsel %vm1536_vm8, %v1506_v33, %v3623_v43  ;;  %v1540_v40 = vsel %vm1536_vm8, %v1507_v22, %v3624_v10  ;;  %v6251_v33 = vld [vmem:[#allocation7_spill] sm:$0xff] }
 0x109   : > { %v3637_v8 = vpop.permute.xlu0 %3636  ;;  %v1555_v46 = vsel %vm1536_vm8, %v1522_v47, %v3628_v52  ;;  %v1556_v7 = vsel %vm1536_vm8, %v1523_v6, %v3629_v62  ;;  %v1572_v54 = vsel %vm1569_vm9, %v1539_v16, %v3633_v15  ;;  %v1573_v2 = vsel %vm1569_vm9, %v1540_v40, %v3634_v21  ;;  %v6250_v62 = vld [vmem:[#allocation16_spill] sm:$0xff]  ;;  %v6252_v15 = vld [vmem:[#allocation5_spill] sm:$0xff] }
 0x10a   : > { %v3642_v53 = vpop.permute.xlu1 %3641  ;;  %v3639_v5 = vunpack.i.h.bf16 %v3637_v8  ;;  %v3638_v60 = vunpack.i.l.bf16 %v3637_v8  ;;  %v3379_v52 = vunpack.i.h.bf16 %v6250_v62  ;;  %v3419_v22 = vunpack.i.h.bf16 %v6251_v33 }
 0x10b   : > { %3926 = vrot.lane.b32.xlu0 %v6249_v50, %s4029_s11  ;;  %v3644_v27 = vunpack.i.h.bf16 %v3642_v53  ;;  %v3643_v51 = vunpack.i.l.bf16 %v3642_v53  ;;  %v3378_v53 = vunpack.i.l.bf16 %v6250_v62  ;;  %v3539_v47 = vunpack.i.h.bf16 %v4840_v38 }
 0x10c   : > { %3931 = vrot.lane.b32.xlu1 %v5015_v24, %s4029_s11  ;;  %v1588_v32 = vsel %vm1569_vm9, %v1555_v46, %v3638_v60  ;;  %v1589_v37 = vsel %vm1569_vm9, %v1556_v7, %v3639_v5  ;;  %v1410_v5 = vsel %vm1404_vm4, %v6252_v15, %v3379_v52  ;;  %v6253_v60 = vld [vmem:[#allocation17_spill] sm:$0xff]  ;;  %v3538_v6 = vunpack.i.l.bf16 %v4840_v38  ;;  %v6255_v7 = vld [vmem:[#allocation14_spill] sm:$0xff] }
 0x10d   : > { %v3647_v58 = vpop.permute.xlu0 %3646  ;;  %v1605_v20 = vsel %vm1602_vm10, %v1572_v54, %v3643_v51  ;;  %v1606_v4 = vsel %vm1602_vm10, %v1573_v2, %v3644_v27  ;;  %v3458_v27 = vunpack.i.l.bf16 %v6253_v60  ;;  %v3499_v51 = vunpack.i.h.bf16 %v4757_v19 }
 0x10e   : > { %v3649_v26 = vunpack.i.h.bf16 %v3647_v58  ;;  %v3648_v11 = vunpack.i.l.bf16 %v3647_v58  ;;  %v3652_v28 = vpop.permute.xlu1 %3651  ;;  %v3498_v58 = vunpack.i.l.bf16 %v4757_v19  ;;  %v3980_v46 = vpack.i.bf16 %v6237_v14, %v6238_v9 }
 0x10f   : > { %3936 = vrot.lane.b32.xlu0 %v4468_v35, %s4030_s12  ;;  %v3654_v18 = vunpack.i.h.bf16 %v3652_v28  ;;  %v3653_v0 = vunpack.i.l.bf16 %v3652_v28 }
 0x110   : > { %3941 = vrot.lane.b32.xlu1 %v5017_v25, %s4030_s12  ;;  %v1621_v55 = vsel %vm1602_vm10, %v1588_v32, %v3648_v11  ;;  %v1622_v8 = vsel %vm1602_vm10, %v1589_v37, %v3649_v26  ;;  %v1426_v26 = vsel %vm1404_vm4, %v6255_v7, %v3419_v22  ;;  %v6256_v11 = vld [vmem:[#allocation13_spill] sm:$0xff] }
 0x111   : > { %v3657_v41 = vpop.permute.xlu0 %3656  ;;  %v1638_v30 = vsel %vm1635_vm11, %v1605_v20, %v3653_v0  ;;  %v1639_v42 = vsel %vm1635_vm11, %v1606_v4, %v3654_v18  ;;  %v1459_v9 = vsel %vm1437_vm5, %v1426_v26, %v3499_v51  ;;  %v6257_v20 = vld [vmem:[#allocation24_spill] sm:$0xff] }
 0x112   : > { %v3659_v12 = vunpack.i.h.bf16 %v3657_v41  ;;  %v3658_v3 = vunpack.i.l.bf16 %v3657_v41  ;;  %v1669_v61 = vpack.c.bf16 %v1639_v42, %v1638_v30  ;;  %v3662_v23 = vpop.permute.xlu1 %3661 }
 0x113   : > { %3946 = vrot.lane.b32.xlu0 %v5002_v56, %s4024_s23  ;;  %v3664_v28 = vunpack.i.h.bf16 %v3662_v23  ;;  %v3663_v54 = vunpack.i.l.bf16 %v3662_v23 }
 0x114   : > { %v1654_v10 = vsel %vm1635_vm11, %v1621_v55, %v3658_v3  ;;  %v1655_v43 = vsel %vm1635_vm11, %v1622_v8, %v3659_v12  ;;  %3951 = vrot.lane.b32.xlu1 %v5006_v57, %s4024_s23  ;;  %3084 = vmatmul.mubr.msk.bf16.gmra.mrb[4].mxu0 %vm1714_vm12, %v1669_v61  ;;  %v3418_v57 = vunpack.i.l.bf16 %v6251_v33 }
 0x115   : > { %v1677_v17 = vpack.c.bf16 %v1655_v43, %v1654_v10  ;;  %v3667_v31 = vpop.permute.xlu0 %3666  ;;  %1822 = vmatprep.mubr.bf16.mxu0 %v6243_v49  ;;  %v1492_v3 = vsel %vm1470_vm6, %v1459_v9, %v3664_v28  ;;  %v6261_v9 = vld [vmem:[#allocation19_spill] sm:$0xff] }
 0x116   : > { %v3672_v56 = vpop.permute.xlu1 %3671  ;;  %v1425_v19 = vsel %vm1404_vm4, %v6256_v11, %v3418_v57  ;;  %v3669_v18 = vunpack.i.h.bf16 %v3667_v31  ;;  %v3668_v0 = vunpack.i.l.bf16 %v3667_v31  ;;  %v6260_v11 = vld [vmem:[#allocation23_spill] sm:$0xff] }
 0x117   : > { %3956 = vrot.lane.b32.xlu0 %v6249_v50, %s4025_s6  ;;  %3092 = vmatmul.mubr.msk.bf16.gmra.mrb[4].mxu1 %vm1714_vm12, %v1677_v17  ;;  %v3459_v50 = vunpack.i.h.bf16 %v6253_v60  ;;  %v1458_v14 = vsel %vm1437_vm5, %v1425_v19, %v3498_v58  ;;  %v3674_v41 = vunpack.i.h.bf16 %v3672_v56  ;;  %v6259_v58 = vld [vmem:[#allocation4_spill] sm:$0xff] }
 0x118   : > { %1902 = vmatprep.mubr.bf16.mxu1 %v6243_v49  ;;  %3961 = vrot.lane.b32.xlu1 %v5015_v24, %s4025_s6  ;;  %v6254_v24 = vld [vmem:[#allocation6_spill] sm:$0xff]  ;;  %v1491_v12 = vsel %vm1470_vm6, %v1458_v14, %v3663_v54 }
 0x119   : > { %v3677_v21 = vpop.permute.xlu0 %3676  ;;  %v1409_v40 = vsel %vm1404_vm4, %v6254_v24, %v3378_v53  ;;  %v6258_v53 = vld [vmem:[#allocation15_spill] sm:$0xff]  ;;  %v1525_v57 = vsel %vm1503_vm7, %v1492_v3, %v3674_v41 }
 0x11a   : > { %v3682_v16 = vpop.permute.xlu1 %3681  ;;  %v1442_v38 = vsel %vm1437_vm5, %v1409_v40, %v3458_v27  ;;  %v3679_v30 = vunpack.i.h.bf16 %v3677_v21  ;;  %v3678_v42 = vunpack.i.l.bf16 %v3677_v21 }
 0x11b   : > { %3966 = vrot.lane.b32.xlu0 %v4468_v35, %s4026_s9  ;;  %v1443_v35 = vsel %vm1437_vm5, %v1410_v5, %v3459_v50  ;;  %v1475_v32 = vsel %vm1470_vm6, %v1442_v38, %v3538_v6  ;;  %v3684_v55 = vunpack.i.h.bf16 %v3682_v16  ;;  %v3683_v8 = vunpack.i.l.bf16 %v3682_v16 }
 0x11c   : > { %3971 = vrot.lane.b32.xlu1 %v5017_v25, %s4026_s9  ;;  %v1476_v37 = vsel %vm1470_vm6, %v1443_v35, %v3539_v47  ;;  %v3673_v25 = vunpack.i.l.bf16 %v3672_v56  ;;  %v1508_v23 = vsel %vm1503_vm7, %v1475_v32, %v3668_v0 }
 0x11d   : > { %v3687_v2 = vpop.permute.xlu0 %3686  ;;  %v1509_v10 = vsel %vm1503_vm7, %v1476_v37, %v3669_v18  ;;  %v1541_v21 = vsel %vm1536_vm8, %v1508_v23, %v3678_v42  ;;  %v1558_v60 = vsel %vm1536_vm8, %v1525_v57, %v3684_v55 }
 0x11e   : > { %v3692_v4 = vpop.permute.xlu1 %3691  ;;  %v3689_v43 = vunpack.i.h.bf16 %v3687_v2  ;;  %v3688_v17 = vunpack.i.l.bf16 %v3687_v2  ;;  %v1524_v22 = vsel %vm1503_vm7, %v1491_v12, %v3673_v25  ;;  %v1542_v15 = vsel %vm1536_vm8, %v1509_v10, %v3679_v30 }
 0x11f   : > { %3976 = vrot.lane.b32.xlu0 %v6257_v20, %s4028_s10  ;;  %v3694_v31 = vunpack.i.h.bf16 %v3692_v4  ;;  %v3693_v62 = vunpack.i.l.bf16 %v3692_v4  ;;  %v1557_v5 = vsel %vm1536_vm8, %v1524_v22, %v3683_v8 }
 0x120   : > { %3981 = vrot.lane.b32.xlu1 %v3980_v46, %s4028_s10  ;;  %v1574_v47 = vsel %vm1569_vm9, %v1541_v21, %v3688_v17  ;;  %v1575_v6 = vsel %vm1569_vm9, %v1542_v15, %v3689_v43 }
 0x121   : > { %v3697_v61 = vpop.permute.xlu0 %3696  ;;  %v1590_v40 = vsel %vm1569_vm9, %v1557_v5, %v3693_v62  ;;  %v1591_v46 = vsel %vm1569_vm9, %v1558_v60, %v3694_v31 }
 0x122   : > { %v3699_v52 = vunpack.i.h.bf16 %v3697_v61  ;;  %v3698_v56 = vunpack.i.l.bf16 %v3697_v61  ;;  %v3702_v33 = vpop.permute.xlu1 %3701 }
 0x123   : > { %3986 = vrot.lane.b32.xlu0 %v6258_v53, %s4029_s11  ;;  %v3704_v50 = vunpack.i.h.bf16 %v3702_v33  ;;  %v3703_v27 = vunpack.i.l.bf16 %v3702_v33 }
 0x124   : > { %3991 = vrot.lane.b32.xlu1 %v6259_v58, %s4029_s11  ;;  %v1607_v7 = vsel %vm1602_vm10, %v1574_v47, %v3698_v56  ;;  %v1608_v26 = vsel %vm1602_vm10, %v1575_v6, %v3699_v52 }
 0x125   : > { %v3707_v51 = vpop.permute.xlu0 %3706  ;;  %v1623_v38 = vsel %vm1602_vm10, %v1590_v40, %v3703_v27  ;;  %v1624_v18 = vsel %vm1602_vm10, %v1591_v46, %v3704_v50 }
 0x126   : > { %v3709_v16 = vunpack.i.h.bf16 %v3707_v51  ;;  %v3708_v24 = vunpack.i.l.bf16 %v3707_v51  ;;  %v3712_v19 = vpop.permute.xlu1 %3711 }
 0x127   : > { %3996 = vrot.lane.b32.xlu0 %v6260_v11, %s4030_s12  ;;  %v3714_v2 = vunpack.i.h.bf16 %v3712_v19  ;;  %v3713_v35 = vunpack.i.l.bf16 %v3712_v19 }
 0x128   : > { %v1640_v28 = vsel %vm1635_vm11, %v1607_v7, %v3708_v24  ;;  %v1641_v54 = vsel %vm1635_vm11, %v1608_v26, %v3709_v16  ;;  %4001 = vrot.lane.b32.xlu1 %v6261_v9, %s4030_s12 }
 0x129   : > { %v1670_v0 = vpack.c.bf16 %v1641_v54, %v1640_v28  ;;  %v3717_v14 = vpop.permute.xlu0 %3716  ;;  %v1656_v32 = vsel %vm1635_vm11, %v1623_v38, %v3713_v35  ;;  %v1657_v37 = vsel %vm1635_vm11, %v1624_v18, %v3714_v2 }
 0x12a   : > { %v1678_v20 = vpack.c.bf16 %v1657_v37, %v1656_v32  ;;  %v3722_v4 = vpop.permute.xlu1 %3721  ;;  %v3719_v42 = vunpack.i.h.bf16 %v3717_v14  ;;  %v3718_v12 = vunpack.i.l.bf16 %v3717_v14 }
 0x12b   : > { %3085 = vmatmul.mubr.msk.bf16.gmra.mrb[8].mxu0 %vm1714_vm12, %v1670_v0  ;;  %v3724_v55 = vunpack.i.h.bf16 %v3722_v4  ;;  %v3723_v8 = vunpack.i.l.bf16 %v3722_v4 }
 0x12c   : > { %1832 = vmatprep.mubr.bf16.mxu0 %v6243_v49  ;;  %3093 = vmatmul.mubr.msk.bf16.gmra.mrb[8].mxu1 %vm1714_vm12, %v1678_v20  ;;  %v1494_v31 = vsel %vm1470_vm6, %v4778_v36, %v3719_v42  ;;  %v1493_v62 = vsel %vm1470_vm6, %v4781_v48, %v3718_v12 }
 0x12d   : > { %v3727_v41 = vpop.permute.xlu0 %3726  ;;  %1912 = vmatprep.mubr.bf16.mxu1 %v6243_v49  ;;  %v1510_v33 = vsel %vm1503_vm7, %v4848_v13, %v3723_v8  ;;  %v1511_v22 = vsel %vm1503_vm7, %v4852_v39, %v3724_v55 }
 0x12e   : > { %v3732_v25 = vpop.permute.xlu1 %3731  ;;  %v3729_v23 = vunpack.i.h.bf16 %v3727_v41  ;;  %v3728_v10 = vunpack.i.l.bf16 %v3727_v41 }
 0x12f   : > { %v3734_v43 = vunpack.i.h.bf16 %v3732_v25  ;;  %v3733_v17 = vunpack.i.l.bf16 %v3732_v25 }
 0x130   : > { %v1526_v36 = vsel %vm1503_vm7, %v1493_v62, %v3728_v10  ;;  %v1527_v48 = vsel %vm1503_vm7, %v1494_v31, %v3729_v23 }
 0x131   : > { %v3737_v30 = vpop.permute.xlu0 %3736  ;;  %v1543_v51 = vsel %vm1536_vm8, %v1510_v33, %v3733_v17  ;;  %v1544_v58 = vsel %vm1536_vm8, %v1511_v22, %v3734_v43 }
 0x132   : > { %v3742_v3 = vpop.permute.xlu1 %3741  ;;  %v3739_v52 = vunpack.i.h.bf16 %v3737_v30  ;;  %v3738_v56 = vunpack.i.l.bf16 %v3737_v30 }
 0x133   : > { %v3744_v57 = vunpack.i.h.bf16 %v3742_v3  ;;  %v3743_v21 = vunpack.i.l.bf16 %v3742_v3 }
 0x134   : > { %v1559_v13 = vsel %vm1536_vm8, %v1526_v36, %v3738_v56  ;;  %v1560_v47 = vsel %vm1536_vm8, %v1527_v48, %v3739_v52 }
 0x135   : > { %v3747_v61 = vpop.permute.xlu0 %3746  ;;  %v1576_v24 = vsel %vm1569_vm9, %v1543_v51, %v3743_v21  ;;  %v1577_v40 = vsel %vm1569_vm9, %v1544_v58, %v3744_v57 }
 0x136   : > { %v3752_v53 = vpop.permute.xlu1 %3751  ;;  %v3749_v15 = vunpack.i.h.bf16 %v3747_v61  ;;  %v3748_v5 = vunpack.i.l.bf16 %v3747_v61 }
 0x137   : > { %v3754_v60 = vunpack.i.h.bf16 %v3752_v53  ;;  %v3753_v50 = vunpack.i.l.bf16 %v3752_v53 }
 0x138   : > { %v1592_v26 = vsel %vm1569_vm9, %v1559_v13, %v3748_v5  ;;  %v1593_v11 = vsel %vm1569_vm9, %v1560_v47, %v3749_v15 }
 0x139   : > { %v3757_v27 = vpop.permute.xlu0 %3756  ;;  %v1609_v19 = vsel %vm1602_vm10, %v1576_v24, %v3753_v50  ;;  %v1610_v28 = vsel %vm1602_vm10, %v1577_v40, %v3754_v60 }
 0x13a   : > { %v3759_v39 = vunpack.i.h.bf16 %v3757_v27  ;;  %v3758_v6 = vunpack.i.l.bf16 %v3757_v27  ;;  %v3762_v16 = vpop.permute.xlu1 %3761 }
 0x13b   : > { %v3764_v46 = vunpack.i.h.bf16 %v3762_v16  ;;  %v3763_v7 = vunpack.i.l.bf16 %v3762_v16 }
 0x13c   : > { %v1625_v0 = vsel %vm1602_vm10, %v1592_v26, %v3758_v6  ;;  %v1626_v14 = vsel %vm1602_vm10, %v1593_v11, %v3759_v39 }
 0x13d   : > { %v3767_v54 = vpop.permute.xlu0 %3766  ;;  %v1642_v2 = vsel %vm1635_vm11, %v1609_v19, %v3763_v7  ;;  %v1643_v35 = vsel %vm1635_vm11, %v1610_v28, %v3764_v46 }
 0x13e   : > { %v3769_v38 = vunpack.i.h.bf16 %v3767_v54  ;;  %v3768_v18 = vunpack.i.l.bf16 %v3767_v54  ;;  %v1671_v9 = vpack.c.bf16 %v1643_v35, %v1642_v2  ;;  %v3772_v32 = vpop.permute.xlu1 %3771 }
 0x13f   : > { %v3774_v12 = vunpack.i.h.bf16 %v3772_v32  ;;  %v3773_v3 = vunpack.i.l.bf16 %v3772_v32 }
 0x140   : > { %v1658_v37 = vsel %vm1635_vm11, %v1625_v0, %v3768_v18  ;;  %v1659_v20 = vsel %vm1635_vm11, %v1626_v14, %v3769_v38  ;;  %3086 = vmatmul.mubr.msk.bf16.gmra.mrb[12].mxu0 %vm1714_vm12, %v1671_v9 }
 0x141   : > { %v1679_v4 = vpack.c.bf16 %v1659_v20, %v1658_v37  ;;  %v3777_v41 = vpop.permute.xlu0 %3776  ;;  %1842 = vmatprep.mubr.bf16.mxu0 %v6243_v49  ;;  %v1495_v62 = vsel %vm1470_vm6, %v4791_v44, %v3773_v3  ;;  %v1496_v52 = vsel %vm1470_vm6, %v4794_v34, %v3774_v12 }
 0x142   : > { %v3782_v25 = vpop.permute.xlu1 %3781  ;;  %v3779_v8 = vunpack.i.h.bf16 %v3777_v41  ;;  %v3778_v61 = vunpack.i.l.bf16 %v3777_v41 }
 0x143   : > { %3094 = vmatmul.mubr.msk.bf16.gmra.mrb[12].mxu1 %vm1714_vm12, %v1679_v4  ;;  %v3784_v10 = vunpack.i.h.bf16 %v3782_v25  ;;  %v3783_v43 = vunpack.i.l.bf16 %v3782_v25 }
 0x144   : > { %1922 = vmatprep.mubr.bf16.mxu1 %v6243_v49  ;;  %v1512_v22 = vsel %vm1503_vm7, %v4860_v1, %v3778_v61  ;;  %v1513_v57 = vsel %vm1503_vm7, %v4864_v63, %v3779_v8 }
 0x145   : > { %v3787_v30 = vpop.permute.xlu0 %3786  ;;  %v1528_v44 = vsel %vm1503_vm7, %v1495_v62, %v3783_v43  ;;  %v1529_v34 = vsel %vm1503_vm7, %v1496_v52, %v3784_v10 }
 0x146   : > { %v3792_v42 = vpop.permute.xlu1 %3791  ;;  %v3789_v17 = vunpack.i.h.bf16 %v3787_v30  ;;  %v3788_v31 = vunpack.i.l.bf16 %v3787_v30 }
 0x147   : > { %v3794_v56 = vunpack.i.h.bf16 %v3792_v42  ;;  %v3793_v53 = vunpack.i.l.bf16 %v3792_v42 }
 0x148   : > { %v1545_v48 = vsel %vm1536_vm8, %v1512_v22, %v3788_v31  ;;  %v1546_v51 = vsel %vm1536_vm8, %v1513_v57, %v3789_v17 }
 0x149   : > { %v3797_v55 = vpop.permute.xlu0 %3796  ;;  %v1561_v1 = vsel %vm1536_vm8, %v1528_v44, %v3793_v53  ;;  %v1562_v58 = vsel %vm1536_vm8, %v1529_v34, %v3794_v56  ;;  %v6262_v53 = vld [vmem:[#allocation25_spill] sm:$0xff] }
 0x14a   : > { %v3802_v23 = vpop.permute.xlu1 %3801  ;;  %v3799_v21 = vunpack.i.h.bf16 %v3797_v55  ;;  %v3798_v15 = vunpack.i.l.bf16 %v3797_v55 }
 0x14b   : > { %v3804_v5 = vunpack.i.h.bf16 %v3802_v23  ;;  %v3803_v60 = vunpack.i.l.bf16 %v3802_v23 }
 0x14c   : > { %v1578_v39 = vsel %vm1569_vm9, %v1545_v48, %v3798_v15  ;;  %v1579_v6 = vsel %vm1569_vm9, %v1546_v51, %v3799_v21 }
 0x14d   : > { %v3807_v33 = vpop.permute.xlu0 %3806  ;;  %v1594_v40 = vsel %vm1569_vm9, %v1561_v1, %v3803_v60  ;;  %v1595_v46 = vsel %vm1569_vm9, %v1562_v58, %v3804_v5 }
 0x14e   : > { %v3809_v50 = vunpack.i.h.bf16 %v3807_v33  ;;  %v3808_v27 = vunpack.i.l.bf16 %v3807_v33  ;;  %v3812_v36 = vpop.permute.xlu1 %3811 }
 0x14f   : > { %v3814_v63 = vunpack.i.h.bf16 %v3812_v36  ;;  %v3813_v13 = vunpack.i.l.bf16 %v3812_v36 }
 0x150   : > { %v1611_v7 = vsel %vm1602_vm10, %v1578_v39, %v3808_v27  ;;  %v1612_v26 = vsel %vm1602_vm10, %v1579_v6, %v3809_v50 }
 0x151   : > { %v3817_v47 = vpop.permute.xlu0 %3816  ;;  %v1627_v35 = vsel %vm1602_vm10, %v1594_v40, %v3813_v13  ;;  %v1628_v38 = vsel %vm1602_vm10, %v1595_v46, %v3814_v63 }
 0x152   : > { %v3819_v16 = vunpack.i.h.bf16 %v3817_v47  ;;  %v3818_v24 = vunpack.i.l.bf16 %v3817_v47  ;;  %v3822_v11 = vpop.permute.xlu1 %3821 }
 0x153   : > { %v3824_v54 = vunpack.i.h.bf16 %v3822_v11  ;;  %v3823_v2 = vunpack.i.l.bf16 %v3822_v11 }
 0x154   : > { %v1644_v19 = vsel %vm1635_vm11, %v1611_v7, %v3818_v24  ;;  %v1645_v28 = vsel %vm1635_vm11, %v1612_v26, %v3819_v16 }
 0x155   : > { %v1672_v18 = vpack.c.bf16 %v1645_v28, %v1644_v19  ;;  %v3827_v0 = vpop.permute.xlu0 %3826  ;;  %v1660_v14 = vsel %vm1635_vm11, %v1627_v35, %v3823_v2  ;;  %v1661_v9 = vsel %vm1635_vm11, %v1628_v38, %v3824_v54 }
 0x156   : > { %v1680_v32 = vpack.c.bf16 %v1661_v9, %v1660_v14  ;;  %v3832_v37 = vpop.permute.xlu1 %3831  ;;  %v3829_v25 = vunpack.i.h.bf16 %v3827_v0  ;;  %v3828_v30 = vunpack.i.l.bf16 %v3827_v0 }
 0x157   : > { %3087 = vmatmul.mubr.msk.bf16.gmra.mrb[16].mxu0 %vm1714_vm12, %v1672_v18  ;;  %v3834_v12 = vunpack.i.h.bf16 %v3832_v37  ;;  %v3833_v3 = vunpack.i.l.bf16 %v3832_v37 }
 0x158   : > { %1852 = vmatprep.mubr.bf16.mxu0 %v6243_v49  ;;  %3095 = vmatmul.mubr.msk.bf16.gmra.mrb[16].mxu1 %vm1714_vm12, %v1680_v32  ;;  %v1482_v23 = vsel %vm1470_vm6, %v4721_v29, %v3829_v25  ;;  %v1481_v10 = vsel %vm1470_vm6, %v4724_v45, %v3828_v30 }
 0x159   : > { %v3837_v20 = vpop.permute.xlu0 %3836  ;;  %1932 = vmatprep.mubr.bf16.mxu1 %v6243_v49  ;;  %v1497_v56 = vsel %vm1470_vm6, %v4807_v59, %v3833_v3  ;;  %v1498_v33 = vsel %vm1470_vm6, %v6262_v53, %v3834_v12 }
 0x15a   : > { %v3842_v4 = vpop.permute.xlu1 %3841  ;;  %v3839_v8 = vunpack.i.h.bf16 %v3837_v20  ;;  %v3838_v61 = vunpack.i.l.bf16 %v3837_v20 }
 0x15b   : > { %v3844_v17 = vunpack.i.h.bf16 %v3842_v4  ;;  %v3843_v31 = vunpack.i.l.bf16 %v3842_v4 }
 0x15c   : > { %v1514_v15 = vsel %vm1503_vm7, %v1481_v10, %v3838_v61  ;;  %v1515_v29 = vsel %vm1503_vm7, %v1482_v23, %v3839_v8  ;;  %v6263_v23 = vld [vmem:[#allocation8_spill] sm:$0xff] }
 0x15d   : > { %v3847_v41 = vpop.permute.xlu0 %3846  ;;  %v1530_v34 = vsel %vm1503_vm7, %v1497_v56, %v3843_v31  ;;  %v1531_v59 = vsel %vm1503_vm7, %v1498_v33, %v3844_v17  ;;  %v6265_v33 = vld [vmem:[#allocation10_spill] sm:$0xff] }
 0x15e   : > { %v3852_v42 = vpop.permute.xlu1 %3851  ;;  %v3849_v62 = vunpack.i.h.bf16 %v3847_v41  ;;  %v3848_v52 = vunpack.i.l.bf16 %v3847_v41 }
 0x15f   : > { %v3854_v22 = vunpack.i.h.bf16 %v3852_v42  ;;  %v3853_v57 = vunpack.i.l.bf16 %v3852_v42 }
 0x160   : > { %v1547_v48 = vsel %vm1536_vm8, %v1514_v15, %v3848_v52  ;;  %v1548_v51 = vsel %vm1536_vm8, %v1515_v29, %v3849_v62 }
 0x161   : > { %v3857_v55 = vpop.permute.xlu0 %3856  ;;  %v1563_v1 = vsel %vm1536_vm8, %v1530_v34, %v3853_v57  ;;  %v1564_v58 = vsel %vm1536_vm8, %v1531_v59, %v3854_v22  ;;  %v6266_v57 = vld [vmem:[#allocation26_spill] sm:$0xff] }
 0x162   : > { %v3862_v43 = vpop.permute.xlu1 %3861  ;;  %v3859_v5 = vunpack.i.h.bf16 %v3857_v55  ;;  %v3858_v45 = vunpack.i.l.bf16 %v3857_v55 }
 0x163   : > { %v3864_v60 = vunpack.i.h.bf16 %v3862_v43  ;;  %v3863_v50 = vunpack.i.l.bf16 %v3862_v43  ;;  %v6264_v43 = vld [vmem:[#allocation18_spill] sm:$0xff] }
 0x164   : > { %v1580_v39 = vsel %vm1569_vm9, %v1547_v48, %v3858_v45  ;;  %v1581_v6 = vsel %vm1569_vm9, %v1548_v51, %v3859_v5 }
 0x165   : > { %v3867_v21 = vpop.permute.xlu0 %3866  ;;  %v1596_v40 = vsel %vm1569_vm9, %v1563_v1, %v3863_v50  ;;  %v1597_v46 = vsel %vm1569_vm9, %v1564_v58, %v3864_v60 }
 0x166   : > { %v3869_v27 = vunpack.i.h.bf16 %v3867_v21  ;;  %v3868_v36 = vunpack.i.l.bf16 %v3867_v21  ;;  %v3872_v44 = vpop.permute.xlu1 %3871 }
 0x167   : > { %v3874_v63 = vunpack.i.h.bf16 %v3872_v44  ;;  %v3873_v13 = vunpack.i.l.bf16 %v3872_v44 }
 0x168   : > { %v1613_v7 = vsel %vm1602_vm10, %v1580_v39, %v3868_v36  ;;  %v1614_v26 = vsel %vm1602_vm10, %v1581_v6, %v3869_v27 }
 0x169   : > { %v3877_v47 = vpop.permute.xlu0 %3876  ;;  %v1629_v35 = vsel %vm1602_vm10, %v1596_v40, %v3873_v13  ;;  %v1630_v38 = vsel %vm1602_vm10, %v1597_v46, %v3874_v63 }
 0x16a   : > { %v3879_v16 = vunpack.i.h.bf16 %v3877_v47  ;;  %v3878_v24 = vunpack.i.l.bf16 %v3877_v47  ;;  %v3882_v11 = vpop.permute.xlu1 %3881 }
 0x16b   : > { %v3884_v54 = vunpack.i.h.bf16 %v3882_v11  ;;  %v3883_v2 = vunpack.i.l.bf16 %v3882_v11 }
 0x16c   : > { %v1646_v19 = vsel %vm1635_vm11, %v1613_v7, %v3878_v24  ;;  %v1647_v28 = vsel %vm1635_vm11, %v1614_v26, %v3879_v16 }
 0x16d   : > { %v1673_v18 = vpack.c.bf16 %v1647_v28, %v1646_v19  ;;  %v3887_v0 = vpop.permute.xlu0 %3886  ;;  %v1662_v14 = vsel %vm1635_vm11, %v1629_v35, %v3883_v2  ;;  %v1663_v9 = vsel %vm1635_vm11, %v1630_v38, %v3884_v54 }
 0x16e   : > { %v1681_v32 = vpack.c.bf16 %v1663_v9, %v1662_v14  ;;  %v3892_v37 = vpop.permute.xlu1 %3891  ;;  %v3889_v25 = vunpack.i.h.bf16 %v3887_v0  ;;  %v3888_v30 = vunpack.i.l.bf16 %v3887_v0 }
 0x16f   : > { %3088 = vmatmul.mubr.msk.bf16.gmra.mrb[20].mxu0 %vm1714_vm12, %v1673_v18  ;;  %v3894_v12 = vunpack.i.h.bf16 %v3892_v37  ;;  %v3893_v3 = vunpack.i.l.bf16 %v3892_v37 }
 0x170   : > { %1862 = vmatprep.mubr.bf16.mxu0 %v6243_v49  ;;  %3096 = vmatmul.mubr.msk.bf16.gmra.mrb[20].mxu1 %vm1714_vm12, %v1681_v32  ;;  %v1483_v10 = vsel %vm1470_vm6, %v6263_v23, %v3888_v30  ;;  %v1484_v17 = vsel %vm1470_vm6, %v6264_v43, %v3889_v25 }
 0x171   : > { %v3897_v20 = vpop.permute.xlu0 %3896  ;;  %1942 = vmatprep.mubr.bf16.mxu1 %v6243_v49  ;;  %v1499_v22 = vsel %vm1470_vm6, %v6265_v33, %v3893_v3  ;;  %v1500_v21 = vsel %vm1470_vm6, %v6266_v57, %v3894_v12  ;;  %v6269_v57 = vld [vmem:[#allocation27_spill] sm:$0xff] }
 0x172   : > { %v3902_v4 = vpop.permute.xlu1 %3901  ;;  %v3899_v8 = vunpack.i.h.bf16 %v3897_v20  ;;  %v3898_v61 = vunpack.i.l.bf16 %v3897_v20 }
 0x173   : > { %v3904_v62 = vunpack.i.h.bf16 %v3902_v4  ;;  %v3903_v52 = vunpack.i.l.bf16 %v3902_v4 }
 0x174   : > { %v1516_v45 = vsel %vm1503_vm7, %v1483_v10, %v3898_v61  ;;  %v1517_v60 = vsel %vm1503_vm7, %v1484_v17, %v3899_v8  ;;  %v6267_v17 = vld [vmem:[#allocation9_spill] sm:$0xff] }
 0x175   : > { %v3907_v41 = vpop.permute.xlu0 %3906  ;;  %v1532_v51 = vsel %vm1503_vm7, %v1499_v22, %v3903_v52  ;;  %v1533_v1 = vsel %vm1503_vm7, %v1500_v21, %v3904_v62  ;;  %v6268_v62 = vld [vmem:[#allocation20_spill] sm:$0xff] }
 0x176   : > { %v3912_v42 = vpop.permute.xlu1 %3911  ;;  %v3909_v56 = vunpack.i.h.bf16 %v3907_v41  ;;  %v3908_v53 = vunpack.i.l.bf16 %v3907_v41 }
 0x177   : > { %v3914_v15 = vunpack.i.h.bf16 %v3912_v42  ;;  %v3913_v29 = vunpack.i.l.bf16 %v3912_v42 }
 0x178   : > { %v1549_v58 = vsel %vm1536_vm8, %v1516_v45, %v3908_v53  ;;  %v1550_v63 = vsel %vm1536_vm8, %v1517_v60, %v3909_v56 }
 0x179   : > { %v3917_v55 = vpop.permute.xlu0 %3916  ;;  %v1565_v13 = vsel %vm1536_vm8, %v1532_v51, %v3913_v29  ;;  %v1566_v47 = vsel %vm1536_vm8, %v1533_v1, %v3914_v15  ;;  %v6270_v15 = vld [vmem:[#allocation21_spill] sm:$0xff] }
 0x17a   : > { %v3922_v31 = vpop.permute.xlu1 %3921  ;;  %v3919_v50 = vunpack.i.h.bf16 %v3917_v55  ;;  %v3918_v27 = vunpack.i.l.bf16 %v3917_v55 }
 0x17b   : > { %v3924_v36 = vunpack.i.h.bf16 %v3922_v31  ;;  %v3923_v44 = vunpack.i.l.bf16 %v3922_v31 }
 0x17c   : > { %v1582_v24 = vsel %vm1569_vm9, %v1549_v58, %v3918_v27  ;;  %v1583_v40 = vsel %vm1569_vm9, %v1550_v63, %v3919_v50 }
 0x17d   : > { %v3927_v5 = vpop.permute.xlu0 %3926  ;;  %v1598_v26 = vsel %vm1569_vm9, %v1565_v13, %v3923_v44  ;;  %v1599_v11 = vsel %vm1569_vm9, %v1566_v47, %v3924_v36 }
 0x17e   : > { %v3929_v34 = vunpack.i.h.bf16 %v3927_v5  ;;  %v3928_v59 = vunpack.i.l.bf16 %v3927_v5  ;;  %v3932_v48 = vpop.permute.xlu1 %3931 }
 0x17f   : > { %v3934_v39 = vunpack.i.h.bf16 %v3932_v48  ;;  %v3933_v6 = vunpack.i.l.bf16 %v3932_v48 }
 0x180   : > { %v1615_v19 = vsel %vm1602_vm10, %v1582_v24, %v3928_v59  ;;  %v1616_v28 = vsel %vm1602_vm10, %v1583_v40, %v3929_v34 }
 0x181   : > { %v3937_v16 = vpop.permute.xlu0 %3936  ;;  %v1631_v0 = vsel %vm1602_vm10, %v1598_v26, %v3933_v6  ;;  %v1632_v14 = vsel %vm1602_vm10, %v1599_v11, %v3934_v39 }
 0x182   : > { %v3939_v46 = vunpack.i.h.bf16 %v3937_v16  ;;  %v3938_v7 = vunpack.i.l.bf16 %v3937_v16  ;;  %v3942_v54 = vpop.permute.xlu1 %3941 }
 0x183   : > { %v3944_v38 = vunpack.i.h.bf16 %v3942_v54  ;;  %v3943_v18 = vunpack.i.l.bf16 %v3942_v54 }
 0x184   : > { %v1648_v2 = vsel %vm1635_vm11, %v1615_v19, %v3938_v7  ;;  %v1649_v35 = vsel %vm1635_vm11, %v1616_v28, %v3939_v46 }
 0x185   : > { %v1674_v9 = vpack.c.bf16 %v1649_v35, %v1648_v2  ;;  %v3947_v32 = vpop.permute.xlu0 %3946  ;;  %v1664_v37 = vsel %vm1635_vm11, %v1631_v0, %v3943_v18  ;;  %v1665_v20 = vsel %vm1635_vm11, %v1632_v14, %v3944_v38 }
 0x186   : > { %v1682_v4 = vpack.c.bf16 %v1665_v20, %v1664_v37  ;;  %v3952_v41 = vpop.permute.xlu1 %3951  ;;  %v3949_v12 = vunpack.i.h.bf16 %v3947_v32  ;;  %v3948_v3 = vunpack.i.l.bf16 %v3947_v32 }
 0x187   : > { %3089 = vmatmul.mubr.msk.bf16.gmra.mrb[24].mxu0 %vm1714_vm12, %v1674_v9  ;;  %v3954_v8 = vunpack.i.h.bf16 %v3952_v41  ;;  %v3953_v61 = vunpack.i.l.bf16 %v3952_v41 }
 0x188   : > { %1872 = vmatprep.mubr.bf16.mxu0 %v6243_v49  ;;  %3097 = vmatmul.mubr.msk.bf16.gmra.mrb[24].mxu1 %vm1714_vm12, %v1682_v4  ;;  %v1486_v31 = vsel %vm1470_vm6, %v6267_v17, %v3949_v12  ;;  %v1485_v52 = vsel %vm1470_vm6, %v6268_v62, %v3948_v3  ;;  %v1963_v12 = vld [vmem:[%s6103_s2] sm:$0x3] }
 0x189   : > { %v3957_v25 = vpop.permute.xlu0 %3956  ;;  %1952 = vmatprep.mubr.bf16.mxu1 %v6243_v49  ;;  %v1501_v21 = vsel %vm1470_vm6, %v6269_v57, %v3953_v61  ;;  %v1502_v29 = vsel %vm1470_vm6, %v6270_v15, %v3954_v8 }
 0x18a   : > { %v3962_v30 = vpop.permute.xlu1 %3961  ;;  %v3959_v10 = vunpack.i.h.bf16 %v3957_v25  ;;  %v3958_v43 = vunpack.i.l.bf16 %v3957_v25  ;;  %v1965_v25 = vlaneseq }
 0x18b   : > { %v3964_v53 = vunpack.i.h.bf16 %v3962_v30  ;;  %v3963_v33 = vunpack.i.l.bf16 %v3962_v30 }
 0x18c   : > { %v1518_v50 = vsel %vm1503_vm7, %v1485_v52, %v3958_v43  ;;  %v1519_v27 = vsel %vm1503_vm7, %v1486_v31, %v3959_v10  ;;  %v1966_v30 = vshrl.u32 %v1965_v25, 7 }
 0x18d   : > { %v3967_v42 = vpop.permute.xlu0 %3966  ;;  %v1534_v58 = vsel %vm1503_vm7, %v1501_v21, %v3963_v33  ;;  %v1535_v63 = vsel %vm1503_vm7, %v1502_v29, %v3964_v53 }
 0x18e   : > { %v3972_v55 = vpop.permute.xlu1 %3971  ;;  %v3969_v49 = vunpack.i.h.bf16 %v3967_v42  ;;  %v3968_v22 = vunpack.i.l.bf16 %v3967_v42  ;;  %v1967_v42 = vsub.s32 0, %v1966_v30  ;;  %v1971_v3 = vsub.s32 1, %v1966_v30 }
 0x18f   : > { %v3974_v5 = vunpack.i.h.bf16 %v3972_v55  ;;  %v3973_v45 = vunpack.i.l.bf16 %v3972_v55  ;;  %v2039_v55 = vld [vmem:[%s6104_s3] sm:$0x3] }
 0x190   : > { %v1551_v13 = vsel %vm1536_vm8, %v1518_v50, %v3968_v22  ;;  %v1552_v47 = vsel %vm1536_vm8, %v1519_v27, %v3969_v49  ;;  %v5314_v8 = vrot.slane %v1963_v12, %v1967_v42  ;;  %v5316_v61 = vrot.slane %v1963_v12, %v1971_v3 }
 0x191   : > { %v3977_v23 = vpop.permute.xlu0 %3976  ;;  %v1567_v39 = vsel %vm1536_vm8, %v1534_v58, %v3973_v45  ;;  %v1568_v6 = vsel %vm1536_vm8, %v1535_v63, %v3974_v5  ;;  %v5320_v43 = vrot.slane %v2039_v55, %v1971_v3 }
 0x192   : > { %v3982_v56 = vpop.permute.xlu1 %3981  ;;  %v3979_v36 = vunpack.i.h.bf16 %v3977_v23  ;;  %v3978_v44 = vunpack.i.l.bf16 %v3977_v23  ;;  %v5318_v23 = vrot.slane %v2039_v55, %v1967_v42 }
 0x193   : > { %v3984_v34 = vunpack.i.h.bf16 %v3982_v56  ;;  %v3983_v59 = vunpack.i.l.bf16 %v3982_v56 }
 0x194   : > { %v1584_v46 = vsel %vm1569_vm9, %v1551_v13, %v3978_v44  ;;  %v1585_v7 = vsel %vm1569_vm9, %v1552_v47, %v3979_v36 }
 0x195   : > { %v3987_v60 = vpop.permute.xlu0 %3986  ;;  %v1600_v19 = vsel %vm1569_vm9, %v1567_v39, %v3983_v59  ;;  %v1601_v28 = vsel %vm1569_vm9, %v1568_v6, %v3984_v34 }
 0x196   : > { %v3989_v48 = vunpack.i.h.bf16 %v3987_v60  ;;  %v3988_v51 = vunpack.i.l.bf16 %v3987_v60  ;;  %v3992_v1 = vpop.permute.xlu1 %3991 }
 0x197   : > { %v3994_v16 = vunpack.i.h.bf16 %v3992_v1  ;;  %v3993_v24 = vunpack.i.l.bf16 %v3992_v1 }
 0x198   : > { %v1617_v54 = vsel %vm1602_vm10, %v1584_v46, %v3988_v51  ;;  %v1618_v2 = vsel %vm1602_vm10, %v1585_v7, %v3989_v48 }
 0x199   : > { %v3997_v40 = vpop.permute.xlu0 %3996  ;;  %v1633_v9 = vsel %vm1602_vm10, %v1600_v19, %v3993_v24  ;;  %v1634_v32 = vsel %vm1602_vm10, %v1601_v28, %v3994_v16 }
 0x19a   : > { %v3999_v26 = vunpack.i.h.bf16 %v3997_v40  ;;  %v3998_v11 = vunpack.i.l.bf16 %v3997_v40  ;;  %v4002_v35 = vpop.permute.xlu1 %4001 }
 0x19b   : > { %v4004_v0 = vunpack.i.h.bf16 %v4002_v35  ;;  %v4003_v14 = vunpack.i.l.bf16 %v4002_v35 }
 0x19c   : > { %v1650_v38 = vsel %vm1635_vm11, %v1617_v54, %v3998_v11  ;;  %v1651_v18 = vsel %vm1635_vm11, %v1618_v2, %v3999_v26 }
 0x19d   : > { %v1675_v37 = vpack.c.bf16 %v1651_v18, %v1650_v38  ;;  %v1666_v20 = vsel %vm1635_vm11, %v1633_v9, %v4003_v14  ;;  %v1667_v4 = vsel %vm1635_vm11, %v1634_v32, %v4004_v0 }
 0x19e   : > { %v1683_v41 = vpack.c.bf16 %v1667_v4, %v1666_v20 }
 0x19f   : > { %3090 = vmatmul.mubr.msk.bf16.gmra.mrb[28].mxu0 %vm1714_vm12, %v1675_v37 }
 0x1a0   : > { %3098 = vmatmul.mubr.msk.bf16.gmra.mrb[28].mxu1 %vm1714_vm12, %v1683_v41 }
 0x1d2   : > { %v1804_v10 = vpop.f32.mrb[0].mxu0 }
 0x1d3   : > { %v1975_v17 = vmul.f32 %v5314_v8, %v1804_v10  ;;  %v1806_v31 = vpop.f32.mrb[1].mxu0 }
 0x1d4   : > { %v1976_v62 = vmul.f32 %v5316_v61, %v1806_v31  ;;  %v1808_v52 = vpop.f32.mrb[2].mxu0  ;;  %v1884_v56 = vpop.f32.mrb[0].mxu1 }
 0x1d5   : > { %v5325_v53 = vadd.f32 %v5318_v23, %v1975_v17  ;;  %v1977_v33 = vmul.f32 %v5314_v8, %v1808_v52  ;;  %v1810_v49 = vpop.f32.mrb[3].mxu0  ;;  %v1886_v22 = vpop.f32.mrb[1].mxu1  ;;  %v2007_v11 = vmul.f32 %v5314_v8, %v1884_v56 }
 0x1d6   : > { %v2052_v57 = vadd.f32 %v5320_v43, %v1976_v62  ;;  %v1978_v21 = vmul.f32 %v5316_v61, %v1810_v49  ;;  %v2008_v15 = vmul.f32 %v5316_v61, %v1886_v22  ;;  %v1888_v29 = vpop.f32.mrb[2].mxu1 }
 0x1d7   : > { %v5332_v5 = vadd.f32 %v5318_v23, %v1977_v33  ;;  %v1890_v45 = vpop.f32.mrb[3].mxu1  ;;  %v2115_v44 = vmax.f32 %v5325_v53, 0.0  ;;  %v5358_v32 = vadd.f32 %v5318_v23, %v2007_v11  ;;  %v2009_v25 = vmul.f32 %v5314_v8, %v1888_v29 }
 0x1d8   : > { %v2116_v60 = vmax.f32 %v2052_v57, 0.0  ;;  %v2054_v50 = vadd.f32 %v5320_v43, %v1978_v21  ;;  %v2084_v27 = vadd.f32 %v5320_v43, %v2008_v15  ;;  %v2010_v36 = vmul.f32 %v5316_v61, %v1890_v45 }
 0x1d9   : > { %v2117_v34 = vmax.f32 %v5332_v5, 0.0  ;;  %v5343_v39 = vmax.f32 %v2115_v44, 0.0  ;;  %v6149_v56 = vmax.f32 %v5358_v32, 0.0  ;;  %v5375_v33 = vadd.f32 %v5318_v23, %v2009_v25 }
 0x1da   : > { %v2339_v59 = vrot.slane %v2116_v60, 7  ;;  %v2118_v48 = vmax.f32 %v2054_v50, 0.0  ;;  %v2148_v51 = vmax.f32 %v2084_v27, 0.0  ;;  %v2086_v1 = vadd.f32 %v5320_v43, %v2010_v36 }
 0x1db   : > { %v5347_v16 = vmax.f32 %v2117_v34, 0.0  ;;  %v6156_v54 = vmax.f32 %v5343_v39, 0.0 }
 0x1dc   : > { %v2419_v58 = vsel %vm296_vm0, 0.0, %v2339_v59  ;;  %v2340_v63 = vrot.slane %v2118_v48, 7  ;;  %v2363_v13 = vrot.slane %v2148_v51, 7  ;;  %v2150_v47 = vmax.f32 %v2086_v1, 0.0 }
 0x1dd   : > { %v2435_v6 = vmax.f32 %v2116_v60, %v2419_v58  ;;  %v6154_v0 = vmax.f32 %v5347_v16, 0.0  ;;  %v5364_v30 = vmax.f32 %v6156_v54, 0.0 }
 0x1de   : > { %v2341_v24 = vsel %vm296_vm0, %v2339_v59, %v2340_v63  ;;  %v2427_v40 = vsel %vm296_vm0, 0.0, %v2363_v13  ;;  %v2364_v46 = vrot.slane %v2150_v47, 7 }
 0x1df   : > { %v2499_v7 = vrot.slane %v2435_v6, 6  ;;  %v2436_v26 = vmax.f32 %v2118_v48, %v2341_v24  ;;  %v2451_v19 = vmax.f32 %v2148_v51, %v2427_v40  ;;  %v5370_v55 = vmax.f32 %v6154_v0, 0.0 }
 0x1e0   : > { %v2365_v28 = vsel %vm296_vm0, %v2363_v13, %v2364_v46  ;;  %v2275_v60 = vmax.f32 %v5364_v30, 0.0 }
 0x1e1   : > { %v2579_v2 = vsel %vm1763_vm3, 0.0, %v2499_v7  ;;  %v2500_v35 = vrot.slane %v2436_v26, 6  ;;  %v2452_v38 = vmax.f32 %v2150_v47, %v2365_v28  ;;  %v2523_v14 = vrot.slane %v2451_v19, 6  ;;  %6271 = vst [vmem:[#allocation2_spill] sm:$0xff] %v5370_v55 }
 0x1e2   : > { %v2595_v18 = vmax.f32 %v2435_v6, %v2579_v2  ;;  %v2276_v50 = vmax.f32 %v5370_v55, 0.0 }
 0x1e3   : > { %v2501_v9 = vsel %vm1763_vm3, %v2499_v7, %v2500_v35  ;;  %v2524_v37 = vrot.slane %v2452_v38, 6  ;;  %v2587_v41 = vsel %vm1763_vm3, 0.0, %v2523_v14 }
 0x1e4   : > { %v2660_v20 = vrot.slane %v2595_v18, 4  ;;  %v2596_v4 = vmax.f32 %v2436_v26, %v2501_v9  ;;  %v2611_v42 = vmax.f32 %v2451_v19, %v2587_v41 }
 0x1e5   : > { %v2525_v12 = vsel %vm1763_vm3, %v2523_v14, %v2524_v37 }
 0x1e6   : > { %v2740_v3 = vsel %vm2659_vm13, 0.0, %v2660_v20  ;;  %v2661_v10 = vrot.slane %v2596_v4, 4  ;;  %v2612_v17 = vmax.f32 %v2452_v38, %v2525_v12  ;;  %v2684_v62 = vrot.slane %v2611_v42, 4 }
 0x1e7   : > { %v2756_v31 = vmax.f32 %v2595_v18, %v2740_v3  ;;  %v1814_v22 = vpop.f32.mrb[4].mxu0  ;;  %v6148_v3 = vmax.f32 %v5375_v33, 0.0 }
 0x1e8   : > { %v2662_v52 = vsel %vm2659_vm13, %v2660_v20, %v2661_v10  ;;  %v2685_v49 = vrot.slane %v2612_v17, 4  ;;  %v2748_v15 = vsel %vm2659_vm13, 0.0, %v2684_v62  ;;  %v1979_v29 = vmul.f32 %v5314_v8, %v1814_v22  ;;  %v1816_v45 = vpop.f32.mrb[5].mxu0 }
 0x1e9   : > { %v2788_v57 = vmax.f32 %v2756_v31, 0.0  ;;  %v2757_v21 = vmax.f32 %v2596_v4, %v2662_v52  ;;  %v1980_v59 = vmul.f32 %v5316_v61, %v1816_v45  ;;  %v1818_v48 = vpop.f32.mrb[6].mxu0  ;;  %v5383_v1 = vmax.f32 %v2611_v42, %v2748_v15 }
 0x1ea   : > { %v2686_v27 = vsel %vm2659_vm13, %v2684_v62, %v2685_v49  ;;  %v1894_v36 = vpop.f32.mrb[4].mxu1  ;;  %v5386_v63 = vadd.f32 %v5318_v23, %v1979_v29  ;;  %v1820_v47 = vpop.f32.mrb[7].mxu0  ;;  %v1981_v28 = vmul.f32 %v5314_v8, %v1818_v48 }
 0x1eb   : > { %v2789_v51 = vmax.f32 %v2757_v21, %v2756_v31  ;;  %v2773_v58 = vmax.f32 %v2612_v17, %v2686_v27  ;;  %v1896_v13 = vpop.f32.mrb[5].mxu1  ;;  %v2820_v6 = vadd.f32 %v2788_v57, %v2275_v60  ;;  %v2011_v24 = vmul.f32 %v5314_v8, %v1894_v36 }
 0x1ec   : > { %v2056_v40 = vadd.f32 %v5320_v43, %v1980_v59  ;;  %v2012_v46 = vmul.f32 %v5316_v61, %v1896_v13  ;;  %v1898_v7 = vpop.f32.mrb[6].mxu1  ;;  %v2119_v19 = vmax.f32 %v5386_v63, 0.0  ;;  %v5415_v20 = vadd.f32 %v5318_v23, %v1981_v28 }
 0x1ed   : > { %v2821_v26 = vadd.f32 %v2789_v51, %v2276_v50  ;;  %v5392_v11 = vmax.f32 %v2773_v58, %v5383_v1  ;;  %v1900_v2 = vpop.f32.mrb[7].mxu1  ;;  %v5404_v35 = vadd.f32 %v5318_v23, %v2011_v24  ;;  %v2013_v14 = vmul.f32 %v5314_v8, %v1898_v7 }
 0x1ee   : > { %v2120_v38 = vmax.f32 %v2056_v40, 0.0  ;;  %v2088_v18 = vadd.f32 %v5320_v43, %v2012_v46  ;;  %v5412_v37 = vmax.f32 %v2119_v19, %v2115_v44  ;;  %v1982_v4 = vmul.f32 %v5316_v61, %v1820_v47 }
 0x1ef   : > { %6272 = vst [vmem:[#allocation3_spill] sm:$0xff] %v5392_v11  ;;  %v3234_v9 = vpack.c.bf16 %v2821_v26, %v2820_v6  ;;  %v2151_v41 = vmax.f32 %v5404_v35, 0.0  ;;  %v5420_v12 = vadd.f32 %v5318_v23, %v2013_v14  ;;  %v2121_v53 = vmax.f32 %v5415_v20, 0.0 }
 0x1f0   : > { %v2342_v25 = vrot.slane %v2120_v38, 7  ;;  %v2152_v42 = vmax.f32 %v2088_v18, 0.0  ;;  %v2058_v44 = vadd.f32 %v5320_v43, %v1982_v4  ;;  %v2014_v10 = vmul.f32 %v5316_v61, %v1900_v2 }
 0x1f1   : > { %3235 = vst [vmem:[%s5401_s22] sm:$0xff] %v3234_v9   ;;  %v5431_v17 = vmax.f32 %v2151_v41, %v6149_v56  ;;  %v2153_v52 = vmax.f32 %v5420_v12, 0.0  ;;  %v5439_v22 = vmax.f32 %v2121_v53, %v2117_v34  ;;  %v6153_v5 = vmax.f32 %v5412_v37, 0.0 }
 0x1f2   : > { %v2420_v31 = vsel %vm296_vm0, 0.0, %v2342_v25  ;;  %v2366_v62 = vrot.slane %v2152_v42, 7  ;;  %v2122_v57 = vmax.f32 %v2058_v44, 0.0  ;;  %v2090_v29 = vadd.f32 %v5320_v43, %v2014_v10 }
 0x1f3   : > { %v2437_v49 = vmax.f32 %v2120_v38, %v2420_v31  ;;  %v5446_v15 = vmax.f32 %v2153_v52, %v6148_v3  ;;  %v6151_v48 = vmax.f32 %v5439_v22, 0.0  ;;  %v5457_v46 = vmax.f32 %v6153_v5, 0.0 }
 0x1f4   : > { %v2428_v21 = vsel %vm296_vm0, 0.0, %v2366_v62  ;;  %v2343_v50 = vrot.slane %v2122_v57, 7  ;;  %v2154_v27 = vmax.f32 %v2090_v29, 0.0 }
 0x1f5   : > { %v2502_v45 = vrot.slane %v2437_v49, 6  ;;  %v2453_v60 = vmax.f32 %v2152_v42, %v2428_v21  ;;  %v5462_v38 = vmax.f32 %v6151_v48, 0.0  ;;  %v2277_v44 = vmax.f32 %v5457_v46, 0.0 }
 0x1f6   : > { %v2344_v51 = vsel %vm296_vm0, %v2342_v25, %v2343_v50  ;;  %v2367_v58 = vrot.slane %v2154_v27, 7 }
 0x1f7   : > { %v2580_v34 = vsel %vm1763_vm3, 0.0, %v2502_v45  ;;  %v2526_v36 = vrot.slane %v2453_v60, 6  ;;  %v2438_v47 = vmax.f32 %v2122_v57, %v2344_v51  ;;  %6273 = vst [vmem:[#allocation11_spill] sm:$0xff] %v5462_v38  ;;  %v2278_v57 = vmax.f32 %v5462_v38, 0.0 }
 0x1f8   : > { %v2597_v59 = vmax.f32 %v2437_v49, %v2580_v34  ;;  %v2368_v40 = vsel %vm296_vm0, %v2366_v62, %v2367_v58 }
 0x1f9   : > { %v2588_v13 = vsel %vm1763_vm3, 0.0, %v2526_v36  ;;  %v2503_v7 = vrot.slane %v2438_v47, 6  ;;  %v2454_v26 = vmax.f32 %v2154_v27, %v2368_v40 }
 0x1fa   : > { %v2663_v6 = vrot.slane %v2597_v59, 4  ;;  %v2613_v24 = vmax.f32 %v2453_v60, %v2588_v13 }
 0x1fb   : > { %v2504_v14 = vsel %vm1763_vm3, %v2502_v45, %v2503_v7  ;;  %v2527_v9 = vrot.slane %v2454_v26, 6 }
 0x1fc   : > { %v2741_v28 = vsel %vm2659_vm13, 0.0, %v2663_v6  ;;  %v2687_v2 = vrot.slane %v2613_v24, 4  ;;  %v2598_v25 = vmax.f32 %v2438_v47, %v2504_v14 }
 0x1fd   : > { %v2758_v18 = vmax.f32 %v2597_v59, %v2741_v28  ;;  %v2528_v31 = vsel %vm1763_vm3, %v2526_v36, %v2527_v9 }
 0x1fe   : > { %v2749_v4 = vsel %vm2659_vm13, 0.0, %v2687_v2  ;;  %v1824_v42 = vpop.f32.mrb[8].mxu0  ;;  %v2664_v21 = vrot.slane %v2598_v25, 4  ;;  %v2614_v29 = vmax.f32 %v2454_v26, %v2528_v31 }
 0x1ff   : > { %v2790_v10 = vmax.f32 %v2758_v18, 0.0  ;;  %v1983_v62 = vmul.f32 %v5314_v8, %v1824_v42  ;;  %v1826_v49 = vpop.f32.mrb[9].mxu0  ;;  %v1904_v50 = vpop.f32.mrb[8].mxu1  ;;  %v5471_v34 = vmax.f32 %v2613_v24, %v2749_v4 }
 0x200   : > { %v1984_v60 = vmul.f32 %v5316_v61, %v1826_v49  ;;  %v1828_v45 = vpop.f32.mrb[10].mxu0  ;;  %v1906_v58 = vpop.f32.mrb[9].mxu1  ;;  %v2665_v13 = vsel %vm2659_vm13, %v2663_v6, %v2664_v21  ;;  %v2688_v47 = vrot.slane %v2614_v29, 4  ;;  %v2015_v9 = vmul.f32 %v5314_v8, %v1904_v50 }
 0x201   : > { %v2822_v27 = vadd.f32 %v2790_v10, %v2277_v44  ;;  %v5474_v59 = vadd.f32 %v5318_v23, %v1983_v62  ;;  %v1985_v51 = vmul.f32 %v5314_v8, %v1828_v45  ;;  %v1830_v36 = vpop.f32.mrb[11].mxu0  ;;  %v1908_v26 = vpop.f32.mrb[10].mxu1  ;;  %v2759_v28 = vmax.f32 %v2598_v25, %v2665_v13 }
 0x202   : > { %v2060_v40 = vadd.f32 %v5320_v43, %v1984_v60  ;;  %v1986_v7 = vmul.f32 %v5316_v61, %v1830_v36  ;;  %v1910_v4 = vpop.f32.mrb[11].mxu1  ;;  %v2689_v42 = vsel %vm2659_vm13, %v2687_v2, %v2688_v47  ;;  %v2016_v10 = vmul.f32 %v5316_v61, %v1906_v58 }
 0x203   : > { %v2123_v14 = vmax.f32 %v5474_v59, 0.0  ;;  %v5482_v24 = vadd.f32 %v5318_v23, %v1985_v51  ;;  %v2791_v31 = vmax.f32 %v2759_v28, %v2758_v18  ;;  %v2775_v62 = vmax.f32 %v2614_v29, %v2689_v42 }
 0x204   : > { %v2124_v44 = vmax.f32 %v2060_v40, 0.0  ;;  %v2062_v6 = vadd.f32 %v5320_v43, %v1986_v7  ;;  %v5496_v45 = vadd.f32 %v5318_v23, %v2015_v9  ;;  %v2092_v2 = vadd.f32 %v5320_v43, %v2016_v10 }
 0x205   : > { %v5492_v25 = vmax.f32 %v2123_v14, %v2119_v19  ;;  %v2125_v49 = vmax.f32 %v5482_v24, 0.0  ;;  %v2823_v50 = vadd.f32 %v2791_v31, %v2278_v57  ;;  %v5500_v18 = vmax.f32 %v2775_v62, %v5471_v34 }
 0x206   : > { %v2345_v21 = vrot.slane %v2124_v44, 7  ;;  %v2126_v60 = vmax.f32 %v2062_v6, 0.0  ;;  %v2155_v36 = vmax.f32 %v5496_v45, 0.0  ;;  %v2156_v58 = vmax.f32 %v2092_v2, 0.0 }
 0x207   : > { %6274 = vst [vmem:[#allocation22_spill] sm:$0xff] %v5500_v18  ;;  %v5504_v63 = vmax.f32 %v5492_v25, %v5343_v39  ;;  %v5510_v19 = vmax.f32 %v2125_v49, %v2121_v53  ;;  %v3239_v57 = vpack.c.bf16 %v2823_v50, %v2822_v27  ;;  %v2017_v7 = vmul.f32 %v5314_v8, %v1908_v26 }
 0x208   : > { %v2421_v29 = vsel %vm296_vm0, 0.0, %v2345_v21  ;;  %v2346_v51 = vrot.slane %v2126_v60, 7  ;;  %v5523_v20 = vmax.f32 %v2155_v36, %v2151_v41  ;;  %v2369_v53 = vrot.slane %v2156_v58, 7 }
 0x209   : > { %v2439_v13 = vmax.f32 %v2124_v44, %v2421_v29  ;;  %v5516_v47 = vmax.f32 %v5510_v19, %v5347_v16  ;;  %3326 = vst [vmem:[%s5401_s22 + $0x8] sm:$0xff] %v3239_v57   ;;  %v5529_v42 = vadd.f32 %v5318_v23, %v2017_v7  ;;  %v2018_v44 = vmul.f32 %v5316_v61, %v1910_v4 }
 0x20a   : > { %v2347_v40 = vsel %vm296_vm0, %v2345_v21, %v2346_v51  ;;  %v2429_v27 = vsel %vm296_vm0, 0.0, %v2369_v53  ;;  %v6150_v26 = vmax.f32 %v5504_v63, 0.0 }
 0x20b   : > { %6275 = vst [vmem:[#allocation12_spill] sm:$0xff] %v5516_v47  ;;  %v2505_v28 = vrot.slane %v2439_v13, 6  ;;  %v2440_v9 = vmax.f32 %v2126_v60, %v2347_v40  ;;  %v2455_v10 = vmax.f32 %v2156_v58, %v2429_v27  ;;  %v2157_v41 = vmax.f32 %v5529_v42, 0.0 }
 0x20c   : > { %v2094_v62 = vadd.f32 %v5320_v43, %v2018_v44 }
 0x20d   : > { %v2581_v6 = vsel %vm1763_vm3, 0.0, %v2505_v28  ;;  %v2506_v35 = vrot.slane %v2440_v9, 6  ;;  %v2529_v60 = vrot.slane %v2455_v10, 6  ;;  %v5541_v4 = vmax.f32 %v2157_v41, %v2153_v52 }
 0x20e   : > { %v2599_v31 = vmax.f32 %v2439_v13, %v2581_v6  ;;  %v2158_v29 = vmax.f32 %v2094_v62, 0.0 }
 0x20f   : > { %v2507_v21 = vsel %vm1763_vm3, %v2505_v28, %v2506_v35  ;;  %v2589_v51 = vsel %vm1763_vm3, 0.0, %v2529_v60  ;;  %v6152_v28 = vmax.f32 %v5516_v47, 0.0 }
 0x210   : > { %v2666_v2 = vrot.slane %v2599_v31, 4  ;;  %v2600_v50 = vmax.f32 %v2440_v9, %v2507_v21  ;;  %v2615_v13 = vmax.f32 %v2455_v10, %v2589_v51  ;;  %v2370_v40 = vrot.slane %v2158_v29, 7 }
 0x211   : > { %v2279_v9 = vmax.f32 %v6150_v26, 0.0 }
 0x212   : > { %v2742_v58 = vsel %vm2659_vm13, 0.0, %v2666_v2  ;;  %v2667_v57 = vrot.slane %v2600_v50, 4  ;;  %v2690_v27 = vrot.slane %v2615_v13, 4  ;;  %v2371_v52 = vsel %vm296_vm0, %v2369_v53, %v2370_v40 }
 0x213   : > { %v2760_v7 = vmax.f32 %v2599_v31, %v2742_v58  ;;  %v1834_v44 = vpop.f32.mrb[12].mxu0  ;;  %v2456_v62 = vmax.f32 %v2158_v29, %v2371_v52 }
 0x214   : > { %v2668_v12 = vsel %vm2659_vm13, %v2666_v2, %v2667_v57  ;;  %v1987_v21 = vmul.f32 %v5314_v8, %v1834_v44  ;;  %v1836_v3 = vpop.f32.mrb[13].mxu0  ;;  %v2750_v10 = vsel %vm2659_vm13, 0.0, %v2690_v27  ;;  %v2280_v2 = vmax.f32 %v6152_v28, 0.0 }
 0x215   : > { %v2792_v6 = vmax.f32 %v2760_v7, 0.0  ;;  %v2761_v35 = vmax.f32 %v2600_v50, %v2668_v12  ;;  %v1988_v51 = vmul.f32 %v5316_v61, %v1836_v3  ;;  %v1838_v58 = vpop.f32.mrb[14].mxu0  ;;  %v2530_v26 = vrot.slane %v2456_v62, 6 }
 0x216   : > { %v1914_v31 = vpop.f32.mrb[12].mxu1  ;;  %v1840_v40 = vpop.f32.mrb[15].mxu0  ;;  %v5556_v50 = vadd.f32 %v5318_v23, %v1987_v21  ;;  %v5561_v48 = vmax.f32 %v2615_v13, %v2750_v10 }
 0x217   : > { %v2824_v56 = vadd.f32 %v2792_v6, %v2279_v9  ;;  %v2793_v57 = vmax.f32 %v2761_v35, %v2760_v7  ;;  %v1916_v53 = vpop.f32.mrb[13].mxu1  ;;  %v2019_v29 = vmul.f32 %v5314_v8, %v1914_v31  ;;  %v2064_v12 = vadd.f32 %v5320_v43, %v1988_v51 }
 0x218   : > { %v2020_v52 = vmul.f32 %v5316_v61, %v1916_v53  ;;  %v1918_v44 = vpop.f32.mrb[14].mxu1  ;;  %v2531_v9 = vsel %vm1763_vm3, %v2529_v60, %v2530_v26  ;;  %v1989_v7 = vmul.f32 %v5314_v8, %v1838_v58  ;;  %v6159_v21 = vmax.f32 %v5556_v50, 0.0 }
 0x219   : > { %v2825_v3 = vadd.f32 %v2793_v57, %v2280_v2  ;;  %v1920_v6 = vpop.f32.mrb[15].mxu1  ;;  %v2616_v35 = vmax.f32 %v2456_v62, %v2531_v9  ;;  %v5567_v28 = vadd.f32 %v5318_v23, %v2019_v29  ;;  %v2128_v31 = vmax.f32 %v2064_v12, 0.0 }
 0x21a   : > { %v2096_v53 = vadd.f32 %v5320_v43, %v2020_v52  ;;  %v5571_v2 = vadd.f32 %v5318_v23, %v1989_v7  ;;  %v2021_v13 = vmul.f32 %v5314_v8, %v1918_v44  ;;  %v5578_v26 = vmax.f32 %v6159_v21, %v2123_v14 }
 0x21b   : > { %v3244_v51 = vpack.c.bf16 %v2825_v3, %v2824_v56  ;;  %v2691_v10 = vrot.slane %v2616_v35, 4  ;;  %v6157_v60 = vmax.f32 %v5567_v28, 0.0  ;;  %v2348_v62 = vrot.slane %v2128_v31, 7 }
 0x21c   : > { %v2160_v58 = vmax.f32 %v2096_v53, 0.0  ;;  %v6158_v56 = vmax.f32 %v5571_v2, 0.0  ;;  %v5584_v57 = vadd.f32 %v5318_v23, %v2021_v13  ;;  %v1990_v29 = vmul.f32 %v5316_v61, %v1840_v40 }
 0x21d   : > { %3327 = vst [vmem:[%s5401_s22 + $0x10] sm:$0xff] %v3244_v51   ;;  %v2692_v12 = vsel %vm2659_vm13, %v2690_v27, %v2691_v10  ;;  %v5590_v59 = vmax.f32 %v5578_v26, %v5412_v37  ;;  %v5596_v14 = vmax.f32 %v6157_v60, %v2155_v36  ;;  %v2422_v52 = vsel %vm296_vm0, 0.0, %v2348_v62 }
 0x21e   : > { %v2777_v44 = vmax.f32 %v2616_v35, %v2692_v12  ;;  %v2441_v3 = vmax.f32 %v2128_v31, %v2422_v52  ;;  %v2372_v9 = vrot.slane %v2160_v58, 7  ;;  %v5603_v27 = vmax.f32 %v6158_v56, %v2125_v49 }
 0x21f   : > { %v5607_v40 = vmax.f32 %v5596_v14, %v5431_v17  ;;  %v6155_v45 = vmax.f32 %v5584_v57, 0.0  ;;  %v2066_v36 = vadd.f32 %v5320_v43, %v1990_v29  ;;  %v2022_v10 = vmul.f32 %v5316_v61, %v1920_v6 }
 0x220   : > { %v5612_v7 = vmax.f32 %v2777_v44, %v5561_v48  ;;  %v2508_v35 = vrot.slane %v2441_v3, 6  ;;  %v2430_v31 = vsel %vm296_vm0, 0.0, %v2372_v9  ;;  %v5617_v24 = vmax.f32 %v5603_v27, %v5439_v22 }
 0x221   : > { %v2457_v49 = vmax.f32 %v2160_v58, %v2430_v31  ;;  %v5623_v51 = vmax.f32 %v6155_v45, %v2157_v41  ;;  %v2130_v53 = vmax.f32 %v2066_v36, 0.0  ;;  %v2098_v58 = vadd.f32 %v5320_v43, %v2022_v10 }
 0x222   : > { %6276 = vst [vmem:[#allocation16_spill] sm:$0xff] %v5612_v7  ;;  %6277 = vst [vmem:[#allocation7_spill] sm:$0xff] %v5617_v24  ;;  %v2582_v13 = vsel %vm1763_vm3, 0.0, %v2508_v35  ;;  %v6160_v36 = vmax.f32 %v5590_v59, 0.0 }
 0x223   : > { %6278 = vst [vmem:[#allocation5_spill] sm:$0xff] %v5623_v51  ;;  %v2601_v29 = vmax.f32 %v2441_v3, %v2582_v13  ;;  %v2532_v12 = vrot.slane %v2457_v49, 6  ;;  %v5629_v52 = vmax.f32 %v5623_v51, %v5446_v15  ;;  %v2349_v44 = vrot.slane %v2130_v53, 7 }
 0x224   : > { %v2162_v45 = vmax.f32 %v2098_v58, 0.0  ;;  %v6164_v3 = vmax.f32 %v5617_v24, 0.0  ;;  %v2281_v10 = vmax.f32 %v6160_v36, 0.0 }
 0x225   : > { %6279 = vst [vmem:[#allocation17_spill] sm:$0xff] %v5629_v52  ;;  %v2669_v31 = vrot.slane %v2601_v29, 4  ;;  %v2590_v42 = vsel %vm1763_vm3, 0.0, %v2532_v12  ;;  %v2350_v41 = vsel %vm296_vm0, %v2348_v62, %v2349_v44  ;;  %v6280_v52 = vmax.f32 %v5556_v50, 0.0 }
 0x226   : > { %v2617_v5 = vmax.f32 %v2457_v49, %v2590_v42  ;;  %v2442_v0 = vmax.f32 %v2130_v53, %v2350_v41  ;;  %v2373_v56 = vrot.slane %v2162_v45, 7  ;;  %v2282_v53 = vmax.f32 %v6164_v3, 0.0 }
 0x227   : > { %v2743_v6 = vsel %vm2659_vm13, 0.0, %v2669_v31 }
 0x228   : > { %v2762_v13 = vmax.f32 %v2601_v29, %v2743_v6  ;;  %v2693_v54 = vrot.slane %v2617_v5, 4  ;;  %v2509_v60 = vrot.slane %v2442_v0, 6  ;;  %v2374_v44 = vsel %vm296_vm0, %v2372_v9, %v2373_v56 }
 0x229   : > { %v2458_v42 = vmax.f32 %v2162_v45, %v2374_v44 }
 0x22a   : > { %v1844_v21 = vpop.f32.mrb[16].mxu0  ;;  %v2794_v7 = vmax.f32 %v2762_v13, 0.0  ;;  %v2510_v62 = vsel %vm1763_vm3, %v2508_v35, %v2509_v60  ;;  %v2751_v18 = vsel %vm2659_vm13, 0.0, %v2693_v54 }
 0x22b   : > { %v1846_v49 = vpop.f32.mrb[17].mxu0  ;;  %v2602_v58 = vmax.f32 %v2442_v0, %v2510_v62  ;;  %v1991_v29 = vmul.f32 %v5314_v8, %v1844_v21  ;;  %v1924_v6 = vpop.f32.mrb[16].mxu1  ;;  %v2533_v24 = vrot.slane %v2458_v42, 6 }
 0x22c   : > { %v1848_v41 = vpop.f32.mrb[18].mxu0  ;;  %v1992_v11 = vmul.f32 %v5316_v61, %v1846_v49  ;;  %v2023_v60 = vmul.f32 %v5314_v8, %v1924_v6  ;;  %v1926_v56 = vpop.f32.mrb[17].mxu1  ;;  %v2826_v9 = vadd.f32 %v2794_v7, %v2281_v10 }
 0x22d   : > { %v1993_v36 = vmul.f32 %v5314_v8, %v1848_v41  ;;  %v1850_v38 = vpop.f32.mrb[19].mxu0  ;;  %v2670_v35 = vrot.slane %v2602_v58, 4  ;;  %v5649_v0 = vadd.f32 %v5318_v23, %v1991_v29  ;;  %v1928_v45 = vpop.f32.mrb[18].mxu1  ;;  %v2534_v7 = vsel %vm1763_vm3, %v2532_v12, %v2533_v24 }
 0x22e   : > { %v2068_v21 = vadd.f32 %v5320_v43, %v1992_v11  ;;  %v1994_v44 = vmul.f32 %v5316_v61, %v1850_v38  ;;  %v5657_v49 = vadd.f32 %v5318_v23, %v2023_v60  ;;  %v1930_v41 = vpop.f32.mrb[19].mxu1  ;;  %v2024_v29 = vmul.f32 %v5316_v61, %v1926_v56 }
 0x22f   : > { %v5653_v62 = vadd.f32 %v5318_v23, %v1993_v36  ;;  %v2671_v6 = vsel %vm2659_vm13, %v2669_v31, %v2670_v35  ;;  %v6170_v10 = vmax.f32 %v5649_v0, 0.0  ;;  %v2618_v55 = vmax.f32 %v2458_v42, %v2534_v7 }
 0x230   : > { %v2763_v3 = vmax.f32 %v2602_v58, %v2671_v6  ;;  %v2132_v11 = vmax.f32 %v2068_v21, 0.0  ;;  %v2070_v60 = vadd.f32 %v5320_v43, %v1994_v44  ;;  %v6167_v31 = vmax.f32 %v5657_v49, 0.0 }
 0x231   : > { %v6169_v36 = vmax.f32 %v5653_v62, 0.0  ;;  %v5668_v38 = vmax.f32 %v6170_v10, %v6280_v52  ;;  %v2100_v24 = vadd.f32 %v5320_v43, %v2024_v29  ;;  %v2694_v35 = vrot.slane %v2618_v55, 4 }
 0x232   : > { %v2795_v12 = vmax.f32 %v2763_v3, %v2762_v13  ;;  %v2351_v56 = vrot.slane %v2132_v11, 7  ;;  %v6281_v58 = vmax.f32 %v5571_v2, 0.0  ;;  %v2134_v52 = vmax.f32 %v2070_v60, 0.0 }
 0x233   : > { %v5681_v50 = vmax.f32 %v5668_v38, %v5492_v25  ;;  %v6282_v21 = vmax.f32 %v5567_v28, 0.0  ;;  %v2164_v3 = vmax.f32 %v2100_v24, 0.0  ;;  %v2695_v2 = vsel %vm2659_vm13, %v2693_v54, %v2694_v35 }
 0x234   : > { %v5677_v42 = vmax.f32 %v6169_v36, %v6281_v58  ;;  %v2827_v13 = vadd.f32 %v2795_v12, %v2282_v53  ;;  %v2423_v6 = vsel %vm296_vm0, 0.0, %v2351_v56  ;;  %v5695_v25 = vmax.f32 %v2617_v5, %v2751_v18 }
 0x235   : > { %v5687_v44 = vmax.f32 %v6167_v31, %v6282_v21  ;;  %v2779_v29 = vmax.f32 %v2618_v55, %v2695_v2  ;;  %v2443_v60 = vmax.f32 %v2132_v11, %v2423_v6  ;;  %v2352_v28 = vrot.slane %v2134_v52, 7 }
 0x236   : > { %v5693_v7 = vmax.f32 %v5677_v42, %v5510_v19  ;;  %v3249_v58 = vpack.c.bf16 %v2827_v13, %v2826_v9  ;;  %v2375_v31 = vrot.slane %v2164_v3, 7  ;;  %v2025_v5 = vmul.f32 %v5314_v8, %v1928_v45 }
 0x237   : > { %v5700_v53 = vmax.f32 %v2779_v29, %v5695_v25  ;;  %v2511_v54 = vrot.slane %v2443_v60, 6  ;;  %v2353_v24 = vsel %vm296_vm0, %v2351_v56, %v2352_v28  ;;  %v2026_v9 = vmul.f32 %v5316_v61, %v1930_v41 }
 0x238   : > { %6283 = vst [vmem:[#allocation6_spill] sm:$0xff] %v5693_v7  ;;  %3328 = vst [vmem:[%s5401_s22 + $0x18] sm:$0xff] %v3249_v58   ;;  %v2444_v12 = vmax.f32 %v2134_v52, %v2353_v24  ;;  %v2431_v19 = vsel %vm296_vm0, 0.0, %v2375_v31  ;;  %v5709_v13 = vadd.f32 %v5318_v23, %v2025_v5 }
 0x239   : > { %6284 = vst [vmem:[#allocation14_spill] sm:$0xff] %v5700_v53  ;;  %v2583_v55 = vsel %vm1763_vm3, 0.0, %v2511_v54  ;;  %v2459_v18 = vmax.f32 %v2164_v3, %v2431_v19  ;;  %v2102_v6 = vadd.f32 %v5320_v43, %v2026_v9  ;;  %v6285_v3 = vmax.f32 %v5343_v39, 0.0 }
 0x23a   : > { %v2603_v11 = vmax.f32 %v2443_v60, %v2583_v55  ;;  %v2512_v35 = vrot.slane %v2444_v12, 6  ;;  %v6168_v29 = vmax.f32 %v5709_v13, 0.0  ;;  %v6286_v19 = vmax.f32 %v5584_v57, 0.0 }
 0x23b   : > { %v2535_v2 = vrot.slane %v2459_v18, 6  ;;  %v2166_v58 = vmax.f32 %v2102_v6, 0.0  ;;  %v5718_v41 = vmax.f32 %v5681_v50, %v6285_v3 }
 0x23c   : > { %v2672_v56 = vrot.slane %v2603_v11, 4  ;;  %v2513_v52 = vsel %vm1763_vm3, %v2511_v54, %v2512_v35  ;;  %v5725_v5 = vmax.f32 %v6168_v29, %v6286_v19 }
 0x23d   : > { %v2604_v28 = vmax.f32 %v2444_v12, %v2513_v52  ;;  %v2591_v45 = vsel %vm1763_vm3, 0.0, %v2535_v2  ;;  %v6288_v12 = vmax.f32 %v5347_v16, 0.0  ;;  %v2376_v39 = vrot.slane %v2166_v58, 7 }
 0x23e   : > { %v2744_v60 = vsel %vm2659_vm13, 0.0, %v2672_v56  ;;  %v2619_v24 = vmax.f32 %v2459_v18, %v2591_v45  ;;  %6287 = vst [vmem:[#allocation13_spill] sm:$0xff] %v5725_v5 }
 0x23f   : > { %v2764_v54 = vmax.f32 %v2603_v11, %v2744_v60  ;;  %v5730_v55 = vmax.f32 %v5693_v7, %v6288_v12  ;;  %v2673_v9 = vrot.slane %v2604_v28, 4  ;;  %v2377_v57 = vsel %vm296_vm0, %v2375_v31, %v2376_v39 }
 0x240   : > { %v2696_v35 = vrot.slane %v2619_v24, 4  ;;  %v2460_v19 = vmax.f32 %v2166_v58, %v2377_v57  ;;  %v2283_v60 = vmax.f32 %v5718_v41, 0.0 }
 0x241   : > { %6289 = vst [vmem:[#allocation24_spill] sm:$0xff] %v5730_v55  ;;  %v2796_v52 = vmax.f32 %v2764_v54, 0.0  ;;  %v2674_v18 = vsel %vm2659_vm13, %v2672_v56, %v2673_v9  ;;  %v2284_v12 = vmax.f32 %v5730_v55, 0.0 }
 0x242   : > { %v1854_v45 = vpop.f32.mrb[20].mxu0  ;;  %v2765_v3 = vmax.f32 %v2604_v28, %v2674_v18  ;;  %v2752_v21 = vsel %vm2659_vm13, 0.0, %v2696_v35  ;;  %v2536_v56 = vrot.slane %v2460_v19, 6 }
 0x243   : > { %v1995_v11 = vmul.f32 %v5314_v8, %v1854_v45  ;;  %v1856_v16 = vpop.f32.mrb[21].mxu0  ;;  %v1934_v36 = vpop.f32.mrb[20].mxu1  ;;  %v2828_v39 = vadd.f32 %v2796_v52, %v2283_v60 }
 0x244   : > { %v1996_v29 = vmul.f32 %v5316_v61, %v1856_v16  ;;  %v1858_v6 = vpop.f32.mrb[22].mxu0  ;;  %v2797_v10 = vmax.f32 %v2765_v3, %v2764_v54  ;;  %v1936_v9 = vpop.f32.mrb[21].mxu1  ;;  %v2027_v45 = vmul.f32 %v5314_v8, %v1934_v36  ;;  %v2537_v55 = vsel %vm1763_vm3, %v2535_v2, %v2536_v56 }
 0x245   : > { %v5742_v31 = vadd.f32 %v5318_v23, %v1995_v11  ;;  %v1997_v28 = vmul.f32 %v5314_v8, %v1858_v6  ;;  %v1860_v58 = vpop.f32.mrb[23].mxu0  ;;  %v1938_v53 = vpop.f32.mrb[22].mxu1  ;;  %v2620_v11 = vmax.f32 %v2460_v19, %v2537_v55  ;;  %v6290_v36 = vmax.f32 %v5649_v0, 0.0 }
 0x246   : > { %v2072_v18 = vadd.f32 %v5320_v43, %v1996_v29  ;;  %v1998_v57 = vmul.f32 %v5316_v61, %v1860_v58  ;;  %v2829_v16 = vadd.f32 %v2797_v10, %v2284_v12  ;;  %v1940_v6 = vpop.f32.mrb[23].mxu1  ;;  %v5755_v29 = vadd.f32 %v5318_v23, %v2027_v45 }
 0x247   : > { %v6176_v54 = vmax.f32 %v5742_v31, 0.0  ;;  %v5751_v3 = vadd.f32 %v5318_v23, %v1997_v28  ;;  %v2028_v12 = vmul.f32 %v5316_v61, %v1936_v9  ;;  %v2697_v56 = vrot.slane %v2620_v11, 4 }
 0x248   : > { %v2136_v7 = vmax.f32 %v2072_v18, 0.0  ;;  %v2074_v52 = vadd.f32 %v5320_v43, %v1998_v57  ;;  %v3254_v60 = vpack.c.bf16 %v2829_v16, %v2828_v39  ;;  %v6173_v19 = vmax.f32 %v5755_v29, 0.0 }
 0x249   : > { %v5761_v10 = vmax.f32 %v6176_v54, %v6290_v36  ;;  %v6175_v2 = vmax.f32 %v5751_v3, 0.0  ;;  %v6291_v0 = vmax.f32 %v5653_v62, 0.0  ;;  %v2104_v18 = vadd.f32 %v5320_v43, %v2028_v12 }
 0x24a   : > { %v2354_v28 = vrot.slane %v2136_v7, 7  ;;  %v2138_v55 = vmax.f32 %v2074_v52, 0.0  ;;  %3329 = vst [vmem:[%s5401_s22 + $0x20] sm:$0xff] %v3254_v60   ;;  %v2029_v9 = vmul.f32 %v5314_v8, %v1938_v53  ;;  %v2698_v57 = vsel %vm2659_vm13, %v2696_v35, %v2697_v56 }
 0x24b   : > { %v5769_v58 = vmax.f32 %v5761_v10, %v5578_v26  ;;  %v5775_v39 = vmax.f32 %v6175_v2, %v6291_v0  ;;  %v6292_v52 = vmax.f32 %v5657_v49, 0.0  ;;  %v5787_v62 = vmax.f32 %v2619_v24, %v2752_v21 }
 0x24c   : > { %v2424_v45 = vsel %vm296_vm0, 0.0, %v2354_v28  ;;  %v2355_v16 = vrot.slane %v2138_v55, 7  ;;  %v2781_v60 = vmax.f32 %v2620_v11, %v2698_v57  ;;  %v2168_v56 = vmax.f32 %v2104_v18, 0.0 }
 0x24d   : > { %v5785_v26 = vmax.f32 %v6173_v19, %v6292_v52  ;;  %v2445_v36 = vmax.f32 %v2136_v7, %v2424_v45  ;;  %v5791_v12 = vmax.f32 %v5775_v39, %v5603_v27  ;;  %v5797_v49 = vadd.f32 %v5318_v23, %v2029_v9 }
 0x24e   : > { %v2356_v53 = vsel %vm296_vm0, %v2354_v28, %v2355_v16  ;;  %v5800_v0 = vmax.f32 %v2781_v60, %v5787_v62  ;;  %v2378_v11 = vrot.slane %v2168_v56, 7  ;;  %v2030_v27 = vmul.f32 %v5316_v61, %v1940_v6 }
 0x24f   : > { %6293 = vst [vmem:[#allocation15_spill] sm:$0xff] %v5791_v12  ;;  %v2514_v21 = vrot.slane %v2445_v36, 6  ;;  %v2446_v24 = vmax.f32 %v2138_v55, %v2356_v53  ;;  %v6174_v7 = vmax.f32 %v5797_v49, 0.0  ;;  %v6295_v18 = vmax.f32 %v5709_v13, 0.0 }
 0x250   : > { %6294 = vst [vmem:[#allocation4_spill] sm:$0xff] %v5800_v0  ;;  %v2432_v16 = vsel %vm296_vm0, 0.0, %v2378_v11  ;;  %v2106_v55 = vadd.f32 %v5320_v43, %v2030_v27 }
 0x251   : > { %v2584_v57 = vsel %vm1763_vm3, 0.0, %v2514_v21  ;;  %v2515_v45 = vrot.slane %v2446_v24, 6  ;;  %v5810_v9 = vmax.f32 %v6174_v7, %v6295_v18  ;;  %v2461_v52 = vmax.f32 %v2168_v56, %v2432_v16 }
 0x252   : > { %v2605_v28 = vmax.f32 %v2445_v36, %v2584_v57  ;;  %v6297_v36 = vmax.f32 %v5412_v37, 0.0  ;;  %v2170_v19 = vmax.f32 %v2106_v55, 0.0  ;;  %v6298_v56 = vmax.f32 %v5439_v22, 0.0 }
 0x253   : > { %6296 = vst [vmem:[#allocation23_spill] sm:$0xff] %v5810_v9  ;;  %v2516_v53 = vsel %vm1763_vm3, %v2514_v21, %v2515_v45  ;;  %v2538_v13 = vrot.slane %v2461_v52, 6 }
 0x254   : > { %v2675_v60 = vrot.slane %v2605_v28, 4  ;;  %v5819_v57 = vmax.f32 %v5769_v58, %v6297_v36  ;;  %v2606_v35 = vmax.f32 %v2446_v24, %v2516_v53  ;;  %v5825_v27 = vmax.f32 %v5791_v12, %v6298_v56 }
 0x255   : > { %v2592_v45 = vsel %vm1763_vm3, 0.0, %v2538_v13  ;;  %v2379_v6 = vrot.slane %v2170_v19, 7 }
 0x256   : > { %v2745_v18 = vsel %vm2659_vm13, 0.0, %v2675_v60  ;;  %6299 = vst [vmem:[#allocation19_spill] sm:$0xff] %v5825_v27  ;;  %v2676_v21 = vrot.slane %v2606_v35, 4  ;;  %v2621_v7 = vmax.f32 %v2461_v52, %v2592_v45  ;;  %v2285_v37 = vmax.f32 %v5819_v57, 0.0 }
 0x257   : > { %v2766_v16 = vmax.f32 %v2605_v28, %v2745_v18  ;;  %v2380_v55 = vsel %vm296_vm0, %v2378_v11, %v2379_v6  ;;  %v2286_v56 = vmax.f32 %v5825_v27, 0.0 }
 0x258   : > { %v2677_v24 = vsel %vm2659_vm13, %v2675_v60, %v2676_v21  ;;  %v2699_v2 = vrot.slane %v2621_v7, 4  ;;  %v2462_v54 = vmax.f32 %v2170_v19, %v2380_v55 }
 0x259   : > { %v2798_v36 = vmax.f32 %v2766_v16, 0.0  ;;  %v2767_v53 = vmax.f32 %v2606_v35, %v2677_v24 }
 0x25a   : > { %v1864_v22 = vpop.f32.mrb[24].mxu0  ;;  %v2753_v52 = vsel %vm2659_vm13, 0.0, %v2699_v2  ;;  %v2539_v45 = vrot.slane %v2462_v54, 6 }
 0x25b   : > { %v2830_v0 = vadd.f32 %v2798_v36, %v2285_v37  ;;  %v1999_v28 = vmul.f32 %v5314_v8, %v1864_v22  ;;  %v1866_v18 = vpop.f32.mrb[25].mxu0  ;;  %v2799_v51 = vmax.f32 %v2767_v53, %v2766_v16  ;;  %v1944_v60 = vpop.f32.mrb[24].mxu1  ;;  %v5843_v53 = vmax.f32 %v2621_v7, %v2753_v52 }
 0x25c   : > { %v2000_v9 = vmul.f32 %v5316_v61, %v1866_v18  ;;  %v1868_v12 = vpop.f32.mrb[26].mxu0  ;;  %v2031_v6 = vmul.f32 %v5314_v8, %v1944_v60  ;;  %v1946_v21 = vpop.f32.mrb[25].mxu1  ;;  %v2540_v36 = vsel %vm1763_vm3, %v2538_v13, %v2539_v45 }
 0x25d   : > { %v5836_v11 = vadd.f32 %v5318_v23, %v1999_v28  ;;  %v2001_v19 = vmul.f32 %v5314_v8, %v1868_v12  ;;  %v1870_v35 = vpop.f32.mrb[27].mxu0  ;;  %v2831_v37 = vadd.f32 %v2799_v51, %v2286_v56  ;;  %v1948_v55 = vpop.f32.mrb[26].mxu1  ;;  %v2622_v22 = vmax.f32 %v2462_v54, %v2540_v36 }
 0x25e   : > { %v2076_v16 = vadd.f32 %v5320_v43, %v2000_v9  ;;  %v2002_v24 = vmul.f32 %v5316_v61, %v1870_v35  ;;  %v1950_v18 = vpop.f32.mrb[27].mxu1  ;;  %v5851_v13 = vadd.f32 %v5318_v23, %v2031_v6  ;;  %v6301_v56 = vmax.f32 %v5742_v31, 0.0 }
 0x25f   : > { %v6185_v28 = vmax.f32 %v5836_v11, 0.0  ;;  %v5847_v12 = vadd.f32 %v5318_v23, %v2001_v19  ;;  %v3259_v60 = vpack.c.bf16 %v2831_v37, %v2830_v0  ;;  %v2700_v9 = vrot.slane %v2622_v22, 4 }
 0x260   : > { %v2140_v27 = vmax.f32 %v2076_v16, 0.0  ;;  %v2078_v51 = vadd.f32 %v5320_v43, %v2002_v24  ;;  %6300 = vst [vmem:[#allocation25_spill] sm:$0xff] %v5851_v13  ;;  %v2032_v52 = vmul.f32 %v5316_v61, %v1946_v21  ;;  %v6182_v19 = vmax.f32 %v5851_v13, 0.0 }
 0x261   : > { %v5857_v7 = vmax.f32 %v6185_v28, %v6301_v56  ;;  %v6183_v54 = vmax.f32 %v5847_v12, 0.0  ;;  %3330 = vst [vmem:[%s5401_s22 + $0x28] sm:$0xff] %v3259_v60   ;;  %v2033_v35 = vmul.f32 %v5314_v8, %v1948_v55  ;;  %v2701_v6 = vsel %vm2659_vm13, %v2699_v2, %v2700_v9 }
 0x262   : > { %v2357_v45 = vrot.slane %v2140_v27, 7  ;;  %v2142_v0 = vmax.f32 %v2078_v51, 0.0  ;;  %v6302_v37 = vmax.f32 %v5751_v3, 0.0  ;;  %v2108_v21 = vadd.f32 %v5320_v43, %v2032_v52 }
 0x263   : > { %v5867_v31 = vmax.f32 %v5857_v7, %v5668_v38  ;;  %v2783_v16 = vmax.f32 %v2622_v22, %v2701_v6  ;;  %v6303_v55 = vmax.f32 %v5755_v29, 0.0  ;;  %v5894_v29 = vadd.f32 %v5318_v23, %v2033_v35 }
 0x264   : > { %v5873_v36 = vmax.f32 %v6183_v54, %v6302_v37  ;;  %v2425_v24 = vsel %vm296_vm0, 0.0, %v2357_v45  ;;  %v2358_v60 = vrot.slane %v2142_v0, 7  ;;  %v2172_v51 = vmax.f32 %v2108_v21, 0.0 }
 0x265   : > { %v5881_v2 = vmax.f32 %v6182_v19, %v6303_v55  ;;  %v2447_v38 = vmax.f32 %v2140_v27, %v2425_v24  ;;  %v5888_v9 = vmax.f32 %v2783_v16, %v5843_v53  ;;  %6305 = vst [vmem:[#allocation18_spill] sm:$0xff] %v5894_v29  ;;  %v6184_v27 = vmax.f32 %v5894_v29, 0.0 }
 0x266   : > { %v5885_v3 = vmax.f32 %v5873_v36, %v5677_v42  ;;  %v2359_v22 = vsel %vm296_vm0, %v2357_v45, %v2358_v60  ;;  %v2381_v37 = vrot.slane %v2172_v51, 7  ;;  %v2034_v42 = vmul.f32 %v5316_v61, %v1950_v18 }
 0x267   : > { %6304 = vst [vmem:[#allocation8_spill] sm:$0xff] %v5888_v9  ;;  %v2517_v52 = vrot.slane %v2447_v38, 6  ;;  %v2448_v6 = vmax.f32 %v2142_v0, %v2359_v22  ;;  %v6306_v45 = vmax.f32 %v5797_v49, 0.0 }
 0x268   : > { %v2433_v55 = vsel %vm296_vm0, 0.0, %v2381_v37  ;;  %v2110_v35 = vadd.f32 %v5320_v43, %v2034_v42 }
 0x269   : > { %v2585_v21 = vsel %vm1763_vm3, 0.0, %v2517_v52  ;;  %v2518_v24 = vrot.slane %v2448_v6, 6  ;;  %v5904_v60 = vmax.f32 %v6184_v27, %v6306_v45  ;;  %v2463_v22 = vmax.f32 %v2172_v51, %v2433_v55 }
 0x26a   : > { %v2607_v16 = vmax.f32 %v2447_v38, %v2585_v21  ;;  %v2174_v54 = vmax.f32 %v2110_v35, 0.0  ;;  %v5912_v38 = vmax.f32 %v5867_v31, %v5504_v63  ;;  %v5917_v45 = vmax.f32 %v5885_v3, %v5516_v47 }
 0x26b   : > { %6307 = vst [vmem:[#allocation10_spill] sm:$0xff] %v5904_v60  ;;  %v2519_v0 = vsel %vm1763_vm3, %v2517_v52, %v2518_v24  ;;  %v2541_v49 = vrot.slane %v2463_v22, 6 }
 0x26c   : > { %v2678_v19 = vrot.slane %v2607_v16, 4  ;;  %v2608_v56 = vmax.f32 %v2448_v6, %v2519_v0  ;;  %v2382_v52 = vrot.slane %v2174_v54, 7  ;;  %v2287_v0 = vmax.f32 %v5912_v38, 0.0 }
 0x26d   : > { %v2593_v6 = vsel %vm1763_vm3, 0.0, %v2541_v49  ;;  %v2288_v9 = vmax.f32 %v5917_v45, 0.0 }
 0x26e   : > { %v2746_v21 = vsel %vm2659_vm13, 0.0, %v2678_v19  ;;  %v2679_v42 = vrot.slane %v2608_v56, 4  ;;  %v2623_v55 = vmax.f32 %v2463_v22, %v2593_v6  ;;  %v2383_v35 = vsel %vm296_vm0, %v2381_v37, %v2382_v52 }
 0x26f   : > { %v2768_v51 = vmax.f32 %v2607_v16, %v2746_v21  ;;  %v2464_v28 = vmax.f32 %v2174_v54, %v2383_v35 }
 0x270   : > { %v2680_v24 = vsel %vm2659_vm13, %v2678_v19, %v2679_v42  ;;  %v2702_v47 = vrot.slane %v2623_v55, 4 }
 0x271   : > { %v2800_v27 = vmax.f32 %v2768_v51, 0.0  ;;  %v2769_v18 = vmax.f32 %v2608_v56, %v2680_v24  ;;  %v2542_v5 = vrot.slane %v2464_v28, 6 }
 0x272   : > { %v1874_v16 = vpop.f32.mrb[28].mxu0  ;;  %v2754_v54 = vsel %vm2659_vm13, 0.0, %v2702_v47 }
 0x273   : > { %v2832_v21 = vadd.f32 %v2800_v27, %v2287_v0  ;;  %v2801_v60 = vmax.f32 %v2769_v18, %v2768_v51  ;;  %v2003_v19 = vmul.f32 %v5314_v8, %v1874_v16  ;;  %v1876_v22 = vpop.f32.mrb[29].mxu0  ;;  %v1954_v6 = vpop.f32.mrb[28].mxu1  ;;  %v2784_v35 = vmax.f32 %v2623_v55, %v2754_v54 }
 0x274   : > { %v2004_v56 = vmul.f32 %v5316_v61, %v1876_v22  ;;  %v1878_v52 = vpop.f32.mrb[30].mxu0  ;;  %v2543_v13 = vsel %vm1763_vm3, %v2541_v49, %v2542_v5  ;;  %v5933_v51 = vpop.f32.mrb[29].mxu1  ;;  %v2035_v5 = vmul.f32 %v5314_v8, %v1954_v6 }
 0x275   : > { %v2833_v24 = vadd.f32 %v2801_v60, %v2288_v9  ;;  %v2079_v27 = vadd.f32 %v5318_v23, %v2003_v19  ;;  %v1880_v18 = vpop.f32.mrb[31].mxu0  ;;  %v2624_v0 = vmax.f32 %v2464_v28, %v2543_v13  ;;  %v2005_v42 = vmul.f32 %v5314_v8, %v1878_v52  ;;  %v5938_v22 = vpop.f32.mrb[30].mxu1 }
 0x276   : > { %v2080_v16 = vadd.f32 %v5320_v43, %v2004_v56  ;;  %v2006_v37 = vmul.f32 %v5316_v61, %v1880_v18  ;;  %v2812_v9 = vmax.f32 %v5787_v62, 0.0  ;;  %v5942_v49 = vpop.f32.mrb[31].mxu1  ;;  %v2814_v56 = vmax.f32 %v5843_v53, 0.0 }
 0x277   : > { %v3264_v60 = vpack.c.bf16 %v2833_v24, %v2832_v21  ;;  %v2143_v55 = vmax.f32 %v2079_v27, 0.0  ;;  %v2703_v19 = vrot.slane %v2624_v0, 4  ;;  %v2081_v28 = vadd.f32 %v5318_v23, %v2005_v42 }
 0x278   : > { %v2144_v54 = vmax.f32 %v2080_v16, 0.0  ;;  %v5946_v13 = vadd.f32 %v5320_v43, %v2006_v37  ;;  %v2816_v52 = vmax.f32 %v2784_v35, 0.0  ;;  %v6308_v18 = vmax.f32 %v5836_v11, 0.0 }
 0x279   : > { %3331 = vst [vmem:[%s5401_s22 + $0x30] sm:$0xff] %v3264_v60   ;;  %v6309_v21 = vmax.f32 %v5358_v32, 0.0  ;;  %v2704_v6 = vsel %vm2659_vm13, %v2702_v47, %v2703_v19  ;;  %v2145_v16 = vmax.f32 %v2081_v28, 0.0  ;;  %v5958_v42 = vadd.f32 %v5318_v23, %v2035_v5 }
 0x27a   : > { %v2193_v62 = vmax.f32 %v2143_v55, %v6308_v18  ;;  %v5955_v27 = vrot.slane %v2144_v54, 7  ;;  %v2785_v37 = vmax.f32 %v2624_v0, %v2704_v6  ;;  %v6310_v32 = vmax.f32 %v5847_v12, 0.0 }
 0x27b   : > { %v2195_v24 = vmax.f32 %v6309_v21, %v2143_v55  ;;  %v6311_v47 = vmax.f32 %v5375_v33, 0.0  ;;  %v2146_v28 = vmax.f32 %v5946_v13, 0.0  ;;  %v6312_v12 = vmax.f32 %v5687_v44, %v5523_v20 }
 0x27c   : > { %v2225_v29 = vmax.f32 %v2193_v62, %v5761_v10  ;;  %v2229_v60 = vmax.f32 %v5431_v17, %v2193_v62  ;;  %v2194_v55 = vmax.f32 %v2145_v16, %v6310_v32  ;;  %v2817_v18 = vmax.f32 %v2785_v37, %v2784_v35 }
 0x27d   : > { %v2227_v53 = vmax.f32 %v2195_v24, %v5857_v7  ;;  %v2231_v11 = vmax.f32 %v5523_v20, %v2195_v24  ;;  %v2196_v19 = vmax.f32 %v6311_v47, %v2145_v16  ;;  %v2426_v10 = vsel %vm296_vm0, 0.0, %v5955_v27 }
 0x27e   : > { %v2261_v0 = vmax.f32 %v2229_v60, %v5769_v58  ;;  %v2265_v7 = vmax.f32 %v5607_v40, %v2225_v29  ;;  %v6313_v33 = vmax.f32 %v5785_v26, %v5596_v14  ;;  %v5982_v35 = vmax.f32 %v2225_v29, %v5590_v59 }
 0x27f   : > { %v2259_v5 = vmax.f32 %v2227_v53, %v5681_v50  ;;  %v2263_v17 = vmax.f32 %v2231_v11, %v5867_v31  ;;  %v2267_v62 = vmax.f32 %v6312_v12, %v2227_v53  ;;  %v6314_v50 = vmax.f32 %v5881_v2, %v5687_v44  ;;  %v6326_v12 = vld [vmem:[#allocation23_spill] sm:$0xff] }
 0x280   : > { %v2269_v21 = vmax.f32 %v6313_v33, %v2229_v60  ;;  %v2293_v31 = vmax.f32 %v2261_v0, %v5457_v46  ;;  %v6315_v6 = vmax.f32 %v5504_v63, 0.0  ;;  %v6316_v20 = vmax.f32 %v5590_v59, 0.0 }
 0x281   : > { %v2271_v58 = vmax.f32 %v6314_v50, %v2231_v11  ;;  %v2291_v24 = vmax.f32 %v2259_v5, %v5364_v30  ;;  %v2299_v14 = vmax.f32 %v2267_v62, %v5718_v41  ;;  %v6317_v60 = vmax.f32 %v5383_v1, 0.0  ;;  %v6327_v62 = vld [vmem:[#allocation5_spill] sm:$0xff]  ;;  %v6329_v50 = vld [vmem:[#allocation10_spill] sm:$0xff] }
 0x282   : > { %v2295_v16 = vmax.f32 %v2263_v17, %v6315_v6  ;;  %v2297_v37 = vmax.f32 %v2265_v7, %v6316_v20  ;;  %v2301_v53 = vmax.f32 %v2269_v21, %v5819_v57  ;;  %v6318_v2 = vmax.f32 %v5471_v34, 0.0 }
 0x283   : > { %v2303_v29 = vmax.f32 %v2271_v58, %v5912_v38  ;;  %v2836_v44 = vadd.f32 %v6317_v60, %v2291_v24  ;;  %v6000_v11 = vmax.f32 %v2144_v54, %v2426_v10  ;;  %v6319_v46 = vmax.f32 %v5561_v48, 0.0 }
 0x284   : > { %v2838_v30 = vadd.f32 %v6318_v2, %v2293_v31  ;;  %v6320_v59 = vmax.f32 %v5695_v25, 0.0  ;;  %v2844_v47 = vadd.f32 %v2812_v9, %v2299_v14  ;;  %v2846_v41 = vadd.f32 %v2814_v56, %v2301_v53  ;;  %v6321_v56 = vld [vmem:[#allocation6_spill] sm:$0xff]  ;;  %v6333_v14 = vld [vmem:[#allocation12_spill] sm:$0xff] }
 0x285   : > { %v2840_v63 = vadd.f32 %v6319_v46, %v2295_v16  ;;  %v2848_v5 = vadd.f32 %v2816_v52, %v2303_v29  ;;  %v2520_v57 = vrot.slane %v6000_v11, 6  ;;  %v6008_v38 = vmax.f32 %v2194_v55, %v5775_v39  ;;  %v6322_v39 = vld [vmem:[#allocation17_spill] sm:$0xff]  ;;  %v6331_v31 = vld [vmem:[#allocation2_spill] sm:$0xff]  ;;  %v6335_v29 = vld [vmem:[#allocation7_spill] sm:$0xff] }
 0x286   : > { %v2842_v32 = vadd.f32 %v6320_v59, %v2297_v37  ;;  %v2228_v1 = vmax.f32 %v2196_v19, %v5873_v36  ;;  %v2289_v34 = vmax.f32 %v5982_v35, 0.0  ;;  %v2230_v54 = vmax.f32 %v5446_v15, %v2194_v55  ;;  %v6323_v15 = vld [vmem:[#allocation15_spill] sm:$0xff]  ;;  %v6337_v46 = vld [vmem:[#allocation24_spill] sm:$0xff] }
 0x287   : > { %v2232_v48 = vmax.f32 %v5541_v4, %v2196_v19  ;;  %v2036_v25 = vmul.f32 %v5316_v61, %v5933_v51  ;;  %v2586_v9 = vsel %vm1763_vm3, 0.0, %v2520_v57  ;;  %v2266_v0 = vmax.f32 %v6322_v39, %v6008_v38  ;;  %v6324_v51 = vld [vmem:[#allocation13_spill] sm:$0xff]  ;;  %v6332_v37 = vld [vmem:[#allocation11_spill] sm:$0xff] }
 0x288   : > { %v2260_v52 = vmax.f32 %v2228_v1, %v6321_v56  ;;  %v2361_v36 = vrot.slane %v2146_v28, 7  ;;  %v6025_v10 = vmax.f32 %v6000_v11, %v2586_v9  ;;  %v2262_v55 = vmax.f32 %v2230_v54, %v6323_v15  ;;  %v6339_v9 = vld [vmem:[#allocation3_spill] sm:$0xff] }
 0x289   : > { %v2264_v19 = vmax.f32 %v2232_v48, %v5885_v3  ;;  %v6325_v17 = vmax.f32 %v6324_v51, %v5541_v4  ;;  %v6328_v33 = vmax.f32 %v6326_v12, %v6327_v62  ;;  %v6330_v58 = vmax.f32 %v6329_v50, %v6324_v51 }
 0x28a   : > { %v2292_v6 = vmax.f32 %v2260_v52, %v6331_v31  ;;  %v2175_v16 = vmax.f32 %v5958_v42, 0.0  ;;  %v2681_v20 = vrot.slane %v6025_v10, 4  ;;  %v2294_v3 = vmax.f32 %v2262_v55, %v6332_v37  ;;  %v6340_v52 = vld [vmem:[#allocation22_spill] sm:$0xff]  ;;  %v6341_v55 = vld [vmem:[#allocation16_spill] sm:$0xff] }
 0x28b   : > { %v2268_v7 = vmax.f32 %v6325_v17, %v2228_v1  ;;  %v2270_v21 = vmax.f32 %v6328_v33, %v2230_v54  ;;  %v2272_v24 = vmax.f32 %v6330_v58, %v2232_v48  ;;  %v6334_v53 = vmax.f32 %v6333_v14, 0.0  ;;  %v6338_v1 = vld [vmem:[#allocation19_spill] sm:$0xff]  ;;  %v6344_v33 = vld [vmem:[#allocation8_spill] sm:$0xff] }
 0x28c   : > { %v6336_v60 = vmax.f32 %v6335_v29, 0.0  ;;  %v2837_v56 = vadd.f32 %v6339_v9, %v2292_v6  ;;  %v2747_v42 = vsel %vm2659_vm13, 0.0, %v2681_v20  ;;  %v2839_v15 = vadd.f32 %v6340_v52, %v2294_v3 }
 0x28d   : > { %v2296_v4 = vmax.f32 %v2264_v19, %v6334_v53  ;;  %v2300_v59 = vmax.f32 %v2268_v7, %v6337_v46  ;;  %v2302_v54 = vmax.f32 %v2270_v21, %v6338_v1  ;;  %v2304_v48 = vmax.f32 %v2272_v24, %v5917_v45  ;;  %v6342_v19 = vld [vmem:[#allocation14_spill] sm:$0xff]  ;;  %v6343_v7 = vld [vmem:[#allocation4_spill] sm:$0xff]  ;;  %v6345_v53 = vld [vmem:[#allocation25_spill] sm:$0xff] }
 0x28e   : > { %v2298_v2 = vmax.f32 %v2266_v0, %v6336_v60  ;;  %v2770_v0 = vmax.f32 %v6025_v10, %v2747_v42  ;;  %v3274_v50 = vpack.c.bf16 %v2837_v56, %v2836_v44  ;;  %v3279_v58 = vpack.c.bf16 %v2839_v15, %v2838_v30 }
 0x28f   : > { %v2841_v51 = vadd.f32 %v6341_v55, %v2296_v4  ;;  %v2845_v62 = vadd.f32 %v6343_v7, %v2300_v59  ;;  %v2847_v45 = vadd.f32 %v6344_v33, %v2302_v54  ;;  %v2849_v21 = vadd.f32 %v2817_v18, %v2304_v48 }
 0x290   : > { %v2843_v17 = vadd.f32 %v6342_v19, %v2298_v2  ;;  %v2802_v6 = vmax.f32 %v2770_v0, 0.0  ;;  %3333 = vst [vmem:[%s5401_s22 + $0x40] sm:$0xff] %v3274_v50   ;;  %3334 = vst [vmem:[%s5401_s22 + $0x48] sm:$0xff] %v3279_v58   ;;  %v2362_v10 = vsel %vm296_vm0, %v5955_v27, %v2361_v36  ;;  %v6346_v18 = vmax.f32 %v6345_v53, 0.0 }
 0x291   : > { %v3284_v24 = vpack.c.bf16 %v2841_v51, %v2840_v63  ;;  %v3294_v37 = vpack.c.bf16 %v2845_v62, %v2844_v47  ;;  %v3299_v3 = vpack.c.bf16 %v2847_v45, %v2846_v41  ;;  %v3304_v14 = vpack.c.bf16 %v2849_v21, %v2848_v5 }
 0x292   : > { %v3289_v31 = vpack.c.bf16 %v2843_v17, %v2842_v32  ;;  %v2209_v44 = vmax.f32 %v2175_v16, %v6346_v18  ;;  %v2112_v30 = vadd.f32 %v5320_v43, %v2036_v25  ;;  %v2037_v63 = vmul.f32 %v5314_v8, %v5938_v22 }
 0x293   : > { %3335 = vst [vmem:[%s5401_s22 + $0x50] sm:$0xff] %v3284_v24   ;;  %v2834_v32 = vadd.f32 %v2802_v6, %v2289_v34  ;;  %3337 = vst [vmem:[%s5401_s22 + $0x60] sm:$0xff] %v3294_v37   ;;  %v2450_v47 = vmax.f32 %v2146_v28, %v2362_v10  ;;  %v2038_v41 = vmul.f32 %v5316_v61, %v5942_v49  ;;  %v6347_v49 = vld [vmem:[#allocation18_spill] sm:$0xff] }
 0x294   : > { %3336 = vst [vmem:[%s5401_s22 + $0x58] sm:$0xff] %v3289_v31   ;;  %3338 = vst [vmem:[%s5401_s22 + $0x68] sm:$0xff] %v3299_v3   ;;  %v2241_v27 = vmax.f32 %v2209_v44, %v5785_v26  ;;  %v2176_v5 = vmax.f32 %v2112_v30, 0.0  ;;  %v2113_v36 = vadd.f32 %v5318_v23, %v2037_v63  ;;  %v6348_v60 = vmax.f32 %v6347_v49, 0.0 }
 0x295   : > { %3339 = vst [vmem:[%s5401_s22 + $0x70] sm:$0xff] %v3304_v14   ;;  %v2521_v16 = vrot.slane %v2450_v47, 6  ;;  %v2114_v25 = vadd.f32 %v5320_v43, %v2038_v41  ;;  %v2258_v59 = vmax.f32 %v6008_v38, %v6335_v29 }
 0x296   : > { %v2273_v8 = vmax.f32 %v2241_v27, %v5607_v40  ;;  %v2384_v22 = vrot.slane %v2176_v5, 7  ;;  %v2177_v34 = vmax.f32 %v2113_v36, 0.0 }
 0x297   : > { %v2522_v13 = vsel %vm1763_vm3, %v2520_v57, %v2521_v16  ;;  %v2178_v28 = vmax.f32 %v2114_v25, 0.0  ;;  %v2290_v15 = vmax.f32 %v2258_v59, 0.0 }
 0x298   : > { %v2610_v4 = vmax.f32 %v2450_v47, %v2522_v13  ;;  %v2305_v61 = vmax.f32 %v2273_v8, %v5982_v35  ;;  %v2434_v26 = vsel %vm296_vm0, 0.0, %v2384_v22  ;;  %v2210_v23 = vmax.f32 %v2177_v34, %v6348_v60 }
 0x299   : > { %v2465_v2 = vmax.f32 %v2176_v5, %v2434_v26  ;;  %v2385_v46 = vrot.slane %v2178_v28, 7 }
 0x29a   : > { %v2682_v43 = vrot.slane %v2610_v4, 4  ;;  %v2242_v40 = vmax.f32 %v2210_v23, %v6326_v12 }
 0x29b   : > { %v2544_v11 = vrot.slane %v2465_v2, 6  ;;  %v2386_v57 = vsel %vm296_vm0, %v2384_v22, %v2385_v46 }
 0x29c   : > { %v2683_v1 = vsel %vm2659_vm13, %v2681_v20, %v2682_v43  ;;  %v2274_v35 = vmax.f32 %v2242_v40, %v6322_v39  ;;  %v2466_v54 = vmax.f32 %v2178_v28, %v2386_v57 }
 0x29d   : > { %v2771_v48 = vmax.f32 %v2610_v4, %v2683_v1  ;;  %v2594_v9 = vsel %vm1763_vm3, 0.0, %v2544_v11 }
 0x29e   : > { %v2625_v56 = vmax.f32 %v2465_v2, %v2594_v9  ;;  %v2306_v42 = vmax.f32 %v2274_v35, %v2258_v59  ;;  %v2545_v52 = vrot.slane %v2466_v54, 6 }
 0x29f   : > { %v2803_v12 = vmax.f32 %v2771_v48, %v2770_v0 }
 0x2a0   : > { %v2705_v55 = vrot.slane %v2625_v56, 4  ;;  %v2546_v38 = vsel %vm1763_vm3, %v2544_v11, %v2545_v52 }
 0x2a1   : > { %v2835_v29 = vadd.f32 %v2803_v12, %v2290_v15  ;;  %v2626_v51 = vmax.f32 %v2466_v54, %v2546_v38 }
 0x2a2   : > { %v2755_v20 = vsel %vm2659_vm13, 0.0, %v2705_v55 }
 0x2a3   : > { %v3269_v19 = vpack.c.bf16 %v2835_v29, %v2834_v32  ;;  %v2786_v39 = vmax.f32 %v2625_v56, %v2755_v20  ;;  %v2706_v17 = vrot.slane %v2626_v51, 4 }
 0x2a5   : > { %3332 = vst [vmem:[%s5401_s22 + $0x38] sm:$0xff] %v3269_v19   ;;  %v2818_v7 = vmax.f32 %v2786_v39, 0.0  ;;  %v2707_v62 = vsel %vm2659_vm13, %v2705_v55, %v2706_v17 }
 0x2a6   : > { %v2787_v33 = vmax.f32 %v2626_v51, %v2707_v62 }
 0x2a7   : > { %v2850_v45 = vadd.f32 %v2818_v7, %v2305_v61 }
 0x2a8   : > { %v2819_v21 = vmax.f32 %v2787_v33, %v2786_v39 }
 0x2aa   : > { %v2851_v50 = vadd.f32 %v2819_v21, %v2306_v42 }
 0x2ac   : > { %v3309_v0 = vpack.c.bf16 %v2851_v50, %v2850_v45 }
 0x2ae   : > { %3340 = vst [vmem:[%s5401_s22 + $0x78] sm:$0xff] %v3309_v0  }
 0x2af PF: > { %s14_s15 = sadd.s32 1, %s4019_s15  }
 0x2b0   : > { %p11_p4 = scmp.ge.s32.totalorder %s14_s15, 4  }
 0x2b2   :  { %13 = sbr.rel (!%p11_p4) target bundleno = 1 (0x1), region = 66 }

// kernel: br_corner_pooling_forward.4
= control target key start
LH: loop header
LB: loop body
LE: loop exit
PB: predicated region body
PF: predicated region fallthrough
CT: control target
= control target key end

     0   :  { %s3618_s15 = smov 0   ;;  %s4937_s0 = inlined_call_operand.vmem [shape: bf16[2,16,16,128], index: 0, kind: input, shape index: {}]   ;;  %s4938_s1 = inlined_call_operand.vmem [shape: bf16[2,16,16,4], index: 1, kind: input, shape index: {}]   ;;  %s4939_s2 = inlined_call_operand.vmem [shape: bf16[1156,4], index: 2, kind: input, shape index: {}]   ;;  %s4940_s3 = inlined_call_operand.vmem [shape: f32[1,4], index: 3, kind: input, shape index: {}]   ;;  %s4941_s4 = inlined_call_operand.vmem [shape: bf16[2,16,16,4], index: 4, kind: output, shape index: {}]  }
   0x1 LB: > { %s2561_s16 = sadd.s32 4294967295, %s3588_s15   ;;  %p2565_p0 = scmp.ge.s32.totalorder %s3588_s15, 1  ;;  %s3588_s15 = sphi %s3618_s15, %s14_s15  }
   0x2   : > { %p172_p1 = scmp.lt.s32.totalorder %s3588_s15, 3 }
   0x4   : > { %p173_p2 = pnand %p2565_p0, %p172_p1 }
   0x6   : > { %176 = sbr.rel (%p173_p2) target bundleno = 584 (0x248), region = 36 }
   0xd   : > { %v3493_v0 = vld [vmem:[%s4939_s2 + $0x40] sm:$0xff]   ;;  %v3495_v2 = vld [vmem:[%s4939_s2 + $0x48] sm:$0xff]   ;;  %p203_p3 = scmp.lt.s32.totalorder %s2561_s16, 1  ;;  %v3497_v4 = vld [vmem:[%s4939_s2 + $0x50] sm:$0xff]   ;;  %v3590_v6 = vmov 0.0   ;;  %vm316_vm0 = vcmask 1040384  }
   0xe   : > { %v3494_v1 = vld [vmem:[%s4939_s2] sm:$0xff]   ;;  %3466 = vmatprep.subr.bf16.mxu1 %v3493_v0  ;;  %3018 = vmatprep.subr.bf16.mxu0 %v3493_v0  ;;  %v3496_v3 = vld [vmem:[%s4939_s2 + $0x8] sm:$0xff]   ;;  %v3498_v5 = vld [vmem:[%s4939_s2 + $0x10] sm:$0xff]   ;;  %v3644_v7 = vrot.slane %v3590_v6, 7  ;;  %vm483_vm1 = vcmask 1046528   ;;  %vm596_vm2 = vcmask 1045504  }
   0xf   : > { %3474 = vmatpush3.bf16.msra.mxu1 %v3494_v1  ;;  %3019 = vmatpush3.bf16.msra.mxu0 %v3494_v1  ;;  %s5054_s16 = smov (!%p203_p3, %s2561_s16), 1  ;;  %v3499_v8 = vld [vmem:[%s4939_s2 + $0x58] sm:$0xff]   ;;  %v3501_v13 = vld [vmem:[%s4939_s2 + $0x60] sm:$0xff]   ;;  %v3503_v21 = vld [vmem:[%s4939_s2 + $0x68] sm:$0xff]   ;;  %vm3591_vm4 = vmmov 1   ;;  %vm1492_vm6 = vcmask 1041408  }
  0x10   : > { %3467 = vmatprep.subr.bf16.mxu1 %v3495_v2  ;;  %3020 = vmatprep.subr.bf16.mxu0 %v3495_v2  ;;  %v417_v9 = vsel %vm316_vm0, 0.0, %v3644_v7  ;;  %s3651_s5 = sshll.u32 %s5054_s16, 7  ;;  %v434_v10 = vsel %vm316_vm0, %v3644_v7, 0.0  ;;  %v3500_v11 = vld [vmem:[%s4939_s2 + $0x18] sm:$0xff]   ;;  %v485_v14 = vrot.slane %v3644_v7, 1  ;;  %v3502_v18 = vld [vmem:[%s4939_s2 + $0x20] sm:$0xff]   ;;  %v3725_v55 = vpack.c.bf16 %v3644_v7, %v3644_v7  ;;  %vm3742_vm3 = vmneg %vm316_vm0 }
  0x11   : > { %v484_v12 = vrot.slane %v417_v9, 1  ;;  %s3666_s12 = scalar_lea.vmem %s4937_s0, %s3651_s5  ;;  %v487_v15 = vrot.slane %v434_v10, 1  ;;  %v597_v17 = vrot.slane %v417_v9, 2  ;;  %v600_v20 = vrot.slane %v434_v10, 2  ;;  %v3504_v27 = vld [vmem:[%s4939_s2 + $0x28] sm:$0xff]   ;;  %v3505_v33 = vld [vmem:[%s4939_s2 + $0x70] sm:$0xff]   ;;  %vm3783_vm5 = vmpackc.low %vm3591_vm4, %vm3742_vm3  ;;  %s4306_s6 = scalar_lea.vmem %s4938_s1, %s3651_s5 }
  0x12   : > { %v3009_v22 = vld [vmem:[%s3666_s12 + $0x38] sm:$0xff]   ;;  %v598_v24 = vrot.slane %v3644_v7, 2  ;;  %v3010_v37 = vld [vmem:[%s3666_s12 + $0x40] sm:$0xff]   ;;  %v3506_v38 = vld [vmem:[%s4939_s2 + $0x30] sm:$0xff]   ;;  %4994 = vst [vmem:[#allocation4_spill] sm:$0xff] %v3725_v55  ;;  %vm1443_vm7 = vcmask 31744   ;;  %s4838_s9 = scalar_lea.vmem %s4941_s4, %s3651_s5 }
  0x13   : > { %3475 = vmatpush3.bf16.msra.mxu1 %v3496_v3  ;;  %3021 = vmatpush3.bf16.msra.mxu0 %v3496_v3  ;;  %v486_v16 = vsel %vm483_vm1, %v484_v12, %v485_v14  ;;  %v488_v19 = vsel %vm483_vm1, %v485_v14, %v487_v15  ;;  %v2969_v25 = vunpack.c.l.bf16 %v3009_v22  ;;  %v2970_v26 = vunpack.c.h.bf16 %v3009_v22  ;;  %v2940_v44 = vld [vmem:[%s3666_s12] sm:$0xff]   ;;  %v3507_v45 = vld [vmem:[%s4939_s2 + $0x78] sm:$0xff]   ;;  %v3011_v58 = vld [vmem:[%s3666_s12 + $0x48] sm:$0xff]  }
  0x14   : > { %3468 = vmatprep.subr.bf16.mxu1 %v3497_v4  ;;  %3022 = vmatprep.subr.bf16.mxu0 %v3497_v4  ;;  %v3677_v23 = vpack.c.bf16 %v488_v19, %v486_v16  ;;  %v599_v28 = vsel %vm596_vm2, %v597_v17, %v598_v24  ;;  %v601_v29 = vsel %vm596_vm2, %v598_v24, %v600_v20  ;;  %v2973_v42 = vunpack.c.l.bf16 %v3010_v37  ;;  %v3508_v50 = vld [vmem:[%s4939_s2 + $0x38] sm:$0xff]   ;;  %v3509_v54 = vld [vmem:[%s4939_s2 + $0xc0] sm:$0xff]   ;;  %v3513_v14 = vld [vmem:[%s4939_s2 + $0xc8] sm:$0xff]  }
  0x15   : > { %v340_v30 = vrot.slane %v2969_v25, 7  ;;  %v341_v31 = vrot.slane %v2970_v26, 7  ;;  %v3686_v32 = vpack.c.bf16 %v601_v29, %v599_v28  ;;  %v2974_v43 = vunpack.c.h.bf16 %v3010_v37  ;;  %v3511_v1 = vld [vmem:[%s4939_s2 + $0x140] sm:$0xff]   ;;  %v3515_v22 = vld [vmem:[%s4939_s2 + $0x148] sm:$0xff]  }
  0x16   : > { %4992 = vst [vmem:[#allocation2_spill] sm:$0xff] %v3677_v23  ;;  %1528 = vmatprep.mubr.bf16.mxu0 %v3677_v23  ;;  %v2941_v48 = vunpack.c.l.bf16 %v2940_v44  ;;  %v2942_v49 = vunpack.c.h.bf16 %v2940_v44  ;;  %v3718_v52 = vrot.slane %v2973_v42, 7  ;;  %v2977_v62 = vunpack.c.l.bf16 %v3011_v58  ;;  %v3512_v6 = vld [vmem:[%s4939_s2 + $0x100] sm:$0xff]   ;;  %v3514_v29 = vld [vmem:[%s4939_s2 + $0x88] sm:$0xff]  }
  0x17   : > { %3476 = vmatpush3.bf16.msra.mxu1 %v3498_v5  ;;  %3023 = vmatpush3.bf16.msra.mxu0 %v3498_v5  ;;  %v3692_v34 = vsel %vm316_vm0, %v340_v30, %v341_v31  ;;  %v3695_v35 = vsel %vm316_vm0, 0.0, %v340_v30  ;;  %v3698_v36 = vsel %vm316_vm0, %v341_v31, 0.0  ;;  %v344_v53 = vrot.slane %v2974_v43, 7  ;;  %v3510_v5 = vld [vmem:[%s4939_s2 + $0x80] sm:$0xff]  }
  0x18   : > { %3469 = vmatprep.subr.bf16.mxu1 %v3499_v8  ;;  %3024 = vmatprep.subr.bf16.mxu0 %v3499_v8  ;;  %v524_v39 = vrot.slane %v3695_v35, 1  ;;  %v525_v40 = vrot.slane %v3692_v34, 1  ;;  %v527_v41 = vrot.slane %v3698_v36, 1  ;;  %v3727_v56 = vrot.slane %v2941_v48, 7 }
  0x19   : > { %v320_v57 = vrot.slane %v2942_v49, 7  ;;  %v3732_v59 = vsel %vm316_vm0, %v3718_v52, %v344_v53  ;;  %v3736_v60 = vsel %vm316_vm0, 0.0, %v3718_v52  ;;  %v3739_v61 = vsel %vm316_vm0, %v344_v53, 0.0 }
  0x1a   : > { %v526_v46 = vsel %vm483_vm1, %v524_v39, %v525_v40  ;;  %v528_v47 = vsel %vm483_vm1, %v525_v40, %v527_v41  ;;  %v3747_v0 = vpack.c.bf16 %v3692_v34, %v340_v30  ;;  %v529_v2 = vrot.slane %v3736_v60, 1  ;;  %v3516_v30 = vld [vmem:[%s4939_s2 + $0x108] sm:$0xff]  }
  0x1b   : > { %3477 = vmatpush3.bf16.msra.mxu1 %v3500_v11  ;;  %3025 = vmatpush3.bf16.msra.mxu0 %v3500_v11  ;;  %v3716_v51 = vpack.c.bf16 %v528_v47, %v526_v46  ;;  %v530_v3 = vrot.slane %v3732_v59, 1  ;;  %v532_v4 = vrot.slane %v3739_v61, 1  ;;  %v3764_v7 = vsel %vm316_vm0, %v3727_v56, %v320_v57  ;;  %v3003_v11 = vld [vmem:[%s3666_s12 + $0x8] sm:$0xff]   ;;  %v3517_v46 = vld [vmem:[%s4939_s2 + $0xd0] sm:$0xff]  }
  0x1c   : > { %3470 = vmatprep.subr.bf16.mxu1 %v3501_v13  ;;  %3026 = vmatprep.subr.bf16.mxu0 %v3501_v13  ;;  %4997 = vst [vmem:[#allocation5_spill] sm:$0xff] %v3747_v0  ;;  %v3768_v8 = vsel %vm316_vm0, 0.0, %v3727_v56  ;;  %v3771_v9 = vsel %vm316_vm0, %v320_v57, 0.0  ;;  %v2978_v10 = vunpack.c.h.bf16 %v3011_v58  ;;  %v490_v16 = vrot.slane %v3764_v7, 1 }
  0x1d   : > { %4993 = vst [vmem:[#allocation3_spill] sm:$0xff] %v3716_v51  ;;  %1592 = vmatprep.mubr.bf16.mxu1 %v3716_v51  ;;  %v531_v12 = vsel %vm483_vm1, %v529_v2, %v530_v3  ;;  %v533_v13 = vsel %vm483_vm1, %v530_v3, %v532_v4  ;;  %v489_v15 = vrot.slane %v3768_v8, 1  ;;  %v492_v19 = vrot.slane %v3771_v9, 1  ;;  %v3518_v2 = vld [vmem:[%s4939_s2 + $0x90] sm:$0xff]  }
  0x1e   : > { %v346_v20 = vrot.slane %v2977_v62, 7  ;;  %v347_v24 = vrot.slane %v2978_v10, 7  ;;  %v2945_v25 = vunpack.c.l.bf16 %v3003_v11  ;;  %v2946_v26 = vunpack.c.h.bf16 %v3003_v11  ;;  %v3520_v3 = vld [vmem:[%s4939_s2 + $0x110] sm:$0xff]  }
  0x1f   : > { %3478 = vmatpush3.bf16.msra.mxu1 %v3502_v18  ;;  %3027 = vmatpush3.bf16.msra.mxu0 %v3502_v18  ;;  %v3787_v18 = vpack.c.bf16 %v533_v13, %v531_v12  ;;  %v493_v28 = vsel %vm483_vm1, %v490_v16, %v492_v19  ;;  %v3823_v43 = vpack.c.bf16 %v3732_v59, %v3718_v52  ;;  %v3521_v12 = vld [vmem:[%s4939_s2 + $0xd8] sm:$0xff]   ;;  %vm2461_vm8 = vcmask 27648  }
  0x20   : > { %3471 = vmatprep.subr.bf16.mxu1 %v3503_v21  ;;  %3028 = vmatprep.subr.bf16.mxu0 %v3503_v21  ;;  %v491_v21 = vsel %vm483_vm1, %v489_v15, %v490_v16  ;;  %v3803_v31 = vsel %vm316_vm0, 0.0, %v346_v20  ;;  %v3815_v40 = vsel %vm316_vm0, %v346_v20, %v347_v24  ;;  %v3818_v41 = vsel %vm316_vm0, %v347_v24, 0.0  ;;  %v3523_v13 = vld [vmem:[%s4939_s2 + $0x158] sm:$0xff]  }
  0x21   : > { %5000 = vst [vmem:[#allocation6_spill] sm:$0xff] %v3787_v18  ;;  %v3812_v39 = vpack.c.bf16 %v493_v28, %v491_v21  ;;  %v534_v42 = vrot.slane %v3803_v31, 1  ;;  %5001 = vst [vmem:[#allocation7_spill] sm:$0xff] %v3823_v43  ;;  %v535_v44 = vrot.slane %v3815_v40, 1  ;;  %v322_v47 = vrot.slane %v2945_v25, 7 }
  0x22   : > { %v3833_v48 = vpack.c.bf16 %v3764_v7, %v3727_v56  ;;  %v323_v49 = vrot.slane %v2946_v26, 7  ;;  %v3875_v15 = vpack.c.bf16 %v3815_v40, %v346_v20 }
  0x23   : > { %3479 = vmatpush3.bf16.msra.mxu1 %v3504_v27  ;;  %3029 = vmatpush3.bf16.msra.mxu0 %v3504_v27  ;;  %v3012_v27 = vld [vmem:[%s3666_s12 + $0x50] sm:$0xff]   ;;  %v3844_v58 = vsel %vm316_vm0, 0.0, %v322_v47 }
  0x24   : > { %3472 = vmatprep.subr.bf16.mxu1 %v3505_v33  ;;  %3030 = vmatprep.subr.bf16.mxu0 %v3505_v33  ;;  %v2981_v33 = vunpack.c.l.bf16 %v3012_v27  ;;  %v2982_v37 = vunpack.c.h.bf16 %v3012_v27  ;;  %v3847_v62 = vsel %vm316_vm0, %v322_v47, %v323_v49  ;;  %v3850_v63 = vsel %vm316_vm0, %v323_v49, 0.0  ;;  %5003 = vst [vmem:[#allocation9_spill] sm:$0xff] %v3875_v15  ;;  %v3522_v27 = vld [vmem:[%s4939_s2 + $0x98] sm:$0xff]   ;;  %v3014_v49 = vld [vmem:[%s3666_s12 + $0x60] sm:$0xff]  }
  0x25   : > { %v497_v10 = vrot.slane %v3850_v63, 1 }
  0x26   : > { %v3838_v52 = vrot.slane %v2981_v33, 7  ;;  %v350_v53 = vrot.slane %v2982_v37, 7  ;;  %v3524_v33 = vld [vmem:[%s4939_s2 + $0x118] sm:$0xff]  }
  0x27   : > { %3480 = vmatpush3.bf16.msra.mxu1 %v3506_v38  ;;  %3031 = vmatpush3.bf16.msra.mxu0 %v3506_v38  ;;  %v3004_v38 = vld [vmem:[%s3666_s12 + $0x10] sm:$0xff]  }
  0x28   : > { %3473 = vmatprep.subr.bf16.mxu1 %v3507_v45  ;;  %3032 = vmatprep.subr.bf16.mxu0 %v3507_v45  ;;  %v537_v45 = vrot.slane %v3818_v41, 1  ;;  %v2949_v56 = vunpack.c.l.bf16 %v3004_v38  ;;  %v2950_v4 = vunpack.c.h.bf16 %v3004_v38  ;;  %v3865_v11 = vsel %vm316_vm0, %v3838_v52, %v350_v53 }
  0x29   : > { %v3879_v16 = vsel %vm316_vm0, 0.0, %v3838_v52  ;;  %v3882_v19 = vsel %vm316_vm0, %v350_v53, 0.0  ;;  %v540_v21 = vrot.slane %v3865_v11, 1 }
  0x2a   : > { %v538_v57 = vsel %vm483_vm1, %v535_v44, %v537_v45  ;;  %v539_v26 = vrot.slane %v3879_v16, 1  ;;  %v542_v20 = vrot.slane %v3882_v19, 1  ;;  %v3525_v45 = vld [vmem:[%s4939_s2 + $0xe0] sm:$0xff]  }
  0x2b   : > { %3481 = vmatpush3.bf16.msra.mxu1 %v3508_v50  ;;  %3033 = vmatpush3.bf16.msra.mxu0 %v3508_v50  ;;  %v3519_v50 = vld [vmem:[%s4939_s2 + $0x150] sm:$0xff]  }
  0x2c   : > { %3130 = vmatprep.subr.bf16.mxu1 %v3509_v54  ;;  %3242 = vmatprep.subr.bf16.mxu0 %v3511_v1  ;;  %v536_v54 = vsel %vm483_vm1, %v534_v42, %v535_v44  ;;  %v494_v1 = vrot.slane %v3844_v58, 1  ;;  %v541_v38 = vsel %vm483_vm1, %v539_v26, %v540_v21  ;;  %v543_v42 = vsel %vm483_vm1, %v540_v21, %v542_v20  ;;  %v3528_v21 = vld [vmem:[%s4939_s2 + $0x120] sm:$0xff]  }
  0x2d   : > { %v2990_v26 = vunpack.c.h.bf16 %v3014_v49 }
  0x2e   : > { %2697 = vmatmul.mubr.msk.bf16.vlgmr.msra.gmra.mrb[0].mxu1 %vm3783_vm5, %v3747_v0  ;;  %2665 = vmatmul.mubr.msk.bf16.vlgmr.msra.gmra.mrb[0].mxu0 %vm3783_vm5, %v3725_v55 }
  0x2f   : > { %3131 = vmatpush3.bf16.msra.mxu1 %v3510_v5  ;;  %3243 = vmatpush3.bf16.msra.mxu0 %v3512_v6  ;;  %v3859_v5 = vpack.c.bf16 %v538_v57, %v536_v54  ;;  %v495_v6 = vrot.slane %v3847_v62, 1 }
  0x30   : > { %1600 = vmatprep.mubr.bf16.mxu1 %v3787_v18  ;;  %3132 = vmatprep.subr.bf16.mxu1 %v3513_v14  ;;  %v3013_v14 = vld [vmem:[%s3666_s12 + $0x58] sm:$0xff]   ;;  %v3007_v18 = vld [vmem:[%s3666_s12 + $0x28] sm:$0xff]  }
  0x31   : > { %1536 = vmatprep.mubr.bf16.mxu0 %v3812_v39  ;;  %3244 = vmatprep.subr.bf16.mxu0 %v3515_v22  ;;  %5002 = vst [vmem:[#allocation8_spill] sm:$0xff] %v3859_v5  ;;  %v3005_v22 = vld [vmem:[%s3666_s12 + $0x18] sm:$0xff]   ;;  %v496_v24 = vsel %vm483_vm1, %v494_v1, %v495_v6  ;;  %v498_v25 = vsel %vm483_vm1, %v495_v6, %v497_v10  ;;  %v2985_v37 = vunpack.c.l.bf16 %v3013_v14  ;;  %v2986_v44 = vunpack.c.h.bf16 %v3013_v14 }
  0x32   : > { %v3899_v28 = vpack.c.bf16 %v498_v25, %v496_v24  ;;  %v2954_v10 = vunpack.c.h.bf16 %v3005_v22  ;;  %v2989_v25 = vunpack.c.l.bf16 %v3014_v49 }
  0x33   : > { %3133 = vmatpush3.bf16.msra.mxu1 %v3514_v29  ;;  %3245 = vmatpush3.bf16.msra.mxu0 %v3516_v30  ;;  %v3901_v29 = vrot.slane %v2949_v56, 7  ;;  %v326_v30 = vrot.slane %v2950_v4, 7  ;;  %v3928_v56 = vpack.c.bf16 %v543_v42, %v541_v38  ;;  %v352_v4 = vrot.slane %v2985_v37, 7 }
  0x34   : > { %3134 = vmatprep.subr.bf16.mxu1 %v3517_v46  ;;  %3246 = vmatprep.subr.bf16.mxu0 %v3519_v50  ;;  %5004 = vst [vmem:[#allocation10_spill] sm:$0xff] %v3899_v28  ;;  %v2953_v46 = vunpack.c.l.bf16 %v3005_v22  ;;  %v3915_v50 = vpack.c.bf16 %v3847_v62, %v322_v47  ;;  %v353_v6 = vrot.slane %v2986_v44, 7  ;;  %v3006_v44 = vld [vmem:[%s3666_s12 + $0x20] sm:$0xff]  }
  0x35   : > { %v3919_v53 = vsel %vm316_vm0, %v3901_v29, %v326_v30  ;;  %v3923_v54 = vsel %vm316_vm0, 0.0, %v3901_v29  ;;  %v3926_v57 = vsel %vm316_vm0, %v326_v30, 0.0  ;;  %5005 = vst [vmem:[#allocation11_spill] sm:$0xff] %v3928_v56  ;;  %v3952_v30 = vsel %vm316_vm0, 0.0, %v352_v4 }
  0x36   : > { %2701 = vmatmul.mubr.msk.bf16.gmra.mrb[4].mxu1 %vm3783_vm5, %v3823_v43  ;;  %2669 = vmatmul.mubr.msk.bf16.gmra.mrb[4].mxu0 %vm3783_vm5, %v3833_v48  ;;  %v499_v1 = vrot.slane %v3923_v54, 1  ;;  %v500_v47 = vrot.slane %v3919_v53, 1  ;;  %v3936_v14 = vrot.slane %v2953_v46, 7  ;;  %v3949_v22 = vsel %vm316_vm0, %v352_v4, %v353_v6  ;;  %v3531_v46 = vld [vmem:[%s4939_s2 + $0x168] sm:$0xff]  }
  0x37   : > { %1608 = vmatprep.mubr.bf16.mxu1 %v3859_v5  ;;  %3135 = vmatpush3.bf16.msra.mxu1 %v3518_v2  ;;  %v502_v2 = vrot.slane %v3926_v57, 1  ;;  %v3955_v37 = vsel %vm316_vm0, %v353_v6, 0.0  ;;  %v544_v38 = vrot.slane %v3952_v30, 1  ;;  %v545_v42 = vrot.slane %v3949_v22, 1 }
  0x38   : > { %1544 = vmatprep.mubr.bf16.mxu0 %v3899_v28  ;;  %3247 = vmatpush3.bf16.msra.mxu0 %v3520_v3  ;;  %v3527_v3 = vld [vmem:[%s4939_s2 + $0x160] sm:$0xff]   ;;  %v501_v24 = vsel %vm483_vm1, %v499_v1, %v500_v47  ;;  %v3975_v49 = vsel %vm316_vm0, 0.0, %v3936_v14  ;;  %v3977_v1 = vrot.slane %v2989_v25, 7  ;;  %v3988_v6 = vpack.c.bf16 %v3865_v11, %v3838_v52  ;;  %v3015_v25 = vld [vmem:[%s3666_s12 + $0x68] sm:$0xff]  }
  0x39   : > { %3136 = vmatprep.subr.bf16.mxu1 %v3521_v12  ;;  %3248 = vmatprep.subr.bf16.mxu0 %v3523_v13  ;;  %v3526_v12 = vld [vmem:[%s4939_s2 + $0xa0] sm:$0xff]   ;;  %v503_v13 = vsel %vm483_vm1, %v500_v47, %v502_v2  ;;  %v356_v47 = vrot.slane %v2990_v26, 7  ;;  %v3530_v2 = vld [vmem:[%s4939_s2 + $0xa8] sm:$0xff]   ;;  %v4034_v0 = vpack.c.bf16 %v3949_v22, %v352_v4  ;;  %v2994_v4 = vunpack.c.h.bf16 %v3015_v25 }
  0x3a   : > { %v3946_v20 = vpack.c.bf16 %v503_v13, %v501_v24  ;;  %5007 = vst [vmem:[#allocation13_spill] sm:$0xff] %v3988_v6  ;;  %v504_v13 = vrot.slane %v3975_v49, 1 }
  0x3b   : > { %3137 = vmatpush3.bf16.msra.mxu1 %v3522_v27  ;;  %v547_v27 = vrot.slane %v3955_v37, 1  ;;  %v4004_v52 = vsel %vm316_vm0, %v3977_v1, %v356_v47  ;;  %v4025_v5 = vsel %vm316_vm0, %v356_v47, 0.0  ;;  %5011 = vst [vmem:[#allocation17_spill] sm:$0xff] %v4034_v0  ;;  %v2993_v47 = vunpack.c.l.bf16 %v3015_v25 }
  0x3c   : > { %5006 = vst [vmem:[#allocation12_spill] sm:$0xff] %v3946_v20  ;;  %3249 = vmatpush3.bf16.msra.mxu0 %v3524_v33  ;;  %3138 = vmatprep.subr.bf16.mxu1 %v3525_v45  ;;  %v3529_v33 = vld [vmem:[%s4939_s2 + $0xe8] sm:$0xff]   ;;  %v329_v45 = vrot.slane %v2954_v10, 7  ;;  %v546_v10 = vsel %vm483_vm1, %v544_v38, %v545_v42  ;;  %v2957_v38 = vunpack.c.l.bf16 %v3006_v44 }
  0x3d   : > { %3250 = vmatprep.subr.bf16.mxu0 %v3527_v3  ;;  %v3532_v3 = vld [vmem:[%s4939_s2 + $0x128] sm:$0xff]   ;;  %v548_v24 = vsel %vm483_vm1, %v545_v42, %v547_v27  ;;  %v3533_v42 = vld [vmem:[%s4939_s2 + $0xf0] sm:$0xff]   ;;  %v4011_v27 = vpack.c.bf16 %v3919_v53, %v3901_v29  ;;  %v4061_v25 = vrot.slane %v2993_v47, 7 }
  0x3e   : > { %2705 = vmatmul.mubr.msk.bf16.gmra.mrb[8].mxu1 %vm3783_vm5, %v3875_v15  ;;  %2673 = vmatmul.mubr.msk.bf16.gmra.mrb[8].mxu0 %vm3783_vm5, %v3915_v50  ;;  %v3997_v26 = vsel %vm316_vm0, %v3936_v14, %v329_v45  ;;  %v4000_v55 = vsel %vm316_vm0, %v329_v45, 0.0  ;;  %v550_v15 = vrot.slane %v4004_v52, 1 }
  0x3f   : > { %1616 = vmatprep.mubr.bf16.mxu1 %v3928_v56  ;;  %1552 = vmatprep.mubr.bf16.mxu0 %v3946_v20  ;;  %5008 = vst [vmem:[#allocation14_spill] sm:$0xff] %v4000_v55  ;;  %5009 = vst [vmem:[#allocation15_spill] sm:$0xff] %v4011_v27  ;;  %v505_v23 = vrot.slane %v3997_v26, 1  ;;  %v507_v45 = vrot.slane %v4000_v55, 1  ;;  %v4022_v56 = vpack.c.bf16 %v548_v24, %v546_v10  ;;  %v4038_v24 = vrot.slane %v2957_v38, 7  ;;  %v3534_v20 = vld [vmem:[%s4939_s2 + $0xb0] sm:$0xff]  }
  0x40   : > { %3139 = vmatpush3.bf16.msra.mxu1 %v3526_v12  ;;  %3251 = vmatpush3.bf16.msra.mxu0 %v3528_v21  ;;  %v4017_v12 = vsel %vm316_vm0, 0.0, %v3977_v1  ;;  %v3535_v21 = vld [vmem:[%s4939_s2 + $0x170] sm:$0xff]   ;;  %v2962_v38 = vunpack.c.h.bf16 %v3007_v18 }
  0x41   : > { %3140 = vmatprep.subr.bf16.mxu1 %v3529_v33  ;;  %3252 = vmatprep.subr.bf16.mxu0 %v3531_v46  ;;  %5010 = vst [vmem:[#allocation16_spill] sm:$0xff] %v4022_v56  ;;  %v549_v29 = vrot.slane %v4017_v12, 1  ;;  %v506_v43 = vsel %vm483_vm1, %v504_v13, %v505_v23  ;;  %v508_v51 = vsel %vm483_vm1, %v505_v23, %v507_v45  ;;  %v552_v33 = vrot.slane %v4025_v5, 1  ;;  %v3536_v23 = vld [vmem:[%s4939_s2 + $0x130] sm:$0xff]  }
  0x42   : > { %v2958_v46 = vunpack.c.h.bf16 %v3006_v44  ;;  %v4036_v10 = vpack.c.bf16 %v508_v51, %v506_v43  ;;  %v2961_v51 = vunpack.c.l.bf16 %v3007_v18  ;;  %v3537_v43 = vld [vmem:[%s4939_s2 + $0xf8] sm:$0xff]   ;;  %v3008_v55 = vld [vmem:[%s3666_s12 + $0x30] sm:$0xff]  }
  0x43   : > { %v551_v44 = vsel %vm483_vm1, %v549_v29, %v550_v15  ;;  %v359_v29 = vrot.slane %v2994_v4, 7  ;;  %v3539_v18 = vld [vmem:[%s4939_s2 + $0x178] sm:$0xff]  }
  0x44   : > { %5012 = vst [vmem:[#allocation18_spill] sm:$0xff] %v4036_v10  ;;  %3141 = vmatpush3.bf16.msra.mxu1 %v3530_v2  ;;  %3253 = vmatpush3.bf16.msra.mxu0 %v3532_v3  ;;  %v332_v13 = vrot.slane %v2958_v46, 7  ;;  %v553_v2 = vsel %vm483_vm1, %v550_v15, %v552_v33  ;;  %v4059_v3 = vsel %vm316_vm0, 0.0, %v4038_v24  ;;  %v4081_v33 = vpack.c.bf16 %v3997_v26, %v3936_v14 }
  0x45   : > { %3142 = vmatprep.subr.bf16.mxu1 %v3533_v42  ;;  %3254 = vmatprep.subr.bf16.mxu0 %v3535_v21  ;;  %5013 = vst [vmem:[#allocation19_spill] sm:$0xff] %v4059_v3  ;;  %v3538_v42 = vld [vmem:[%s4939_s2 + $0xb8] sm:$0xff]   ;;  %v509_v21 = vrot.slane %v4059_v3, 1  ;;  %v4092_v4 = vpack.c.bf16 %v553_v2, %v551_v44  ;;  %v4096_v14 = vsel %vm316_vm0, %v4061_v25, %v359_v29 }
  0x46   : > { %2709 = vmatmul.mubr.msk.bf16.gmra.mrb[12].mxu1 %vm3783_vm5, %v3988_v6  ;;  %2677 = vmatmul.mubr.msk.bf16.gmra.mrb[12].mxu0 %vm3783_vm5, %v4011_v27  ;;  %v4070_v45 = vsel %vm316_vm0, %v4038_v24, %v332_v13  ;;  %v4073_v15 = vsel %vm316_vm0, %v332_v13, 0.0  ;;  %5015 = vst [vmem:[#allocation21_spill] sm:$0xff] %v4081_v33  ;;  %v3540_v13 = vld [vmem:[%s4939_s2 + $0x138] sm:$0xff]   ;;  %v4099_v6 = vsel %vm316_vm0, %v359_v29, 0.0  ;;  %v555_v3 = vrot.slane %v4096_v14, 1 }
  0x47   : > { %1624 = vmatprep.mubr.bf16.mxu1 %v4022_v56  ;;  %1560 = vmatprep.mubr.bf16.mxu0 %v4036_v10  ;;  %5014 = vst [vmem:[#allocation20_spill] sm:$0xff] %v4073_v15  ;;  %v510_v46 = vrot.slane %v4070_v45, 1  ;;  %v512_v47 = vrot.slane %v4073_v15, 1  ;;  %v4087_v56 = vsel %vm316_vm0, 0.0, %v4061_v25  ;;  %5016 = vst [vmem:[#allocation22_spill] sm:$0xff] %v4092_v4  ;;  %v4101_v10 = vrot.slane %v2961_v51, 7 }
  0x48   : > { %3143 = vmatpush3.bf16.msra.mxu1 %v3534_v20  ;;  %3255 = vmatpush3.bf16.msra.mxu0 %v3536_v23  ;;  %v3016_v15 = vld [vmem:[%s3666_s12 + $0x70] sm:$0xff]   ;;  %v3541_v20 = vld [vmem:[%s4939_s2 + $0x1c0] sm:$0xff]   ;;  %v554_v2 = vrot.slane %v4087_v56, 1  ;;  %v557_v51 = vrot.slane %v4099_v6, 1  ;;  %v335_v27 = vrot.slane %v2962_v38, 7  ;;  %v4973_v38 = vmov 0  }
  0x49   : > { %3144 = vmatprep.subr.bf16.mxu1 %v3537_v43  ;;  %3256 = vmatprep.subr.bf16.mxu0 %v3539_v18  ;;  %v511_v23 = vsel %vm483_vm1, %v509_v21, %v510_v46  ;;  %v513_v44 = vsel %vm483_vm1, %v510_v46, %v512_v47  ;;  %v4116_v43 = vsel %vm316_vm0, 0.0, %v4101_v10  ;;  %v2997_v28 = vunpack.c.l.bf16 %v3016_v15 }
  0x4a   : > { %v4111_v29 = vpack.c.bf16 %v513_v44, %v511_v23  ;;  %5018 = vst [vmem:[#allocation24_spill] sm:$0xff] %v4116_v43  ;;  %v514_v18 = vrot.slane %v4116_v43, 1  ;;  %v4122_v21 = vsel %vm316_vm0, %v4101_v10, %v335_v27  ;;  %v4125_v46 = vsel %vm316_vm0, %v335_v27, 0.0 }
  0x4b   : > { %v2998_v47 = vunpack.c.h.bf16 %v3016_v15  ;;  %v517_v27 = vrot.slane %v4125_v46, 1  ;;  %v361_v23 = vrot.slane %v2997_v28, 7  ;;  %v558_v15 = vsel %vm483_vm1, %v555_v3, %v557_v51 }
  0x4c   : > { %5017 = vst [vmem:[#allocation23_spill] sm:$0xff] %v4111_v29  ;;  %3145 = vmatpush3.bf16.msra.mxu1 %v3538_v42  ;;  %3257 = vmatpush3.bf16.msra.mxu0 %v3540_v13  ;;  %v556_v42 = vsel %vm483_vm1, %v554_v2, %v555_v3  ;;  %v515_v13 = vrot.slane %v4122_v21, 1  ;;  %v2965_v44 = vunpack.c.l.bf16 %v3008_v55 }
  0x4d   : > { %3354 = vmatprep.subr.bf16.mxu1 %v3541_v20  ;;  %2140 = vmatprep.subr.bf16.mxu0 %v4973_v38  ;;  %v362_v20 = vrot.slane %v2998_v47, 7  ;;  %v2966_v38 = vunpack.c.h.bf16 %v3008_v55  ;;  %v4143_v2 = vsel %vm316_vm0, 0.0, %v361_v23  ;;  %v4157_v55 = vpack.c.bf16 %v4070_v45, %v4038_v24 }
  0x4e   : > { %2713 = vmatmul.mubr.msk.bf16.gmra.mrb[16].mxu1 %vm3783_vm5, %v4034_v0  ;;  %2681 = vmatmul.mubr.msk.bf16.gmra.mrb[16].mxu0 %vm3783_vm5, %v4081_v33  ;;  %v516_v0 = vsel %vm483_vm1, %v514_v18, %v515_v13  ;;  %v518_v43 = vsel %vm483_vm1, %v515_v13, %v517_v27  ;;  %v4159_v3 = vpack.c.bf16 %v558_v15, %v556_v42  ;;  %v337_v51 = vrot.slane %v2965_v44, 7 }
  0x4f   : > { %1632 = vmatprep.mubr.bf16.mxu1 %v4092_v4  ;;  %1568 = vmatprep.mubr.bf16.mxu0 %v4111_v29  ;;  %v4146_v33 = vsel %vm316_vm0, %v361_v23, %v362_v20  ;;  %v4149_v28 = vsel %vm316_vm0, %v362_v20, 0.0  ;;  %v4153_v4 = vpack.c.bf16 %v4004_v52, %v3977_v1  ;;  %5020 = vst [vmem:[#allocation26_spill] sm:$0xff] %v4157_v55  ;;  %v559_v47 = vrot.slane %v4143_v2, 1 }
  0x50   : > { %5021 = vst [vmem:[#allocation27_spill] sm:$0xff] %v4159_v3  ;;  %v4161_v18 = vpack.c.bf16 %v518_v43, %v516_v0  ;;  %v560_v13 = vrot.slane %v4146_v33, 1  ;;  %v338_v27 = vrot.slane %v2966_v38, 7  ;;  %v562_v20 = vrot.slane %v4149_v28, 1 }
  0x51   : > { %5019 = vst [vmem:[#allocation25_spill] sm:$0xff] %v4153_v4  ;;  %v4167_v29 = vsel %vm316_vm0, 0.0, %v337_v51 }
  0x52   : > { %5022 = vst [vmem:[#allocation28_spill] sm:$0xff] %v4167_v29  ;;  %v4170_v1 = vsel %vm316_vm0, %v337_v51, %v338_v27  ;;  %v4173_v24 = vsel %vm316_vm0, %v338_v27, 0.0  ;;  %v519_v42 = vrot.slane %v4167_v29, 1  ;;  %v561_v38 = vsel %vm483_vm1, %v559_v47, %v560_v13 }
  0x53   : > { %5023 = vst [vmem:[#allocation29_spill] sm:$0xff] %v4173_v24  ;;  %v520_v0 = vrot.slane %v4170_v1, 1  ;;  %v522_v43 = vrot.slane %v4173_v24, 1  ;;  %v563_v15 = vsel %vm483_vm1, %v560_v13, %v562_v20  ;;  %v603_v29 = vrot.slane %v3764_v7, 2 }
  0x54   : > { %v4195_v24 = vpack.c.bf16 %v4096_v14, %v4061_v25  ;;  %v4201_v47 = vpack.c.bf16 %v563_v15, %v561_v38  ;;  %v607_v20 = vrot.slane %v3844_v58, 2  ;;  %v637_v25 = vrot.slane %v3695_v35, 2 }
  0x55   : > { %v521_v44 = vsel %vm483_vm1, %v519_v42, %v520_v0  ;;  %v523_v27 = vsel %vm483_vm1, %v520_v0, %v522_v43  ;;  %v610_v42 = vrot.slane %v3850_v63, 2  ;;  %v4219_v58 = vpack.c.bf16 %v4146_v33, %v361_v23 }
  0x56   : > { %2717 = vmatmul.mubr.msk.bf16.gmra.mrb[20].mxu1 %vm3783_vm5, %v4153_v4  ;;  %2685 = vmatmul.mubr.msk.bf16.gmra.mrb[20].mxu0 %vm3783_vm5, %v4157_v55  ;;  %v602_v4 = vrot.slane %v3768_v8, 2  ;;  %v605_v55 = vrot.slane %v3771_v9, 2  ;;  %v4203_v13 = vpack.c.bf16 %v523_v27, %v521_v44  ;;  %v608_v8 = vrot.slane %v3847_v62, 2 }
  0x57   : > { %1640 = vmatprep.mubr.bf16.mxu1 %v4159_v3  ;;  %1576 = vmatprep.mubr.bf16.mxu0 %v4161_v18  ;;  %v4199_v3 = vpack.c.bf16 %v4122_v21, %v4101_v10  ;;  %v638_v62 = vrot.slane %v3692_v34, 2  ;;  %v640_v63 = vrot.slane %v3698_v36, 2  ;;  %v4225_v35 = vpack.c.bf16 %v4170_v1, %v337_v51 }
  0x58   : > { %v604_v7 = vsel %vm596_vm2, %v602_v4, %v603_v29  ;;  %v606_v9 = vsel %vm596_vm2, %v603_v29, %v605_v55  ;;  %v609_v4 = vsel %vm596_vm2, %v607_v20, %v608_v8  ;;  %v642_v29 = vrot.slane %v3736_v60, 2 }
  0x59   : > { %v4227_v10 = vpack.c.bf16 %v606_v9, %v604_v7  ;;  %v611_v55 = vsel %vm596_vm2, %v608_v8, %v610_v42  ;;  %v639_v23 = vsel %vm596_vm2, %v637_v25, %v638_v62  ;;  %v641_v0 = vsel %vm596_vm2, %v638_v62, %v640_v63 }
  0x5a   : > { %v643_v43 = vrot.slane %v3732_v59, 2  ;;  %v4235_v34 = vpack.c.bf16 %v641_v0, %v639_v23  ;;  %v645_v36 = vrot.slane %v3739_v61, 2  ;;  %v647_v51 = vrot.slane %v3803_v31, 2 }
  0x5b   : > { %v648_v38 = vrot.slane %v3815_v40, 2  ;;  %v650_v60 = vrot.slane %v3818_v41, 2  ;;  %v652_v44 = vrot.slane %v3879_v16, 2  ;;  %v653_v27 = vrot.slane %v3865_v11, 2 }
  0x5c   : > { %v644_v15 = vsel %vm596_vm2, %v642_v29, %v643_v43  ;;  %v646_v20 = vsel %vm596_vm2, %v643_v43, %v645_v36  ;;  %v655_v8 = vrot.slane %v3882_v19, 2  ;;  %v657_v61 = vrot.slane %v3952_v30, 2 }
  0x5d   : > { %v649_v59 = vsel %vm596_vm2, %v647_v51, %v648_v38  ;;  %v4248_v7 = vpack.c.bf16 %v646_v20, %v644_v15  ;;  %v651_v31 = vsel %vm596_vm2, %v648_v38, %v650_v60  ;;  %v654_v40 = vsel %vm596_vm2, %v652_v44, %v653_v27 }
  0x5e   : > { %2721 = vmatmul.mubr.msk.bf16.gmra.mrb[24].mxu1 %vm3783_vm5, %v4195_v24  ;;  %2689 = vmatmul.mubr.msk.bf16.gmra.mrb[24].mxu0 %vm3783_vm5, %v4199_v3  ;;  %v658_v41 = vrot.slane %v3949_v22, 2  ;;  %v4259_v11 = vpack.c.bf16 %v651_v31, %v649_v59  ;;  %v656_v16 = vsel %vm596_vm2, %v653_v27, %v655_v8  ;;  %v660_v19 = vrot.slane %v3955_v37, 2  ;;  %v5025_v8 = vld [vmem:[#allocation14_spill] sm:$0xff]  ;;  %v3548_v31 = vld [vmem:[%s4939_s2 + $0x190] sm:$0xff]  }
  0x5f   : > { %1648 = vmatprep.mubr.bf16.mxu1 %v4201_v47  ;;  %1584 = vmatprep.mubr.bf16.mxu0 %v4203_v13  ;;  %v662_v30 = vrot.slane %v4017_v12, 2  ;;  %v4268_v22 = vpack.c.bf16 %v656_v16, %v654_v40  ;;  %v663_v42 = vrot.slane %v4004_v52, 2  ;;  %v665_v25 = vrot.slane %v4025_v5, 2  ;;  %v3549_v40 = vld [vmem:[%s4939_s2 + $0x210] sm:$0xff]   ;;  %v3551_v16 = vld [vmem:[%s4939_s2 + $0x198] sm:$0xff]  }
  0x60   : > { %v659_v9 = vsel %vm596_vm2, %v657_v61, %v658_v41  ;;  %v661_v62 = vsel %vm596_vm2, %v658_v41, %v660_v19  ;;  %v667_v37 = vrot.slane %v4087_v56, 2  ;;  %v668_v12 = vrot.slane %v4096_v14, 2  ;;  %v3543_v14 = vld [vmem:[%s4939_s2 + $0x200] sm:$0xff]   ;;  %v3552_v19 = vld [vmem:[%s4939_s2 + $0x218] sm:$0xff]  }
  0x61   : > { %v670_v63 = vrot.slane %v4099_v6, 2  ;;  %v4277_v29 = vpack.c.bf16 %v661_v62, %v659_v9  ;;  %v666_v23 = vsel %vm596_vm2, %v663_v42, %v665_v25  ;;  %v672_v0 = vrot.slane %v4143_v2, 2  ;;  %v3542_v6 = vld [vmem:[%s4939_s2 + $0x180] sm:$0xff]   ;;  %v5028_v62 = vld [vmem:[#allocation19_spill] sm:$0xff] }
  0x62   : > { %v669_v5 = vsel %vm596_vm2, %v667_v37, %v668_v12  ;;  %v673_v56 = vrot.slane %v4146_v33, 2  ;;  %v612_v36 = vrot.slane %v3923_v54, 2  ;;  %v675_v2 = vrot.slane %v4149_v28, 2  ;;  %v3544_v54 = vld [vmem:[%s4939_s2 + $0x1c8] sm:$0xff]  }
  0x63   : > { %v671_v43 = vsel %vm596_vm2, %v668_v12, %v670_v63  ;;  %v4297_v38 = vpack.c.bf16 %v611_v55, %v609_v4  ;;  %v613_v15 = vrot.slane %v3919_v53, 2  ;;  %v615_v33 = vrot.slane %v3926_v57, 2  ;;  %v3545_v53 = vld [vmem:[%s4939_s2 + $0x188] sm:$0xff]   ;;  %v3547_v55 = vld [vmem:[%s4939_s2 + $0x1d0] sm:$0xff]  }
  0x64   : > { %v4294_v51 = vpack.c.bf16 %v671_v43, %v669_v5  ;;  %v674_v60 = vsel %vm596_vm2, %v672_v0, %v673_v56  ;;  %v676_v44 = vsel %vm596_vm2, %v673_v56, %v675_v2  ;;  %v3546_v28 = vld [vmem:[%s4939_s2 + $0x208] sm:$0xff]   ;;  %v5024_v27 = vmov 0   ;;  %v5029_v63 = vld [vmem:[#allocation20_spill] sm:$0xff]  ;;  %v3555_v0 = vld [vmem:[%s4939_s2 + $0x1a0] sm:$0xff]  }
  0x65   : > { %v4317_v57 = vpack.c.bf16 %v676_v44, %v674_v60  ;;  %v616_v4 = vsel %vm596_vm2, %v613_v15, %v615_v33  ;;  %v617_v20 = vrot.slane %v3975_v49, 2  ;;  %v618_v59 = vrot.slane %v3997_v26, 2  ;;  %v3550_v49 = vld [vmem:[%s4939_s2 + $0x1d8] sm:$0xff]   ;;  %v5026_v26 = vld [vmem:[#allocation10_spill] sm:$0xff]  ;;  %v3557_v5 = vld [vmem:[%s4939_s2 + $0x1e8] sm:$0xff]  }
  0x66   : > { %2725 = vmatmul.mubr.msk.bf16.gmra.mrb[28].mxu1 %vm3783_vm5, %v4219_v58  ;;  %2693 = vmatmul.mubr.msk.bf16.gmra.mrb[28].mxu0 %vm3783_vm5, %v4225_v35  ;;  %v620_v61 = vrot.slane %v5025_v8, 2  ;;  %v622_v37 = vrot.slane %v5028_v62, 2  ;;  %v623_v12 = vrot.slane %v4070_v45, 2  ;;  %v5030_v45 = vld [vmem:[#allocation12_spill] sm:$0xff]  ;;  %v5031_v43 = vld [vmem:[#allocation21_spill] sm:$0xff]  ;;  %v630_v44 = vrot.slane %v4125_v46, 2 }
  0x67   : > { %2729 = vmatprep.mubr.msk.bf16.mxu1 %vm3783_vm5, %v3833_v48  ;;  %1850 = vmatprep.mubr.bf16.mxu0 %v4227_v10  ;;  %v664_v48 = vsel %vm596_vm2, %v662_v30, %v663_v42  ;;  %v5027_v30 = vld [vmem:[#allocation15_spill] sm:$0xff]  ;;  %v619_v9 = vsel %vm596_vm2, %v617_v20, %v618_v59  ;;  %v3560_v2 = vld [vmem:[%s4939_s2 + $0x1f0] sm:$0xff]   ;;  %v5034_v46 = vld [vmem:[#allocation26_spill] sm:$0xff] }
  0x68   : > { %v4282_v52 = vpack.c.bf16 %v666_v23, %v664_v48  ;;  %v621_v42 = vsel %vm596_vm2, %v618_v59, %v620_v61  ;;  %v625_v48 = vrot.slane %v5029_v63, 2  ;;  %v3553_v23 = vld [vmem:[%s4939_s2 + $0x220] sm:$0xff]   ;;  %v624_v56 = vsel %vm596_vm2, %v622_v37, %v623_v12  ;;  %v5032_v33 = vld [vmem:[#allocation24_spill] sm:$0xff]  ;;  %v3562_v20 = vld [vmem:[%s4939_s2 + $0x238] sm:$0xff]  }
  0x69   : > { %v4365_v25 = vpack.c.bf16 %v621_v42, %v619_v9  ;;  %v627_v60 = vrot.slane %v5032_v33, 2  ;;  %v3564_v59 = vld [vmem:[%s4939_s2 + $0x1b8] sm:$0xff]   ;;  %v3565_v8 = vld [vmem:[%s4939_s2 + $0x240] ss:$0 sps:$4 sm:$0x33]   ;;  %v5037_v9 = vld [vmem:[#allocation23_spill] sm:$0xff] }
  0x6a   : > { %v5039_v37 = vld [vmem:[#allocation3_spill] sm:$0xff]  ;;  %v5041_v63 = vld [vmem:[#allocation6_spill] sm:$0xff] }
  0x6e   : > { %1690 = vmatmul.mubr.bf16.vlgmr.msra.gmra.mrb[32].mxu1 %v3686_v32  ;;  %1851 = vmatmul.mubr.bf16.vlgmr.msra.gmra.mrb[32].mxu0 %v3812_v39  ;;  %v614_v39 = vsel %vm596_vm2, %v612_v36, %v613_v15  ;;  %v3558_v36 = vld [vmem:[%s4939_s2 + $0x1a8] sm:$0xff]  }
  0x6f   : > { %3355 = vmatpush3.bf16.msra.mxu1 %v3542_v6  ;;  %2141 = vmatpush1.bf16.msra.mxu0 %v3543_v14  ;;  %v4341_v41 = vpack.c.bf16 %v616_v4, %v614_v39  ;;  %v626_v6 = vsel %vm596_vm2, %v623_v12, %v625_v48  ;;  %v3556_v14 = vld [vmem:[%s4939_s2 + $0x228] sm:$0xff]   ;;  %v3563_v39 = vld [vmem:[%s4939_s2 + $0x1f8] sm:$0xff]  }
  0x70   : > { %2733 = vmatprep.mubr.msk.bf16.mxu1 %vm3783_vm5, %v3915_v50  ;;  %1858 = vmatprep.mubr.bf16.mxu0 %v4297_v38  ;;  %v4398_v15 = vpack.c.bf16 %v626_v6, %v624_v56  ;;  %v5040_v12 = vld [vmem:[#allocation7_spill] sm:$0xff]  ;;  %v5042_v48 = vld [vmem:[#allocation9_spill] sm:$0xff]  ;;  %v5047_v6 = vld [vmem:[#allocation16_spill] sm:$0xff] }
  0x71   : > { %3356 = vmatprep.subr.bf16.mxu1 %v3544_v54  ;;  %2142 = vmatprep.subr.bf16.mxu0 %v5024_v27  ;;  %v628_v54 = vrot.slane %v4122_v21, 2  ;;  %v5033_v21 = vld [vmem:[#allocation18_spill] sm:$0xff]  ;;  %v5046_v56 = vld [vmem:[#allocation17_spill] sm:$0xff] }
  0x73   : > { %3357 = vmatpush3.bf16.msra.mxu1 %v3545_v53  ;;  %2143 = vmatpush1.bf16.msra.mxu0 %v3546_v28  ;;  %v3559_v53 = vld [vmem:[%s4939_s2 + $0x230] sm:$0xff]   ;;  %v629_v4 = vsel %vm596_vm2, %v627_v60, %v628_v54 }
  0x74   : > { %3358 = vmatprep.subr.bf16.mxu1 %v3547_v55  ;;  %2144 = vmatprep.subr.bf16.mxu0 %v5024_v27  ;;  %v3561_v28 = vld [vmem:[%s4939_s2 + $0x1b0] sm:$0xff]   ;;  %v631_v55 = vsel %vm596_vm2, %v628_v54, %v630_v44  ;;  %v5049_v44 = vld [vmem:[#allocation22_spill] sm:$0xff] }
  0x75   : > { %v4431_v61 = vpack.c.bf16 %v631_v55, %v629_v4 }
  0x76   : > { %1698 = vmatmul.mubr.bf16.gmra.mrb[36].mxu1 %v4227_v10  ;;  %1859 = vmatmul.mubr.bf16.gmra.mrb[36].mxu0 %v5026_v26  ;;  %v3554_v10 = vld [vmem:[%s4939_s2 + $0x1e0] sm:$0xff]  }
  0x77   : > { %2737 = vmatprep.mubr.msk.bf16.mxu1 %vm3783_vm5, %v5027_v30  ;;  %1866 = vmatprep.mubr.bf16.mxu0 %v4341_v41 }
  0x78   : > { %3359 = vmatpush3.bf16.msra.mxu1 %v3548_v31  ;;  %2145 = vmatpush1.bf16.msra.mxu0 %v3549_v40  ;;  %v5035_v31 = vld [vmem:[#allocation28_spill] sm:$0xff] }
  0x79   : > { %3360 = vmatprep.subr.bf16.mxu1 %v3550_v49  ;;  %2146 = vmatprep.subr.bf16.mxu0 %v5024_v27  ;;  %v632_v40 = vrot.slane %v5035_v31, 2  ;;  %v633_v49 = vrot.slane %v4170_v1, 2 }
  0x7b   : > { %v634_v42 = vsel %vm596_vm2, %v632_v40, %v633_v49 }
  0x7c   : > { %3361 = vmatpush3.bf16.msra.mxu1 %v3551_v16  ;;  %2147 = vmatpush1.bf16.msra.mxu0 %v3552_v19  ;;  %v5036_v16 = vld [vmem:[#allocation29_spill] sm:$0xff] }
  0x7d   : > { %2148 = vmatprep.subr.bf16.mxu0 %v5024_v27  ;;  %3362 = vmatprep.subr.bf16.mxu1 %v3554_v10  ;;  %v635_v19 = vrot.slane %v5036_v16, 2  ;;  %v1494_v10 = vsel %vm1492_vm6, %v3565_v8, 0 }
  0x7e   : > { %1706 = vmatmul.mubr.bf16.gmra.mrb[40].mxu1 %v4297_v38  ;;  %1867 = vmatmul.mubr.bf16.gmra.mrb[40].mxu0 %v5030_v45 }
  0x7f   : > { %2741 = vmatprep.mubr.msk.bf16.mxu1 %vm3783_vm5, %v5031_v43  ;;  %1874 = vmatprep.mubr.bf16.mxu0 %v4365_v25  ;;  %v636_v1 = vsel %vm596_vm2, %v633_v49, %v635_v19 }
  0x80   : > { %2149 = vmatpush1.bf16.msra.mxu0 %v3553_v23  ;;  %3363 = vmatpush3.bf16.msra.mxu1 %v3555_v0  ;;  %v4445_v62 = vpack.c.bf16 %v636_v1, %v634_v42  ;;  %v5043_v23 = vld [vmem:[#allocation8_spill] sm:$0xff]  ;;  %v5044_v0 = vld [vmem:[#allocation13_spill] sm:$0xff] }
  0x81   : > { %2150 = vmatprep.subr.bf16.mxu0 %v5024_v27  ;;  %3364 = vmatprep.subr.bf16.mxu1 %v3557_v5  ;;  %v5045_v5 = vld [vmem:[#allocation11_spill] sm:$0xff] }
  0x84   : > { %2151 = vmatpush1.bf16.msra.mxu0 %v3556_v14  ;;  %3365 = vmatpush3.bf16.msra.mxu1 %v3558_v36  ;;  %v3017_v14 = vld [vmem:[%s3666_s12 + $0x78] sm:$0xff]  }
  0x85   : > { %2152 = vmatprep.subr.bf16.mxu0 %v5024_v27  ;;  %3366 = vmatprep.subr.bf16.mxu1 %v3560_v2  ;;  %v5048_v36 = vld [vmem:[#allocation25_spill] sm:$0xff]  ;;  %v3001_v2 = vunpack.c.l.bf16 %v3017_v14  ;;  %v3002_v33 = vunpack.c.h.bf16 %v3017_v14 }
  0x86   : > { %1714 = vmatmul.mubr.bf16.gmra.mrb[44].mxu1 %v4341_v41  ;;  %1875 = vmatmul.mubr.bf16.gmra.mrb[44].mxu0 %v5033_v21 }
  0x87   : > { %2745 = vmatprep.mubr.msk.bf16.mxu1 %vm3783_vm5, %v5034_v46  ;;  %1882 = vmatprep.mubr.bf16.mxu0 %v4398_v15  ;;  %v364_v60 = vrot.slane %v3001_v2, 7  ;;  %v365_v54 = vrot.slane %v3002_v33, 7  ;;  %v3566_v2 = vld [vmem:[%s4306_s6] sm:$0xff]   ;;  %v3567_v33 = vld [vmem:[%s4306_s6 + $0x8] sm:$0xff]  }
  0x88   : > { %2153 = vmatpush1.bf16.msra.mxu0 %v3559_v53  ;;  %3367 = vmatpush3.bf16.msra.mxu1 %v3561_v28 }
  0x89   : > { %2154 = vmatprep.subr.bf16.mxu0 %v5024_v27  ;;  %3368 = vmatprep.subr.bf16.mxu1 %v3563_v39  ;;  %v366_v53 = vsel %vm316_vm0, %v364_v60, %v365_v54  ;;  %v433_v28 = vsel %vm316_vm0, 0.0, %v364_v60  ;;  %v450_v39 = vsel %vm316_vm0, %v365_v54, 0.0 }
  0x8a   : > { %v718_v4 = vrot.slane %v433_v28, 2  ;;  %v719_v55 = vrot.slane %v366_v53, 2  ;;  %v4507_v40 = vpack.c.bf16 %v366_v53, %v364_v60  ;;  %v711_v16 = vrot.slane %v433_v28, 1  ;;  %v3568_v60 = vld [vmem:[%s4306_s6 + $0x10] sm:$0xff]   ;;  %v3570_v28 = vld [vmem:[%s4306_s6 + $0x20] sm:$0xff]  }
  0x8b   : > { %v712_v19 = vrot.slane %v366_v53, 1 }
  0x8c   : > { %2155 = vmatpush1.bf16.msra.mxu0 %v3562_v20  ;;  %3369 = vmatpush3.bf16.msra.mxu1 %v3564_v59  ;;  %v721_v20 = vrot.slane %v450_v39, 2  ;;  %v5050_v59 = vld [vmem:[#allocation27_spill] sm:$0xff]  ;;  %v720_v8 = vsel %vm596_vm2, %v718_v4, %v719_v55 }
  0x8d   : > { %2156 = vmatprep.subr.bf16.mxu0 %v5024_v27  ;;  %v5038_v27 = vld [vmem:[#allocation5_spill] sm:$0xff]  ;;  %v713_v42 = vsel %vm483_vm1, %v711_v16, %v712_v19 }
  0x8e   : > { %1722 = vmatmul.mubr.bf16.gmra.mrb[48].mxu1 %v4365_v25  ;;  %1883 = vmatmul.mubr.bf16.gmra.mrb[48].mxu0 %v5037_v9  ;;  %v722_v31 = vsel %vm596_vm2, %v719_v55, %v721_v20 }
  0x8f   : > { %2749 = vmatprep.mubr.msk.bf16.mxu1 %vm3783_vm5, %v4199_v3  ;;  %1890 = vmatprep.mubr.bf16.mxu0 %v4431_v61  ;;  %v4509_v49 = vpack.c.bf16 %v722_v31, %v720_v8 }
  0x90   : > { %2157 = vmatpush1.bf16.msra.mxu0 %v1494_v10  ;;  %v714_v10 = vrot.slane %v450_v39, 1 }
  0x92   : > { %v715_v1 = vsel %vm483_vm1, %v712_v19, %v714_v10 }
  0x93   : > { %v4519_v14 = vpack.c.bf16 %v715_v1, %v713_v42 }
  0x96   : > { %1730 = vmatmul.mubr.bf16.gmra.mrb[52].mxu1 %v4398_v15  ;;  %1891 = vmatmul.mubr.bf16.gmra.mrb[52].mxu0 %v4161_v18 }
  0x97   : > { %2753 = vmatprep.mubr.msk.bf16.mxu1 %vm3783_vm5, %v4225_v35  ;;  %1898 = vmatprep.mubr.bf16.mxu0 %v4445_v62 }
  0x9e   : > { %1738 = vmatmul.mubr.bf16.gmra.mrb[56].mxu1 %v4431_v61  ;;  %1899 = vmatmul.mubr.bf16.gmra.mrb[56].mxu0 %v4203_v13 }
  0x9f   : > { %2757 = vmatprep.mubr.msk.bf16.mxu1 %vm3783_vm5, %v5038_v27  ;;  %1906 = vmatprep.mubr.bf16.mxu0 %v4235_v34 }
  0xa6   : > { %1746 = vmatmul.mubr.bf16.gmra.mrb[60].mxu1 %v4445_v62  ;;  %1907 = vmatmul.mubr.bf16.gmra.mrb[60].mxu0 %v5039_v37 }
  0xa7   : > { %2761 = vmatprep.mubr.msk.bf16.mxu1 %vm3783_vm5, %v5040_v12  ;;  %1914 = vmatprep.mubr.bf16.mxu0 %v4248_v7 }
  0xae   : > { %1754 = vmatmul.mubr.bf16.gmra.mrb[64].mxu1 %v4235_v34  ;;  %1915 = vmatmul.mubr.bf16.gmra.mrb[64].mxu0 %v5041_v63 }
  0xaf   : > { %2765 = vmatprep.mubr.msk.bf16.mxu1 %vm3783_vm5, %v5042_v48  ;;  %1922 = vmatprep.mubr.bf16.mxu0 %v4259_v11 }
  0xb6   : > { %1762 = vmatmul.mubr.bf16.gmra.mrb[68].mxu1 %v4248_v7  ;;  %1923 = vmatmul.mubr.bf16.gmra.mrb[68].mxu0 %v5043_v23 }
  0xb7   : > { %2769 = vmatprep.mubr.msk.bf16.mxu1 %vm3783_vm5, %v5044_v0  ;;  %1930 = vmatprep.mubr.bf16.mxu0 %v4268_v22 }
  0xbe   : > { %1770 = vmatmul.mubr.bf16.gmra.mrb[72].mxu1 %v4259_v11  ;;  %1931 = vmatmul.mubr.bf16.gmra.mrb[72].mxu0 %v5045_v5 }
  0xbf   : > { %2773 = vmatprep.mubr.msk.bf16.mxu1 %vm3783_vm5, %v5046_v56  ;;  %1938 = vmatprep.mubr.bf16.mxu0 %v4277_v29 }
  0xc6   : > { %1778 = vmatmul.mubr.bf16.gmra.mrb[76].mxu1 %v4268_v22  ;;  %1939 = vmatmul.mubr.bf16.gmra.mrb[76].mxu0 %v5047_v6 }
  0xc7   : > { %2777 = vmatprep.mubr.msk.bf16.mxu1 %vm3783_vm5, %v5048_v36  ;;  %1946 = vmatprep.mubr.bf16.mxu0 %v4282_v52 }
  0xce   : > { %1786 = vmatmul.mubr.bf16.gmra.mrb[80].mxu1 %v4277_v29  ;;  %1947 = vmatmul.mubr.bf16.gmra.mrb[80].mxu0 %v5049_v44 }
  0xcf   : > { %2781 = vmatprep.mubr.msk.bf16.mxu1 %vm3783_vm5, %v4195_v24  ;;  %1954 = vmatprep.mubr.bf16.mxu0 %v4294_v51 }
  0xd6   : > { %1794 = vmatmul.mubr.bf16.gmra.mrb[84].mxu1 %v4282_v52  ;;  %1955 = vmatmul.mubr.bf16.gmra.mrb[84].mxu0 %v5050_v59 }
  0xd7   : > { %2785 = vmatprep.mubr.msk.bf16.mxu1 %vm3783_vm5, %v4219_v58  ;;  %1962 = vmatprep.mubr.bf16.mxu0 %v4317_v57 }
  0xde   : > { %1802 = vmatmul.mubr.bf16.gmra.mrb[88].mxu1 %v4294_v51  ;;  %1963 = vmatmul.mubr.bf16.gmra.mrb[88].mxu0 %v4201_v47 }
  0xdf   : > { %2789 = vmatprep.mubr.msk.bf16.mxu1 %vm3783_vm5, %v4507_v40  ;;  %1970 = vmatprep.mubr.bf16.mxu0 %v4509_v49 }
  0xe6   : > { %1810 = vmatmul.mubr.bf16.gmra.mrb[92].mxu1 %v4317_v57  ;;  %1971 = vmatmul.mubr.bf16.gmra.mrb[92].mxu0 %v4519_v14 }
  0xe7   : > { %2011 = vmatprep.mubr.bf16.mxu1 %v5026_v26  ;;  %2854 = vmatprep.mubr.msk.bf16.mxu0 %vm1443_vm7, %v3566_v2  ;;  %v3569_v26 = vld [vmem:[%s4306_s6 + $0x18] sm:$0xff]  }
  0xee   : > { %2793 = vmatmul.mubr.msk.bf16.vlgmr.msra.gmra.mrb[96].mxu1 %vm3783_vm5, %v3915_v50  ;;  %2173 = vmatmul.mubr.bf16.vlgmr.msra.gmra.mrb[96].mxu0 %v4297_v38 }
  0xef   : > { %2019 = vmatprep.mubr.bf16.mxu1 %v5030_v45  ;;  %2855 = vmatprep.mubr.msk.bf16.mxu0 %vm1443_vm7, %v3567_v33  ;;  %v3571_v33 = vld [vmem:[%s4306_s6 + $0x28] sm:$0xff]  }
  0xf6   : > { %2797 = vmatmul.mubr.msk.bf16.gmra.mrb[100].mxu1 %vm3783_vm5, %v5027_v30  ;;  %2181 = vmatmul.mubr.bf16.gmra.mrb[100].mxu0 %v4341_v41  ;;  %v4550_v41 = vld [vmem:[%s4940_s3] ss:$0 sm:$0xff] }
  0xf7   : > { %2027 = vmatprep.mubr.bf16.mxu1 %v5033_v21  ;;  %2856 = vmatprep.mubr.msk.bf16.mxu0 %vm1443_vm7, %v3568_v60 }
  0xfe   : > { %2801 = vmatmul.mubr.msk.bf16.gmra.mrb[104].mxu1 %vm3783_vm5, %v5031_v43  ;;  %2189 = vmatmul.mubr.bf16.gmra.mrb[104].mxu0 %v4365_v25 }
  0xff   : > { %2035 = vmatprep.mubr.bf16.mxu1 %v5037_v9  ;;  %2857 = vmatprep.mubr.msk.bf16.mxu0 %vm1443_vm7, %v3569_v26 }
 0x101   : > { %v3082_v50 = vpop.f32.mrb[0].mxu1  ;;  %v3034_v38 = vpop.f32.mrb[0].mxu0 }
 0x102   : > { %v3083_v30 = vpop.f32.mrb[1].mxu1  ;;  %v3035_v45 = vpop.f32.mrb[1].mxu0 }
 0x103   : > { %v3084_v21 = vadd.f32 %v3083_v30, %v3082_v50  ;;  %v3085_v54 = vpop.f32.mrb[2].mxu1  ;;  %v4552_v53 = vadd.f32 %v3035_v45, %v3034_v38  ;;  %v3037_v43 = vpop.f32.mrb[2].mxu0 }
 0x104   : > { %v3086_v25 = vpop.f32.mrb[3].mxu1  ;;  %v3038_v39 = vpop.f32.mrb[3].mxu0 }
 0x105   : > { %v4556_v9 = vadd.f32 %v3084_v21, %v4550_v41  ;;  %v3087_v4 = vadd.f32 %v3086_v25, %v3085_v54  ;;  %v4558_v55 = vadd.f32 %v3038_v39, %v3037_v43  ;;  %v3572_v39 = vld [vmem:[%s4306_s6 + $0x30] sm:$0xff]  }
 0x106   : > { %2805 = vmatmul.mubr.msk.bf16.gmra.mrb[108].mxu1 %vm3783_vm5, %v5034_v46  ;;  %2197 = vmatmul.mubr.bf16.gmra.mrb[108].mxu0 %v4398_v15 }
 0x107   : > { %v4565_v20 = vadd.f32 %v3087_v4, %v4550_v41  ;;  %2043 = vmatprep.mubr.bf16.mxu1 %v4161_v18  ;;  %2858 = vmatprep.mubr.msk.bf16.mxu0 %vm1443_vm7, %v3570_v28 }
 0x109   : > { %v3088_v8 = vpop.f32.mrb[4].mxu1  ;;  %v3040_v31 = vpop.f32.mrb[4].mxu0 }
 0x10a   : > { %v3089_v16 = vpop.f32.mrb[5].mxu1  ;;  %v3041_v19 = vpop.f32.mrb[5].mxu0 }
 0x10b   : > { %v3090_v10 = vadd.f32 %v3089_v16, %v3088_v8  ;;  %v3091_v42 = vpop.f32.mrb[6].mxu1  ;;  %v4569_v1 = vadd.f32 %v3041_v19, %v3040_v31  ;;  %v3043_v2 = vpop.f32.mrb[6].mxu0 }
 0x10c   : > { %v3092_v46 = vpop.f32.mrb[7].mxu1  ;;  %v3044_v60 = vpop.f32.mrb[7].mxu0 }
 0x10d   : > { %v4573_v15 = vadd.f32 %v3090_v10, %v4550_v41  ;;  %v3093_v26 = vadd.f32 %v3092_v46, %v3091_v42  ;;  %v4575_v18 = vadd.f32 %v3044_v60, %v3043_v2 }
 0x10e   : > { %2809 = vmatmul.mubr.msk.bf16.gmra.mrb[112].mxu1 %vm3783_vm5, %v4199_v3  ;;  %2205 = vmatmul.mubr.bf16.gmra.mrb[112].mxu0 %v4431_v61 }
 0x10f   : > { %v4582_v50 = vadd.f32 %v3093_v26, %v4550_v41  ;;  %2051 = vmatprep.mubr.bf16.mxu1 %v4203_v13  ;;  %2859 = vmatprep.mubr.msk.bf16.mxu0 %vm1443_vm7, %v3571_v33  ;;  %v3573_v26 = vld [vmem:[%s4306_s6 + $0x38] sm:$0xff]  }
 0x111   : > { %v3094_v38 = vpop.f32.mrb[8].mxu1  ;;  %v3046_v30 = vpop.f32.mrb[8].mxu0 }
 0x112   : > { %v3095_v45 = vpop.f32.mrb[9].mxu1  ;;  %v3047_v21 = vpop.f32.mrb[9].mxu0 }
 0x113   : > { %v3096_v54 = vadd.f32 %v3095_v45, %v3094_v38  ;;  %v3097_v43 = vpop.f32.mrb[10].mxu1  ;;  %v4586_v28 = vadd.f32 %v3047_v21, %v3046_v30  ;;  %v3049_v25 = vpop.f32.mrb[10].mxu0 }
 0x114   : > { %v3098_v3 = vpop.f32.mrb[11].mxu1  ;;  %v3050_v4 = vpop.f32.mrb[11].mxu0 }
 0x115   : > { %v4590_v61 = vadd.f32 %v3096_v54, %v4550_v41  ;;  %v3099_v8 = vadd.f32 %v3098_v3, %v3097_v43  ;;  %v4592_v13 = vadd.f32 %v3050_v4, %v3049_v25 }
 0x116   : > { %2813 = vmatmul.mubr.msk.bf16.gmra.mrb[116].mxu1 %vm3783_vm5, %v4225_v35  ;;  %2213 = vmatmul.mubr.bf16.gmra.mrb[116].mxu0 %v4445_v62 }
 0x117   : > { %v4599_v31 = vadd.f32 %v3099_v8, %v4550_v41  ;;  %2059 = vmatprep.mubr.bf16.mxu1 %v5039_v37  ;;  %2860 = vmatprep.mubr.msk.bf16.mxu0 %vm1443_vm7, %v3572_v39 }
 0x119   : > { %v3100_v16 = vpop.f32.mrb[12].mxu1  ;;  %v3052_v19 = vpop.f32.mrb[12].mxu0 }
 0x11a   : > { %v3101_v10 = vpop.f32.mrb[13].mxu1  ;;  %v3053_v42 = vpop.f32.mrb[13].mxu0 }
 0x11b   : > { %v3102_v2 = vadd.f32 %v3101_v10, %v3100_v16  ;;  %v3103_v33 = vpop.f32.mrb[14].mxu1  ;;  %v4603_v46 = vadd.f32 %v3053_v42, %v3052_v19  ;;  %v3055_v60 = vpop.f32.mrb[14].mxu0  ;;  %v3574_v16 = vld [vmem:[%s4306_s6 + $0x40] sm:$0xff]  }
 0x11c   : > { %v3104_v35 = vpop.f32.mrb[15].mxu1  ;;  %v3056_v38 = vpop.f32.mrb[15].mxu0 }
 0x11d   : > { %v4607_v62 = vadd.f32 %v3102_v2, %v4550_v41  ;;  %v3105_v30 = vadd.f32 %v3104_v35, %v3103_v33  ;;  %v4609_v37 = vadd.f32 %v3056_v38, %v3055_v60 }
 0x11e   : > { %2817 = vmatmul.mubr.msk.bf16.gmra.mrb[120].mxu1 %vm3783_vm5, %v5038_v27  ;;  %2221 = vmatmul.mubr.bf16.gmra.mrb[120].mxu0 %v4235_v34 }
 0x11f   : > { %v4616_v45 = vadd.f32 %v3105_v30, %v4550_v41  ;;  %2067 = vmatprep.mubr.bf16.mxu1 %v5041_v63  ;;  %2861 = vmatprep.mubr.msk.bf16.mxu0 %vm1443_vm7, %v3573_v26 }
 0x121   : > { %v3106_v21 = vpop.f32.mrb[16].mxu1  ;;  %v3058_v54 = vpop.f32.mrb[16].mxu0 }
 0x122   : > { %v3107_v43 = vpop.f32.mrb[17].mxu1  ;;  %v3059_v25 = vpop.f32.mrb[17].mxu0 }
 0x123   : > { %v3108_v39 = vadd.f32 %v3107_v43, %v3106_v21  ;;  %v3109_v3 = vpop.f32.mrb[18].mxu1  ;;  %v4620_v4 = vadd.f32 %v3059_v25, %v3058_v54  ;;  %v3061_v8 = vpop.f32.mrb[18].mxu0  ;;  %v3575_v54 = vld [vmem:[%s4306_s6 + $0x48] sm:$0xff]  }
 0x124   : > { %v3110_v27 = vpop.f32.mrb[19].mxu1  ;;  %v3062_v19 = vpop.f32.mrb[19].mxu0 }
 0x125   : > { %v4624_v34 = vadd.f32 %v3108_v39, %v4550_v41  ;;  %v3111_v10 = vadd.f32 %v3110_v27, %v3109_v3  ;;  %v4626_v63 = vadd.f32 %v3062_v19, %v3061_v8 }
 0x126   : > { %2821 = vmatmul.mubr.msk.bf16.gmra.mrb[124].mxu1 %vm3783_vm5, %v5040_v12  ;;  %2229 = vmatmul.mubr.bf16.gmra.mrb[124].mxu0 %v4248_v7 }
 0x127   : > { %v4633_v42 = vadd.f32 %v3111_v10, %v4550_v41  ;;  %2075 = vmatprep.mubr.bf16.mxu1 %v5043_v23  ;;  %2862 = vmatprep.mubr.msk.bf16.mxu0 %vm1443_vm7, %v3574_v16 }
 0x129   : > { %v3112_v2 = vpop.f32.mrb[20].mxu1  ;;  %v3064_v33 = vpop.f32.mrb[20].mxu0 }
 0x12a   : > { %v3113_v60 = vpop.f32.mrb[21].mxu1  ;;  %v3065_v26 = vpop.f32.mrb[21].mxu0 }
 0x12b   : > { %v3114_v35 = vadd.f32 %v3113_v60, %v3112_v2  ;;  %v3115_v38 = vpop.f32.mrb[22].mxu1  ;;  %v4637_v30 = vadd.f32 %v3065_v26, %v3064_v33  ;;  %v3067_v21 = vpop.f32.mrb[22].mxu0  ;;  %v3576_v60 = vld [vmem:[%s4306_s6 + $0x50] sm:$0xff]  }
 0x12c   : > { %v3116_v12 = vpop.f32.mrb[23].mxu1  ;;  %v3068_v43 = vpop.f32.mrb[23].mxu0 }
 0x12d   : > { %v4641_v7 = vadd.f32 %v3114_v35, %v4550_v41  ;;  %v3117_v25 = vadd.f32 %v3116_v12, %v3115_v38  ;;  %v4643_v23 = vadd.f32 %v3068_v43, %v3067_v21 }
 0x12e   : > { %2825 = vmatmul.mubr.msk.bf16.gmra.mrb[128].mxu1 %vm3783_vm5, %v5042_v48  ;;  %2237 = vmatmul.mubr.bf16.gmra.mrb[128].mxu0 %v4259_v11 }
 0x12f   : > { %v4650_v39 = vadd.f32 %v3117_v25, %v4550_v41  ;;  %2083 = vmatprep.mubr.bf16.mxu1 %v5045_v5  ;;  %2863 = vmatprep.mubr.msk.bf16.mxu0 %vm1443_vm7, %v3575_v54 }
 0x131   : > { %v3118_v3 = vpop.f32.mrb[24].mxu1  ;;  %v3070_v8 = vpop.f32.mrb[24].mxu0 }
 0x132   : > { %v3119_v16 = vpop.f32.mrb[25].mxu1  ;;  %v3071_v27 = vpop.f32.mrb[25].mxu0 }
 0x133   : > { %v3120_v19 = vadd.f32 %v3119_v16, %v3118_v3  ;;  %v3121_v10 = vpop.f32.mrb[26].mxu1  ;;  %v4654_v2 = vadd.f32 %v3071_v27, %v3070_v8  ;;  %v3073_v33 = vpop.f32.mrb[26].mxu0  ;;  %v3577_v27 = vld [vmem:[%s4306_s6 + $0x58] sm:$0xff]  }
 0x134   : > { %v3122_v48 = vpop.f32.mrb[27].mxu1  ;;  %v3074_v26 = vpop.f32.mrb[27].mxu0 }
 0x135   : > { %v4658_v11 = vadd.f32 %v3120_v19, %v4550_v41  ;;  %v3123_v35 = vadd.f32 %v3122_v48, %v3121_v10  ;;  %v4660_v5 = vadd.f32 %v3074_v26, %v3073_v33 }
 0x136   : > { %2829 = vmatmul.mubr.msk.bf16.gmra.mrb[132].mxu1 %vm3783_vm5, %v5044_v0  ;;  %2245 = vmatmul.mubr.bf16.gmra.mrb[132].mxu0 %v4268_v22 }
 0x137   : > { %v4667_v38 = vadd.f32 %v3123_v35, %v4550_v41  ;;  %2091 = vmatprep.mubr.bf16.mxu1 %v5047_v6  ;;  %2864 = vmatprep.mubr.msk.bf16.mxu0 %vm1443_vm7, %v3576_v60 }
 0x139   : > { %v3124_v21 = vpop.f32.mrb[28].mxu1  ;;  %v3076_v54 = vpop.f32.mrb[28].mxu0 }
 0x13a   : > { %v3125_v12 = vpop.f32.mrb[29].mxu1  ;;  %v3077_v43 = vpop.f32.mrb[29].mxu0 }
 0x13b   : > { %v3126_v25 = vadd.f32 %v3125_v12, %v3124_v21  ;;  %v3127_v3 = vpop.f32.mrb[30].mxu1  ;;  %v4671_v8 = vadd.f32 %v3077_v43, %v3076_v54  ;;  %v3079_v16 = vpop.f32.mrb[30].mxu0  ;;  %v1531_v21 = vadd.f32 %v4552_v53, %v4550_v41 }
 0x13c   : > { %v3128_v0 = vpop.f32.mrb[31].mxu1  ;;  %v3080_v19 = vpop.f32.mrb[31].mxu0 }
 0x13d   : > { %v4675_v22 = vadd.f32 %v3126_v25, %v4550_v41  ;;  %v3129_v10 = vadd.f32 %v3128_v0, %v3127_v3  ;;  %v4677_v6 = vadd.f32 %v3080_v19, %v3079_v16  ;;  %v3578_v25 = vld [vmem:[%s4306_s6 + $0x60] sm:$0xff]   ;;  %v1534_v16 = vadd.f32 %v4558_v55, %v4550_v41 }
 0x13e   : > { %2833 = vmatmul.mubr.msk.bf16.gmra.mrb[136].mxu1 %vm3783_vm5, %v5046_v56  ;;  %2253 = vmatmul.mubr.bf16.gmra.mrb[136].mxu0 %v4277_v29 }
 0x13f   : > { %v4684_v33 = vadd.f32 %v3129_v10, %v4550_v41  ;;  %2099 = vmatprep.mubr.bf16.mxu1 %v5049_v44  ;;  %2865 = vmatprep.mubr.msk.bf16.mxu0 %vm1443_vm7, %v3577_v27 }
 0x141   : > { %v3146_v60 = vpop.f32.mrb[32].mxu1  ;;  %v3258_v48 = vpop.f32.mrb[32].mxu0 }
 0x142   : > { %v3147_v26 = vpop.f32.mrb[33].mxu1  ;;  %v3259_v35 = vpop.f32.mrb[33].mxu0 }
 0x143   : > { %v3148_v54 = vadd.f32 %v3147_v26, %v3146_v60  ;;  %v3149_v12 = vpop.f32.mrb[34].mxu1  ;;  %v3260_v43 = vadd.f32 %v3259_v35, %v3258_v48  ;;  %v3261_v56 = vpop.f32.mrb[34].mxu0  ;;  %v1539_v35 = vadd.f32 %v4569_v1, %v4550_v41 }
 0x144   : > { %v3150_v29 = vpop.f32.mrb[35].mxu1  ;;  %v3262_v3 = vpop.f32.mrb[35].mxu0 }
 0x145   : > { %v1692_v44 = vadd.f32 %v3148_v54, %v1531_v21  ;;  %v3151_v0 = vadd.f32 %v3150_v29, %v3149_v12  ;;  %v3263_v27 = vadd.f32 %v3262_v3, %v3261_v56  ;;  %v3579_v12 = vld [vmem:[%s4306_s6 + $0x68] sm:$0xff]  }
 0x146   : > { %2837 = vmatmul.mubr.msk.bf16.gmra.mrb[140].mxu1 %vm3783_vm5, %v5048_v36  ;;  %2261 = vmatmul.mubr.bf16.gmra.mrb[140].mxu0 %v4282_v52 }
 0x147   : > { %v1695_v53 = vadd.f32 %v3151_v0, %v1534_v16  ;;  %v4697_v19 = vadd.f32 %v3260_v43, %v1692_v44  ;;  %2107 = vmatprep.mubr.bf16.mxu1 %v5050_v59  ;;  %2866 = vmatprep.mubr.msk.bf16.mxu0 %vm1443_vm7, %v3578_v25  ;;  %v1542_v59 = vadd.f32 %v4575_v18, %v4550_v41 }
 0x149   : > { %v4701_v10 = vadd.f32 %v3263_v27, %v1695_v53  ;;  %v3152_v55 = vpop.f32.mrb[36].mxu1  ;;  %v3264_v60 = vpop.f32.mrb[36].mxu0 }
 0x14a   : > { %v3153_v48 = vpop.f32.mrb[37].mxu1  ;;  %v3265_v26 = vpop.f32.mrb[37].mxu0 }
 0x14b   : > { %v3154_v36 = vadd.f32 %v3153_v48, %v3152_v55  ;;  %v3155_v21 = vpop.f32.mrb[38].mxu1  ;;  %v3266_v54 = vadd.f32 %v3265_v26, %v3264_v60  ;;  %v3267_v52 = vpop.f32.mrb[38].mxu0  ;;  %v1547_v55 = vadd.f32 %v4586_v28, %v4550_v41  ;;  %v3580_v26 = vld [vmem:[%s4306_s6 + $0x70] sm:$0xff]  }
 0x14c   : > { %v3156_v43 = vpop.f32.mrb[39].mxu1  ;;  %v3268_v56 = vpop.f32.mrb[39].mxu0 }
 0x14d   : > { %v1700_v25 = vadd.f32 %v3154_v36, %v1539_v35  ;;  %v3157_v29 = vadd.f32 %v3156_v43, %v3155_v21  ;;  %v3269_v3 = vadd.f32 %v3268_v56, %v3267_v52 }
 0x14e   : > { %2841 = vmatmul.mubr.msk.bf16.gmra.mrb[144].mxu1 %vm3783_vm5, %v4195_v24  ;;  %2269 = vmatmul.mubr.bf16.gmra.mrb[144].mxu0 %v4294_v51 }
 0x14f   : > { %v1703_v1 = vadd.f32 %v3157_v29, %v1542_v59  ;;  %v4712_v16 = vadd.f32 %v3266_v54, %v1700_v25  ;;  %2115 = vmatprep.mubr.bf16.mxu1 %v4201_v47  ;;  %2867 = vmatprep.mubr.msk.bf16.mxu0 %vm1443_vm7, %v3579_v12  ;;  %v1550_v47 = vadd.f32 %v4592_v13, %v4550_v41 }
 0x150   : > { %v1555_v29 = vadd.f32 %v4603_v46, %v4550_v41 }
 0x151   : > { %v4716_v44 = vadd.f32 %v3269_v3, %v1703_v1  ;;  %v3158_v18 = vpop.f32.mrb[40].mxu1  ;;  %v3270_v0 = vpop.f32.mrb[40].mxu0 }
 0x152   : > { %v3159_v27 = vpop.f32.mrb[41].mxu1  ;;  %v3271_v53 = vpop.f32.mrb[41].mxu0 }
 0x153   : > { %v3160_v24 = vadd.f32 %v3159_v27, %v3158_v18  ;;  %v3161_v60 = vpop.f32.mrb[42].mxu1  ;;  %v3272_v48 = vadd.f32 %v3271_v53, %v3270_v0  ;;  %v3273_v51 = vpop.f32.mrb[42].mxu0  ;;  %v3581_v18 = vld [vmem:[%s4306_s6 + $0x78] sm:$0xff]  }
 0x154   : > { %v3162_v35 = vpop.f32.mrb[43].mxu1  ;;  %v3274_v36 = vpop.f32.mrb[43].mxu0 }
 0x155   : > { %v1708_v21 = vadd.f32 %v3160_v24, %v1547_v55  ;;  %v3163_v54 = vadd.f32 %v3162_v35, %v3161_v60  ;;  %v3275_v52 = vadd.f32 %v3274_v36, %v3273_v51 }
 0x156   : > { %2845 = vmatmul.mubr.msk.bf16.gmra.mrb[148].mxu1 %vm3783_vm5, %v4219_v58  ;;  %2277 = vmatmul.mubr.bf16.gmra.mrb[148].mxu0 %v4317_v57 }
 0x157   : > { %v1711_v28 = vadd.f32 %v3163_v54, %v1550_v47  ;;  %v4727_v12 = vadd.f32 %v3272_v48, %v1708_v21  ;;  %2123 = vmatprep.mubr.bf16.mxu1 %v4519_v14  ;;  %2868 = vmatprep.mubr.msk.bf16.mxu0 %vm1443_vm7, %v3580_v26  ;;  %v1558_v14 = vadd.f32 %v4609_v37, %v4550_v41  ;;  %v5051_v48 = vld [vmem:[#allocation2_spill] sm:$0xff] }
 0x158   : > { %v1563_v47 = vadd.f32 %v4620_v4, %v4550_v41 }
 0x159   : > { %v4731_v43 = vadd.f32 %v3275_v52, %v1711_v28  ;;  %v3164_v13 = vpop.f32.mrb[44].mxu1  ;;  %v3276_v56 = vpop.f32.mrb[44].mxu0 }
 0x15a   : > { %v3165_v59 = vpop.f32.mrb[45].mxu1  ;;  %v3277_v25 = vpop.f32.mrb[45].mxu0 }
 0x15b   : > { %v3166_v58 = vadd.f32 %v3165_v59, %v3164_v13  ;;  %v3167_v3 = vpop.f32.mrb[46].mxu1  ;;  %v3278_v1 = vadd.f32 %v3277_v25, %v3276_v56  ;;  %v3279_v57 = vpop.f32.mrb[46].mxu0  ;;  %v1566_v13 = vadd.f32 %v4626_v63, %v4550_v41  ;;  %v1571_v63 = vadd.f32 %v4637_v30, %v4550_v41 }
 0x15c   : > { %v3168_v0 = vpop.f32.mrb[47].mxu1  ;;  %v3280_v27 = vpop.f32.mrb[47].mxu0 }
 0x15d   : > { %v1716_v53 = vadd.f32 %v3166_v58, %v1555_v29  ;;  %v3169_v55 = vadd.f32 %v3168_v0, %v3167_v3  ;;  %v3281_v24 = vadd.f32 %v3280_v27, %v3279_v57  ;;  %v5052_v29 = vld [vmem:[#allocation4_spill] sm:$0xff] }
 0x15e   : > { %2849 = vmatmul.mubr.msk.bf16.gmra.mrb[152].mxu1 %vm3783_vm5, %v4507_v40  ;;  %2285 = vmatmul.mubr.bf16.gmra.mrb[152].mxu0 %v4509_v49 }
 0x15f   : > { %v1719_v46 = vadd.f32 %v3169_v55, %v1558_v14  ;;  %v4742_v60 = vadd.f32 %v3278_v1, %v1716_v53  ;;  %2131 = vmatprep.mubr.bf16.mxu1 %v5051_v48  ;;  %2869 = vmatprep.mubr.msk.bf16.mxu0 %vm1443_vm7, %v3581_v18 }
 0x161   : > { %v4746_v51 = vadd.f32 %v3281_v24, %v1719_v46  ;;  %v3170_v26 = vpop.f32.mrb[48].mxu1  ;;  %v3282_v37 = vpop.f32.mrb[48].mxu0 }
 0x162   : > { %v3171_v35 = vpop.f32.mrb[49].mxu1  ;;  %v3283_v36 = vpop.f32.mrb[49].mxu0 }
 0x163   : > { %v3172_v21 = vadd.f32 %v3171_v35, %v3170_v26  ;;  %v3173_v40 = vpop.f32.mrb[50].mxu1  ;;  %v3284_v54 = vadd.f32 %v3283_v36, %v3282_v37  ;;  %v3285_v49 = vpop.f32.mrb[50].mxu0 }
 0x164   : > { %v3174_v52 = vpop.f32.mrb[51].mxu1  ;;  %v3286_v28 = vpop.f32.mrb[51].mxu0 }
 0x165   : > { %v1724_v56 = vadd.f32 %v3172_v21, %v1563_v47  ;;  %v3175_v59 = vadd.f32 %v3174_v52, %v3173_v40  ;;  %v3287_v25 = vadd.f32 %v3286_v28, %v3285_v49 }
 0x166   : > { %2853 = vmatmul.mubr.msk.bf16.gmra.mrb[156].mxu1 %vm3783_vm5, %v5052_v29  ;;  %2293 = vmatmul.mubr.bf16.gmra.mrb[156].mxu0 %v3686_v32  ;;  %v1574_v32 = vadd.f32 %v4643_v23, %v4550_v41 }
 0x167   : > { %v1727_v58 = vadd.f32 %v3175_v59, %v1566_v13  ;;  %v4756_v4 = vadd.f32 %v3284_v54, %v1724_v56  ;;  %v1579_v54 = vadd.f32 %v4654_v2, %v4550_v41  ;;  %v1582_v59 = vadd.f32 %v4660_v5, %v4550_v41 }
 0x169   : > { %v4758_v3 = vadd.f32 %v3287_v25, %v1727_v58  ;;  %v3176_v1 = vpop.f32.mrb[52].mxu1  ;;  %v3288_v57 = vpop.f32.mrb[52].mxu0 }
 0x16a   : > { %v3177_v18 = vpop.f32.mrb[53].mxu1  ;;  %v3289_v0 = vpop.f32.mrb[53].mxu0 }
 0x16b   : > { %v3178_v27 = vadd.f32 %v3177_v18, %v3176_v1  ;;  %v3179_v14 = vpop.f32.mrb[54].mxu1  ;;  %v3290_v53 = vadd.f32 %v3289_v0, %v3288_v57  ;;  %v3291_v55 = vpop.f32.mrb[54].mxu0 }
 0x16c   : > { %v3180_v17 = vpop.f32.mrb[55].mxu1  ;;  %v3292_v24 = vpop.f32.mrb[55].mxu0 }
 0x16d   : > { %v1732_v46 = vadd.f32 %v3178_v27, %v1571_v63  ;;  %v3181_v48 = vadd.f32 %v3180_v17, %v3179_v14  ;;  %v3293_v26 = vadd.f32 %v3292_v24, %v3291_v55  ;;  %v1587_v14 = vadd.f32 %v4671_v8, %v4550_v41 }
 0x16f   : > { %v1735_v37 = vadd.f32 %v3181_v48, %v1574_v32  ;;  %v4764_v35 = vadd.f32 %v3290_v53, %v1732_v46  ;;  %v1590_v46 = vadd.f32 %v4677_v6, %v4550_v41 }
 0x171   : > { %v4766_v36 = vadd.f32 %v3293_v26, %v1735_v37  ;;  %v3182_v47 = vpop.f32.mrb[56].mxu1  ;;  %v3294_v21 = vpop.f32.mrb[56].mxu0 }
 0x172   : > { %v3183_v30 = vpop.f32.mrb[57].mxu1  ;;  %v3295_v40 = vpop.f32.mrb[57].mxu0 }
 0x173   : > { %v3184_v49 = vadd.f32 %v3183_v30, %v3182_v47  ;;  %v3185_v52 = vpop.f32.mrb[58].mxu1  ;;  %v3296_v28 = vadd.f32 %v3295_v40, %v3294_v21  ;;  %v3297_v13 = vpop.f32.mrb[58].mxu0 }
 0x174   : > { %v3186_v23 = vpop.f32.mrb[59].mxu1  ;;  %v3298_v56 = vpop.f32.mrb[59].mxu0 }
 0x175   : > { %v1740_v25 = vadd.f32 %v3184_v49, %v1579_v54  ;;  %v3187_v29 = vadd.f32 %v3186_v23, %v3185_v52  ;;  %v3299_v58 = vadd.f32 %v3298_v56, %v3297_v13 }
 0x177   : > { %v1743_v1 = vadd.f32 %v3187_v29, %v1582_v59  ;;  %v4772_v57 = vadd.f32 %v3296_v28, %v1740_v25 }
 0x179   : > { %v4774_v18 = vadd.f32 %v3299_v58, %v1743_v1  ;;  %v3188_v0 = vpop.f32.mrb[60].mxu1  ;;  %v3300_v63 = vpop.f32.mrb[60].mxu0 }
 0x17a   : > { %v3189_v2 = vpop.f32.mrb[61].mxu1  ;;  %v3301_v27 = vpop.f32.mrb[61].mxu0 }
 0x17b   : > { %v3190_v53 = vadd.f32 %v3189_v2, %v3188_v0  ;;  %v3191_v55 = vpop.f32.mrb[62].mxu1  ;;  %v3302_v17 = vadd.f32 %v3301_v27, %v3300_v63  ;;  %v3303_v24 = vpop.f32.mrb[62].mxu0 }
 0x17c   : > { %v3192_v5 = vpop.f32.mrb[63].mxu1  ;;  %v3304_v32 = vpop.f32.mrb[63].mxu0 }
 0x17d   : > { %v1748_v48 = vadd.f32 %v3190_v53, %v1587_v14  ;;  %v3193_v26 = vadd.f32 %v3192_v5, %v3191_v55  ;;  %v3305_v37 = vadd.f32 %v3304_v32, %v3303_v24 }
 0x17f   : > { %v1751_v47 = vadd.f32 %v3193_v26, %v1590_v46  ;;  %v4780_v21 = vadd.f32 %v3302_v17, %v1748_v48 }
 0x181   : > { %v4782_v30 = vadd.f32 %v3305_v37, %v1751_v47  ;;  %v3194_v40 = vpop.f32.mrb[64].mxu1  ;;  %v3306_v54 = vpop.f32.mrb[64].mxu0 }
 0x182   : > { %v3195_v8 = vpop.f32.mrb[65].mxu1  ;;  %v3307_v49 = vpop.f32.mrb[65].mxu0 }
 0x183   : > { %v3196_v52 = vadd.f32 %v3195_v8, %v3194_v40  ;;  %v3197_v28 = vpop.f32.mrb[66].mxu1  ;;  %v3308_v13 = vadd.f32 %v3307_v49, %v3306_v54  ;;  %v3309_v23 = vpop.f32.mrb[66].mxu0 }
 0x184   : > { %v3198_v56 = vpop.f32.mrb[67].mxu1  ;;  %v3310_v59 = vpop.f32.mrb[67].mxu0 }
 0x185   : > { %v1756_v41 = vadd.f32 %v3196_v52, %v4556_v9  ;;  %v3199_v6 = vadd.f32 %v3198_v56, %v3197_v28  ;;  %v3311_v25 = vadd.f32 %v3310_v59, %v3309_v23 }
 0x187   : > { %v1759_v29 = vadd.f32 %v3199_v6, %v4565_v20  ;;  %v4786_v58 = vadd.f32 %v3308_v13, %v1756_v41 }
 0x189   : > { %v4788_v1 = vadd.f32 %v3311_v25, %v1759_v29  ;;  %v3200_v0 = vpop.f32.mrb[68].mxu1  ;;  %v3312_v63 = vpop.f32.mrb[68].mxu0 }
 0x18a   : > { %v3201_v2 = vpop.f32.mrb[69].mxu1  ;;  %v3313_v27 = vpop.f32.mrb[69].mxu0 }
 0x18b   : > { %v3202_v14 = vadd.f32 %v3201_v2, %v3200_v0  ;;  %v3203_v53 = vpop.f32.mrb[70].mxu1  ;;  %v3314_v55 = vadd.f32 %v3313_v27, %v3312_v63  ;;  %v3315_v17 = vpop.f32.mrb[70].mxu0 }
 0x18c   : > { %v3204_v24 = vpop.f32.mrb[71].mxu1  ;;  %v3316_v5 = vpop.f32.mrb[71].mxu0 }
 0x18d   : > { %v1764_v9 = vadd.f32 %v3202_v14, %v4573_v15  ;;  %v3205_v32 = vadd.f32 %v3204_v24, %v3203_v53  ;;  %v3317_v46 = vadd.f32 %v3316_v5, %v3315_v17 }
 0x18f   : > { %v1767_v20 = vadd.f32 %v3205_v32, %v4582_v50  ;;  %v4792_v48 = vadd.f32 %v3314_v55, %v1764_v9 }
 0x191   : > { %v4794_v26 = vadd.f32 %v3317_v46, %v1767_v20  ;;  %v3206_v37 = vpop.f32.mrb[72].mxu1  ;;  %v3318_v47 = vpop.f32.mrb[72].mxu0 }
 0x192   : > { %v3207_v40 = vpop.f32.mrb[73].mxu1  ;;  %v3319_v54 = vpop.f32.mrb[73].mxu0 }
 0x193   : > { %v3208_v8 = vadd.f32 %v3207_v40, %v3206_v37  ;;  %v3209_v49 = vpop.f32.mrb[74].mxu1  ;;  %v3320_v52 = vadd.f32 %v3319_v54, %v3318_v47  ;;  %v3321_v28 = vpop.f32.mrb[74].mxu0 }
 0x194   : > { %v3210_v13 = vpop.f32.mrb[75].mxu1  ;;  %v3322_v23 = vpop.f32.mrb[75].mxu0 }
 0x195   : > { %v1772_v15 = vadd.f32 %v3208_v8, %v4590_v61  ;;  %v3211_v56 = vadd.f32 %v3210_v13, %v3209_v49  ;;  %v3323_v59 = vadd.f32 %v3322_v23, %v3321_v28 }
 0x197   : > { %v1775_v50 = vadd.f32 %v3211_v56, %v4599_v31  ;;  %v4798_v41 = vadd.f32 %v3320_v52, %v1772_v15 }
 0x199   : > { %v4800_v6 = vadd.f32 %v3323_v59, %v1775_v50  ;;  %v3212_v25 = vpop.f32.mrb[76].mxu1  ;;  %v3324_v29 = vpop.f32.mrb[76].mxu0 }
 0x19a   : > { %v3213_v0 = vpop.f32.mrb[77].mxu1  ;;  %v3325_v63 = vpop.f32.mrb[77].mxu0 }
 0x19b   : > { %v3214_v2 = vadd.f32 %v3213_v0, %v3212_v25  ;;  %v3215_v27 = vpop.f32.mrb[78].mxu1  ;;  %v3326_v14 = vadd.f32 %v3325_v63, %v3324_v29  ;;  %v3327_v53 = vpop.f32.mrb[78].mxu0 }
 0x19c   : > { %v3216_v55 = vpop.f32.mrb[79].mxu1  ;;  %v3328_v17 = vpop.f32.mrb[79].mxu0 }
 0x19d   : > { %v1780_v61 = vadd.f32 %v3214_v2, %v4607_v62  ;;  %v3217_v24 = vadd.f32 %v3216_v55, %v3215_v27  ;;  %v3329_v5 = vadd.f32 %v3328_v17, %v3327_v53 }
 0x19f   : > { %v1783_v31 = vadd.f32 %v3217_v24, %v4616_v45  ;;  %v4804_v9 = vadd.f32 %v3326_v14, %v1780_v61 }
 0x1a1   : > { %v4806_v32 = vadd.f32 %v3329_v5, %v1783_v31  ;;  %v3218_v46 = vpop.f32.mrb[80].mxu1  ;;  %v3330_v20 = vpop.f32.mrb[80].mxu0 }
 0x1a2   : > { %v3219_v37 = vpop.f32.mrb[81].mxu1  ;;  %v3331_v47 = vpop.f32.mrb[81].mxu0 }
 0x1a3   : > { %v3220_v40 = vadd.f32 %v3219_v37, %v3218_v46  ;;  %v3221_v54 = vpop.f32.mrb[82].mxu1  ;;  %v3332_v8 = vadd.f32 %v3331_v47, %v3330_v20  ;;  %v3333_v49 = vpop.f32.mrb[82].mxu0 }
 0x1a4   : > { %v3222_v52 = vpop.f32.mrb[83].mxu1  ;;  %v3334_v28 = vpop.f32.mrb[83].mxu0 }
 0x1a5   : > { %v1788_v62 = vadd.f32 %v3220_v40, %v4624_v34  ;;  %v3223_v13 = vadd.f32 %v3222_v52, %v3221_v54  ;;  %v3335_v23 = vadd.f32 %v3334_v28, %v3333_v49 }
 0x1a7   : > { %v1791_v45 = vadd.f32 %v3223_v13, %v4633_v42  ;;  %v4810_v15 = vadd.f32 %v3332_v8, %v1788_v62 }
 0x1a9   : > { %v4812_v56 = vadd.f32 %v3335_v23, %v1791_v45  ;;  %v3224_v59 = vpop.f32.mrb[84].mxu1  ;;  %v3336_v50 = vpop.f32.mrb[84].mxu0 }
 0x1aa   : > { %v3225_v25 = vpop.f32.mrb[85].mxu1  ;;  %v3337_v29 = vpop.f32.mrb[85].mxu0 }
 0x1ab   : > { %v3226_v0 = vadd.f32 %v3225_v25, %v3224_v59  ;;  %v3227_v63 = vpop.f32.mrb[86].mxu1  ;;  %v3338_v2 = vadd.f32 %v3337_v29, %v3336_v50  ;;  %v3339_v27 = vpop.f32.mrb[86].mxu0 }
 0x1ac   : > { %v3228_v14 = vpop.f32.mrb[87].mxu1  ;;  %v3340_v53 = vpop.f32.mrb[87].mxu0 }
 0x1ad   : > { %v1796_v34 = vadd.f32 %v3226_v0, %v4641_v7  ;;  %v3229_v55 = vadd.f32 %v3228_v14, %v3227_v63  ;;  %v3341_v17 = vadd.f32 %v3340_v53, %v3339_v27 }
 0x1af   : > { %v1799_v42 = vadd.f32 %v3229_v55, %v4650_v39  ;;  %v4816_v61 = vadd.f32 %v3338_v2, %v1796_v34 }
 0x1b1   : > { %v4818_v24 = vadd.f32 %v3341_v17, %v1799_v42  ;;  %v3230_v5 = vpop.f32.mrb[88].mxu1  ;;  %v3342_v31 = vpop.f32.mrb[88].mxu0 }
 0x1b2   : > { %v3231_v46 = vpop.f32.mrb[89].mxu1  ;;  %v3343_v20 = vpop.f32.mrb[89].mxu0 }
 0x1b3   : > { %v3232_v37 = vadd.f32 %v3231_v46, %v3230_v5  ;;  %v3233_v47 = vpop.f32.mrb[90].mxu1  ;;  %v3344_v40 = vadd.f32 %v3343_v20, %v3342_v31  ;;  %v3345_v54 = vpop.f32.mrb[90].mxu0 }
 0x1b4   : > { %v3234_v8 = vpop.f32.mrb[91].mxu1  ;;  %v3346_v49 = vpop.f32.mrb[91].mxu0 }
 0x1b5   : > { %v1804_v7 = vadd.f32 %v3232_v37, %v4658_v11  ;;  %v3235_v52 = vadd.f32 %v3234_v8, %v3233_v47  ;;  %v3347_v28 = vadd.f32 %v3346_v49, %v3345_v54 }
 0x1b7   : > { %v1807_v39 = vadd.f32 %v3235_v52, %v4667_v38  ;;  %v4822_v62 = vadd.f32 %v3344_v40, %v1804_v7 }
 0x1b9   : > { %v4824_v13 = vadd.f32 %v3347_v28, %v1807_v39  ;;  %v3236_v23 = vpop.f32.mrb[92].mxu1  ;;  %v3348_v45 = vpop.f32.mrb[92].mxu0 }
 0x1ba   : > { %v3237_v59 = vpop.f32.mrb[93].mxu1  ;;  %v3349_v50 = vpop.f32.mrb[93].mxu0 }
 0x1bb   : > { %v3238_v25 = vadd.f32 %v3237_v59, %v3236_v23  ;;  %v3239_v29 = vpop.f32.mrb[94].mxu1  ;;  %v3350_v0 = vadd.f32 %v3349_v50, %v3348_v45  ;;  %v3351_v63 = vpop.f32.mrb[94].mxu0 }
 0x1bc   : > { %v3240_v2 = vpop.f32.mrb[95].mxu1  ;;  %v3352_v27 = vpop.f32.mrb[95].mxu0 }
 0x1bd   : > { %v1812_v11 = vadd.f32 %v3238_v25, %v4675_v22  ;;  %v3241_v14 = vadd.f32 %v3240_v2, %v3239_v29  ;;  %v3353_v53 = vadd.f32 %v3352_v27, %v3351_v63 }
 0x1bf   : > { %v1815_v38 = vadd.f32 %v3241_v14, %v4684_v33  ;;  %v4828_v34 = vadd.f32 %v3350_v0, %v1812_v11 }
 0x1c1   : > { %v4830_v55 = vadd.f32 %v3353_v53, %v1815_v38  ;;  %v3370_v17 = vpop.f32.mrb[96].mxu1  ;;  %v2174_v42 = vpop.f32.mrb[96].mxu0 }
 0x1c2   : > { %v3371_v5 = vpop.f32.mrb[97].mxu1  ;;  %v2176_v31 = vpop.f32.mrb[97].mxu0 }
 0x1c3   : > { %v3372_v46 = vadd.f32 %v3371_v5, %v3370_v17  ;;  %v3373_v20 = vpop.f32.mrb[98].mxu1  ;;  %v2177_v37 = vpop.f32.mrb[98].mxu0 }
 0x1c4   : > { %v3374_v47 = vpop.f32.mrb[99].mxu1  ;;  %v2179_v40 = vpop.f32.mrb[99].mxu0 }
 0x1c5   : > { %v3375_v54 = vadd.f32 %v3374_v47, %v3373_v20  ;;  %v2014_v22 = vadd.f32 %v3372_v46, %v4697_v19 }
 0x1c7   : > { %v2175_v8 = vadd.f32 %v2174_v42, %v2014_v22  ;;  %v2017_v33 = vadd.f32 %v3375_v54, %v4701_v10 }
 0x1c9   : > { %v2301_v49 = vmax.f32 %v2175_v8, 0.0  ;;  %v2178_v7 = vadd.f32 %v2177_v37, %v2017_v33  ;;  %v3376_v52 = vpop.f32.mrb[100].mxu1  ;;  %v2182_v28 = vpop.f32.mrb[100].mxu0 }
 0x1ca   : > { %v3377_v39 = vpop.f32.mrb[101].mxu1  ;;  %v2184_v23 = vpop.f32.mrb[101].mxu0 }
 0x1cb   : > { %v2907_v45 = vpack.c.bf16 %v2301_v49, %v2301_v49  ;;  %v2302_v59 = vmax.f32 %v2178_v7, 0.0  ;;  %v3378_v19 = vadd.f32 %v3377_v39, %v3376_v52  ;;  %v3379_v50 = vpop.f32.mrb[102].mxu1  ;;  %v2185_v25 = vpop.f32.mrb[102].mxu0 }
 0x1cc   : > { %v3380_v10 = vpop.f32.mrb[103].mxu1  ;;  %v2187_v29 = vpop.f32.mrb[103].mxu0 }
 0x1cd   : > { %2462 = vst.msk [vmem:[%s4838_s9] sm:$0xf] %vm2461_vm8, %v2907_v45  ;;  %v2908_v0 = vpack.c.bf16 %v2302_v59, %v2302_v59  ;;  %v3381_v63 = vadd.f32 %v3380_v10, %v3379_v50  ;;  %v2022_v2 = vadd.f32 %v3378_v19, %v4712_v16 }
 0x1cf   : > { %2463 = vst.msk [vmem:[%s4838_s9 + $0x4] sm:$0xf] %vm2461_vm8, %v2908_v0  ;;  %v2183_v27 = vadd.f32 %v2182_v28, %v2022_v2  ;;  %v2025_v11 = vadd.f32 %v3381_v63, %v4716_v44 }
 0x1d1   : > { %v2303_v14 = vmax.f32 %v2183_v27, 0.0  ;;  %v2186_v53 = vadd.f32 %v2185_v25, %v2025_v11  ;;  %v3382_v38 = vpop.f32.mrb[104].mxu1  ;;  %v2190_v17 = vpop.f32.mrb[104].mxu0 }
 0x1d2   : > { %v3383_v42 = vpop.f32.mrb[105].mxu1  ;;  %v2192_v5 = vpop.f32.mrb[105].mxu0 }
 0x1d3   : > { %v2909_v31 = vpack.c.bf16 %v2303_v14, %v2303_v14  ;;  %v2304_v46 = vmax.f32 %v2186_v53, 0.0  ;;  %v3384_v20 = vadd.f32 %v3383_v42, %v3382_v38  ;;  %v3385_v37 = vpop.f32.mrb[106].mxu1  ;;  %v2193_v47 = vpop.f32.mrb[106].mxu0 }
 0x1d4   : > { %v3386_v40 = vpop.f32.mrb[107].mxu1  ;;  %v2195_v16 = vpop.f32.mrb[107].mxu0 }
 0x1d5   : > { %2464 = vst.msk [vmem:[%s4838_s9 + $0x8] sm:$0xf] %vm2461_vm8, %v2909_v31  ;;  %v2910_v54 = vpack.c.bf16 %v2304_v46, %v2304_v46  ;;  %v3387_v22 = vadd.f32 %v3386_v40, %v3385_v37  ;;  %v2030_v44 = vadd.f32 %v3384_v20, %v4727_v12 }
 0x1d7   : > { %2465 = vst.msk [vmem:[%s4838_s9 + $0xc] sm:$0xf] %vm2461_vm8, %v2910_v54  ;;  %v2191_v8 = vadd.f32 %v2190_v17, %v2030_v44  ;;  %v2033_v33 = vadd.f32 %v3387_v22, %v4731_v43 }
 0x1d9   : > { %v2305_v49 = vmax.f32 %v2191_v8, 0.0  ;;  %v2194_v7 = vadd.f32 %v2193_v47, %v2033_v33  ;;  %v3388_v52 = vpop.f32.mrb[108].mxu1  ;;  %v2198_v28 = vpop.f32.mrb[108].mxu0 }
 0x1da   : > { %v3389_v39 = vpop.f32.mrb[109].mxu1  ;;  %v2200_v23 = vpop.f32.mrb[109].mxu0 }
 0x1db   : > { %v2911_v45 = vpack.c.bf16 %v2305_v49, %v2305_v49  ;;  %v2306_v59 = vmax.f32 %v2194_v7, 0.0  ;;  %v3390_v19 = vadd.f32 %v3389_v39, %v3388_v52  ;;  %v3391_v50 = vpop.f32.mrb[110].mxu1  ;;  %v2201_v25 = vpop.f32.mrb[110].mxu0 }
 0x1dc   : > { %v3392_v10 = vpop.f32.mrb[111].mxu1  ;;  %v2203_v12 = vpop.f32.mrb[111].mxu0 }
 0x1dd   : > { %2466 = vst.msk [vmem:[%s4838_s9 + $0x10] sm:$0xf] %vm2461_vm8, %v2911_v45  ;;  %v2912_v29 = vpack.c.bf16 %v2306_v59, %v2306_v59  ;;  %v3393_v0 = vadd.f32 %v3392_v10, %v3391_v50  ;;  %v2038_v43 = vadd.f32 %v3390_v19, %v4742_v60 }
 0x1df   : > { %2467 = vst.msk [vmem:[%s4838_s9 + $0x14] sm:$0xf] %vm2461_vm8, %v2912_v29  ;;  %v2199_v63 = vadd.f32 %v2198_v28, %v2038_v43  ;;  %v2041_v2 = vadd.f32 %v3393_v0, %v4746_v51 }
 0x1e1   : > { %v2307_v27 = vmax.f32 %v2199_v63, 0.0  ;;  %v2202_v11 = vadd.f32 %v2201_v25, %v2041_v2  ;;  %v3394_v14 = vpop.f32.mrb[112].mxu1  ;;  %v2206_v53 = vpop.f32.mrb[112].mxu0 }
 0x1e2   : > { %v3395_v38 = vpop.f32.mrb[113].mxu1  ;;  %v2208_v17 = vpop.f32.mrb[113].mxu0 }
 0x1e3   : > { %v2913_v42 = vpack.c.bf16 %v2307_v27, %v2307_v27  ;;  %v2308_v5 = vmax.f32 %v2202_v11, 0.0  ;;  %v3396_v31 = vadd.f32 %v3395_v38, %v3394_v14  ;;  %v3397_v46 = vpop.f32.mrb[114].mxu1  ;;  %v2209_v20 = vpop.f32.mrb[114].mxu0 }
 0x1e4   : > { %v3398_v37 = vpop.f32.mrb[115].mxu1  ;;  %v2211_v60 = vpop.f32.mrb[115].mxu0 }
 0x1e5   : > { %2468 = vst.msk [vmem:[%s4838_s9 + $0x18] sm:$0xf] %vm2461_vm8, %v2913_v42  ;;  %v2914_v47 = vpack.c.bf16 %v2308_v5, %v2308_v5  ;;  %v3399_v40 = vadd.f32 %v3398_v37, %v3397_v46  ;;  %v2046_v51 = vadd.f32 %v3396_v31, %v4756_v4 }
 0x1e7   : > { %2469 = vst.msk [vmem:[%s4838_s9 + $0x1c] sm:$0xf] %vm2461_vm8, %v2914_v47  ;;  %v2207_v16 = vadd.f32 %v2206_v53, %v2046_v51  ;;  %v2049_v54 = vadd.f32 %v3399_v40, %v4758_v3 }
 0x1e9   : > { %v2309_v22 = vmax.f32 %v2207_v16, 0.0  ;;  %v2210_v44 = vadd.f32 %v2209_v20, %v2049_v54  ;;  %v3400_v8 = vpop.f32.mrb[116].mxu1  ;;  %v2214_v33 = vpop.f32.mrb[116].mxu0 }
 0x1ea   : > { %v3401_v49 = vpop.f32.mrb[117].mxu1  ;;  %v2216_v7 = vpop.f32.mrb[117].mxu0 }
 0x1eb   : > { %v2915_v52 = vpack.c.bf16 %v2309_v22, %v2309_v22  ;;  %v2310_v28 = vmax.f32 %v2210_v44, 0.0  ;;  %v3402_v39 = vadd.f32 %v3401_v49, %v3400_v8  ;;  %v3403_v23 = vpop.f32.mrb[118].mxu1  ;;  %v2217_v45 = vpop.f32.mrb[118].mxu0 }
 0x1ec   : > { %v3404_v59 = vpop.f32.mrb[119].mxu1  ;;  %v2219_v4 = vpop.f32.mrb[119].mxu0 }
 0x1ed   : > { %2470 = vst.msk [vmem:[%s4838_s9 + $0x20] sm:$0xf] %vm2461_vm8, %v2915_v52  ;;  %v2916_v19 = vpack.c.bf16 %v2310_v28, %v2310_v28  ;;  %v3405_v50 = vadd.f32 %v3404_v59, %v3403_v23  ;;  %v2054_v3 = vadd.f32 %v3402_v39, %v4764_v35 }
 0x1ef   : > { %2471 = vst.msk [vmem:[%s4838_s9 + $0x24] sm:$0xf] %vm2461_vm8, %v2916_v19  ;;  %v2215_v25 = vadd.f32 %v2214_v33, %v2054_v3  ;;  %v2057_v10 = vadd.f32 %v3405_v50, %v4766_v36 }
 0x1f1   : > { %v2311_v12 = vmax.f32 %v2215_v25, 0.0  ;;  %v2218_v29 = vadd.f32 %v2217_v45, %v2057_v10  ;;  %v3406_v0 = vpop.f32.mrb[120].mxu1  ;;  %v2222_v43 = vpop.f32.mrb[120].mxu0 }
 0x1f2   : > { %v3407_v63 = vpop.f32.mrb[121].mxu1  ;;  %v2224_v2 = vpop.f32.mrb[121].mxu0 }
 0x1f3   : > { %v2917_v27 = vpack.c.bf16 %v2311_v12, %v2311_v12  ;;  %v2312_v11 = vmax.f32 %v2218_v29, 0.0  ;;  %v3408_v14 = vadd.f32 %v3407_v63, %v3406_v0  ;;  %v3409_v53 = vpop.f32.mrb[122].mxu1  ;;  %v2225_v38 = vpop.f32.mrb[122].mxu0 }
 0x1f4   : > { %v3410_v17 = vpop.f32.mrb[123].mxu1  ;;  %v2227_v35 = vpop.f32.mrb[123].mxu0 }
 0x1f5   : > { %2472 = vst.msk [vmem:[%s4838_s9 + $0x28] sm:$0xf] %vm2461_vm8, %v2917_v27  ;;  %v2918_v42 = vpack.c.bf16 %v2312_v11, %v2312_v11  ;;  %v3411_v5 = vadd.f32 %v3410_v17, %v3409_v53  ;;  %v2062_v36 = vadd.f32 %v3408_v14, %v4772_v57 }
 0x1f7   : > { %2473 = vst.msk [vmem:[%s4838_s9 + $0x2c] sm:$0xf] %vm2461_vm8, %v2918_v42  ;;  %v2223_v31 = vadd.f32 %v2222_v43, %v2062_v36  ;;  %v2065_v46 = vadd.f32 %v3411_v5, %v4774_v18 }
 0x1f9   : > { %v2313_v20 = vmax.f32 %v2223_v31, 0.0  ;;  %v2226_v37 = vadd.f32 %v2225_v38, %v2065_v46  ;;  %v3412_v60 = vpop.f32.mrb[124].mxu1  ;;  %v2230_v47 = vpop.f32.mrb[124].mxu0 }
 0x1fa   : > { %v3413_v40 = vpop.f32.mrb[125].mxu1  ;;  %v2232_v51 = vpop.f32.mrb[125].mxu0 }
 0x1fb   : > { %v2919_v16 = vpack.c.bf16 %v2313_v20, %v2313_v20  ;;  %v2314_v54 = vmax.f32 %v2226_v37, 0.0  ;;  %v3414_v22 = vadd.f32 %v3413_v40, %v3412_v60  ;;  %v3415_v44 = vpop.f32.mrb[126].mxu1  ;;  %v2233_v8 = vpop.f32.mrb[126].mxu0 }
 0x1fc   : > { %v3416_v33 = vpop.f32.mrb[127].mxu1  ;;  %v2235_v57 = vpop.f32.mrb[127].mxu0 }
 0x1fd   : > { %2474 = vst.msk [vmem:[%s4838_s9 + $0x30] sm:$0xf] %vm2461_vm8, %v2919_v16  ;;  %v2920_v49 = vpack.c.bf16 %v2314_v54, %v2314_v54  ;;  %v3417_v7 = vadd.f32 %v3416_v33, %v3415_v44  ;;  %v2070_v18 = vadd.f32 %v3414_v22, %v4780_v21 }
 0x1ff   : > { %2475 = vst.msk [vmem:[%s4838_s9 + $0x34] sm:$0xf] %vm2461_vm8, %v2920_v49  ;;  %v2231_v52 = vadd.f32 %v2230_v47, %v2070_v18  ;;  %v2073_v28 = vadd.f32 %v3417_v7, %v4782_v30 }
 0x201   : > { %v2315_v39 = vmax.f32 %v2231_v52, 0.0  ;;  %v2234_v23 = vadd.f32 %v2233_v8, %v2073_v28  ;;  %v3418_v45 = vpop.f32.mrb[128].mxu1  ;;  %v2238_v59 = vpop.f32.mrb[128].mxu0 }
 0x202   : > { %v3419_v4 = vpop.f32.mrb[129].mxu1  ;;  %v2240_v19 = vpop.f32.mrb[129].mxu0 }
 0x203   : > { %v2921_v50 = vpack.c.bf16 %v2315_v39, %v2315_v39  ;;  %v2316_v3 = vmax.f32 %v2234_v23, 0.0  ;;  %v3420_v25 = vadd.f32 %v3419_v4, %v3418_v45  ;;  %v3421_v10 = vpop.f32.mrb[130].mxu1  ;;  %v2241_v12 = vpop.f32.mrb[130].mxu0 }
 0x204   : > { %v3422_v29 = vpop.f32.mrb[131].mxu1  ;;  %v2243_v21 = vpop.f32.mrb[131].mxu0 }
 0x205   : > { %2476 = vst.msk [vmem:[%s4838_s9 + $0x38] sm:$0xf] %vm2461_vm8, %v2921_v50  ;;  %v2922_v0 = vpack.c.bf16 %v2316_v3, %v2316_v3  ;;  %v3423_v43 = vadd.f32 %v3422_v29, %v3421_v10  ;;  %v2078_v30 = vadd.f32 %v3420_v25, %v4786_v58 }
 0x207   : > { %2477 = vst.msk [vmem:[%s4838_s9 + $0x3c] sm:$0xf] %vm2461_vm8, %v2922_v0  ;;  %v2239_v63 = vadd.f32 %v2238_v59, %v2078_v30  ;;  %v2081_v2 = vadd.f32 %v3423_v43, %v4788_v1 }
 0x209   : > { %v2317_v27 = vmax.f32 %v2239_v63, 0.0  ;;  %v2242_v11 = vadd.f32 %v2241_v12, %v2081_v2  ;;  %v3424_v14 = vpop.f32.mrb[132].mxu1  ;;  %v2246_v53 = vpop.f32.mrb[132].mxu0 }
 0x20a   : > { %v3425_v38 = vpop.f32.mrb[133].mxu1  ;;  %v2248_v17 = vpop.f32.mrb[133].mxu0 }
 0x20b   : > { %v2923_v35 = vpack.c.bf16 %v2317_v27, %v2317_v27  ;;  %v2318_v42 = vmax.f32 %v2242_v11, 0.0  ;;  %v3426_v5 = vadd.f32 %v3425_v38, %v3424_v14  ;;  %v3427_v36 = vpop.f32.mrb[134].mxu1  ;;  %v2249_v31 = vpop.f32.mrb[134].mxu0 }
 0x20c   : > { %v3428_v46 = vpop.f32.mrb[135].mxu1  ;;  %v2251_v58 = vpop.f32.mrb[135].mxu0 }
 0x20d   : > { %2478 = vst.msk [vmem:[%s4838_s9 + $0x40] sm:$0xf] %vm2461_vm8, %v2923_v35  ;;  %v2924_v20 = vpack.c.bf16 %v2318_v42, %v2318_v42  ;;  %v3429_v37 = vadd.f32 %v3428_v46, %v3427_v36  ;;  %v2086_v1 = vadd.f32 %v3426_v5, %v4792_v48 }
 0x20f   : > { %2479 = vst.msk [vmem:[%s4838_s9 + $0x44] sm:$0xf] %vm2461_vm8, %v2924_v20  ;;  %v2247_v60 = vadd.f32 %v2246_v53, %v2086_v1  ;;  %v2089_v47 = vadd.f32 %v3429_v37, %v4794_v26 }
 0x211   : > { %v2319_v40 = vmax.f32 %v2247_v60, 0.0  ;;  %v2250_v51 = vadd.f32 %v2249_v31, %v2089_v47  ;;  %v3430_v16 = vpop.f32.mrb[136].mxu1  ;;  %v2254_v54 = vpop.f32.mrb[136].mxu0 }
 0x212   : > { %v3431_v22 = vpop.f32.mrb[137].mxu1  ;;  %v2256_v44 = vpop.f32.mrb[137].mxu0 }
 0x213   : > { %v2925_v8 = vpack.c.bf16 %v2319_v40, %v2319_v40  ;;  %v2320_v33 = vmax.f32 %v2250_v51, 0.0  ;;  %v3432_v57 = vadd.f32 %v3431_v22, %v3430_v16  ;;  %v3433_v49 = vpop.f32.mrb[138].mxu1  ;;  %v2257_v7 = vpop.f32.mrb[138].mxu0 }
 0x214   : > { %v3434_v18 = vpop.f32.mrb[139].mxu1  ;;  %v2259_v48 = vpop.f32.mrb[139].mxu0 }
 0x215   : > { %2480 = vst.msk [vmem:[%s4838_s9 + $0x48] sm:$0xf] %vm2461_vm8, %v2925_v8  ;;  %v2926_v52 = vpack.c.bf16 %v2320_v33, %v2320_v33  ;;  %v3435_v28 = vadd.f32 %v3434_v18, %v3433_v49  ;;  %v2094_v26 = vadd.f32 %v3432_v57, %v4798_v41 }
 0x217   : > { %2481 = vst.msk [vmem:[%s4838_s9 + $0x4c] sm:$0xf] %vm2461_vm8, %v2926_v52  ;;  %v2255_v39 = vadd.f32 %v2254_v54, %v2094_v26  ;;  %v2097_v23 = vadd.f32 %v3435_v28, %v4800_v6 }
 0x219   : > { %v2321_v45 = vmax.f32 %v2255_v39, 0.0  ;;  %v2258_v59 = vadd.f32 %v2257_v7, %v2097_v23  ;;  %v3436_v4 = vpop.f32.mrb[140].mxu1  ;;  %v2262_v19 = vpop.f32.mrb[140].mxu0 }
 0x21a   : > { %v3437_v50 = vpop.f32.mrb[141].mxu1  ;;  %v2264_v3 = vpop.f32.mrb[141].mxu0 }
 0x21b   : > { %v2927_v25 = vpack.c.bf16 %v2321_v45, %v2321_v45  ;;  %v2322_v10 = vmax.f32 %v2258_v59, 0.0  ;;  %v3438_v12 = vadd.f32 %v3437_v50, %v3436_v4  ;;  %v3439_v29 = vpop.f32.mrb[142].mxu1  ;;  %v2265_v21 = vpop.f32.mrb[142].mxu0 }
 0x21c   : > { %v3440_v0 = vpop.f32.mrb[143].mxu1  ;;  %v2267_v41 = vpop.f32.mrb[143].mxu0 }
 0x21d   : > { %2482 = vst.msk [vmem:[%s4838_s9 + $0x50] sm:$0xf] %vm2461_vm8, %v2927_v25  ;;  %v2928_v43 = vpack.c.bf16 %v2322_v10, %v2322_v10  ;;  %v3441_v30 = vadd.f32 %v3440_v0, %v3439_v29  ;;  %v2102_v6 = vadd.f32 %v3438_v12, %v4804_v9 }
 0x21f   : > { %2483 = vst.msk [vmem:[%s4838_s9 + $0x54] sm:$0xf] %vm2461_vm8, %v2928_v43  ;;  %v2263_v63 = vadd.f32 %v2262_v19, %v2102_v6  ;;  %v2105_v2 = vadd.f32 %v3441_v30, %v4806_v32 }
 0x221   : > { %v2323_v27 = vmax.f32 %v2263_v63, 0.0  ;;  %v2266_v11 = vadd.f32 %v2265_v21, %v2105_v2  ;;  %v3442_v14 = vpop.f32.mrb[144].mxu1  ;;  %v2270_v53 = vpop.f32.mrb[144].mxu0 }
 0x222   : > { %v3443_v38 = vpop.f32.mrb[145].mxu1  ;;  %v2272_v17 = vpop.f32.mrb[145].mxu0 }
 0x223   : > { %v2929_v35 = vpack.c.bf16 %v2323_v27, %v2323_v27  ;;  %v2324_v42 = vmax.f32 %v2266_v11, 0.0  ;;  %v3444_v5 = vadd.f32 %v3443_v38, %v3442_v14  ;;  %v3445_v36 = vpop.f32.mrb[146].mxu1  ;;  %v2273_v31 = vpop.f32.mrb[146].mxu0 }
 0x224   : > { %v3446_v46 = vpop.f32.mrb[147].mxu1  ;;  %v2275_v9 = vpop.f32.mrb[147].mxu0 }
 0x225   : > { %2484 = vst.msk [vmem:[%s4838_s9 + $0x58] sm:$0xf] %vm2461_vm8, %v2929_v35  ;;  %v2930_v58 = vpack.c.bf16 %v2324_v42, %v2324_v42  ;;  %v3447_v20 = vadd.f32 %v3446_v46, %v3445_v36  ;;  %v2110_v32 = vadd.f32 %v3444_v5, %v4810_v15 }
 0x227   : > { %2485 = vst.msk [vmem:[%s4838_s9 + $0x5c] sm:$0xf] %vm2461_vm8, %v2930_v58  ;;  %v2271_v37 = vadd.f32 %v2270_v53, %v2110_v32  ;;  %v2113_v1 = vadd.f32 %v3447_v20, %v4812_v56 }
 0x229   : > { %v2325_v60 = vmax.f32 %v2271_v37, 0.0  ;;  %v2274_v47 = vadd.f32 %v2273_v31, %v2113_v1  ;;  %v3448_v40 = vpop.f32.mrb[148].mxu1  ;;  %v2278_v51 = vpop.f32.mrb[148].mxu0 }
 0x22a   : > { %v3449_v16 = vpop.f32.mrb[149].mxu1  ;;  %v2280_v54 = vpop.f32.mrb[149].mxu0 }
 0x22b   : > { %v2931_v22 = vpack.c.bf16 %v2325_v60, %v2325_v60  ;;  %v2326_v44 = vmax.f32 %v2274_v47, 0.0  ;;  %v3450_v8 = vadd.f32 %v3449_v16, %v3448_v40  ;;  %v3451_v33 = vpop.f32.mrb[150].mxu1  ;;  %v2281_v57 = vpop.f32.mrb[150].mxu0 }
 0x22c   : > { %v3452_v49 = vpop.f32.mrb[151].mxu1  ;;  %v2283_v15 = vpop.f32.mrb[151].mxu0 }
 0x22d   : > { %2486 = vst.msk [vmem:[%s4838_s9 + $0x60] sm:$0xf] %vm2461_vm8, %v2931_v22  ;;  %v2932_v7 = vpack.c.bf16 %v2326_v44, %v2326_v44  ;;  %v3453_v18 = vadd.f32 %v3452_v49, %v3451_v33  ;;  %v2118_v56 = vadd.f32 %v3450_v8, %v4816_v61 }
 0x22f   : > { %2487 = vst.msk [vmem:[%s4838_s9 + $0x64] sm:$0xf] %vm2461_vm8, %v2932_v7  ;;  %v2279_v48 = vadd.f32 %v2278_v51, %v2118_v56  ;;  %v2121_v52 = vadd.f32 %v3453_v18, %v4818_v24 }
 0x231   : > { %v2327_v28 = vmax.f32 %v2279_v48, 0.0  ;;  %v2282_v26 = vadd.f32 %v2281_v57, %v2121_v52  ;;  %v3454_v39 = vpop.f32.mrb[152].mxu1  ;;  %v2286_v23 = vpop.f32.mrb[152].mxu0 }
 0x232   : > { %v3455_v45 = vpop.f32.mrb[153].mxu1  ;;  %v2288_v59 = vpop.f32.mrb[153].mxu0 }
 0x233   : > { %v2933_v4 = vpack.c.bf16 %v2327_v28, %v2327_v28  ;;  %v2328_v19 = vmax.f32 %v2282_v26, 0.0  ;;  %v3456_v50 = vadd.f32 %v3455_v45, %v3454_v39  ;;  %v3457_v3 = vpop.f32.mrb[154].mxu1  ;;  %v2289_v25 = vpop.f32.mrb[154].mxu0 }
 0x234   : > { %v3458_v10 = vpop.f32.mrb[155].mxu1  ;;  %v2291_v61 = vpop.f32.mrb[155].mxu0 }
 0x235   : > { %2488 = vst.msk [vmem:[%s4838_s9 + $0x68] sm:$0xf] %vm2461_vm8, %v2933_v4  ;;  %v2934_v12 = vpack.c.bf16 %v2328_v19, %v2328_v19  ;;  %v3459_v29 = vadd.f32 %v3458_v10, %v3457_v3  ;;  %v2126_v24 = vadd.f32 %v3456_v50, %v4822_v62 }
 0x237   : > { %2489 = vst.msk [vmem:[%s4838_s9 + $0x6c] sm:$0xf] %vm2461_vm8, %v2934_v12  ;;  %v2287_v21 = vadd.f32 %v2286_v23, %v2126_v24  ;;  %v2129_v0 = vadd.f32 %v3459_v29, %v4824_v13 }
 0x239   : > { %v2329_v41 = vmax.f32 %v2287_v21, 0.0  ;;  %v2290_v43 = vadd.f32 %v2289_v25, %v2129_v0  ;;  %v3460_v30 = vpop.f32.mrb[156].mxu1  ;;  %v2294_v6 = vpop.f32.mrb[156].mxu0 }
 0x23a   : > { %v3461_v63 = vpop.f32.mrb[157].mxu1  ;;  %v2296_v2 = vpop.f32.mrb[157].mxu0 }
 0x23b   : > { %v2935_v27 = vpack.c.bf16 %v2329_v41, %v2329_v41  ;;  %v2330_v11 = vmax.f32 %v2290_v43, 0.0  ;;  %v3462_v14 = vadd.f32 %v3461_v63, %v3460_v30  ;;  %v3463_v53 = vpop.f32.mrb[158].mxu1  ;;  %v2297_v38 = vpop.f32.mrb[158].mxu0 }
 0x23c   : > { %v3464_v62 = vpop.f32.mrb[159].mxu1  ;;  %v2299_v17 = vpop.f32.mrb[159].mxu0 }
 0x23d   : > { %2490 = vst.msk [vmem:[%s4838_s9 + $0x70] sm:$0xf] %vm2461_vm8, %v2935_v27  ;;  %v2936_v35 = vpack.c.bf16 %v2330_v11, %v2330_v11  ;;  %v3465_v13 = vadd.f32 %v3464_v62, %v3463_v53  ;;  %v2134_v42 = vadd.f32 %v3462_v14, %v4828_v34 }
 0x23f   : > { %2491 = vst.msk [vmem:[%s4838_s9 + $0x74] sm:$0xf] %vm2461_vm8, %v2936_v35  ;;  %v2295_v5 = vadd.f32 %v2294_v6, %v2134_v42  ;;  %v2137_v36 = vadd.f32 %v3465_v13, %v4830_v55 }
 0x241   : > { %v2331_v31 = vmax.f32 %v2295_v5, 0.0  ;;  %v2298_v46 = vadd.f32 %v2297_v38, %v2137_v36 }
 0x243   : > { %v2937_v9 = vpack.c.bf16 %v2331_v31, %v2331_v31  ;;  %v2332_v58 = vmax.f32 %v2298_v46, 0.0 }
 0x245   : > { %2492 = vst.msk [vmem:[%s4838_s9 + $0x78] sm:$0xf] %vm2461_vm8, %v2937_v9  ;;  %v2938_v20 = vpack.c.bf16 %v2332_v58, %v2332_v58 }
 0x247   : > { %2493 = vst.msk [vmem:[%s4838_s9 + $0x7c] sm:$0xf] %vm2461_vm8, %v2938_v20 }
 0x248 PF: > { %s14_s15 = sadd.s32 1, %s3588_s15  }
 0x249   : > { %p11_p4 = scmp.ge.s32.totalorder %s14_s15, 4  }
 0x24b   :  { %13 = sbr.rel (!%p11_p4) target bundleno = 1 (0x1), region = 69 }

</bundles_post_ra>
